<compile_context>
chip_gen: v7x
topology: tpu7x:2x2x1
jax: 0.10.0
libtpu: 0.0.40
codegen_flags: <defaults>
</compile_context>

<pallas_src>
import functools

import jax
import jax.numpy as jnp
from jax import lax
from jax.experimental import pallas as pl
from jax.experimental.pallas import tpu as pltpu

_STRIP = 8  # row-strip height for the depthwise accumulation (must divide H)


def _net_kernel(
    p_ref,                                       # (1, H*W, 9*32) bf16 im2col patches
    w1_ref, b1_ref,                              # (288, 64) bf16, (1, 64) f32
    d1dw_ref, d1dwb_ref, d1pw_ref, d1pwb_ref,    # (9,64) f32, (1,64) f32, (64,128) bf16, (1,128) f32
    d2dw_ref, d2dwb_ref, d2pw_ref, d2pwb_ref,    # (9,128), (1,128), (128,256) bf16, (1,256)
    d3dw_ref, d3dwb_ref, d3pw_ref, d3pwb_ref,    # (9,256), (1,256), (256,40) f32, (1,40)
    fcw_ref, fcb_ref,                            # (40,10) f32, (1,10) f32
    o_ref,                                       # (1, 1, 10) f32
    pad1_ref, pad2_ref, act3_ref,                # bf16 activation scratch (VMEM)
    *, H, W, strip,
):
    f32 = jnp.float32

    # ------------------------------------------------------------------
    # Zero ONLY the row bands that are read as vertical padding (interiors
    # are fully overwritten below; there are no column borders by design).
    # ------------------------------------------------------------------
    c1 = pad1_ref.shape[-1]
    c2 = pad2_ref.shape[-1]
    pad1_ref[0:2, :, :] = jnp.zeros((2, W, c1), pad1_ref.dtype)
    pad1_ref[2 + H:4 + H, :, :] = jnp.zeros((2, W, c1), pad1_ref.dtype)
    pad2_ref[0:4, :, :] = jnp.zeros((4, W, c2), pad2_ref.dtype)
    pad2_ref[4 + H:8 + H, :, :] = jnp.zeros((4, W, c2), pad2_ref.dtype)

    # ------------------------------------------------------------------
    # Layer 1: conv 3x3 (32 -> 64) as one im2col matmul (patches pre-packed
    # in the wrapper).  Interior of pad1 sits at rows [2, 2+H), cols [0, W).
    # ------------------------------------------------------------------
    y1 = jnp.dot(p_ref[0], w1_ref[...], preferred_element_type=f32) + b1_ref[0]
    pad1_ref[2:2 + H, :, :] = y1.reshape(H, W, c1).astype(pad1_ref.dtype)

    # ------------------------------------------------------------------
    # Fused dilated depthwise (f32 VPU) + pointwise 1x1 (bf16 MXU, f32 acc),
    # strip-tiled over rows.  Horizontal taps come from pltpu.roll along the
    # sublane (W) axis + a 0/1 column mask, so every load is aligned.
    # Source interior starts at buffer row `dil`; all interiors start at col 0.
    # ------------------------------------------------------------------
    def dws_layer(src_ref, dw_ref, dwb_ref, pw_ref, pwb_ref,
                  dst_ref, dst_row0, dil):
        c_in = dw_ref.shape[1]
        c_out = pw_ref.shape[1]
        # Hoisted once-per-layer loads (no repeated broadcasts per strip).
        taps = [dw_ref[t] for t in range(9)]
        dwb = dwb_ref[0]
        pw = pw_ref[...]
        pwb = pwb_ref[0]
        col = lax.broadcasted_iota(jnp.int32, (1, W, 1), 1)
        m_left = (col >= dil).astype(f32)       # tap dx=0 reads x[w - dil]
        m_right = (col < W - dil).astype(f32)   # tap dx=2 reads x[w + dil]

        for h0 in range(0, H, strip):
            acc = jnp.zeros((strip, W, c_in), f32)
            for dy in range(3):
                r0 = h0 + dy * dil              # aligned full-width strip load
                row = src_ref[r0:r0 + strip, :, :].astype(f32)
                acc = acc + row * taps[3 * dy + 1]
                acc = acc + pltpu.roll(row, dil, axis=1) * m_left * taps[3 * dy + 0]
                acc = acc + pltpu.roll(row, W - dil, axis=1) * m_right * taps[3 * dy + 2]
            acc = acc + dwb
            y = jnp.dot(acc.reshape(strip * W, c_in).astype(jnp.bfloat16), pw,
                        preferred_element_type=f32) + pwb
            dst_ref[dst_row0 + h0:dst_row0 + h0 + strip, :, :] = (
                y.reshape(strip, W, c_out).astype(dst_ref.dtype))

    dws_layer(pad1_ref, d1dw_ref, d1dwb_ref, d1pw_ref, d1pwb_ref,
              pad2_ref, dst_row0=4, dil=2)
    dws_layer(pad2_ref, d2dw_ref, d2dwb_ref, d2pw_ref, d2pwb_ref,
              act3_ref, dst_row0=0, dil=4)

    # ------------------------------------------------------------------
    # DWS block 3 fused with global average pooling + head.
    # mean(pw(dw(x))) = pw(mean(dw(x))) + b_pw, and each tap's window sum is
    # a separable row-range x col-range sum of the (unpadded) act3 interior:
    # compute 3 column-range sums once, then combine with 3 row-range masks.
    # ------------------------------------------------------------------
    dil3 = 6
    c3 = d3dw_ref.shape[1]
    colp = lax.broadcasted_iota(jnp.int32, (1, W, 1), 1)
    head = (colp < dil3).astype(f32)            # cols excluded when dx = 2
    tail = (colp >= W - dil3).astype(f32)       # cols excluded when dx = 0

    cs_parts = ([], [], [])                     # per dx in {0,1,2}
    for r0 in range(0, H, strip):
        blk = act3_ref[r0:r0 + strip, :, :].astype(f32)      # (strip, W, c3)
        s_full = jnp.sum(blk, axis=1)                        # (strip, c3)
        s_head = jnp.sum(blk * head, axis=1)
        s_tail = jnp.sum(blk * tail, axis=1)
        cs_parts[0].append(s_full - s_tail)                  # cols [0, W-dil3)
        cs_parts[1].append(s_full)                           # cols [0, W)
        cs_parts[2].append(s_full - s_head)                  # cols [dil3, W)
    cs = [jnp.concatenate(p, axis=0) for p in cs_parts]      # each (H, c3)

    rowi = lax.broadcasted_iota(jnp.int32, (H, 1), 0)
    rmask = [(rowi < H - dil3).astype(f32),                  # rows for dy = 0
             jnp.ones((H, 1), f32),                          # rows for dy = 1
             (rowi >= dil3).astype(f32)]                     # rows for dy = 2

    taps3 = [d3dw_ref[t] for t in range(9)]
    pooled = jnp.zeros((1, c3), f32)
    for dy in range(3):
        for dx in range(3):
            s = jnp.sum(cs[dx] * rmask[dy], axis=0, keepdims=True)   # (1, c3)
            pooled = pooled + s * taps3[3 * dy + dx]
    pooled = pooled * (1.0 / float(H * W)) + d3dwb_ref[0]            # f32

    hid = jnp.dot(pooled, d3pw_ref[...],
                  preferred_element_type=f32) + d3pwb_ref[0]          # (1, 40) f32
    out = jnp.dot(hid, fcw_ref[...],
                  preferred_element_type=f32) + fcb_ref[0]            # (1, 10)
    o_ref[...] = out.reshape(1, 1, fcw_ref.shape[1])


def _full_spec(shape):
    # Whole-array block, constant index -> DMA'd once, resident every step.
    return pl.BlockSpec(tuple(shape), lambda b, _r=len(shape): (0,) * _r)


@jax.jit
def net_forward(x_nchw, params):
    # PyTorch NCHW -> NHWC.
    x = jnp.transpose(x_nchw, (0, 2, 3, 1)).astype(jnp.float32)
    B, H, W, Cin = x.shape
    assert Cin == 32 and H % _STRIP == 0 and W % 8 == 0 and H >= 8 and W >= 8

    # conv1 im2col done on the XLA side: bf16 (B, H*W, 9*Cin) patch matrix.
    xp = jnp.pad(x, ((0, 0), (1, 1), (1, 1), (0, 0)))
    taps = [xp[:, dy:dy + H, dx:dx + W, :] for dy in range(3) for dx in range(3)]
    patches = jnp.concatenate(taps, axis=-1).reshape(B, H * W, 9 * Cin)
    patches = patches.astype(jnp.bfloat16)

    c1_out = params["c1_b"].shape[-1]     # 64
    d1_out = params["d1"][2].shape[-1]    # 128
    d2_out = params["d2"][2].shape[-1]    # 256
    d3_out = params["d3"][2].shape[-1]    # 40
    n_out = params["fc_w"].shape[-1]      # 10

    args = [patches, params["c1_w"], params["c1_b"]]
    in_specs = [
        pl.BlockSpec((1, H * W, 9 * Cin), lambda b: (b, 0, 0)),
        _full_spec(params["c1_w"].shape),
        _full_spec(params["c1_b"].shape),
    ]
    for name in ("d1", "d2", "d3"):
        dw, dwb, pw, pwb = params[name]
        args += [dw, dwb, pw, pwb]
        in_specs += [_full_spec(dw.shape), _full_spec(dwb.shape),
                     _full_spec(pw.shape), _full_spec(pwb.shape)]
    args += [params["fc_w"], params["fc_b"]]
    in_specs += [_full_spec(params["fc_w"].shape),
                 _full_spec(params["fc_b"].shape)]

    kernel = functools.partial(_net_kernel, H=H, W=W, strip=_STRIP)

    flops = B * (2 * H * W * (9 * Cin * c1_out + c1_out * d1_out + d1_out * d2_out)
                 + 2 * 9 * H * W * (c1_out + d1_out + d2_out)
                 + 2 * d2_out * d3_out + 2 * d3_out * n_out)
    bytes_accessed = (sum(int(a.size) * a.dtype.itemsize for a in args)
                      + B * n_out * 4)

    out = pl.pallas_call(
        kernel,
        out_shape=jax.ShapeDtypeStruct((B, 1, n_out), jnp.float32),
        grid=(B,),
        in_specs=in_specs,
        out_specs=pl.BlockSpec((1, 1, n_out), lambda b: (b, 0, 0)),
        scratch_shapes=[
            pltpu.VMEM((H + 4, W, c1_out), jnp.bfloat16),   # DWS1 input (row pad 2)
            pltpu.VMEM((H + 8, W, d1_out), jnp.bfloat16),   # DWS2 input (row pad 4)
            pltpu.VMEM((H, W, d2_out), jnp.bfloat16),       # DWS3 input (no pad needed)
        ],
        compiler_params=pltpu.CompilerParams(
            dimension_semantics=("parallel",)),
        cost_estimate=pl.CostEstimate(flops=int(flops), transcendentals=0,
                                      bytes_accessed=int(bytes_accessed)),
    )(*args)
    return out.reshape(B, n_out)


def init_params(key):
    """Deterministic synthetic parameters in kernel-ready layouts.

    Porting real PyTorch weights: conv1 (Cout,Cin,3,3) -> transpose (3,3,Cin,Cout)
    -> reshape (9*Cin,Cout); depthwise (C,1,3,3) -> (3,3,C) -> reshape (9,C);
    pointwise (Cout,Cin,1,1) -> (Cin,Cout); fc (10,40) -> (40,10).
    """
    ks = jax.random.split(key, 8)

    def dws(k, c_in, c_out, pw_dtype=jnp.bfloat16):
        k0, k1, k2, k3 = jax.random.split(k, 4)
        return (
            0.05 * jax.random.normal(k0, (9, c_in), jnp.float32),    # depthwise (tap, C)
            0.01 * jax.random.normal(k1, (1, c_in), jnp.float32),    # depthwise bias
            (0.05 * jax.random.normal(k2, (c_in, c_out), jnp.float32)
             ).astype(pw_dtype),                                      # pointwise (Cin, Cout)
            0.01 * jax.random.normal(k3, (1, c_out), jnp.float32),   # pointwise bias
        )

    p = {}
    p["c1_w"] = (0.05 * jax.random.normal(ks[0], (9 * 32, 64), jnp.float32)
                 ).astype(jnp.bfloat16)
    p["c1_b"] = 0.01 * jax.random.normal(ks[1], (1, 64), jnp.float32)
    p["d1"] = dws(ks[2], 64, 128)
    p["d2"] = dws(ks[3], 128, 256)
    p["d3"] = dws(ks[4], 256, 40, pw_dtype=jnp.float32)  # keep head-side weights f32
    p["fc_w"] = 0.05 * jax.random.normal(ks[5], (40, 10), jnp.float32)
    p["fc_b"] = 0.01 * jax.random.normal(ks[6], (1, 10), jnp.float32)
    return p


if __name__ == "__main__":
    key = jax.random.PRNGKey(0)
    k_x, k_p = jax.random.split(key)
    # Net's first conv expects 32 input channels; spatial 16x16, batch 2 (NCHW).
    x = jax.random.normal(k_x, (2, 32, 16, 16), jnp.float32)
    params = init_params(k_p)

    out = net_forward(x, params)
    out = jax.block_until_ready(out)
    assert out.shape == (2, 10), out.shape
    assert bool(jnp.all(jnp.isfinite(out)))
    print("KERNEL_OK")
</pallas_src>

<mosaic_0001>
module attributes {stable_mosaic.version = 11 : i64} {
  func.func @_net_kernel(%arg0: i32, %arg1: memref<1x256x288xbf16, #tpu.memory_space<vmem>>, %arg2: memref<288x64xbf16, #tpu.memory_space<vmem>>, %arg3: memref<1x64xf32, #tpu.memory_space<vmem>>, %arg4: memref<9x64xf32, #tpu.memory_space<vmem>>, %arg5: memref<1x64xf32, #tpu.memory_space<vmem>>, %arg6: memref<64x128xbf16, #tpu.memory_space<vmem>>, %arg7: memref<1x128xf32, #tpu.memory_space<vmem>>, %arg8: memref<9x128xf32, #tpu.memory_space<vmem>>, %arg9: memref<1x128xf32, #tpu.memory_space<vmem>>, %arg10: memref<128x256xbf16, #tpu.memory_space<vmem>>, %arg11: memref<1x256xf32, #tpu.memory_space<vmem>>, %arg12: memref<9x256xf32, #tpu.memory_space<vmem>>, %arg13: memref<1x256xf32, #tpu.memory_space<vmem>>, %arg14: memref<256x40xf32, #tpu.memory_space<vmem>>, %arg15: memref<1x40xf32, #tpu.memory_space<vmem>>, %arg16: memref<40x10xf32, #tpu.memory_space<vmem>>, %arg17: memref<1x10xf32, #tpu.memory_space<vmem>>, %arg18: memref<1x1x10xf32, #tpu.memory_space<vmem>>, %arg19: memref<20x16x64xbf16, #tpu.memory_space<vmem>>, %arg20: memref<24x16x128xbf16, #tpu.memory_space<vmem>>, %arg21: memref<16x16x256xbf16, #tpu.memory_space<vmem>>) attributes {dimension_semantics = [#tpu.dimension_semantics<parallel>], iteration_bounds = array<i64: 2>, scalar_prefetch = 0 : i64, scratch_operands = 3 : i64, tpu.core_type = #tpu.core_type<tc>, window_params = [{transform_indices = @transform_0, window_bounds = array<i64: 1, 256, 288>}, {pipeline_mode = #tpu.pipeline_mode<synchronous>, transform_indices = @transform_1, window_bounds = array<i64: 288, 64>}, {pipeline_mode = #tpu.pipeline_mode<synchronous>, transform_indices = @transform_2, window_bounds = array<i64: 1, 64>}, {pipeline_mode = #tpu.pipeline_mode<synchronous>, transform_indices = @transform_3, window_bounds = array<i64: 9, 64>}, {pipeline_mode = #tpu.pipeline_mode<synchronous>, transform_indices = @transform_4, window_bounds = array<i64: 1, 64>}, {pipeline_mode = #tpu.pipeline_mode<synchronous>, transform_indices = @transform_5, window_bounds = array<i64: 64, 128>}, {pipeline_mode = #tpu.pipeline_mode<synchronous>, transform_indices = @transform_6, window_bounds = array<i64: 1, 128>}, {pipeline_mode = #tpu.pipeline_mode<synchronous>, transform_indices = @transform_7, window_bounds = array<i64: 9, 128>}, {pipeline_mode = #tpu.pipeline_mode<synchronous>, transform_indices = @transform_8, window_bounds = array<i64: 1, 128>}, {pipeline_mode = #tpu.pipeline_mode<synchronous>, transform_indices = @transform_9, window_bounds = array<i64: 128, 256>}, {pipeline_mode = #tpu.pipeline_mode<synchronous>, transform_indices = @transform_10, window_bounds = array<i64: 1, 256>}, {pipeline_mode = #tpu.pipeline_mode<synchronous>, transform_indices = @transform_11, window_bounds = array<i64: 9, 256>}, {pipeline_mode = #tpu.pipeline_mode<synchronous>, transform_indices = @transform_12, window_bounds = array<i64: 1, 256>}, {pipeline_mode = #tpu.pipeline_mode<synchronous>, transform_indices = @transform_13, window_bounds = array<i64: 256, 40>}, {pipeline_mode = #tpu.pipeline_mode<synchronous>, transform_indices = @transform_14, window_bounds = array<i64: 1, 40>}, {pipeline_mode = #tpu.pipeline_mode<synchronous>, transform_indices = @transform_15, window_bounds = array<i64: 40, 10>}, {pipeline_mode = #tpu.pipeline_mode<synchronous>, transform_indices = @transform_16, window_bounds = array<i64: 1, 10>}, {transform_indices = @transform_17, window_bounds = array<i64: 1, 1, 10>}]} {
    %cst = arith.constant 0.000000e+00 : bf16
    %0 = vector.broadcast %cst : bf16 to vector<2x16x64xbf16>
    %c0 = arith.constant 0 : index
    %c0_0 = arith.constant 0 : index
    %c0_1 = arith.constant 0 : index
    %1 = vector.load %arg19[%c0, %c0_0, %c0_1] : memref<20x16x64xbf16, #tpu.memory_space<vmem>>, vector<2x16x64xbf16>
    tpu.vector_store %arg19[%c0, %c0_0, %c0_1], %0 {strides = array<i32>} : memref<20x16x64xbf16, #tpu.memory_space<vmem>>, vector<2x16x64xbf16>,
    %cst_2 = arith.constant 0.000000e+00 : bf16
    %2 = vector.broadcast %cst_2 : bf16 to vector<2x16x64xbf16>
    %c18 = arith.constant 18 : index
    %c0_3 = arith.constant 0 : index
    %c0_4 = arith.constant 0 : index
    %3 = vector.load %arg19[%c18, %c0_3, %c0_4] : memref<20x16x64xbf16, #tpu.memory_space<vmem>>, vector<2x16x64xbf16>
    tpu.vector_store %arg19[%c18, %c0_3, %c0_4], %2 {strides = array<i32>} : memref<20x16x64xbf16, #tpu.memory_space<vmem>>, vector<2x16x64xbf16>,
    %cst_5 = arith.constant 0.000000e+00 : bf16
    %4 = vector.broadcast %cst_5 : bf16 to vector<4x16x128xbf16>
    %c0_6 = arith.constant 0 : index
    %c0_7 = arith.constant 0 : index
    %c0_8 = arith.constant 0 : index
    %5 = vector.load %arg20[%c0_6, %c0_7, %c0_8] : memref<24x16x128xbf16, #tpu.memory_space<vmem>>, vector<4x16x128xbf16>
    tpu.vector_store %arg20[%c0_6, %c0_7, %c0_8], %4 {strides = array<i32>} : memref<24x16x128xbf16, #tpu.memory_space<vmem>>, vector<4x16x128xbf16>,
    %cst_9 = arith.constant 0.000000e+00 : bf16
    %6 = vector.broadcast %cst_9 : bf16 to vector<4x16x128xbf16>
    %c20 = arith.constant 20 : index
    %c0_10 = arith.constant 0 : index
    %c0_11 = arith.constant 0 : index
    %7 = vector.load %arg20[%c20, %c0_10, %c0_11] : memref<24x16x128xbf16, #tpu.memory_space<vmem>>, vector<4x16x128xbf16>
    tpu.vector_store %arg20[%c20, %c0_10, %c0_11], %6 {strides = array<i32>} : memref<24x16x128xbf16, #tpu.memory_space<vmem>>, vector<4x16x128xbf16>,
    %c0_12 = arith.constant 0 : index
    %c0_13 = arith.constant 0 : index
    %c0_14 = arith.constant 0 : index
    %8 = vector.load %arg1[%c0_12, %c0_13, %c0_14] : memref<1x256x288xbf16, #tpu.memory_space<vmem>>, vector<1x256x288xbf16>
    %9 = vector.shape_cast %8 : vector<1x256x288xbf16> to vector<256x288xbf16>
    %c0_15 = arith.constant 0 : index
    %c0_16 = arith.constant 0 : index
    %10 = vector.load %arg2[%c0_15, %c0_16] : memref<288x64xbf16, #tpu.memory_space<vmem>>, vector<288x64xbf16>
    %cst_17 = arith.constant dense<0.000000e+00> : vector<256x64xf32>
    %11 = tpu.matmul %9, %10, %cst_17 {dimension_numbers = #tpu.dot_dimension_numbers<[1], [0], [0], [1], [0, 0, 1, 1], [], []>} : vector<256x288xbf16>, vector<288x64xbf16>, vector<256x64xf32> -> vector<256x64xf32>
    %c0_18 = arith.constant 0 : index
    %c0_19 = arith.constant 0 : index
    %12 = vector.load %arg3[%c0_18, %c0_19] : memref<1x64xf32, #tpu.memory_space<vmem>>, vector<1x64xf32>
    %13 = vector.shape_cast %12 : vector<1x64xf32> to vector<64xf32>
    %14 = vector.shape_cast %13 : vector<64xf32> to vector<1x64xf32>
    %15 = vector.broadcast %14 : vector<1x64xf32> to vector<256x64xf32>
    %16 = arith.addf %11, %15 : vector<256x64xf32>
    %17 = vector.shape_cast %16 : vector<256x64xf32> to vector<16x16x64xf32>
    %18 = arith.truncf %17 : vector<16x16x64xf32> to vector<16x16x64xbf16>
    %c2 = arith.constant 2 : index
    %c0_20 = arith.constant 0 : index
    %c0_21 = arith.constant 0 : index
    %19 = vector.load %arg19[%c2, %c0_20, %c0_21] : memref<20x16x64xbf16, #tpu.memory_space<vmem>>, vector<16x16x64xbf16>
    tpu.vector_store %arg19[%c2, %c0_20, %c0_21], %18 {strides = array<i32>} : memref<20x16x64xbf16, #tpu.memory_space<vmem>>, vector<16x16x64xbf16>,
    %c0_22 = arith.constant 0 : index
    %c0_23 = arith.constant 0 : index
    %20 = vector.load %arg4[%c0_22, %c0_23] : memref<9x64xf32, #tpu.memory_space<vmem>>, vector<1x64xf32>
    %21 = vector.shape_cast %20 : vector<1x64xf32> to vector<64xf32>
    %c1 = arith.constant 1 : index
    %c0_24 = arith.constant 0 : index
    %22 = vector.load %arg4[%c1, %c0_24] : memref<9x64xf32, #tpu.memory_space<vmem>>, vector<1x64xf32>
    %23 = vector.shape_cast %22 : vector<1x64xf32> to vector<64xf32>
    %c2_25 = arith.constant 2 : index
    %c0_26 = arith.constant 0 : index
    %24 = vector.load %arg4[%c2_25, %c0_26] : memref<9x64xf32, #tpu.memory_space<vmem>>, vector<1x64xf32>
    %25 = vector.shape_cast %24 : vector<1x64xf32> to vector<64xf32>
    %c3 = arith.constant 3 : index
    %c0_27 = arith.constant 0 : index
    %26 = vector.load %arg4[%c3, %c0_27] : memref<9x64xf32, #tpu.memory_space<vmem>>, vector<1x64xf32>
    %27 = vector.shape_cast %26 : vector<1x64xf32> to vector<64xf32>
    %c4 = arith.constant 4 : index
    %c0_28 = arith.constant 0 : index
    %28 = vector.load %arg4[%c4, %c0_28] : memref<9x64xf32, #tpu.memory_space<vmem>>, vector<1x64xf32>
    %29 = vector.shape_cast %28 : vector<1x64xf32> to vector<64xf32>
    %c5 = arith.constant 5 : index
    %c0_29 = arith.constant 0 : index
    %30 = vector.load %arg4[%c5, %c0_29] : memref<9x64xf32, #tpu.memory_space<vmem>>, vector<1x64xf32>
    %31 = vector.shape_cast %30 : vector<1x64xf32> to vector<64xf32>
    %c6 = arith.constant 6 : index
    %c0_30 = arith.constant 0 : index
    %32 = vector.load %arg4[%c6, %c0_30] : memref<9x64xf32, #tpu.memory_space<vmem>>, vector<1x64xf32>
    %33 = vector.shape_cast %32 : vector<1x64xf32> to vector<64xf32>
    %c7 = arith.constant 7 : index
    %c0_31 = arith.constant 0 : index
    %34 = vector.load %arg4[%c7, %c0_31] : memref<9x64xf32, #tpu.memory_space<vmem>>, vector<1x64xf32>
    %35 = vector.shape_cast %34 : vector<1x64xf32> to vector<64xf32>
    %c8 = arith.constant 8 : index
    %c0_32 = arith.constant 0 : index
    %36 = vector.load %arg4[%c8, %c0_32] : memref<9x64xf32, #tpu.memory_space<vmem>>, vector<1x64xf32>
    %37 = vector.shape_cast %36 : vector<1x64xf32> to vector<64xf32>
    %c0_33 = arith.constant 0 : index
    %c0_34 = arith.constant 0 : index
    %38 = vector.load %arg5[%c0_33, %c0_34] : memref<1x64xf32, #tpu.memory_space<vmem>>, vector<1x64xf32>
    %39 = vector.shape_cast %38 : vector<1x64xf32> to vector<64xf32>
    %c0_35 = arith.constant 0 : index
    %c0_36 = arith.constant 0 : index
    %40 = vector.load %arg6[%c0_35, %c0_36] : memref<64x128xbf16, #tpu.memory_space<vmem>>, vector<64x128xbf16>
    %c0_37 = arith.constant 0 : index
    %c0_38 = arith.constant 0 : index
    %41 = vector.load %arg7[%c0_37, %c0_38] : memref<1x128xf32, #tpu.memory_space<vmem>>, vector<1x128xf32>
    %42 = vector.shape_cast %41 : vector<1x128xf32> to vector<128xf32>
    %43 = tpu.iota {dimensions = array<i32: 1>} : vector<1x16x1xi32>
    %c2_i32 = arith.constant 2 : i32
    %44 = vector.broadcast %c2_i32 : i32 to vector<1x16x1xi32>
    %45 = arith.cmpi sge, %43, %44 : vector<1x16x1xi32>
    %46 = arith.extui %45 : vector<1x16x1xi1> to vector<1x16x1xi32>
    %47 = arith.sitofp %46 : vector<1x16x1xi32> to vector<1x16x1xf32>
    %c14_i32 = arith.constant 14 : i32
    %48 = vector.broadcast %c14_i32 : i32 to vector<1x16x1xi32>
    %49 = arith.cmpi slt, %43, %48 : vector<1x16x1xi32>
    %50 = arith.extui %49 : vector<1x16x1xi1> to vector<1x16x1xi32>
    %51 = arith.sitofp %50 : vector<1x16x1xi32> to vector<1x16x1xf32>
    %cst_39 = arith.constant 0.000000e+00 : f32
    %52 = vector.broadcast %cst_39 : f32 to vector<8x16x64xf32>
    %c0_40 = arith.constant 0 : index
    %c0_41 = arith.constant 0 : index
    %c0_42 = arith.constant 0 : index
    %53 = vector.load %arg19[%c0_40, %c0_41, %c0_42] : memref<20x16x64xbf16, #tpu.memory_space<vmem>>, vector<8x16x64xbf16>
    %54 = arith.extf %53 : vector<8x16x64xbf16> to vector<8x16x64xf32>
    %55 = vector.shape_cast %23 : vector<64xf32> to vector<1x1x64xf32>
    %56 = vector.broadcast %55 : vector<1x1x64xf32> to vector<8x16x64xf32>
    %57 = arith.mulf %54, %56 : vector<8x16x64xf32>
    %58 = arith.addf %52, %57 : vector<8x16x64xf32>
    %c2_i32_43 = arith.constant 2 : i32
    %59 = tpu.dynamic_rotate %54 by %c2_i32_43 dim 1 : vector<8x16x64xf32>, i32 -> vector<8x16x64xf32>
    %60 = vector.broadcast %47 : vector<1x16x1xf32> to vector<8x16x64xf32>
    %61 = arith.mulf %59, %60 : vector<8x16x64xf32>
    %62 = vector.shape_cast %21 : vector<64xf32> to vector<1x1x64xf32>
    %63 = vector.broadcast %62 : vector<1x1x64xf32> to vector<8x16x64xf32>
    %64 = arith.mulf %61, %63 : vector<8x16x64xf32>
    %65 = arith.addf %58, %64 : vector<8x16x64xf32>
    %c14_i32_44 = arith.constant 14 : i32
    %66 = tpu.dynamic_rotate %54 by %c14_i32_44 dim 1 : vector<8x16x64xf32>, i32 -> vector<8x16x64xf32>
    %67 = vector.broadcast %51 : vector<1x16x1xf32> to vector<8x16x64xf32>
    %68 = arith.mulf %66, %67 : vector<8x16x64xf32>
    %69 = vector.shape_cast %25 : vector<64xf32> to vector<1x1x64xf32>
    %70 = vector.broadcast %69 : vector<1x1x64xf32> to vector<8x16x64xf32>
    %71 = arith.mulf %68, %70 : vector<8x16x64xf32>
    %72 = arith.addf %65, %71 : vector<8x16x64xf32>
    %c2_45 = arith.constant 2 : index
    %c0_46 = arith.constant 0 : index
    %c0_47 = arith.constant 0 : index
    %73 = vector.load %arg19[%c2_45, %c0_46, %c0_47] : memref<20x16x64xbf16, #tpu.memory_space<vmem>>, vector<8x16x64xbf16>
    %74 = arith.extf %73 : vector<8x16x64xbf16> to vector<8x16x64xf32>
    %75 = vector.shape_cast %29 : vector<64xf32> to vector<1x1x64xf32>
    %76 = vector.broadcast %75 : vector<1x1x64xf32> to vector<8x16x64xf32>
    %77 = arith.mulf %74, %76 : vector<8x16x64xf32>
    %78 = arith.addf %72, %77 : vector<8x16x64xf32>
    %c2_i32_48 = arith.constant 2 : i32
    %79 = tpu.dynamic_rotate %74 by %c2_i32_48 dim 1 : vector<8x16x64xf32>, i32 -> vector<8x16x64xf32>
    %80 = vector.broadcast %47 : vector<1x16x1xf32> to vector<8x16x64xf32>
    %81 = arith.mulf %79, %80 : vector<8x16x64xf32>
    %82 = vector.shape_cast %27 : vector<64xf32> to vector<1x1x64xf32>
    %83 = vector.broadcast %82 : vector<1x1x64xf32> to vector<8x16x64xf32>
    %84 = arith.mulf %81, %83 : vector<8x16x64xf32>
    %85 = arith.addf %78, %84 : vector<8x16x64xf32>
    %c14_i32_49 = arith.constant 14 : i32
    %86 = tpu.dynamic_rotate %74 by %c14_i32_49 dim 1 : vector<8x16x64xf32>, i32 -> vector<8x16x64xf32>
    %87 = vector.broadcast %51 : vector<1x16x1xf32> to vector<8x16x64xf32>
    %88 = arith.mulf %86, %87 : vector<8x16x64xf32>
    %89 = vector.shape_cast %31 : vector<64xf32> to vector<1x1x64xf32>
    %90 = vector.broadcast %89 : vector<1x1x64xf32> to vector<8x16x64xf32>
    %91 = arith.mulf %88, %90 : vector<8x16x64xf32>
    %92 = arith.addf %85, %91 : vector<8x16x64xf32>
    %c4_50 = arith.constant 4 : index
    %c0_51 = arith.constant 0 : index
    %c0_52 = arith.constant 0 : index
    %93 = vector.load %arg19[%c4_50, %c0_51, %c0_52] : memref<20x16x64xbf16, #tpu.memory_space<vmem>>, vector<8x16x64xbf16>
    %94 = arith.extf %93 : vector<8x16x64xbf16> to vector<8x16x64xf32>
    %95 = vector.shape_cast %35 : vector<64xf32> to vector<1x1x64xf32>
    %96 = vector.broadcast %95 : vector<1x1x64xf32> to vector<8x16x64xf32>
    %97 = arith.mulf %94, %96 : vector<8x16x64xf32>
    %98 = arith.addf %92, %97 : vector<8x16x64xf32>
    %c2_i32_53 = arith.constant 2 : i32
    %99 = tpu.dynamic_rotate %94 by %c2_i32_53 dim 1 : vector<8x16x64xf32>, i32 -> vector<8x16x64xf32>
    %100 = vector.broadcast %47 : vector<1x16x1xf32> to vector<8x16x64xf32>
    %101 = arith.mulf %99, %100 : vector<8x16x64xf32>
    %102 = vector.shape_cast %33 : vector<64xf32> to vector<1x1x64xf32>
    %103 = vector.broadcast %102 : vector<1x1x64xf32> to vector<8x16x64xf32>
    %104 = arith.mulf %101, %103 : vector<8x16x64xf32>
    %105 = arith.addf %98, %104 : vector<8x16x64xf32>
    %c14_i32_54 = arith.constant 14 : i32
    %106 = tpu.dynamic_rotate %94 by %c14_i32_54 dim 1 : vector<8x16x64xf32>, i32 -> vector<8x16x64xf32>
    %107 = vector.broadcast %51 : vector<1x16x1xf32> to vector<8x16x64xf32>
    %108 = arith.mulf %106, %107 : vector<8x16x64xf32>
    %109 = vector.shape_cast %37 : vector<64xf32> to vector<1x1x64xf32>
    %110 = vector.broadcast %109 : vector<1x1x64xf32> to vector<8x16x64xf32>
    %111 = arith.mulf %108, %110 : vector<8x16x64xf32>
    %112 = arith.addf %105, %111 : vector<8x16x64xf32>
    %113 = vector.shape_cast %39 : vector<64xf32> to vector<1x1x64xf32>
    %114 = vector.broadcast %113 : vector<1x1x64xf32> to vector<8x16x64xf32>
    %115 = arith.addf %112, %114 : vector<8x16x64xf32>
    %116 = vector.shape_cast %115 : vector<8x16x64xf32> to vector<128x64xf32>
    %117 = arith.truncf %116 : vector<128x64xf32> to vector<128x64xbf16>
    %cst_55 = arith.constant dense<0.000000e+00> : vector<128x128xf32>
    %118 = tpu.matmul %117, %40, %cst_55 {dimension_numbers = #tpu.dot_dimension_numbers<[1], [0], [0], [1], [0, 0, 1, 1], [], []>} : vector<128x64xbf16>, vector<64x128xbf16>, vector<128x128xf32> -> vector<128x128xf32>
    %119 = vector.shape_cast %42 : vector<128xf32> to vector<1x128xf32>
    %120 = vector.broadcast %119 : vector<1x128xf32> to vector<128x128xf32>
    %121 = arith.addf %118, %120 : vector<128x128xf32>
    %122 = vector.shape_cast %121 : vector<128x128xf32> to vector<8x16x128xf32>
    %123 = arith.truncf %122 : vector<8x16x128xf32> to vector<8x16x128xbf16>
    %c4_56 = arith.constant 4 : index
    %c0_57 = arith.constant 0 : index
    %c0_58 = arith.constant 0 : index
    %124 = vector.load %arg20[%c4_56, %c0_57, %c0_58] : memref<24x16x128xbf16, #tpu.memory_space<vmem>>, vector<8x16x128xbf16>
    tpu.vector_store %arg20[%c4_56, %c0_57, %c0_58], %123 {strides = array<i32>} : memref<24x16x128xbf16, #tpu.memory_space<vmem>>, vector<8x16x128xbf16>,
    %cst_59 = arith.constant 0.000000e+00 : f32
    %125 = vector.broadcast %cst_59 : f32 to vector<8x16x64xf32>
    %c8_60 = arith.constant 8 : index
    %c0_61 = arith.constant 0 : index
    %c0_62 = arith.constant 0 : index
    %126 = vector.load %arg19[%c8_60, %c0_61, %c0_62] : memref<20x16x64xbf16, #tpu.memory_space<vmem>>, vector<8x16x64xbf16>
    %127 = arith.extf %126 : vector<8x16x64xbf16> to vector<8x16x64xf32>
    %128 = vector.shape_cast %23 : vector<64xf32> to vector<1x1x64xf32>
    %129 = vector.broadcast %128 : vector<1x1x64xf32> to vector<8x16x64xf32>
    %130 = arith.mulf %127, %129 : vector<8x16x64xf32>
    %131 = arith.addf %125, %130 : vector<8x16x64xf32>
    %c2_i32_63 = arith.constant 2 : i32
    %132 = tpu.dynamic_rotate %127 by %c2_i32_63 dim 1 : vector<8x16x64xf32>, i32 -> vector<8x16x64xf32>
    %133 = vector.broadcast %47 : vector<1x16x1xf32> to vector<8x16x64xf32>
    %134 = arith.mulf %132, %133 : vector<8x16x64xf32>
    %135 = vector.shape_cast %21 : vector<64xf32> to vector<1x1x64xf32>
    %136 = vector.broadcast %135 : vector<1x1x64xf32> to vector<8x16x64xf32>
    %137 = arith.mulf %134, %136 : vector<8x16x64xf32>
    %138 = arith.addf %131, %137 : vector<8x16x64xf32>
    %c14_i32_64 = arith.constant 14 : i32
    %139 = tpu.dynamic_rotate %127 by %c14_i32_64 dim 1 : vector<8x16x64xf32>, i32 -> vector<8x16x64xf32>
    %140 = vector.broadcast %51 : vector<1x16x1xf32> to vector<8x16x64xf32>
    %141 = arith.mulf %139, %140 : vector<8x16x64xf32>
    %142 = vector.shape_cast %25 : vector<64xf32> to vector<1x1x64xf32>
    %143 = vector.broadcast %142 : vector<1x1x64xf32> to vector<8x16x64xf32>
    %144 = arith.mulf %141, %143 : vector<8x16x64xf32>
    %145 = arith.addf %138, %144 : vector<8x16x64xf32>
    %c10 = arith.constant 10 : index
    %c0_65 = arith.constant 0 : index
    %c0_66 = arith.constant 0 : index
    %146 = vector.load %arg19[%c10, %c0_65, %c0_66] : memref<20x16x64xbf16, #tpu.memory_space<vmem>>, vector<8x16x64xbf16>
    %147 = arith.extf %146 : vector<8x16x64xbf16> to vector<8x16x64xf32>
    %148 = vector.shape_cast %29 : vector<64xf32> to vector<1x1x64xf32>
    %149 = vector.broadcast %148 : vector<1x1x64xf32> to vector<8x16x64xf32>
    %150 = arith.mulf %147, %149 : vector<8x16x64xf32>
    %151 = arith.addf %145, %150 : vector<8x16x64xf32>
    %c2_i32_67 = arith.constant 2 : i32
    %152 = tpu.dynamic_rotate %147 by %c2_i32_67 dim 1 : vector<8x16x64xf32>, i32 -> vector<8x16x64xf32>
    %153 = vector.broadcast %47 : vector<1x16x1xf32> to vector<8x16x64xf32>
    %154 = arith.mulf %152, %153 : vector<8x16x64xf32>
    %155 = vector.shape_cast %27 : vector<64xf32> to vector<1x1x64xf32>
    %156 = vector.broadcast %155 : vector<1x1x64xf32> to vector<8x16x64xf32>
    %157 = arith.mulf %154, %156 : vector<8x16x64xf32>
    %158 = arith.addf %151, %157 : vector<8x16x64xf32>
    %c14_i32_68 = arith.constant 14 : i32
    %159 = tpu.dynamic_rotate %147 by %c14_i32_68 dim 1 : vector<8x16x64xf32>, i32 -> vector<8x16x64xf32>
    %160 = vector.broadcast %51 : vector<1x16x1xf32> to vector<8x16x64xf32>
    %161 = arith.mulf %159, %160 : vector<8x16x64xf32>
    %162 = vector.shape_cast %31 : vector<64xf32> to vector<1x1x64xf32>
    %163 = vector.broadcast %162 : vector<1x1x64xf32> to vector<8x16x64xf32>
    %164 = arith.mulf %161, %163 : vector<8x16x64xf32>
    %165 = arith.addf %158, %164 : vector<8x16x64xf32>
    %c12 = arith.constant 12 : index
    %c0_69 = arith.constant 0 : index
    %c0_70 = arith.constant 0 : index
    %166 = vector.load %arg19[%c12, %c0_69, %c0_70] : memref<20x16x64xbf16, #tpu.memory_space<vmem>>, vector<8x16x64xbf16>
    %167 = arith.extf %166 : vector<8x16x64xbf16> to vector<8x16x64xf32>
    %168 = vector.shape_cast %35 : vector<64xf32> to vector<1x1x64xf32>
    %169 = vector.broadcast %168 : vector<1x1x64xf32> to vector<8x16x64xf32>
    %170 = arith.mulf %167, %169 : vector<8x16x64xf32>
    %171 = arith.addf %165, %170 : vector<8x16x64xf32>
    %c2_i32_71 = arith.constant 2 : i32
    %172 = tpu.dynamic_rotate %167 by %c2_i32_71 dim 1 : vector<8x16x64xf32>, i32 -> vector<8x16x64xf32>
    %173 = vector.broadcast %47 : vector<1x16x1xf32> to vector<8x16x64xf32>
    %174 = arith.mulf %172, %173 : vector<8x16x64xf32>
    %175 = vector.shape_cast %33 : vector<64xf32> to vector<1x1x64xf32>
    %176 = vector.broadcast %175 : vector<1x1x64xf32> to vector<8x16x64xf32>
    %177 = arith.mulf %174, %176 : vector<8x16x64xf32>
    %178 = arith.addf %171, %177 : vector<8x16x64xf32>
    %c14_i32_72 = arith.constant 14 : i32
    %179 = tpu.dynamic_rotate %167 by %c14_i32_72 dim 1 : vector<8x16x64xf32>, i32 -> vector<8x16x64xf32>
    %180 = vector.broadcast %51 : vector<1x16x1xf32> to vector<8x16x64xf32>
    %181 = arith.mulf %179, %180 : vector<8x16x64xf32>
    %182 = vector.shape_cast %37 : vector<64xf32> to vector<1x1x64xf32>
    %183 = vector.broadcast %182 : vector<1x1x64xf32> to vector<8x16x64xf32>
    %184 = arith.mulf %181, %183 : vector<8x16x64xf32>
    %185 = arith.addf %178, %184 : vector<8x16x64xf32>
    %186 = vector.shape_cast %39 : vector<64xf32> to vector<1x1x64xf32>
    %187 = vector.broadcast %186 : vector<1x1x64xf32> to vector<8x16x64xf32>
    %188 = arith.addf %185, %187 : vector<8x16x64xf32>
    %189 = vector.shape_cast %188 : vector<8x16x64xf32> to vector<128x64xf32>
    %190 = arith.truncf %189 : vector<128x64xf32> to vector<128x64xbf16>
    %cst_73 = arith.constant dense<0.000000e+00> : vector<128x128xf32>
    %191 = tpu.matmul %190, %40, %cst_73 {dimension_numbers = #tpu.dot_dimension_numbers<[1], [0], [0], [1], [0, 0, 1, 1], [], []>} : vector<128x64xbf16>, vector<64x128xbf16>, vector<128x128xf32> -> vector<128x128xf32>
    %192 = vector.shape_cast %42 : vector<128xf32> to vector<1x128xf32>
    %193 = vector.broadcast %192 : vector<1x128xf32> to vector<128x128xf32>
    %194 = arith.addf %191, %193 : vector<128x128xf32>
    %195 = vector.shape_cast %194 : vector<128x128xf32> to vector<8x16x128xf32>
    %196 = arith.truncf %195 : vector<8x16x128xf32> to vector<8x16x128xbf16>
    %c12_74 = arith.constant 12 : index
    %c0_75 = arith.constant 0 : index
    %c0_76 = arith.constant 0 : index
    %197 = vector.load %arg20[%c12_74, %c0_75, %c0_76] : memref<24x16x128xbf16, #tpu.memory_space<vmem>>, vector<8x16x128xbf16>
    tpu.vector_store %arg20[%c12_74, %c0_75, %c0_76], %196 {strides = array<i32>} : memref<24x16x128xbf16, #tpu.memory_space<vmem>>, vector<8x16x128xbf16>,
    %c0_77 = arith.constant 0 : index
    %c0_78 = arith.constant 0 : index
    %198 = vector.load %arg8[%c0_77, %c0_78] : memref<9x128xf32, #tpu.memory_space<vmem>>, vector<1x128xf32>
    %199 = vector.shape_cast %198 : vector<1x128xf32> to vector<128xf32>
    %c1_79 = arith.constant 1 : index
    %c0_80 = arith.constant 0 : index
    %200 = vector.load %arg8[%c1_79, %c0_80] : memref<9x128xf32, #tpu.memory_space<vmem>>, vector<1x128xf32>
    %201 = vector.shape_cast %200 : vector<1x128xf32> to vector<128xf32>
    %c2_81 = arith.constant 2 : index
    %c0_82 = arith.constant 0 : index
    %202 = vector.load %arg8[%c2_81, %c0_82] : memref<9x128xf32, #tpu.memory_space<vmem>>, vector<1x128xf32>
    %203 = vector.shape_cast %202 : vector<1x128xf32> to vector<128xf32>
    %c3_83 = arith.constant 3 : index
    %c0_84 = arith.constant 0 : index
    %204 = vector.load %arg8[%c3_83, %c0_84] : memref<9x128xf32, #tpu.memory_space<vmem>>, vector<1x128xf32>
    %205 = vector.shape_cast %204 : vector<1x128xf32> to vector<128xf32>
    %c4_85 = arith.constant 4 : index
    %c0_86 = arith.constant 0 : index
    %206 = vector.load %arg8[%c4_85, %c0_86] : memref<9x128xf32, #tpu.memory_space<vmem>>, vector<1x128xf32>
    %207 = vector.shape_cast %206 : vector<1x128xf32> to vector<128xf32>
    %c5_87 = arith.constant 5 : index
    %c0_88 = arith.constant 0 : index
    %208 = vector.load %arg8[%c5_87, %c0_88] : memref<9x128xf32, #tpu.memory_space<vmem>>, vector<1x128xf32>
    %209 = vector.shape_cast %208 : vector<1x128xf32> to vector<128xf32>
    %c6_89 = arith.constant 6 : index
    %c0_90 = arith.constant 0 : index
    %210 = vector.load %arg8[%c6_89, %c0_90] : memref<9x128xf32, #tpu.memory_space<vmem>>, vector<1x128xf32>
    %211 = vector.shape_cast %210 : vector<1x128xf32> to vector<128xf32>
    %c7_91 = arith.constant 7 : index
    %c0_92 = arith.constant 0 : index
    %212 = vector.load %arg8[%c7_91, %c0_92] : memref<9x128xf32, #tpu.memory_space<vmem>>, vector<1x128xf32>
    %213 = vector.shape_cast %212 : vector<1x128xf32> to vector<128xf32>
    %c8_93 = arith.constant 8 : index
    %c0_94 = arith.constant 0 : index
    %214 = vector.load %arg8[%c8_93, %c0_94] : memref<9x128xf32, #tpu.memory_space<vmem>>, vector<1x128xf32>
    %215 = vector.shape_cast %214 : vector<1x128xf32> to vector<128xf32>
    %c0_95 = arith.constant 0 : index
    %c0_96 = arith.constant 0 : index
    %216 = vector.load %arg9[%c0_95, %c0_96] : memref<1x128xf32, #tpu.memory_space<vmem>>, vector<1x128xf32>
    %217 = vector.shape_cast %216 : vector<1x128xf32> to vector<128xf32>
    %c0_97 = arith.constant 0 : index
    %c0_98 = arith.constant 0 : index
    %218 = vector.load %arg10[%c0_97, %c0_98] : memref<128x256xbf16, #tpu.memory_space<vmem>>, vector<128x256xbf16>
    %c0_99 = arith.constant 0 : index
    %c0_100 = arith.constant 0 : index
    %219 = vector.load %arg11[%c0_99, %c0_100] : memref<1x256xf32, #tpu.memory_space<vmem>>, vector<1x256xf32>
    %220 = vector.shape_cast %219 : vector<1x256xf32> to vector<256xf32>
    %221 = tpu.iota {dimensions = array<i32: 1>} : vector<1x16x1xi32>
    %c4_i32 = arith.constant 4 : i32
    %222 = vector.broadcast %c4_i32 : i32 to vector<1x16x1xi32>
    %223 = arith.cmpi sge, %221, %222 : vector<1x16x1xi32>
    %224 = arith.extui %223 : vector<1x16x1xi1> to vector<1x16x1xi32>
    %225 = arith.sitofp %224 : vector<1x16x1xi32> to vector<1x16x1xf32>
    %c12_i32 = arith.constant 12 : i32
    %226 = vector.broadcast %c12_i32 : i32 to vector<1x16x1xi32>
    %227 = arith.cmpi slt, %221, %226 : vector<1x16x1xi32>
    %228 = arith.extui %227 : vector<1x16x1xi1> to vector<1x16x1xi32>
    %229 = arith.sitofp %228 : vector<1x16x1xi32> to vector<1x16x1xf32>
    %cst_101 = arith.constant 0.000000e+00 : f32
    %230 = vector.broadcast %cst_101 : f32 to vector<8x16x128xf32>
    %c0_102 = arith.constant 0 : index
    %c0_103 = arith.constant 0 : index
    %c0_104 = arith.constant 0 : index
    %231 = vector.load %arg20[%c0_102, %c0_103, %c0_104] : memref<24x16x128xbf16, #tpu.memory_space<vmem>>, vector<8x16x128xbf16>
    %232 = arith.extf %231 : vector<8x16x128xbf16> to vector<8x16x128xf32>
    %233 = vector.shape_cast %201 : vector<128xf32> to vector<1x1x128xf32>
    %234 = vector.broadcast %233 : vector<1x1x128xf32> to vector<8x16x128xf32>
    %235 = arith.mulf %232, %234 : vector<8x16x128xf32>
    %236 = arith.addf %230, %235 : vector<8x16x128xf32>
    %c4_i32_105 = arith.constant 4 : i32
    %237 = tpu.dynamic_rotate %232 by %c4_i32_105 dim 1 : vector<8x16x128xf32>, i32 -> vector<8x16x128xf32>
    %238 = vector.broadcast %225 : vector<1x16x1xf32> to vector<8x16x128xf32>
    %239 = arith.mulf %237, %238 : vector<8x16x128xf32>
    %240 = vector.shape_cast %199 : vector<128xf32> to vector<1x1x128xf32>
    %241 = vector.broadcast %240 : vector<1x1x128xf32> to vector<8x16x128xf32>
    %242 = arith.mulf %239, %241 : vector<8x16x128xf32>
    %243 = arith.addf %236, %242 : vector<8x16x128xf32>
    %c12_i32_106 = arith.constant 12 : i32
    %244 = tpu.dynamic_rotate %232 by %c12_i32_106 dim 1 : vector<8x16x128xf32>, i32 -> vector<8x16x128xf32>
    %245 = vector.broadcast %229 : vector<1x16x1xf32> to vector<8x16x128xf32>
    %246 = arith.mulf %244, %245 : vector<8x16x128xf32>
    %247 = vector.shape_cast %203 : vector<128xf32> to vector<1x1x128xf32>
    %248 = vector.broadcast %247 : vector<1x1x128xf32> to vector<8x16x128xf32>
    %249 = arith.mulf %246, %248 : vector<8x16x128xf32>
    %250 = arith.addf %243, %249 : vector<8x16x128xf32>
    %c4_107 = arith.constant 4 : index
    %c0_108 = arith.constant 0 : index
    %c0_109 = arith.constant 0 : index
    %251 = vector.load %arg20[%c4_107, %c0_108, %c0_109] : memref<24x16x128xbf16, #tpu.memory_space<vmem>>, vector<8x16x128xbf16>
    %252 = arith.extf %251 : vector<8x16x128xbf16> to vector<8x16x128xf32>
    %253 = vector.shape_cast %207 : vector<128xf32> to vector<1x1x128xf32>
    %254 = vector.broadcast %253 : vector<1x1x128xf32> to vector<8x16x128xf32>
    %255 = arith.mulf %252, %254 : vector<8x16x128xf32>
    %256 = arith.addf %250, %255 : vector<8x16x128xf32>
    %c4_i32_110 = arith.constant 4 : i32
    %257 = tpu.dynamic_rotate %252 by %c4_i32_110 dim 1 : vector<8x16x128xf32>, i32 -> vector<8x16x128xf32>
    %258 = vector.broadcast %225 : vector<1x16x1xf32> to vector<8x16x128xf32>
    %259 = arith.mulf %257, %258 : vector<8x16x128xf32>
    %260 = vector.shape_cast %205 : vector<128xf32> to vector<1x1x128xf32>
    %261 = vector.broadcast %260 : vector<1x1x128xf32> to vector<8x16x128xf32>
    %262 = arith.mulf %259, %261 : vector<8x16x128xf32>
    %263 = arith.addf %256, %262 : vector<8x16x128xf32>
    %c12_i32_111 = arith.constant 12 : i32
    %264 = tpu.dynamic_rotate %252 by %c12_i32_111 dim 1 : vector<8x16x128xf32>, i32 -> vector<8x16x128xf32>
    %265 = vector.broadcast %229 : vector<1x16x1xf32> to vector<8x16x128xf32>
    %266 = arith.mulf %264, %265 : vector<8x16x128xf32>
    %267 = vector.shape_cast %209 : vector<128xf32> to vector<1x1x128xf32>
    %268 = vector.broadcast %267 : vector<1x1x128xf32> to vector<8x16x128xf32>
    %269 = arith.mulf %266, %268 : vector<8x16x128xf32>
    %270 = arith.addf %263, %269 : vector<8x16x128xf32>
    %c8_112 = arith.constant 8 : index
    %c0_113 = arith.constant 0 : index
    %c0_114 = arith.constant 0 : index
    %271 = vector.load %arg20[%c8_112, %c0_113, %c0_114] : memref<24x16x128xbf16, #tpu.memory_space<vmem>>, vector<8x16x128xbf16>
    %272 = arith.extf %271 : vector<8x16x128xbf16> to vector<8x16x128xf32>
    %273 = vector.shape_cast %213 : vector<128xf32> to vector<1x1x128xf32>
    %274 = vector.broadcast %273 : vector<1x1x128xf32> to vector<8x16x128xf32>
    %275 = arith.mulf %272, %274 : vector<8x16x128xf32>
    %276 = arith.addf %270, %275 : vector<8x16x128xf32>
    %c4_i32_115 = arith.constant 4 : i32
    %277 = tpu.dynamic_rotate %272 by %c4_i32_115 dim 1 : vector<8x16x128xf32>, i32 -> vector<8x16x128xf32>
    %278 = vector.broadcast %225 : vector<1x16x1xf32> to vector<8x16x128xf32>
    %279 = arith.mulf %277, %278 : vector<8x16x128xf32>
    %280 = vector.shape_cast %211 : vector<128xf32> to vector<1x1x128xf32>
    %281 = vector.broadcast %280 : vector<1x1x128xf32> to vector<8x16x128xf32>
    %282 = arith.mulf %279, %281 : vector<8x16x128xf32>
    %283 = arith.addf %276, %282 : vector<8x16x128xf32>
    %c12_i32_116 = arith.constant 12 : i32
    %284 = tpu.dynamic_rotate %272 by %c12_i32_116 dim 1 : vector<8x16x128xf32>, i32 -> vector<8x16x128xf32>
    %285 = vector.broadcast %229 : vector<1x16x1xf32> to vector<8x16x128xf32>
    %286 = arith.mulf %284, %285 : vector<8x16x128xf32>
    %287 = vector.shape_cast %215 : vector<128xf32> to vector<1x1x128xf32>
    %288 = vector.broadcast %287 : vector<1x1x128xf32> to vector<8x16x128xf32>
    %289 = arith.mulf %286, %288 : vector<8x16x128xf32>
    %290 = arith.addf %283, %289 : vector<8x16x128xf32>
    %291 = vector.shape_cast %217 : vector<128xf32> to vector<1x1x128xf32>
    %292 = vector.broadcast %291 : vector<1x1x128xf32> to vector<8x16x128xf32>
    %293 = arith.addf %290, %292 : vector<8x16x128xf32>
    %294 = vector.shape_cast %293 : vector<8x16x128xf32> to vector<128x128xf32>
    %295 = arith.truncf %294 : vector<128x128xf32> to vector<128x128xbf16>
    %cst_117 = arith.constant dense<0.000000e+00> : vector<128x256xf32>
    %296 = tpu.matmul %295, %218, %cst_117 {dimension_numbers = #tpu.dot_dimension_numbers<[1], [0], [0], [1], [0, 0, 1, 1], [], []>} : vector<128x128xbf16>, vector<128x256xbf16>, vector<128x256xf32> -> vector<128x256xf32>
    %297 = vector.shape_cast %220 : vector<256xf32> to vector<1x256xf32>
    %298 = vector.broadcast %297 : vector<1x256xf32> to vector<128x256xf32>
    %299 = arith.addf %296, %298 : vector<128x256xf32>
    %300 = vector.shape_cast %299 : vector<128x256xf32> to vector<8x16x256xf32>
    %301 = arith.truncf %300 : vector<8x16x256xf32> to vector<8x16x256xbf16>
    %c0_118 = arith.constant 0 : index
    %c0_119 = arith.constant 0 : index
    %c0_120 = arith.constant 0 : index
    %302 = vector.load %arg21[%c0_118, %c0_119, %c0_120] : memref<16x16x256xbf16, #tpu.memory_space<vmem>>, vector<8x16x256xbf16>
    tpu.vector_store %arg21[%c0_118, %c0_119, %c0_120], %301 {strides = array<i32>} : memref<16x16x256xbf16, #tpu.memory_space<vmem>>, vector<8x16x256xbf16>,
    %cst_121 = arith.constant 0.000000e+00 : f32
    %303 = vector.broadcast %cst_121 : f32 to vector<8x16x128xf32>
    %c8_122 = arith.constant 8 : index
    %c0_123 = arith.constant 0 : index
    %c0_124 = arith.constant 0 : index
    %304 = vector.load %arg20[%c8_122, %c0_123, %c0_124] : memref<24x16x128xbf16, #tpu.memory_space<vmem>>, vector<8x16x128xbf16>
    %305 = arith.extf %304 : vector<8x16x128xbf16> to vector<8x16x128xf32>
    %306 = vector.shape_cast %201 : vector<128xf32> to vector<1x1x128xf32>
    %307 = vector.broadcast %306 : vector<1x1x128xf32> to vector<8x16x128xf32>
    %308 = arith.mulf %305, %307 : vector<8x16x128xf32>
    %309 = arith.addf %303, %308 : vector<8x16x128xf32>
    %c4_i32_125 = arith.constant 4 : i32
    %310 = tpu.dynamic_rotate %305 by %c4_i32_125 dim 1 : vector<8x16x128xf32>, i32 -> vector<8x16x128xf32>
    %311 = vector.broadcast %225 : vector<1x16x1xf32> to vector<8x16x128xf32>
    %312 = arith.mulf %310, %311 : vector<8x16x128xf32>
    %313 = vector.shape_cast %199 : vector<128xf32> to vector<1x1x128xf32>
    %314 = vector.broadcast %313 : vector<1x1x128xf32> to vector<8x16x128xf32>
    %315 = arith.mulf %312, %314 : vector<8x16x128xf32>
    %316 = arith.addf %309, %315 : vector<8x16x128xf32>
    %c12_i32_126 = arith.constant 12 : i32
    %317 = tpu.dynamic_rotate %305 by %c12_i32_126 dim 1 : vector<8x16x128xf32>, i32 -> vector<8x16x128xf32>
    %318 = vector.broadcast %229 : vector<1x16x1xf32> to vector<8x16x128xf32>
    %319 = arith.mulf %317, %318 : vector<8x16x128xf32>
    %320 = vector.shape_cast %203 : vector<128xf32> to vector<1x1x128xf32>
    %321 = vector.broadcast %320 : vector<1x1x128xf32> to vector<8x16x128xf32>
    %322 = arith.mulf %319, %321 : vector<8x16x128xf32>
    %323 = arith.addf %316, %322 : vector<8x16x128xf32>
    %c12_127 = arith.constant 12 : index
    %c0_128 = arith.constant 0 : index
    %c0_129 = arith.constant 0 : index
    %324 = vector.load %arg20[%c12_127, %c0_128, %c0_129] : memref<24x16x128xbf16, #tpu.memory_space<vmem>>, vector<8x16x128xbf16>
    %325 = arith.extf %324 : vector<8x16x128xbf16> to vector<8x16x128xf32>
    %326 = vector.shape_cast %207 : vector<128xf32> to vector<1x1x128xf32>
    %327 = vector.broadcast %326 : vector<1x1x128xf32> to vector<8x16x128xf32>
    %328 = arith.mulf %325, %327 : vector<8x16x128xf32>
    %329 = arith.addf %323, %328 : vector<8x16x128xf32>
    %c4_i32_130 = arith.constant 4 : i32
    %330 = tpu.dynamic_rotate %325 by %c4_i32_130 dim 1 : vector<8x16x128xf32>, i32 -> vector<8x16x128xf32>
    %331 = vector.broadcast %225 : vector<1x16x1xf32> to vector<8x16x128xf32>
    %332 = arith.mulf %330, %331 : vector<8x16x128xf32>
    %333 = vector.shape_cast %205 : vector<128xf32> to vector<1x1x128xf32>
    %334 = vector.broadcast %333 : vector<1x1x128xf32> to vector<8x16x128xf32>
    %335 = arith.mulf %332, %334 : vector<8x16x128xf32>
    %336 = arith.addf %329, %335 : vector<8x16x128xf32>
    %c12_i32_131 = arith.constant 12 : i32
    %337 = tpu.dynamic_rotate %325 by %c12_i32_131 dim 1 : vector<8x16x128xf32>, i32 -> vector<8x16x128xf32>
    %338 = vector.broadcast %229 : vector<1x16x1xf32> to vector<8x16x128xf32>
    %339 = arith.mulf %337, %338 : vector<8x16x128xf32>
    %340 = vector.shape_cast %209 : vector<128xf32> to vector<1x1x128xf32>
    %341 = vector.broadcast %340 : vector<1x1x128xf32> to vector<8x16x128xf32>
    %342 = arith.mulf %339, %341 : vector<8x16x128xf32>
    %343 = arith.addf %336, %342 : vector<8x16x128xf32>
    %c16 = arith.constant 16 : index
    %c0_132 = arith.constant 0 : index
    %c0_133 = arith.constant 0 : index
    %344 = vector.load %arg20[%c16, %c0_132, %c0_133] : memref<24x16x128xbf16, #tpu.memory_space<vmem>>, vector<8x16x128xbf16>
    %345 = arith.extf %344 : vector<8x16x128xbf16> to vector<8x16x128xf32>
    %346 = vector.shape_cast %213 : vector<128xf32> to vector<1x1x128xf32>
    %347 = vector.broadcast %346 : vector<1x1x128xf32> to vector<8x16x128xf32>
    %348 = arith.mulf %345, %347 : vector<8x16x128xf32>
    %349 = arith.addf %343, %348 : vector<8x16x128xf32>
    %c4_i32_134 = arith.constant 4 : i32
    %350 = tpu.dynamic_rotate %345 by %c4_i32_134 dim 1 : vector<8x16x128xf32>, i32 -> vector<8x16x128xf32>
    %351 = vector.broadcast %225 : vector<1x16x1xf32> to vector<8x16x128xf32>
    %352 = arith.mulf %350, %351 : vector<8x16x128xf32>
    %353 = vector.shape_cast %211 : vector<128xf32> to vector<1x1x128xf32>
    %354 = vector.broadcast %353 : vector<1x1x128xf32> to vector<8x16x128xf32>
    %355 = arith.mulf %352, %354 : vector<8x16x128xf32>
    %356 = arith.addf %349, %355 : vector<8x16x128xf32>
    %c12_i32_135 = arith.constant 12 : i32
    %357 = tpu.dynamic_rotate %345 by %c12_i32_135 dim 1 : vector<8x16x128xf32>, i32 -> vector<8x16x128xf32>
    %358 = vector.broadcast %229 : vector<1x16x1xf32> to vector<8x16x128xf32>
    %359 = arith.mulf %357, %358 : vector<8x16x128xf32>
    %360 = vector.shape_cast %215 : vector<128xf32> to vector<1x1x128xf32>
    %361 = vector.broadcast %360 : vector<1x1x128xf32> to vector<8x16x128xf32>
    %362 = arith.mulf %359, %361 : vector<8x16x128xf32>
    %363 = arith.addf %356, %362 : vector<8x16x128xf32>
    %364 = vector.shape_cast %217 : vector<128xf32> to vector<1x1x128xf32>
    %365 = vector.broadcast %364 : vector<1x1x128xf32> to vector<8x16x128xf32>
    %366 = arith.addf %363, %365 : vector<8x16x128xf32>
    %367 = vector.shape_cast %366 : vector<8x16x128xf32> to vector<128x128xf32>
    %368 = arith.truncf %367 : vector<128x128xf32> to vector<128x128xbf16>
    %cst_136 = arith.constant dense<0.000000e+00> : vector<128x256xf32>
    %369 = tpu.matmul %368, %218, %cst_136 {dimension_numbers = #tpu.dot_dimension_numbers<[1], [0], [0], [1], [0, 0, 1, 1], [], []>} : vector<128x128xbf16>, vector<128x256xbf16>, vector<128x256xf32> -> vector<128x256xf32>
    %370 = vector.shape_cast %220 : vector<256xf32> to vector<1x256xf32>
    %371 = vector.broadcast %370 : vector<1x256xf32> to vector<128x256xf32>
    %372 = arith.addf %369, %371 : vector<128x256xf32>
    %373 = vector.shape_cast %372 : vector<128x256xf32> to vector<8x16x256xf32>
    %374 = arith.truncf %373 : vector<8x16x256xf32> to vector<8x16x256xbf16>
    %c8_137 = arith.constant 8 : index
    %c0_138 = arith.constant 0 : index
    %c0_139 = arith.constant 0 : index
    %375 = vector.load %arg21[%c8_137, %c0_138, %c0_139] : memref<16x16x256xbf16, #tpu.memory_space<vmem>>, vector<8x16x256xbf16>
    tpu.vector_store %arg21[%c8_137, %c0_138, %c0_139], %374 {strides = array<i32>} : memref<16x16x256xbf16, #tpu.memory_space<vmem>>, vector<8x16x256xbf16>,
    %376 = tpu.iota {dimensions = array<i32: 1>} : vector<1x16x1xi32>
    %c6_i32 = arith.constant 6 : i32
    %377 = vector.broadcast %c6_i32 : i32 to vector<1x16x1xi32>
    %378 = arith.cmpi slt, %376, %377 : vector<1x16x1xi32>
    %379 = arith.extui %378 : vector<1x16x1xi1> to vector<1x16x1xi32>
    %380 = arith.sitofp %379 : vector<1x16x1xi32> to vector<1x16x1xf32>
    %c10_i32 = arith.constant 10 : i32
    %381 = vector.broadcast %c10_i32 : i32 to vector<1x16x1xi32>
    %382 = arith.cmpi sge, %376, %381 : vector<1x16x1xi32>
    %383 = arith.extui %382 : vector<1x16x1xi1> to vector<1x16x1xi32>
    %384 = arith.sitofp %383 : vector<1x16x1xi32> to vector<1x16x1xf32>
    %c0_140 = arith.constant 0 : index
    %c0_141 = arith.constant 0 : index
    %c0_142 = arith.constant 0 : index
    %385 = vector.load %arg21[%c0_140, %c0_141, %c0_142] : memref<16x16x256xbf16, #tpu.memory_space<vmem>>, vector<8x16x256xbf16>
    %386 = arith.extf %385 : vector<8x16x256xbf16> to vector<8x16x256xf32>
    %cst_143 = arith.constant dense<0.000000e+00> : vector<8x256xf32>
    %387 = vector.multi_reduction <add>, %386, %cst_143 [1] : vector<8x16x256xf32> to vector<8x256xf32>
    %388 = vector.broadcast %380 : vector<1x16x1xf32> to vector<8x16x256xf32>
    %389 = arith.mulf %386, %388 : vector<8x16x256xf32>
    %cst_144 = arith.constant dense<0.000000e+00> : vector<8x256xf32>
    %390 = vector.multi_reduction <add>, %389, %cst_144 [1] : vector<8x16x256xf32> to vector<8x256xf32>
    %391 = vector.broadcast %384 : vector<1x16x1xf32> to vector<8x16x256xf32>
    %392 = arith.mulf %386, %391 : vector<8x16x256xf32>
    %cst_145 = arith.constant dense<0.000000e+00> : vector<8x256xf32>
    %393 = vector.multi_reduction <add>, %392, %cst_145 [1] : vector<8x16x256xf32> to vector<8x256xf32>
    %394 = arith.subf %387, %393 : vector<8x256xf32>
    %395 = arith.subf %387, %390 : vector<8x256xf32>
    %c8_146 = arith.constant 8 : index
    %c0_147 = arith.constant 0 : index
    %c0_148 = arith.constant 0 : index
    %396 = vector.load %arg21[%c8_146, %c0_147, %c0_148] : memref<16x16x256xbf16, #tpu.memory_space<vmem>>, vector<8x16x256xbf16>
    %397 = arith.extf %396 : vector<8x16x256xbf16> to vector<8x16x256xf32>
    %cst_149 = arith.constant dense<0.000000e+00> : vector<8x256xf32>
    %398 = vector.multi_reduction <add>, %397, %cst_149 [1] : vector<8x16x256xf32> to vector<8x256xf32>
    %399 = vector.broadcast %380 : vector<1x16x1xf32> to vector<8x16x256xf32>
    %400 = arith.mulf %397, %399 : vector<8x16x256xf32>
    %cst_150 = arith.constant dense<0.000000e+00> : vector<8x256xf32>
    %401 = vector.multi_reduction <add>, %400, %cst_150 [1] : vector<8x16x256xf32> to vector<8x256xf32>
    %402 = vector.broadcast %384 : vector<1x16x1xf32> to vector<8x16x256xf32>
    %403 = arith.mulf %397, %402 : vector<8x16x256xf32>
    %cst_151 = arith.constant dense<0.000000e+00> : vector<8x256xf32>
    %404 = vector.multi_reduction <add>, %403, %cst_151 [1] : vector<8x16x256xf32> to vector<8x256xf32>
    %405 = arith.subf %398, %404 : vector<8x256xf32>
    %406 = arith.subf %398, %401 : vector<8x256xf32>
    %407 = tpu.concatenate %394, %405 in 0 : vector<8x256xf32>, vector<8x256xf32> -> vector<16x256xf32>
    %408 = tpu.concatenate %387, %398 in 0 : vector<8x256xf32>, vector<8x256xf32> -> vector<16x256xf32>
    %409 = tpu.concatenate %395, %406 in 0 : vector<8x256xf32>, vector<8x256xf32> -> vector<16x256xf32>
    %410 = tpu.iota {dimensions = array<i32: 0>} : vector<16x1xi32>
    %c10_i32_152 = arith.constant 10 : i32
    %411 = vector.broadcast %c10_i32_152 : i32 to vector<16x1xi32>
    %412 = arith.cmpi slt, %410, %411 : vector<16x1xi32>
    %413 = arith.extui %412 : vector<16x1xi1> to vector<16x1xi32>
    %414 = arith.sitofp %413 : vector<16x1xi32> to vector<16x1xf32>
    %cst_153 = arith.constant 1.000000e+00 : f32
    %415 = vector.broadcast %cst_153 : f32 to vector<16x1xf32>
    %c6_i32_154 = arith.constant 6 : i32
    %416 = vector.broadcast %c6_i32_154 : i32 to vector<16x1xi32>
    %417 = arith.cmpi sge, %410, %416 : vector<16x1xi32>
    %418 = arith.extui %417 : vector<16x1xi1> to vector<16x1xi32>
    %419 = arith.sitofp %418 : vector<16x1xi32> to vector<16x1xf32>
    %c0_155 = arith.constant 0 : index
    %c0_156 = arith.constant 0 : index
    %420 = vector.load %arg12[%c0_155, %c0_156] : memref<9x256xf32, #tpu.memory_space<vmem>>, vector<1x256xf32>
    %421 = vector.shape_cast %420 : vector<1x256xf32> to vector<256xf32>
    %c1_157 = arith.constant 1 : index
    %c0_158 = arith.constant 0 : index
    %422 = vector.load %arg12[%c1_157, %c0_158] : memref<9x256xf32, #tpu.memory_space<vmem>>, vector<1x256xf32>
    %423 = vector.shape_cast %422 : vector<1x256xf32> to vector<256xf32>
    %c2_159 = arith.constant 2 : index
    %c0_160 = arith.constant 0 : index
    %424 = vector.load %arg12[%c2_159, %c0_160] : memref<9x256xf32, #tpu.memory_space<vmem>>, vector<1x256xf32>
    %425 = vector.shape_cast %424 : vector<1x256xf32> to vector<256xf32>
    %c3_161 = arith.constant 3 : index
    %c0_162 = arith.constant 0 : index
    %426 = vector.load %arg12[%c3_161, %c0_162] : memref<9x256xf32, #tpu.memory_space<vmem>>, vector<1x256xf32>
    %427 = vector.shape_cast %426 : vector<1x256xf32> to vector<256xf32>
    %c4_163 = arith.constant 4 : index
    %c0_164 = arith.constant 0 : index
    %428 = vector.load %arg12[%c4_163, %c0_164] : memref<9x256xf32, #tpu.memory_space<vmem>>, vector<1x256xf32>
    %429 = vector.shape_cast %428 : vector<1x256xf32> to vector<256xf32>
    %c5_165 = arith.constant 5 : index
    %c0_166 = arith.constant 0 : index
    %430 = vector.load %arg12[%c5_165, %c0_166] : memref<9x256xf32, #tpu.memory_space<vmem>>, vector<1x256xf32>
    %431 = vector.shape_cast %430 : vector<1x256xf32> to vector<256xf32>
    %c6_167 = arith.constant 6 : index
    %c0_168 = arith.constant 0 : index
    %432 = vector.load %arg12[%c6_167, %c0_168] : memref<9x256xf32, #tpu.memory_space<vmem>>, vector<1x256xf32>
    %433 = vector.shape_cast %432 : vector<1x256xf32> to vector<256xf32>
    %c7_169 = arith.constant 7 : index
    %c0_170 = arith.constant 0 : index
    %434 = vector.load %arg12[%c7_169, %c0_170] : memref<9x256xf32, #tpu.memory_space<vmem>>, vector<1x256xf32>
    %435 = vector.shape_cast %434 : vector<1x256xf32> to vector<256xf32>
    %c8_171 = arith.constant 8 : index
    %c0_172 = arith.constant 0 : index
    %436 = vector.load %arg12[%c8_171, %c0_172] : memref<9x256xf32, #tpu.memory_space<vmem>>, vector<1x256xf32>
    %437 = vector.shape_cast %436 : vector<1x256xf32> to vector<256xf32>
    %cst_173 = arith.constant 0.000000e+00 : f32
    %438 = vector.broadcast %cst_173 : f32 to vector<1x256xf32>
    %439 = vector.broadcast %414 : vector<16x1xf32> to vector<16x256xf32>
    %440 = arith.mulf %407, %439 : vector<16x256xf32>
    %cst_174 = arith.constant dense<0.000000e+00> : vector<256xf32>
    %441 = vector.multi_reduction <add>, %440, %cst_174 [0] : vector<16x256xf32> to vector<256xf32>
    %442 = vector.shape_cast %441 : vector<256xf32> to vector<1x256xf32>
    %443 = vector.shape_cast %421 : vector<256xf32> to vector<1x256xf32>
    %444 = arith.mulf %442, %443 : vector<1x256xf32>
    %445 = arith.addf %438, %444 : vector<1x256xf32>
    %446 = vector.broadcast %414 : vector<16x1xf32> to vector<16x256xf32>
    %447 = arith.mulf %408, %446 : vector<16x256xf32>
    %cst_175 = arith.constant dense<0.000000e+00> : vector<256xf32>
    %448 = vector.multi_reduction <add>, %447, %cst_175 [0] : vector<16x256xf32> to vector<256xf32>
    %449 = vector.shape_cast %448 : vector<256xf32> to vector<1x256xf32>
    %450 = vector.shape_cast %423 : vector<256xf32> to vector<1x256xf32>
    %451 = arith.mulf %449, %450 : vector<1x256xf32>
    %452 = arith.addf %445, %451 : vector<1x256xf32>
    %453 = vector.broadcast %414 : vector<16x1xf32> to vector<16x256xf32>
    %454 = arith.mulf %409, %453 : vector<16x256xf32>
    %cst_176 = arith.constant dense<0.000000e+00> : vector<256xf32>
    %455 = vector.multi_reduction <add>, %454, %cst_176 [0] : vector<16x256xf32> to vector<256xf32>
    %456 = vector.shape_cast %455 : vector<256xf32> to vector<1x256xf32>
    %457 = vector.shape_cast %425 : vector<256xf32> to vector<1x256xf32>
    %458 = arith.mulf %456, %457 : vector<1x256xf32>
    %459 = arith.addf %452, %458 : vector<1x256xf32>
    %460 = vector.broadcast %415 : vector<16x1xf32> to vector<16x256xf32>
    %461 = arith.mulf %407, %460 : vector<16x256xf32>
    %cst_177 = arith.constant dense<0.000000e+00> : vector<256xf32>
    %462 = vector.multi_reduction <add>, %461, %cst_177 [0] : vector<16x256xf32> to vector<256xf32>
    %463 = vector.shape_cast %462 : vector<256xf32> to vector<1x256xf32>
    %464 = vector.shape_cast %427 : vector<256xf32> to vector<1x256xf32>
    %465 = arith.mulf %463, %464 : vector<1x256xf32>
    %466 = arith.addf %459, %465 : vector<1x256xf32>
    %467 = vector.broadcast %415 : vector<16x1xf32> to vector<16x256xf32>
    %468 = arith.mulf %408, %467 : vector<16x256xf32>
    %cst_178 = arith.constant dense<0.000000e+00> : vector<256xf32>
    %469 = vector.multi_reduction <add>, %468, %cst_178 [0] : vector<16x256xf32> to vector<256xf32>
    %470 = vector.shape_cast %469 : vector<256xf32> to vector<1x256xf32>
    %471 = vector.shape_cast %429 : vector<256xf32> to vector<1x256xf32>
    %472 = arith.mulf %470, %471 : vector<1x256xf32>
    %473 = arith.addf %466, %472 : vector<1x256xf32>
    %474 = vector.broadcast %415 : vector<16x1xf32> to vector<16x256xf32>
    %475 = arith.mulf %409, %474 : vector<16x256xf32>
    %cst_179 = arith.constant dense<0.000000e+00> : vector<256xf32>
    %476 = vector.multi_reduction <add>, %475, %cst_179 [0] : vector<16x256xf32> to vector<256xf32>
    %477 = vector.shape_cast %476 : vector<256xf32> to vector<1x256xf32>
    %478 = vector.shape_cast %431 : vector<256xf32> to vector<1x256xf32>
    %479 = arith.mulf %477, %478 : vector<1x256xf32>
    %480 = arith.addf %473, %479 : vector<1x256xf32>
    %481 = vector.broadcast %419 : vector<16x1xf32> to vector<16x256xf32>
    %482 = arith.mulf %407, %481 : vector<16x256xf32>
    %cst_180 = arith.constant dense<0.000000e+00> : vector<256xf32>
    %483 = vector.multi_reduction <add>, %482, %cst_180 [0] : vector<16x256xf32> to vector<256xf32>
    %484 = vector.shape_cast %483 : vector<256xf32> to vector<1x256xf32>
    %485 = vector.shape_cast %433 : vector<256xf32> to vector<1x256xf32>
    %486 = arith.mulf %484, %485 : vector<1x256xf32>
    %487 = arith.addf %480, %486 : vector<1x256xf32>
    %488 = vector.broadcast %419 : vector<16x1xf32> to vector<16x256xf32>
    %489 = arith.mulf %408, %488 : vector<16x256xf32>
    %cst_181 = arith.constant dense<0.000000e+00> : vector<256xf32>
    %490 = vector.multi_reduction <add>, %489, %cst_181 [0] : vector<16x256xf32> to vector<256xf32>
    %491 = vector.shape_cast %490 : vector<256xf32> to vector<1x256xf32>
    %492 = vector.shape_cast %435 : vector<256xf32> to vector<1x256xf32>
    %493 = arith.mulf %491, %492 : vector<1x256xf32>
    %494 = arith.addf %487, %493 : vector<1x256xf32>
    %495 = vector.broadcast %419 : vector<16x1xf32> to vector<16x256xf32>
    %496 = arith.mulf %409, %495 : vector<16x256xf32>
    %cst_182 = arith.constant dense<0.000000e+00> : vector<256xf32>
    %497 = vector.multi_reduction <add>, %496, %cst_182 [0] : vector<16x256xf32> to vector<256xf32>
    %498 = vector.shape_cast %497 : vector<256xf32> to vector<1x256xf32>
    %499 = vector.shape_cast %437 : vector<256xf32> to vector<1x256xf32>
    %500 = arith.mulf %498, %499 : vector<1x256xf32>
    %501 = arith.addf %494, %500 : vector<1x256xf32>
    %cst_183 = arith.constant 3.906250e-03 : f32
    %502 = vector.broadcast %cst_183 : f32 to vector<1x256xf32>
    %503 = arith.mulf %501, %502 : vector<1x256xf32>
    %c0_184 = arith.constant 0 : index
    %c0_185 = arith.constant 0 : index
    %504 = vector.load %arg13[%c0_184, %c0_185] : memref<1x256xf32, #tpu.memory_space<vmem>>, vector<1x256xf32>
    %505 = vector.shape_cast %504 : vector<1x256xf32> to vector<256xf32>
    %506 = vector.shape_cast %505 : vector<256xf32> to vector<1x256xf32>
    %507 = arith.addf %503, %506 : vector<1x256xf32>
    %c0_186 = arith.constant 0 : index
    %c0_187 = arith.constant 0 : index
    %508 = vector.load %arg14[%c0_186, %c0_187] : memref<256x40xf32, #tpu.memory_space<vmem>>, vector<256x40xf32>
    %cst_188 = arith.constant dense<0.000000e+00> : vector<1x40xf32>
    %509 = tpu.matmul %507, %508, %cst_188 {dimension_numbers = #tpu.dot_dimension_numbers<[1], [0], [0], [1], [0, 0, 1, 1], [], []>} : vector<1x256xf32>, vector<256x40xf32>, vector<1x40xf32> -> vector<1x40xf32>
    %c0_189 = arith.constant 0 : index
    %c0_190 = arith.constant 0 : index
    %510 = vector.load %arg15[%c0_189, %c0_190] : memref<1x40xf32, #tpu.memory_space<vmem>>, vector<1x40xf32>
    %511 = vector.shape_cast %510 : vector<1x40xf32> to vector<40xf32>
    %512 = vector.shape_cast %511 : vector<40xf32> to vector<1x40xf32>
    %513 = arith.addf %509, %512 : vector<1x40xf32>
    %c0_191 = arith.constant 0 : index
    %c0_192 = arith.constant 0 : index
    %514 = vector.load %arg16[%c0_191, %c0_192] : memref<40x10xf32, #tpu.memory_space<vmem>>, vector<40x10xf32>
    %cst_193 = arith.constant dense<0.000000e+00> : vector<1x10xf32>
    %515 = tpu.matmul %513, %514, %cst_193 {dimension_numbers = #tpu.dot_dimension_numbers<[1], [0], [0], [1], [0, 0, 1, 1], [], []>} : vector<1x40xf32>, vector<40x10xf32>, vector<1x10xf32> -> vector<1x10xf32>
    %c0_194 = arith.constant 0 : index
    %c0_195 = arith.constant 0 : index
    %516 = vector.load %arg17[%c0_194, %c0_195] : memref<1x10xf32, #tpu.memory_space<vmem>>, vector<1x10xf32>
    %517 = vector.shape_cast %516 : vector<1x10xf32> to vector<10xf32>
    %518 = vector.shape_cast %517 : vector<10xf32> to vector<1x10xf32>
    %519 = arith.addf %515, %518 : vector<1x10xf32>
    %520 = vector.shape_cast %519 : vector<1x10xf32> to vector<1x1x10xf32>
    %c0_196 = arith.constant 0 : index
    %c0_197 = arith.constant 0 : index
    %c0_198 = arith.constant 0 : index
    %521 = vector.load %arg18[%c0_196, %c0_197, %c0_198] : memref<1x1x10xf32, #tpu.memory_space<vmem>>, vector<1x1x10xf32>
    tpu.vector_store %arg18[%c0_196, %c0_197, %c0_198], %520 {strides = array<i32>} : memref<1x1x10xf32, #tpu.memory_space<vmem>>, vector<1x1x10xf32>,
    return
  }
  func.func @transform_0(%arg0: i32) -> (i32, i32, i32) {
    %c0_i32 = arith.constant 0 : i32
    %c0_i32_0 = arith.constant 0 : i32
    %c0_i32_1 = arith.constant 0 : i32
    return %arg0, %c0_i32, %c0_i32_0 : i32, i32, i32
  }
  func.func @transform_1(%arg0: i32) -> (i32, i32) {
    %c0_i32 = arith.constant 0 : i32
    %c0_i32_0 = arith.constant 0 : i32
    %c0_i32_1 = arith.constant 0 : i32
    return %c0_i32, %c0_i32_0 : i32, i32
  }
  func.func @transform_2(%arg0: i32) -> (i32, i32) {
    %c0_i32 = arith.constant 0 : i32
    %c0_i32_0 = arith.constant 0 : i32
    %c0_i32_1 = arith.constant 0 : i32
    return %c0_i32, %c0_i32_0 : i32, i32
  }
  func.func @transform_3(%arg0: i32) -> (i32, i32) {
    %c0_i32 = arith.constant 0 : i32
    %c0_i32_0 = arith.constant 0 : i32
    %c0_i32_1 = arith.constant 0 : i32
    return %c0_i32, %c0_i32_0 : i32, i32
  }
  func.func @transform_4(%arg0: i32) -> (i32, i32) {
    %c0_i32 = arith.constant 0 : i32
    %c0_i32_0 = arith.constant 0 : i32
    %c0_i32_1 = arith.constant 0 : i32
    return %c0_i32, %c0_i32_0 : i32, i32
  }
  func.func @transform_5(%arg0: i32) -> (i32, i32) {
    %c0_i32 = arith.constant 0 : i32
    %c0_i32_0 = arith.constant 0 : i32
    %c0_i32_1 = arith.constant 0 : i32
    return %c0_i32, %c0_i32_0 : i32, i32
  }
  func.func @transform_6(%arg0: i32) -> (i32, i32) {
    %c0_i32 = arith.constant 0 : i32
    %c0_i32_0 = arith.constant 0 : i32
    %c0_i32_1 = arith.constant 0 : i32
    return %c0_i32, %c0_i32_0 : i32, i32
  }
  func.func @transform_7(%arg0: i32) -> (i32, i32) {
    %c0_i32 = arith.constant 0 : i32
    %c0_i32_0 = arith.constant 0 : i32
    %c0_i32_1 = arith.constant 0 : i32
    return %c0_i32, %c0_i32_0 : i32, i32
  }
  func.func @transform_8(%arg0: i32) -> (i32, i32) {
    %c0_i32 = arith.constant 0 : i32
    %c0_i32_0 = arith.constant 0 : i32
    %c0_i32_1 = arith.constant 0 : i32
    return %c0_i32, %c0_i32_0 : i32, i32
  }
  func.func @transform_9(%arg0: i32) -> (i32, i32) {
    %c0_i32 = arith.constant 0 : i32
    %c0_i32_0 = arith.constant 0 : i32
    %c0_i32_1 = arith.constant 0 : i32
    return %c0_i32, %c0_i32_0 : i32, i32
  }
  func.func @transform_10(%arg0: i32) -> (i32, i32) {
    %c0_i32 = arith.constant 0 : i32
    %c0_i32_0 = arith.constant 0 : i32
    %c0_i32_1 = arith.constant 0 : i32
    return %c0_i32, %c0_i32_0 : i32, i32
  }
  func.func @transform_11(%arg0: i32) -> (i32, i32) {
    %c0_i32 = arith.constant 0 : i32
    %c0_i32_0 = arith.constant 0 : i32
    %c0_i32_1 = arith.constant 0 : i32
    return %c0_i32, %c0_i32_0 : i32, i32
  }
  func.func @transform_12(%arg0: i32) -> (i32, i32) {
    %c0_i32 = arith.constant 0 : i32
    %c0_i32_0 = arith.constant 0 : i32
    %c0_i32_1 = arith.constant 0 : i32
    return %c0_i32, %c0_i32_0 : i32, i32
  }
  func.func @transform_13(%arg0: i32) -> (i32, i32) {
    %c0_i32 = arith.constant 0 : i32
    %c0_i32_0 = arith.constant 0 : i32
    %c0_i32_1 = arith.constant 0 : i32
    return %c0_i32, %c0_i32_0 : i32, i32
  }
  func.func @transform_14(%arg0: i32) -> (i32, i32) {
    %c0_i32 = arith.constant 0 : i32
    %c0_i32_0 = arith.constant 0 : i32
    %c0_i32_1 = arith.constant 0 : i32
    return %c0_i32, %c0_i32_0 : i32, i32
  }
  func.func @transform_15(%arg0: i32) -> (i32, i32) {
    %c0_i32 = arith.constant 0 : i32
    %c0_i32_0 = arith.constant 0 : i32
    %c0_i32_1 = arith.constant 0 : i32
    return %c0_i32, %c0_i32_0 : i32, i32
  }
  func.func @transform_16(%arg0: i32) -> (i32, i32) {
    %c0_i32 = arith.constant 0 : i32
    %c0_i32_0 = arith.constant 0 : i32
    %c0_i32_1 = arith.constant 0 : i32
    return %c0_i32, %c0_i32_0 : i32, i32
  }
  func.func @transform_17(%arg0: i32) -> (i32, i32, i32) {
    %c0_i32 = arith.constant 0 : i32
    %c0_i32_0 = arith.constant 0 : i32
    %c0_i32_1 = arith.constant 0 : i32
    return %arg0, %c0_i32, %c0_i32_0 : i32, i32, i32
  }
}

</mosaic_0001>

<bundles_post_ra>
// kernel: net_forward.1
= control target key start
LH: loop header
LB: loop body
LE: loop exit
PB: predicated region body
PF: predicated region fallthrough
CT: control target
= control target key end

     0   :  { %s10917_s0 = inlined_call_operand.vmem [shape: bf16[2,256,288], index: 0, kind: input, shape index: {}]   ;;  %s10918_s1 = inlined_call_operand.vmem [shape: bf16[288,64], index: 1, kind: input, shape index: {}]   ;;  %s10919_s2 = inlined_call_operand.vmem [shape: f32[1,64], index: 2, kind: input, shape index: {}]   ;;  %s10920_s3 = inlined_call_operand.vmem [shape: f32[9,64], index: 3, kind: input, shape index: {}]   ;;  %s10921_s4 = inlined_call_operand.vmem [shape: f32[1,64], index: 4, kind: input, shape index: {}]   ;;  %s10922_s5 = inlined_call_operand.vmem [shape: bf16[64,128], index: 5, kind: input, shape index: {}]   ;;  %s10923_s6 = inlined_call_operand.vmem [shape: f32[1,128], index: 6, kind: input, shape index: {}]   ;;  %s10924_s7 = inlined_call_operand.vmem [shape: f32[9,128], index: 7, kind: input, shape index: {}]   ;;  %s10925_s8 = inlined_call_operand.vmem [shape: f32[1,128], index: 8, kind: input, shape index: {}]   ;;  %s10926_s9 = inlined_call_operand.vmem [shape: bf16[128,256], index: 9, kind: input, shape index: {}]   ;;  %s10927_s10 = inlined_call_operand.vmem [shape: f32[1,256], index: 10, kind: input, shape index: {}]   ;;  %s10928_s11 = inlined_call_operand.vmem [shape: f32[9,256], index: 11, kind: input, shape index: {}]   ;;  %s10929_s12 = inlined_call_operand.vmem [shape: f32[1,256], index: 12, kind: input, shape index: {}]   ;;  %s10930_s13 = inlined_call_operand.vmem [shape: f32[256,40], index: 13, kind: input, shape index: {}]   ;;  %s10931_s14 = inlined_call_operand.vmem [shape: f32[1,40], index: 14, kind: input, shape index: {}]   ;;  %s10932_s15 = inlined_call_operand.vmem [shape: f32[40,10], index: 15, kind: input, shape index: {}]   ;;  %s10933_s16 = inlined_call_operand.vmem [shape: f32[1,10], index: 16, kind: input, shape index: {}]   ;;  %s10934_s17 = inlined_call_operand.hbm [shape: f32[2,1,10], index: 17, kind: output, shape index: {}]  }
   0x1   :  { %10984 = sst [smem:[#allocation35_spill]] %s10917_s0 }
   0x2   :  { %10985 = sst [smem:[#allocation36_spill]] %s10918_s1 }
   0x3   :  { %10986 = sst [smem:[#allocation37_spill]] %s10933_s16 }
   0x4   :  { %10987 = sst [smem:[#allocation38_spill]] %s10934_s17 }
   0x5   :  { %22 = vsyncpa [#allocation6], 0 }
   0x6   :  { %24 = vsyncpa [#allocation6 + $0x1], 0  ;;  %s7355_s24 = smov 0   ;;  %s7357_s25 = smov 0  }
   0x7   :  { %s7359_s26 = smov 0   ;;  %s7361_s27 = smov 0  }
   0x8 LB: > { %10988 = sst [smem:[#allocation8_spill]] %s7246_s24  ;;  %s7376_s28 = sadd.s32 4294967295, %s7258_s27   ;;  %s7258_s27 = sphi %s7361_s27, %s11098_s27   ;;  %s7254_s26 = sphi %s7359_s26, %s11100_s26   ;;  %s7250_s25 = sphi %s7357_s25, %s11102_s25   ;;  %s7246_s24 = sphi %s7355_s24, %s11101_s24  }
   0x9   : > { %10989 = sst [smem:[#allocation9_spill]] %s7254_s26  ;;  %s6524_s29 = sadd.s32 4294967294, %s7258_s27  }
   0xa   : > { %10990 = sst [smem:[#allocation10_spill]] %s7258_s27  ;;  %s7380_s0 = sadd.s32 1, %s7258_s27  }
   0xb   : > { %10991 = sst [smem:[#allocation11_spill]] %s7380_s0  ;;  %s399_s30 = sadd.s32 1, %s7254_s26 }
   0xc   : > { %s396_s18 = ssub.s32 %s7258_s27, %s7380_s0  ;;  %p409_p0 = scmp.ne.s32.totalorder %s7254_s26, %s7250_s25 }
   0xd   : > { %p397_p1 = scmp.eq.s32.totalorder %s396_s18, 0  ;;  %p410_p2 = scmp.eq.s32.totalorder %s7376_s28, 1 }
   0xe   : > { %p415_p3 = scmp.ne.s32.totalorder %s7250_s25, %s7246_s24  ;;  %p416_p4 = scmp.eq.s32.totalorder %s6524_s29, 1 }
   0xf   : > { %s7391_s19 = scalar_select %p397_p1, %s7254_s26, %s399_s30  }
  0x10   : > { %p7393_p5 = por %p410_p2, %p409_p0  ;;  %p7397_p6 = por %p416_p4, %p415_p3 }
  0x11   : > { %10992 = sst [smem:[#allocation12_spill]] %s7391_s19  ;;  %p6527_p7 = scmp.ge.s32.totalorder %s7258_s27, 1 }
  0x12   : > { %s10994_s20 = scalar_select %p7397_p6, 1, 0 }
  0x13   : > { %p490_p8 = scmp.lt.s32.totalorder %s7258_s27, 3 }
  0x14   : > { %10995 = sst [smem:[#allocation13_spill]] %s10994_s20 }
  0x15   : > { %p491_p9 = pnand %p6527_p7, %p490_p8 }
  0x17   : > { %494 = sbr.rel (%p491_p9) target bundleno = 1645 (0x66d), region = 88 }
  0x1e   : > { %s10996_s23 = sld [smem:[#allocation36_spill]]  ;;  %p541_p10 = scmp.lt.s32.totalorder %s7376_s28, 1  ;;  %vm1017_vm0 = vcmask 261120   ;;  %vm547_vm1 = vcmask 523264   ;;  %v10945_v59 = vmov 0   ;;  %vm5758_vm10 = vcmask 1041409  }
  0x1f   : > { %s10997_s16 = sld [smem:[#allocation35_spill]]  ;;  %548 = vst.msk [vmem:[#allocation2] sm:$0xff] %vm547_vm1, %v10945_v59  ;;  %549 = vst.msk [vmem:[#allocation2 + $0x8] sm:$0xff] %vm547_vm1, %v10945_v59  ;;  %vm5760_vm11 = vcmask 1042434   ;;  %vm5762_vm12 = vcmask 1043459   ;;  %vm5764_vm13 = vcmask 1044484  }
  0x20   : > { %s542_s30 = scalar_select %p541_p10, %s7376_s28, 1  ;;  %551 = vst.msk [vmem:[#allocation2 + $0x90] sm:$0xff] %vm547_vm1, %v10945_v59  ;;  %552 = vst.msk [vmem:[#allocation2 + $0x98] sm:$0xff] %vm547_vm1, %v10945_v59  ;;  %vm5766_vm14 = vcmask 1045509   ;;  %vm5768_vm15 = vcmask 1046534  }
  0x21   : > { %s539_s20 = sand.u32 1, %s7250_s25   ;;  %s11093_s18 = sld [smem:[#allocation37_spill]] }
  0x22   : > { %s7019_s24 = smul.u32 384, %s542_s30  ;;  %s6686_s30 = sshll.u32 %s7376_s28, 4 }
  0x23   : > { %s540_s0 = scalar_lea.vmem [#allocation5], %s539_s20  ;;  %s11094_s22 = sld [smem:[#allocation38_spill]] }
  0x24   : > { %v7063_v0 = vld [vmem:[%s10996_s23 + $0x40] sm:$0xff]   ;;  %v7065_v2 = vld [vmem:[%s10996_s23 + $0x48] sm:$0xff]   ;;  %v7067_v4 = vld [vmem:[%s10996_s23 + $0x50] sm:$0xff]   ;;  %s6469_s27 = sshll.u32 %s540_s0, 4  ;;  %s7264_s28 = smov [#allocation5]   ;;  %s10877_s27 = int_to_ptr.vmem [resolvable:$true] %s6469_s27 }
  0x25   : > { %v7064_v1 = vld [vmem:[%s10996_s23] sm:$0xff]   ;;  %6689 = vmatprep.subr.bf16.mxu0 %v7063_v0  ;;  %v7066_v3 = vld [vmem:[%s10996_s23 + $0x8] sm:$0xff]   ;;  %v7068_v5 = vld [vmem:[%s10996_s23 + $0x10] sm:$0xff]   ;;  %s7441_s26 = scalar_lea.vmem %s10997_s16, %s7019_s24  ;;  %s6457_s16 = scalar_lea.sflag [#allocation6], %s539_s20 }
  0x26   : > { %6690 = vmatpush3.bf16.msra.mxu0 %v7064_v1  ;;  %v7069_v6 = vld [vmem:[%s10996_s23 + $0x58] sm:$0xff]   ;;  %v7071_v8 = vld [vmem:[%s10996_s23 + $0x60] sm:$0xff]   ;;  %v7073_v11 = vld [vmem:[%s10996_s23 + $0x68] sm:$0xff]   ;;  %s7196_s24 = scalar_lea.vmem %s10877_s27, 16  ;;  %s7200_s29 = sshll.u32 %s7264_s28, 4  ;;  %s7201_s29 = int_to_ptr.vmem [resolvable:$false] %s7200_s29 }
  0x27   : > { %6691 = vmatprep.subr.bf16.mxu0 %v7065_v2  ;;  %v7070_v7 = vld [vmem:[%s10996_s23 + $0x18] sm:$0xff]   ;;  %v7072_v9 = vld [vmem:[%s10996_s23 + $0x20] sm:$0xff]   ;;  %v7074_v12 = vld [vmem:[%s10996_s23 + $0x28] sm:$0xff]   ;;  %p7197_p11 = scmp.ne.s32.totalorder %s10877_s27, %s7196_s24  ;;  %s7202_s19 = scalar_lea.vmem %s7201_s29, 32 }
  0x28   : > { %v7078_v10 = vld [vmem:[%s10996_s23 + $0x80] sm:$0xff]   ;;  %v7075_v13 = vld [vmem:[%s10996_s23 + $0x70] sm:$0xff]   ;;  %v7083_v15 = vld [vmem:[%s10996_s23 + $0x88] sm:$0xff]   ;;  %p7203_p0 = scmp.lt.s32.totalorder %s10877_s27, %s7201_s29  ;;  %p7204_p1 = scmp.lt.s32.totalorder %s7202_s19, %s7196_s24 }
  0x29   : > { %6884 = vmatprep.subr.bf16.mxu1 %v7078_v10  ;;  %v7082_v14 = vld [vmem:[%s7441_s26 + $0x4] ss:$12 sps:$4 sm:$0xff]   ;;  %v7084_v16 = vld [vmem:[%s7441_s26 + $0x8] ss:$12 sps:$4 sm:$0xff]   ;;  %v7085_v17 = vld [vmem:[%s7441_s26 + $0x20] ss:$12 sps:$4 sm:$0xff]   ;;  %p7198_p12 = pnand %p7197_p11, %p7393_p5 }
  0x2a   : > { %6692 = vmatpush3.bf16.msra.mxu0 %v7066_v3  ;;  %6885 = vmatpush3.bf16.msra.mxu1 %v7078_v10  ;;  %v7076_v18 = vld [vmem:[%s10996_s23 + $0x30] sm:$0xff]   ;;  %v7077_v19 = vld [vmem:[%s10996_s23 + $0x78] sm:$0xff]   ;;  %v7080_v22 = vld [vmem:[%s7441_s26] ss:$12 sps:$4 sm:$0xff]   ;;  %p7205_p2 = por %p7204_p1, %p7203_p0 }
  0x2b   : > { %6693 = vmatprep.subr.bf16.mxu0 %v7067_v4  ;;  %1098 = vmatprep.mubr.bf16.mxu0 %v7082_v14  ;;  %v7092_v20 = vld [vmem:[%s7441_s26 + $0x38] ss:$12 sps:$4 sm:$0xff]   ;;  %v7093_v23 = vld [vmem:[%s7441_s26 + $0x50] ss:$12 sps:$4 sm:$0xff]   ;;  %v7100_v24 = vld [vmem:[%s7441_s26 + $0x68] ss:$12 sps:$4 sm:$0xff]   ;;  %p7199_p13 = pneg %p7198_p12 }
  0x2c   : > { %6886 = vmatprep.subr.bf16.mxu1 %v7083_v15  ;;  %6888 = vmatprep.mubr.msk.bf16.mxu1 %vm1017_vm0, %v7084_v16  ;;  %v7079_v21 = vld [vmem:[%s10996_s23 + $0x38] sm:$0xff]   ;;  %v7101_v27 = vld [vmem:[%s7441_s26 + $0x80] ss:$12 sps:$4 sm:$0xff]   ;;  %v7116_v32 = vld [vmem:[%s7441_s26 + $0xc8] ss:$12 sps:$4 sm:$0xff]  }
  0x2d   : > { %v7086_v25 = vld [vmem:[%s7441_s26 + $0x1c] ss:$12 sps:$4 sm:$0xff]   ;;  %v7088_v26 = vld [vmem:[%s7441_s26 + $0x18] ss:$12 sps:$4 sm:$0xff]   ;;  %v7089_v29 = vld [vmem:[%s7441_s26 + $0x34] ss:$12 sps:$4 sm:$0xff]   ;;  %p7206_p3 = pnand %p7205_p2, %p7199_p13 }
  0x2e   : > { %6694 = vmatpush3.bf16.msra.mxu0 %v7068_v5  ;;  %6887 = vmatpush3.bf16.msra.mxu1 %v7083_v15  ;;  %v7108_v28 = vld [vmem:[%s7441_s26 + $0x98] ss:$12 sps:$4 sm:$0xff]   ;;  %v7091_v30 = vld [vmem:[%s7441_s26 + $0x30] ss:$12 sps:$4 sm:$0xff]   ;;  %v7096_v34 = vld [vmem:[%s7441_s26 + $0x48] ss:$12 sps:$4 sm:$0xff]  }
  0x2f   : > { %6695 = vmatprep.subr.bf16.mxu0 %v7069_v6  ;;  %v7109_v31 = vld [vmem:[%s7441_s26 + $0xb0] ss:$12 sps:$4 sm:$0xff]   ;;  %v7094_v33 = vld [vmem:[%s7441_s26 + $0x4c] ss:$12 sps:$4 sm:$0xff]   ;;  %v7132_v40 = vld [vmem:[%s7441_s26 + $0x128] ss:$12 sps:$4 sm:$0xff]  }
  0x30   : > { %v7117_v35 = vld [vmem:[%s7441_s26 + $0xe0] ss:$12 sps:$4 sm:$0xff]   ;;  %v7124_v36 = vld [vmem:[%s7441_s26 + $0xf8] ss:$12 sps:$4 sm:$0xff]   ;;  %v7125_v38 = vld [vmem:[%s7441_s26 + $0x110] ss:$12 sps:$4 sm:$0xff]  }
  0x31   : > { %6889 = vmatmul.mubr.msk.bf16.vlgmr.msra.gmra.mrb[0].mxu1 %vm1017_vm0, %v7085_v17  ;;  %v7097_v37 = vld [vmem:[%s7441_s26 + $0x64] ss:$12 sps:$4 sm:$0xff]   ;;  %v7099_v39 = vld [vmem:[%s7441_s26 + $0x60] ss:$12 sps:$4 sm:$0xff]   ;;  %v7102_v41 = vld [vmem:[%s7441_s26 + $0x7c] ss:$12 sps:$4 sm:$0xff]  }
  0x32   : > { %6696 = vmatpush3.bf16.msra.mxu0 %v7070_v7  ;;  %6892 = vmatprep.mubr.msk.bf16.mxu1 %vm1017_vm0, %v7092_v20  ;;  %v7133_v42 = vld [vmem:[%s7441_s26 + $0x140] ss:$12 sps:$4 sm:$0xff]   ;;  %v7104_v43 = vld [vmem:[%s7441_s26 + $0x78] ss:$12 sps:$4 sm:$0xff]   ;;  %v7141_v46 = vld [vmem:[%s7441_s26 + $0x170] ss:$12 sps:$4 sm:$0xff]  }
  0x33   : > { %6697 = vmatprep.subr.bf16.mxu0 %v7071_v8  ;;  %v7140_v44 = vld [vmem:[%s7441_s26 + $0x158] ss:$12 sps:$4 sm:$0xff]   ;;  %v7105_v45 = vld [vmem:[%s7441_s26 + $0x94] ss:$12 sps:$4 sm:$0xff]   ;;  %v7107_v47 = vld [vmem:[%s7441_s26 + $0x90] ss:$12 sps:$4 sm:$0xff]  }
  0x34   : > { %v7110_v48 = vld [vmem:[%s7441_s26 + $0xac] ss:$12 sps:$4 sm:$0xff]   ;;  %v7112_v49 = vld [vmem:[%s7441_s26 + $0xa8] ss:$12 sps:$4 sm:$0xff]   ;;  %v7113_v50 = vld [vmem:[%s7441_s26 + $0xc4] ss:$12 sps:$4 sm:$0xff]  }
  0x35   : > { %v7115_v51 = vld [vmem:[%s7441_s26 + $0xc0] ss:$12 sps:$4 sm:$0xff]   ;;  %v7118_v52 = vld [vmem:[%s7441_s26 + $0xdc] ss:$12 sps:$4 sm:$0xff]   ;;  %v7120_v53 = vld [vmem:[%s7441_s26 + $0xd8] ss:$12 sps:$4 sm:$0xff]  }
  0x36   : > { %6698 = vmatpush3.bf16.msra.mxu0 %v7072_v9  ;;  %v7121_v54 = vld [vmem:[%s7441_s26 + $0xf4] ss:$12 sps:$4 sm:$0xff]   ;;  %v7123_v55 = vld [vmem:[%s7441_s26 + $0xf0] ss:$12 sps:$4 sm:$0xff]   ;;  %v7126_v56 = vld [vmem:[%s7441_s26 + $0x10c] ss:$12 sps:$4 sm:$0xff]   ;;  %v1440_v9 = vlaneseq }
  0x37   : > { %6699 = vmatprep.subr.bf16.mxu0 %v7073_v11  ;;  %v7128_v57 = vld [vmem:[%s7441_s26 + $0x108] ss:$12 sps:$4 sm:$0xff]   ;;  %v7129_v58 = vld [vmem:[%s7441_s26 + $0x124] ss:$12 sps:$4 sm:$0xff]   ;;  %v7131_v60 = vld [vmem:[%s7441_s26 + $0x120] ss:$12 sps:$4 sm:$0xff]  }
  0x38   : > { %v7134_v61 = vld [vmem:[%s7441_s26 + $0x13c] ss:$12 sps:$4 sm:$0xff]   ;;  %v7136_v62 = vld [vmem:[%s7441_s26 + $0x138] ss:$12 sps:$4 sm:$0xff]   ;;  %v7137_v63 = vld [vmem:[%s7441_s26 + $0x154] ss:$12 sps:$4 sm:$0xff]  }
  0x39   : > { %6893 = vmatmul.mubr.msk.bf16.gmra.mrb[4].mxu1 %vm1017_vm0, %v7093_v23  ;;  %v7139_v0 = vld [vmem:[%s7441_s26 + $0x150] ss:$12 sps:$4 sm:$0xff]   ;;  %v7142_v1 = vld [vmem:[%s7441_s26 + $0x16c] ss:$12 sps:$4 sm:$0xff]   ;;  %v7144_v2 = vld [vmem:[%s7441_s26 + $0x168] ss:$12 sps:$4 sm:$0xff]   ;;  %s10875_s26 = scalar_lea.hbm %s11094_s22, %s6686_s30 }
  0x3a   : > { %6700 = vmatpush3.bf16.msra.mxu0 %v7074_v12  ;;  %6896 = vmatprep.mubr.msk.bf16.mxu1 %vm1017_vm0, %v7100_v24  ;;  %v7540_v3 = vld [vmem:[%s10922_s5] sm:$0xff]   ;;  %v7547_v4 = vld [vmem:[%s10922_s5 + $0x8] sm:$0xff]   ;;  %v7554_v5 = vld [vmem:[%s10922_s5 + $0x10] sm:$0xff]   ;;  %v7574_v16 = vshrl.u32 %v1440_v9, 7 }
  0x3b   : > { %6701 = vmatprep.subr.bf16.mxu0 %v7075_v13  ;;  %6920 = vmatprep.subr.bf16.mxu1 %v7540_v3  ;;  %10998 = vst [vmem:[#allocation14_spill] sm:$0xff] %v7554_v5  ;;  %v7561_v6 = vld [vmem:[%s10922_s5 + $0x18] sm:$0xff]   ;;  %v1455_v10 = vld [vmem:[#allocation2] sm:$0xff]  ;;  %v1456_v13 = vld [vmem:[#allocation2 + $0x8] sm:$0xff] }
  0x3c   : > { %6921 = vmatpush3.bf16.msra.mxu1 %v7540_v3  ;;  %10999 = vst [vmem:[#allocation15_spill] sm:$0xff] %v7561_v6  ;;  %v7570_v14 = vunpack.c.l.bf16 %v1455_v10  ;;  %v7572_v15 = vunpack.c.h.bf16 %v1455_v10  ;;  %11000 = vst [vmem:[#allocation16_spill] sm:$0xff] %v7574_v16  ;;  %v7576_v17 = vunpack.c.l.bf16 %v1456_v13  ;;  %vm1443_vm2 = vcmp.ge.s32.totalorder %v7574_v16, 2 }
  0x3d   : > { %6922 = vmatprep.subr.bf16.mxu1 %v7547_v4  ;;  %vm1531_vm3 = vcmp.lt.s32.totalorder %v7574_v16, 2  ;;  %vm1616_vm5 = vcmp.lt.s32.totalorder %v7574_v16, 6  ;;  %vm3180_vm6 = vcmp.ge.s32.totalorder %v7574_v16, 4  ;;  %vm3268_vm8 = vcmp.lt.s32.totalorder %v7574_v16, 4 }
  0x3e   : > { %6702 = vmatpush3.bf16.msra.mxu0 %v7076_v18  ;;  %v7578_v18 = vunpack.c.h.bf16 %v1456_v13 }
  0x3f   : > { %6703 = vmatprep.subr.bf16.mxu0 %v7077_v19  ;;  %v7583_v19 = vld [vmem:[%s10919_s2] ss:$0 sm:$0xff] }
  0x40   : > { %6923 = vmatpush3.bf16.msra.mxu1 %v7547_v4 }
  0x41   : > { %6897 = vmatmul.mubr.msk.bf16.gmra.mrb[8].mxu1 %vm1017_vm0, %v7101_v27  ;;  %6924 = vmatprep.subr.bf16.mxu1 %v7554_v5  ;;  %v7596_v27 = vadd.s32 8, %v7574_v16 }
  0x42   : > { %6704 = vmatpush3.bf16.msra.mxu0 %v7079_v21  ;;  %6900 = vmatprep.mubr.msk.bf16.mxu1 %vm1017_vm0, %v7108_v28  ;;  %v1515_v21 = vrot.slane %v7570_v14, 6  ;;  %v1516_v28 = vrot.slane %v7576_v17, 6 }
  0x43   : > { %11001 = vst [vmem:[#allocation17_spill] sm:$0xff] %v7596_v27  ;;  %vm1450_vm4 = vcmp.lt.s32.totalorder %v7596_v27, 14 }
  0x44   : > { %6925 = vmatpush3.bf16.msra.mxu1 %v7554_v5 }
  0x45   : > { %1099 = vmatmul.mubr.bf16.vlgmr.msra.gmra.mrb[0].mxu0 %v7080_v22  ;;  %6926 = vmatprep.subr.bf16.mxu1 %v7561_v6  ;;  %v1523_v22 = vrot.slane %v7572_v15, 6 }
  0x46   : > { %1106 = vmatprep.mubr.bf16.mxu0 %v7086_v25 }
  0x48   : > { %6927 = vmatpush3.bf16.msra.mxu1 %v7561_v6 }
  0x49   : > { %6901 = vmatmul.mubr.msk.bf16.gmra.mrb[12].mxu1 %vm1017_vm0, %v7109_v31  ;;  %6944 = vmatprep.subr.bf16.mxu1 %v7540_v3 }
  0x4a   : > { %6904 = vmatprep.mubr.msk.bf16.mxu1 %vm1017_vm0, %v7116_v32 }
  0x4d   : > { %1107 = vmatmul.mubr.bf16.gmra.mrb[4].mxu0 %v7088_v26 }
  0x4e   : > { %1114 = vmatprep.mubr.bf16.mxu0 %v7089_v29  ;;  %v1524_v29 = vrot.slane %v7578_v18, 6 }
  0x51   : > { %6905 = vmatmul.mubr.msk.bf16.gmra.mrb[16].mxu1 %vm1017_vm0, %v7117_v35 }
  0x52   : > { %6908 = vmatprep.mubr.msk.bf16.mxu1 %vm1017_vm0, %v7124_v36  ;;  %v1540_v36 = vsel %vm1531_vm3, %v1523_v22, %v1515_v21 }
  0x55   : > { %1115 = vmatmul.mubr.bf16.gmra.mrb[8].mxu0 %v7091_v30 }
  0x56   : > { %1122 = vmatprep.mubr.bf16.mxu0 %v7094_v33 }
  0x59   : > { %6909 = vmatmul.mubr.msk.bf16.gmra.mrb[20].mxu1 %vm1017_vm0, %v7125_v38 }
  0x5a   : > { %6912 = vmatprep.mubr.msk.bf16.mxu1 %vm1017_vm0, %v7132_v40  ;;  %v1608_v40 = vrot.slane %v7572_v15, 2 }
  0x5d   : > { %1123 = vmatmul.mubr.bf16.gmra.mrb[12].mxu0 %v7096_v34  ;;  %v10943_v34 = vmov 0.0  }
  0x5e   : > { %1130 = vmatprep.mubr.bf16.mxu0 %v7097_v37  ;;  %v7603_v35 = vsel %vm1443_vm2, 1.0, %v10943_v34 }
  0x61   : > { %6913 = vmatmul.mubr.msk.bf16.gmra.mrb[24].mxu1 %vm1017_vm0, %v7133_v42 }
  0x62   : > { %6916 = vmatprep.mubr.msk.bf16.mxu1 %vm1017_vm0, %v7140_v44  ;;  %v7618_v44 = vld [vmem:[%s10920_s3 + $0x1] ss:$0 sm:$0xff] }
  0x63   : > { %v1484_v9 = vmul.f32 %v7618_v44, %v7572_v15  ;;  %v1485_v15 = vmul.f32 %v7618_v44, %v7576_v17 }
  0x65   : > { %1131 = vmatmul.mubr.bf16.gmra.mrb[16].mxu0 %v7099_v39  ;;  %v1600_v39 = vrot.slane %v7570_v14, 2 }
  0x66   : > { %1138 = vmatprep.mubr.bf16.mxu0 %v7102_v41  ;;  %v1541_v41 = vsel %vm1531_vm3, %v1524_v29, %v1516_v28 }
  0x69   : > { %6917 = vmatmul.mubr.msk.bf16.gmra.mrb[28].mxu1 %vm1017_vm0, %v7141_v46  ;;  %v1609_v46 = vrot.slane %v7578_v18, 2 }
  0x6d   : > { %1139 = vmatmul.mubr.bf16.gmra.mrb[20].mxu0 %v7104_v43 }
  0x6e   : > { %1146 = vmatprep.mubr.bf16.mxu0 %v7105_v45  ;;  %v1601_v45 = vrot.slane %v7576_v17, 2 }
  0x75   : > { %1147 = vmatmul.mubr.bf16.gmra.mrb[24].mxu0 %v7107_v47 }
  0x76   : > { %1154 = vmatprep.mubr.bf16.mxu0 %v7110_v48  ;;  %v1548_v48 = vmul.f32 %v7603_v35, %v1540_v36  ;;  %v1618_v36 = vsel %vm1616_vm5, %v1601_v45, %v1609_v46 }
  0x7d   : > { %1155 = vmatmul.mubr.bf16.gmra.mrb[28].mxu0 %v7112_v49 }
  0x7e   : > { %1162 = vmatprep.mubr.bf16.mxu0 %v7113_v50 }
  0x85   : > { %1163 = vmatmul.mubr.bf16.gmra.mrb[32].mxu0 %v7115_v51 }
  0x86   : > { %1170 = vmatprep.mubr.bf16.mxu0 %v7118_v52  ;;  %v7630_v52 = vld [vmem:[%s10920_s3] ss:$0 sm:$0xff] }
  0x87   : > { %v1568_v10 = vmul.f32 %v7630_v52, %v1548_v48 }
  0x8d   : > { %1171 = vmatmul.mubr.bf16.gmra.mrb[36].mxu0 %v7120_v53  ;;  %v7633_v53 = vsel %vm1450_vm4, 1.0, %v10943_v34  ;;  %vm6380_vm4 = vcmask 326656  }
  0x8e   : > { %1178 = vmatprep.mubr.bf16.mxu0 %v7121_v54  ;;  %v1532_v54 = vsel %vm1531_vm3, %v1515_v21, %v1523_v22  ;;  %v7660_v22 = vld [vmem:[%s10920_s3 + $0x2] ss:$0 sm:$0xff] }
  0x95   : > { %1179 = vmatmul.mubr.bf16.gmra.mrb[40].mxu0 %v7123_v55  ;;  %v1625_v55 = vsel %vm1616_vm5, %v1608_v40, %v1600_v39 }
  0x96   : > { %1186 = vmatprep.mubr.bf16.mxu0 %v7126_v56  ;;  %v1634_v13 = vmul.f32 %v7633_v53, %v1625_v55 }
  0x9d   : > { %1187 = vmatmul.mubr.bf16.gmra.mrb[44].mxu0 %v7128_v57 }
  0x9e   : > { %1194 = vmatprep.mubr.bf16.mxu0 %v7129_v58  ;;  %v1483_v58 = vmul.f32 %v7618_v44, %v7570_v14 }
  0xa5   : > { %1195 = vmatmul.mubr.bf16.gmra.mrb[48].mxu0 %v7131_v60  ;;  %v1550_v60 = vmul.f32 %v7603_v35, %v1541_v41 }
  0xa6   : > { %1202 = vmatprep.mubr.bf16.mxu0 %v7134_v61 }
  0xad   : > { %1203 = vmatmul.mubr.bf16.gmra.mrb[52].mxu0 %v7136_v62 }
  0xae   : > { %1210 = vmatprep.mubr.bf16.mxu0 %v7137_v63 }
  0xb5   : > { %1211 = vmatmul.mubr.bf16.gmra.mrb[56].mxu0 %v7139_v0 }
  0xb6   : > { %1218 = vmatprep.mubr.bf16.mxu0 %v7142_v1  ;;  %v1533_v1 = vsel %vm1531_vm3, %v1516_v28, %v1524_v29  ;;  %v1570_v28 = vmul.f32 %v7630_v52, %v1550_v60 }
  0xb7   : > { %v1571_v29 = vmul.f32 %v7630_v52, %v1533_v1 }
  0xb8   : > { %v1586_v48 = vadd.f32 %v1570_v28, %v1485_v15 }
  0xbd   : > { %1219 = vmatmul.mubr.bf16.gmra.mrb[60].mxu0 %v7144_v2  ;;  %v1626_v2 = vsel %vm1616_vm5, %v1609_v46, %v1601_v45  ;;  %v1655_v45 = vmul.f32 %v7660_v22, %v1618_v36 }
  0xbe   : > { %4657 = vmatprep.mubr.bf16.mxu0 %v10945_v59 }
 0x104   : > { %v7566_v7 = vpop.f32.mrb[0].mxu1 }
 0x105   : > { %v1261_v8 = vpop.f32.mrb[1].mxu1 }
 0x106   : > { %v7568_v11 = vpop.f32.mrb[2].mxu1 }
 0x107   : > { %v1264_v12 = vpop.f32.mrb[3].mxu1 }
 0x10c   : > { %v7585_v20 = vpop.f32.mrb[4].mxu1 }
 0x10d   : > { %v7589_v24 = vpop.f32.mrb[5].mxu1 }
 0x10e   : > { %v7593_v26 = vpop.f32.mrb[6].mxu1 }
 0x10f   : > { %v7600_v32 = vpop.f32.mrb[7].mxu1 }
 0x114   : > { %v7622_v47 = vpop.f32.mrb[8].mxu1 }
 0x115   : > { %v7625_v51 = vpop.f32.mrb[9].mxu1 }
 0x116   : > { %v7639_v57 = vpop.f32.mrb[10].mxu1 }
 0x117   : > { %v7644_v0 = vpop.f32.mrb[11].mxu1 }
 0x118   : > { %v6705_v23 = vpop.f32.mrb[0].mxu0 }
 0x119   : > { %v6706_v25 = vpop.f32.mrb[1].mxu0 }
 0x11a   : > { %v6707_v30 = vadd.f32 %v6706_v25, %v6705_v23  ;;  %v6708_v31 = vpop.f32.mrb[2].mxu0  ;;  %v1617_v23 = vsel %vm1616_vm5, %v1600_v39, %v1608_v40  ;;  %v1486_v25 = vmul.f32 %v7618_v44, %v7578_v18  ;;  %v1654_v18 = vmul.f32 %v7660_v22, %v1634_v13 }
 0x11b   : > { %v6709_v33 = vpop.f32.mrb[3].mxu0  ;;  %v1653_v39 = vmul.f32 %v7660_v22, %v1617_v23 }
 0x11c   : > { %v6710_v37 = vadd.f32 %v6709_v33, %v6708_v31  ;;  %v1101_v38 = vadd.f32 %v6707_v30, %v7583_v19  ;;  %v1636_v30 = vmul.f32 %v7633_v53, %v1626_v2 }
 0x11e   : > { %v1262_v42 = vadd.f32 %v1261_v8, %v1101_v38  ;;  %v1104_v43 = vadd.f32 %v6710_v37, %v7583_v19  ;;  %v7675_v37 = vpop.f32.mrb[12].mxu1  ;;  %v1584_v38 = vadd.f32 %v1568_v10, %v1483_v58  ;;  %v1656_v46 = vmul.f32 %v7660_v22, %v1636_v30 }
 0x120   : > { %v1265_v49 = vadd.f32 %v1264_v12, %v1104_v43  ;;  %v6711_v50 = vpop.f32.mrb[4].mxu0  ;;  %v1569_v12 = vmul.f32 %v7630_v52, %v1532_v54  ;;  %v1669_v60 = vadd.f32 %v1653_v39, %v1584_v38 }
 0x121   : > { %v6712_v56 = vpop.f32.mrb[5].mxu0 }
 0x122   : > { %v1388_v61 = vpack.c.bf16 %v1265_v49, %v1262_v42  ;;  %v6713_v62 = vadd.f32 %v6712_v56, %v6711_v50  ;;  %v6714_v63 = vpop.f32.mrb[6].mxu0  ;;  %v1585_v17 = vadd.f32 %v1569_v12, %v1484_v9  ;;  %v7680_v42 = vpop.f32.mrb[13].mxu1  ;;  %v1587_v49 = vadd.f32 %v1571_v29, %v1486_v25 }
 0x123   : > { %v6715_v8 = vpop.f32.mrb[7].mxu0  ;;  %v1671_v9 = vadd.f32 %v1655_v45, %v1586_v48 }
 0x124   : > { %1405 = vst.msk [vmem:[#allocation2 + $0x10] sm:$0xff] %vm547_vm1, %v1388_v61  ;;  %v1109_v14 = vadd.f32 %v6713_v62, %v7583_v19  ;;  %v6716_v21 = vadd.f32 %v6715_v8, %v6714_v63  ;;  %v1670_v61 = vadd.f32 %v1654_v18, %v1585_v17  ;;  %v1672_v10 = vadd.f32 %v1656_v46, %v1587_v49 }
 0x126   : > { %v1270_v31 = vadd.f32 %v7566_v7, %v1109_v14  ;;  %v1112_v33 = vadd.f32 %v6716_v21, %v7583_v19  ;;  %v7682_v7 = vpop.f32.mrb[14].mxu1  ;;  %v7700_v14 = vld [vmem:[%s10920_s3 + $0x3] ss:$0 sm:$0xff] }
 0x127   : > { %v7686_v56 = vpop.f32.mrb[15].mxu1 }
 0x128   : > { %v1273_v40 = vadd.f32 %v7568_v11, %v1112_v33  ;;  %v6717_v41 = vpop.f32.mrb[8].mxu0  ;;  %v7691_v11 = vld [vmem:[%s10920_s3 + $0x4] ss:$0 sm:$0xff]  ;;  %v7704_v30 = vpop.f32.mrb[16].mxu1  ;;  %v7710_v33 = vld [vmem:[%s10920_s3 + $0x5] ss:$0 sm:$0xff] }
 0x129   : > { %v6718_v43 = vpop.f32.mrb[9].mxu0  ;;  %11002 = vst [vmem:[#allocation18_spill] sm:$0xff] %v7704_v30  ;;  %v7712_v17 = vpop.f32.mrb[17].mxu1 }
 0x12a   : > { %v1389_v50 = vpack.c.bf16 %v1273_v40, %v1270_v31  ;;  %v6719_v54 = vadd.f32 %v6718_v43, %v6717_v41  ;;  %v6720_v55 = vpop.f32.mrb[10].mxu0  ;;  %v7725_v48 = vpop.f32.mrb[18].mxu1 }
 0x12b   : > { %v6721_v58 = vpop.f32.mrb[11].mxu0  ;;  %v1685_v62 = vld [vmem:[#allocation2 + $0x10] sm:$0xff]  ;;  %11003 = vst [vmem:[#allocation19_spill] sm:$0xff] %v7725_v48 }
 0x12c   : > { %1406 = vst.msk [vmem:[#allocation2 + $0x18] sm:$0xff] %vm547_vm1, %v1389_v50  ;;  %v6722_v63 = vadd.f32 %v6721_v58, %v6720_v55  ;;  %v1117_v1 = vadd.f32 %v6719_v54, %v7583_v19  ;;  %v1693_v2 = vunpack.c.l.bf16 %v1685_v62  ;;  %v1694_v8 = vunpack.c.h.bf16 %v1685_v62  ;;  %v7729_v55 = vpop.f32.mrb[19].mxu1 }
 0x12d   : > { %11004 = vst [vmem:[#allocation20_spill] sm:$0xff] %v7729_v55 }
 0x12e   : > { %v1278_v12 = vadd.f32 %v7589_v24, %v1117_v1  ;;  %v1120_v13 = vadd.f32 %v6722_v63, %v7583_v19  ;;  %v1713_v21 = vmul.f32 %v7691_v11, %v1693_v2  ;;  %v1714_v23 = vmul.f32 %v7691_v11, %v1694_v8 }
 0x12f   : > { %v1745_v15 = vrot.slane %v1693_v2, 6  ;;  %v1753_v25 = vrot.slane %v1694_v8, 6  ;;  %v1829_v28 = vrot.slane %v1693_v2, 2  ;;  %v1837_v29 = vrot.slane %v1694_v8, 2 }
 0x130   : > { %v1281_v31 = vadd.f32 %v7600_v32, %v1120_v13  ;;  %v6723_v24 = vpop.f32.mrb[12].mxu0  ;;  %v1729_v36 = vadd.f32 %v1713_v21, %v1669_v60  ;;  %v1730_v38 = vadd.f32 %v1714_v23, %v1670_v61  ;;  %v1487_v39 = vmul.f32 %v7618_v44, %v1693_v2 }
 0x131   : > { %v6724_v18 = vpop.f32.mrb[13].mxu0  ;;  %v1761_v40 = vsel %vm1531_vm3, %v1745_v15, %v1753_v25  ;;  %v1769_v41 = vsel %vm1531_vm3, %v1753_v25, %v1745_v15  ;;  %v7721_v32 = vsel %vm1616_vm5, %v1829_v28, %v1837_v29  ;;  %v1853_v43 = vsel %vm1616_vm5, %v1837_v29, %v1829_v28 }
 0x132   : > { %v1390_v49 = vpack.c.bf16 %v1281_v31, %v1278_v12  ;;  %v6725_v45 = vadd.f32 %v6724_v18, %v6723_v24  ;;  %v6726_v46 = vpop.f32.mrb[14].mxu0  ;;  %v1777_v50 = vmul.f32 %v7603_v35, %v1769_v41  ;;  %v1798_v54 = vmul.f32 %v7700_v14, %v1761_v40 }
 0x133   : > { %v6727_v58 = vpop.f32.mrb[15].mxu0  ;;  %v7732_v60 = vmul.f32 %v7633_v53, %v1853_v43  ;;  %v1881_v61 = vmul.f32 %v7710_v33, %v7721_v32  ;;  %v1686_v62 = vld [vmem:[#allocation2 + $0x18] sm:$0xff]  ;;  %v1488_v63 = vmul.f32 %v7618_v44, %v1694_v8  ;;  %v1573_v1 = vmul.f32 %v7630_v52, %v1761_v40  ;;  %v7757_v43 = vpop.f32.mrb[20].mxu1 }
 0x134   : > { %1407 = vst.msk [vmem:[#allocation2 + $0x20] sm:$0xff] %vm547_vm1, %v1390_v49  ;;  %v1125_v2 = vadd.f32 %v6725_v45, %v7583_v19  ;;  %v6728_v12 = vadd.f32 %v6727_v58, %v6726_v46  ;;  %v1797_v13 = vmul.f32 %v7700_v14, %v1777_v50  ;;  %v1814_v21 = vadd.f32 %v1798_v54, %v1730_v38 }
 0x135   : > { %v1882_v23 = vmul.f32 %v7710_v33, %v7732_v60  ;;  %v7743_v15 = vunpack.c.l.bf16 %v1686_v62  ;;  %v7745_v25 = vunpack.c.h.bf16 %v1686_v62  ;;  %v1572_v28 = vmul.f32 %v7630_v52, %v1777_v50  ;;  %11005 = vst [vmem:[#allocation21_spill] sm:$0xff] %v7757_v43  ;;  %v7762_v50 = vpop.f32.mrb[21].mxu1 }
 0x136   : > { %v1286_v8 = vadd.f32 %v7585_v20, %v1125_v2  ;;  %v1128_v29 = vadd.f32 %v6728_v12, %v7583_v19  ;;  %v1813_v31 = vadd.f32 %v1797_v13, %v1729_v36  ;;  %v7750_v24 = vadd.f32 %v1573_v1, %v1488_v63  ;;  %11006 = vst [vmem:[#allocation22_spill] sm:$0xff] %v7762_v50  ;;  %v7767_v2 = vpop.f32.mrb[22].mxu1 }
 0x137   : > { %v1898_v18 = vadd.f32 %v1882_v23, %v1814_v21  ;;  %v1715_v38 = vmul.f32 %v7691_v11, %v7743_v15  ;;  %v1716_v40 = vmul.f32 %v7691_v11, %v7745_v25  ;;  %v1746_v41 = vrot.slane %v7743_v15, 6  ;;  %11007 = vst [vmem:[#allocation23_spill] sm:$0xff] %v7767_v2  ;;  %v7775_v23 = vpop.f32.mrb[23].mxu1 }
 0x138   : > { %v1289_v49 = vadd.f32 %v7593_v26, %v1128_v29  ;;  %v6729_v45 = vpop.f32.mrb[16].mxu0  ;;  %v1897_v20 = vadd.f32 %v1881_v61, %v1813_v31  ;;  %v1754_v46 = vrot.slane %v7745_v25, 6  ;;  %v1830_v36 = vrot.slane %v7743_v15, 2  ;;  %11008 = vst [vmem:[#allocation24_spill] sm:$0xff] %v7775_v23 }
 0x139   : > { %v6730_v54 = vpop.f32.mrb[17].mxu0  ;;  %v1731_v58 = vadd.f32 %v1715_v38, %v1671_v9  ;;  %v1732_v62 = vadd.f32 %v1716_v40, %v1672_v10  ;;  %v1838_v63 = vrot.slane %v7745_v25, 2  ;;  %v7765_v1 = vadd.f32 %v1572_v28, %v1487_v39  ;;  %v7780_v10 = vld [vmem:[%s10920_s3 + $0x7] ss:$0 sm:$0xff] }
 0x13a   : > { %v1391_v12 = vpack.c.bf16 %v1289_v49, %v1286_v8  ;;  %v6731_v13 = vadd.f32 %v6730_v54, %v6729_v45  ;;  %v6732_v26 = vpop.f32.mrb[18].mxu0  ;;  %v7771_v61 = vsel %vm1531_vm3, %v1746_v41, %v1754_v46  ;;  %v1770_v21 = vsel %vm1531_vm3, %v1754_v46, %v1746_v41 }
 0x13b   : > { %v6733_v9 = vpop.f32.mrb[19].mxu0  ;;  %v1914_v39 = vld [vmem:[#allocation2 + $0x20] sm:$0xff]  ;;  %v7783_v28 = vmul.f32 %v7603_v35, %v1770_v21  ;;  %v1800_v8 = vmul.f32 %v7700_v14, %v7771_v61  ;;  %v7789_v29 = vsel %vm1616_vm5, %v1830_v36, %v1838_v63  ;;  %v1854_v31 = vsel %vm1616_vm5, %v1838_v63, %v1830_v36 }
 0x13c   : > { %1408 = vst.msk [vmem:[#allocation2 + $0x28] sm:$0xff] %vm547_vm1, %v1391_v12  ;;  %v6734_v38 = vadd.f32 %v6733_v9, %v6732_v26  ;;  %v1133_v40 = vadd.f32 %v6731_v13, %v7583_v19  ;;  %v7795_v41 = vunpack.c.l.bf16 %v1914_v39  ;;  %v7797_v49 = vunpack.c.h.bf16 %v1914_v39  ;;  %v7811_v12 = vld [vmem:[%s10920_s3 + $0x6] ss:$0 sm:$0xff] }
 0x13d   : > { %v1799_v45 = vmul.f32 %v7700_v14, %v7783_v28  ;;  %v1816_v46 = vadd.f32 %v1800_v8, %v1732_v62  ;;  %v7802_v54 = vmul.f32 %v7633_v53, %v1854_v31  ;;  %v1883_v21 = vmul.f32 %v7710_v33, %v7789_v29  ;;  %v7821_v8 = vpop.f32.mrb[24].mxu1 }
 0x13e   : > { %v1294_v36 = vadd.f32 %v7625_v51, %v1133_v40  ;;  %v1136_v63 = vadd.f32 %v6734_v38, %v7583_v19  ;;  %v1942_v13 = vmul.f32 %v7780_v10, %v7795_v41  ;;  %v1943_v62 = vmul.f32 %v7780_v10, %v7797_v49  ;;  %11009 = vst [vmem:[#allocation25_spill] sm:$0xff] %v7821_v8  ;;  %v7827_v40 = vld [vmem:[%s10920_s3 + $0x8] ss:$0 sm:$0xff]  ;;  %v7829_v2 = vpop.f32.mrb[25].mxu1 }
 0x13f   : > { %v1974_v26 = vrot.slane %v7795_v41, 6  ;;  %v1982_v9 = vrot.slane %v7797_v49, 6  ;;  %v2058_v39 = vrot.slane %v7795_v41, 2  ;;  %v2066_v51 = vrot.slane %v7797_v49, 2  ;;  %11010 = vst [vmem:[#allocation26_spill] sm:$0xff] %v7829_v2 }
 0x140   : > { %v1297_v31 = vadd.f32 %v7644_v0, %v1136_v63  ;;  %v6735_v38 = vpop.f32.mrb[20].mxu0  ;;  %v1958_v34 = vadd.f32 %v1942_v13, %v1897_v20  ;;  %v1959_v59 = vadd.f32 %v1943_v62, %v1898_v18  ;;  %v1815_v27 = vadd.f32 %v1799_v45, %v1731_v58  ;;  %v7843_v20 = vpop.f32.mrb[26].mxu1 }
 0x141   : > { %v6736_v43 = vpop.f32.mrb[21].mxu0  ;;  %v7833_v23 = vsel %vm1531_vm3, %v1974_v26, %v1982_v9  ;;  %v1998_v8 = vsel %vm1531_vm3, %v1982_v9, %v1974_v26  ;;  %v7839_v0 = vsel %vm1616_vm5, %v2058_v39, %v2066_v51  ;;  %v2082_v63 = vsel %vm1616_vm5, %v2066_v51, %v2058_v39  ;;  %11012 = vst [vmem:[#allocation28_spill] sm:$0xff] %v7843_v20  ;;  %v7850_v2 = vpop.f32.mrb[27].mxu1 }
 0x142   : > { %11011 = vst [vmem:[#allocation27_spill] sm:$0xff] %v7833_v23  ;;  %v1392_v18 = vpack.c.bf16 %v1297_v31, %v1294_v36  ;;  %v6737_v58 = vadd.f32 %v6736_v43, %v6735_v38  ;;  %v6738_v45 = vpop.f32.mrb[22].mxu0  ;;  %v7846_v13 = vmul.f32 %v7603_v35, %v1998_v8  ;;  %v2027_v62 = vmul.f32 %v7811_v12, %v7833_v23 }
 0x143   : > { %11014 = vst [vmem:[#allocation30_spill] sm:$0xff] %v7850_v2  ;;  %v6739_v26 = vpop.f32.mrb[23].mxu0  ;;  %v7853_v9 = vmul.f32 %v7633_v53, %v2082_v63  ;;  %v2110_v39 = vmul.f32 %v7827_v40, %v7839_v0  ;;  %v1884_v36 = vmul.f32 %v7710_v33, %v7802_v54  ;;  %v1899_v43 = vadd.f32 %v1883_v21, %v1815_v27  ;;  %v1915_v51 = vld [vmem:[#allocation2 + $0x28] sm:$0xff] }
 0x144   : > { %11013 = vst [vmem:[#allocation29_spill] sm:$0xff] %v7846_v13  ;;  %1409 = vst.msk [vmem:[#allocation2 + $0x30] sm:$0xff] %vm547_vm1, %v1392_v18  ;;  %v1141_v8 = vadd.f32 %v6737_v58, %v7583_v19  ;;  %v6740_v31 = vadd.f32 %v6739_v26, %v6738_v45  ;;  %v2026_v38 = vmul.f32 %v7811_v12, %v7846_v13  ;;  %v7865_v50 = vunpack.c.l.bf16 %v1915_v51  ;;  %v7874_v18 = vld [vmem:[%s10921_s4] ss:$0 sm:$0xff]  ;;  %v7883_v26 = vpop.f32.mrb[28].mxu1 }
 0x145   : > { %v2043_v20 = vadd.f32 %v2027_v62, %v1959_v59  ;;  %v2111_v63 = vmul.f32 %v7827_v40, %v7853_v9  ;;  %v1900_v2 = vadd.f32 %v1884_v36, %v1816_v46  ;;  %v7867_v48 = vunpack.c.h.bf16 %v1915_v51  ;;  %11015 = vst [vmem:[#allocation31_spill] sm:$0xff] %v7883_v26 }
 0x146   : > { %v1302_v27 = vadd.f32 %v7622_v47, %v1141_v8  ;;  %v1144_v21 = vadd.f32 %v6740_v31, %v7583_v19  ;;  %v2042_v58 = vadd.f32 %v2026_v38, %v1958_v34  ;;  %v1657_v59 = vmul.f32 %v7660_v22, %v7721_v32  ;;  %v7888_v32 = vpop.f32.mrb[29].mxu1 }
 0x147   : > { %v2127_v45 = vadd.f32 %v2111_v63, %v2043_v20  ;;  %v1944_v46 = vmul.f32 %v7780_v10, %v7865_v50  ;;  %v1945_v62 = vmul.f32 %v7780_v10, %v7867_v48  ;;  %v1975_v47 = vrot.slane %v7865_v50, 6  ;;  %11016 = vst [vmem:[#allocation32_spill] sm:$0xff] %v7888_v32  ;;  %v7892_v55 = vpop.f32.mrb[30].mxu1 }
 0x148   : > { %v1305_v36 = vadd.f32 %v7639_v57, %v1144_v21  ;;  %v6741_v51 = vpop.f32.mrb[24].mxu0  ;;  %v2126_v8 = vadd.f32 %v2110_v39, %v2042_v58  ;;  %v1983_v34 = vrot.slane %v7867_v48, 6  ;;  %v2059_v31 = vrot.slane %v7865_v50, 2  ;;  %11017 = vst [vmem:[#allocation33_spill] sm:$0xff] %v7892_v55  ;;  %v7899_v58 = vpop.f32.mrb[31].mxu1 }
 0x149   : > { %v6742_v20 = vpop.f32.mrb[25].mxu0  ;;  %v2149_v38 = vadd.f32 %v7874_v18, %v2127_v45  ;;  %v1960_v63 = vadd.f32 %v1944_v46, %v1899_v43  ;;  %v1961_v30 = vadd.f32 %v1945_v62, %v1900_v2  ;;  %v2067_v6 = vrot.slane %v7867_v48, 2  ;;  %11018 = vst [vmem:[#allocation34_spill] sm:$0xff] %v7899_v58 }
 0x14a   : > { %v1393_v26 = vpack.c.bf16 %v1305_v36, %v1302_v27  ;;  %v6743_v5 = vadd.f32 %v6742_v20, %v6741_v51  ;;  %v6744_v57 = vpop.f32.mrb[26].mxu0  ;;  %v2148_v39 = vadd.f32 %v7874_v18, %v2126_v8  ;;  %v7897_v21 = vsel %vm1531_vm3, %v1975_v47, %v1983_v34 }
 0x14b   : > { %v6745_v32 = vpop.f32.mrb[27].mxu0  ;;  %v1999_v43 = vsel %vm1531_vm3, %v1983_v34, %v1975_v47  ;;  %v2029_v2 = vmul.f32 %v7811_v12, %v7897_v21  ;;  %v7907_v27 = vsel %vm1616_vm5, %v2059_v31, %v2067_v6  ;;  %v2083_v45 = vsel %vm1616_vm5, %v2067_v6, %v2059_v31 }
 0x14c   : > { %1410 = vst.msk [vmem:[#allocation2 + $0x38] sm:$0xff] %vm547_vm1, %v1393_v26  ;;  %v6746_v46 = vadd.f32 %v6745_v32, %v6744_v57  ;;  %v1149_v62 = vadd.f32 %v6743_v5, %v7583_v19  ;;  %v2164_v36 = vpack.c.bf16 %v2149_v38, %v2148_v39  ;;  %v7914_v51 = vmul.f32 %v7603_v35, %v1999_v43 }
 0x14d   : > { %v2045_v47 = vadd.f32 %v2029_v2, %v1961_v30  ;;  %v7917_v8 = vmul.f32 %v7633_v53, %v2083_v45  ;;  %v2112_v34 = vmul.f32 %v7827_v40, %v7907_v27  ;;  %v1658_v20 = vmul.f32 %v7660_v22, %v7732_v60 }
 0x14e   : > { %v1310_v6 = vadd.f32 %v7680_v42, %v1149_v62  ;;  %6928 = vmatprep.mubr.msk.bf16.mxu1 %vm547_vm1, %v2164_v36  ;;  %v1152_v5 = vadd.f32 %v6746_v46, %v7583_v19  ;;  %v2028_v26 = vmul.f32 %v7811_v12, %v7914_v51  ;;  %v1673_v30 = vadd.f32 %v1657_v59, %v7765_v1  ;;  %v1916_v59 = vld [vmem:[#allocation2 + $0x30] sm:$0xff] }
 0x14f   : > { %v2113_v31 = vmul.f32 %v7827_v40, %v7917_v8  ;;  %v1674_v32 = vadd.f32 %v1658_v20, %v7750_v24  ;;  %v1717_v38 = vmul.f32 %v7691_v11, %v7795_v41  ;;  %v1718_v42 = vmul.f32 %v7691_v11, %v7797_v49 }
 0x150   : > { %v1313_v60 = vadd.f32 %v7686_v56, %v1152_v5  ;;  %v6747_v57 = vpop.f32.mrb[28].mxu0  ;;  %v2044_v39 = vadd.f32 %v2028_v26, %v1960_v63  ;;  %v1801_v43 = vmul.f32 %v7700_v14, %v7846_v13  ;;  %v1802_v1 = vmul.f32 %v7700_v14, %v7833_v23 }
 0x151   : > { %v6748_v2 = vpop.f32.mrb[29].mxu0  ;;  %v2129_v45 = vadd.f32 %v2113_v31, %v2045_v47  ;;  %v1733_v24 = vadd.f32 %v1717_v38, %v1673_v30  ;;  %v1734_v46 = vadd.f32 %v1718_v42, %v1674_v32  ;;  %v1885_v62 = vmul.f32 %v7710_v33, %v7839_v0 }
 0x152   : > { %v1394_v36 = vpack.c.bf16 %v1313_v60, %v1310_v6  ;;  %v6749_v20 = vadd.f32 %v6748_v2, %v6747_v57  ;;  %v6750_v55 = vpop.f32.mrb[30].mxu0  ;;  %v2128_v56 = vadd.f32 %v2112_v34, %v2044_v39  ;;  %v1886_v63 = vmul.f32 %v7710_v33, %v7853_v9 }
 0x153   : > { %v6751_v5 = vpop.f32.mrb[31].mxu0  ;;  %v2151_v26 = vadd.f32 %v7874_v18, %v2129_v45  ;;  %v1817_v58 = vadd.f32 %v1801_v43, %v1733_v24  ;;  %v1818_v23 = vadd.f32 %v1802_v1, %v1734_v46  ;;  %v7946_v13 = vunpack.c.l.bf16 %v1916_v59 }
 0x154   : > { %1411 = vst.msk [vmem:[#allocation2 + $0x40] sm:$0xff] %vm547_vm1, %v1394_v36  ;;  %v1157_v47 = vadd.f32 %v6749_v20, %v7583_v19  ;;  %v6752_v30 = vadd.f32 %v6751_v5, %v6750_v55  ;;  %v2150_v6 = vadd.f32 %v7874_v18, %v2128_v56  ;;  %v7951_v31 = vunpack.c.h.bf16 %v1916_v59 }
 0x155   : > { %v1901_v34 = vadd.f32 %v1885_v62, %v1817_v58  ;;  %v1902_v32 = vadd.f32 %v1886_v63, %v1818_v23  ;;  %v1946_v38 = vmul.f32 %v7780_v10, %v7946_v13  ;;  %v1976_v42 = vrot.slane %v7946_v13, 6 }
 0x156   : > { %v1318_v60 = vadd.f32 %v7675_v37, %v1157_v47  ;;  %v1160_v57 = vadd.f32 %v6752_v30, %v7583_v19  ;;  %v2165_v39 = vpack.c.bf16 %v2151_v26, %v2150_v6  ;;  %v1947_v43 = vmul.f32 %v7780_v10, %v7951_v31 }
 0x157   : > { %v1962_v55 = vadd.f32 %v1946_v38, %v1901_v34  ;;  %v1984_v1 = vrot.slane %v7951_v31, 6  ;;  %v2060_v59 = vrot.slane %v7946_v13, 2  ;;  %v2068_v23 = vrot.slane %v7951_v31, 2 }
 0x158   : > { %v1321_v58 = vadd.f32 %v7682_v7, %v1160_v57  ;;  %6929 = vmatmul.mubr.msk.bf16.vlgmr.msra.gmra.mrb[32].mxu1 %vm547_vm1, %v2165_v39  ;;  %v6753_v2 = vpop.f32.mrb[32].mxu0  ;;  %v1963_v45 = vadd.f32 %v1947_v43, %v1902_v32  ;;  %v1489_v37 = vmul.f32 %v7618_v44, %v7743_v15  ;;  %v1490_v24 = vmul.f32 %v7618_v44, %v7745_v25 }
 0x159   : > { %v6754_v46 = vpop.f32.mrb[33].mxu0  ;;  %v7971_v62 = vsel %vm1531_vm3, %v1976_v42, %v1984_v1  ;;  %v2000_v36 = vsel %vm1531_vm3, %v1984_v1, %v1976_v42  ;;  %v7977_v7 = vsel %vm1616_vm5, %v2060_v59, %v2068_v23  ;;  %v2084_v20 = vsel %vm1616_vm5, %v2068_v23, %v2060_v59  ;;  %6945 = vmatpush3.bf16.msra.mxu1 %v7540_v3  ;;  %v11019_v23 = vld [vmem:[#allocation14_spill] sm:$0xff] }
 0x15a   : > { %v1395_v15 = vpack.c.bf16 %v1321_v58, %v1318_v60  ;;  %v6755_v56 = vadd.f32 %v6754_v46, %v6753_v2  ;;  %v6756_v25 = vpop.f32.mrb[34].mxu0  ;;  %v7983_v63 = vmul.f32 %v7603_v35, %v2000_v36  ;;  %v2031_v5 = vmul.f32 %v7811_v12, %v7971_v62  ;;  %6946 = vmatprep.subr.bf16.mxu1 %v7547_v4  ;;  %v1917_v36 = vld [vmem:[#allocation2 + $0x38] sm:$0xff] }
 0x15b   : > { %v6757_v26 = vpop.f32.mrb[35].mxu0  ;;  %v7989_v47 = vmul.f32 %v7633_v53, %v2084_v20  ;;  %v2114_v30 = vmul.f32 %v7827_v40, %v7977_v7  ;;  %v1574_v3 = vmul.f32 %v7630_v52, %v7783_v28  ;;  %v1575_v6 = vmul.f32 %v7630_v52, %v7771_v61 }
 0x15c   : > { %1412 = vst.msk [vmem:[#allocation2 + $0x48] sm:$0xff] %vm547_vm1, %v1395_v15  ;;  %v6758_v34 = vadd.f32 %v6757_v26, %v6756_v25  ;;  %v1165_v32 = vadd.f32 %v6755_v56, %v7583_v19  ;;  %v2030_v38 = vmul.f32 %v7811_v12, %v7983_v63  ;;  %v2047_v42 = vadd.f32 %v2031_v5, %v1963_v45 }
 0x15d   : > { %v2115_v60 = vmul.f32 %v7827_v40, %v7989_v47  ;;  %v1590_v57 = vadd.f32 %v1574_v3, %v1489_v37  ;;  %v1591_v39 = vadd.f32 %v1575_v6, %v1490_v24  ;;  %v1659_v28 = vmul.f32 %v7660_v22, %v7789_v29  ;;  %6947 = vmatpush3.bf16.msra.mxu1 %v7547_v4  ;;  %v11020_v4 = vld [vmem:[#allocation20_spill] sm:$0xff] }
 0x15e   : > { %v1326_v61 = vadd.f32 %v7712_v17, %v1165_v32  ;;  %v2046_v43 = vadd.f32 %v2030_v38, %v1962_v55  ;;  %v1168_v1 = vadd.f32 %v6758_v34, %v7583_v19  ;;  %v1660_v59 = vmul.f32 %v7660_v22, %v7802_v54  ;;  %6948 = vmatprep.subr.bf16.mxu1 %v11019_v23  ;;  %v11021_v34 = vld [vmem:[#allocation15_spill] sm:$0xff] }
 0x15f   : > { %v2131_v58 = vadd.f32 %v2115_v60, %v2047_v42  ;;  %v1675_v2 = vadd.f32 %v1659_v28, %v1590_v57  ;;  %v1719_v45 = vmul.f32 %v7691_v11, %v7865_v50  ;;  %v1720_v29 = vmul.f32 %v7691_v11, %v7867_v48 }
 0x160   : > { %v2130_v37 = vadd.f32 %v2114_v30, %v2046_v43  ;;  %v1329_v24 = vadd.f32 %v11020_v4, %v1168_v1  ;;  %v6759_v17 = vpop.f32.mrb[36].mxu0  ;;  %v1676_v55 = vadd.f32 %v1660_v59, %v1591_v39  ;;  %v1803_v46 = vmul.f32 %v7700_v14, %v7914_v51 }
 0x161   : > { %v2153_v54 = vadd.f32 %v7874_v18, %v2131_v58  ;;  %v6760_v20 = vpop.f32.mrb[37].mxu0  ;;  %v1735_v15 = vadd.f32 %v1719_v45, %v1675_v2  ;;  %v1804_v56 = vmul.f32 %v7700_v14, %v7897_v21  ;;  %v1887_v25 = vmul.f32 %v7710_v33, %v7907_v27  ;;  %6949 = vmatpush3.bf16.msra.mxu1 %v11019_v23  ;;  %v11022_v45 = vld [vmem:[#allocation18_spill] sm:$0xff] }
 0x162   : > { %v2152_v5 = vadd.f32 %v7874_v18, %v2130_v37  ;;  %v1396_v26 = vpack.c.bf16 %v1329_v24, %v1326_v61  ;;  %v6761_v30 = vadd.f32 %v6760_v20, %v6759_v17  ;;  %v6762_v3 = vpop.f32.mrb[38].mxu0  ;;  %v1736_v6 = vadd.f32 %v1720_v29, %v1676_v55  ;;  %6950 = vmatprep.subr.bf16.mxu1 %v11021_v34 }
 0x163   : > { %v2342_v32 = vld [vmem:[#allocation2 + $0x48] sm:$0xff]  ;;  %v6763_v38 = vpop.f32.mrb[39].mxu0  ;;  %v1819_v42 = vadd.f32 %v1803_v46, %v1735_v15  ;;  %v1888_v60 = vmul.f32 %v7710_v33, %v7917_v8  ;;  %v8028_v57 = vunpack.c.l.bf16 %v1917_v36  ;;  %v8030_v39 = vunpack.c.h.bf16 %v1917_v36 }
 0x164   : > { %v8032_v28 = vunpack.c.l.bf16 %v2342_v32  ;;  %v8034_v43 = vunpack.c.h.bf16 %v2342_v32  ;;  %v2166_v61 = vpack.c.bf16 %v2153_v54, %v2152_v5  ;;  %1413 = vst.msk [vmem:[#allocation2 + $0x50] sm:$0xff] %vm547_vm1, %v1396_v26  ;;  %v1173_v1 = vadd.f32 %v6761_v30, %v7583_v19  ;;  %v11023_v5 = vld [vmem:[#allocation19_spill] sm:$0xff] }
 0x165   : > { %v6764_v59 = vadd.f32 %v6763_v38, %v6762_v3  ;;  %v1820_v23 = vadd.f32 %v1804_v56, %v1736_v6  ;;  %v1903_v58 = vadd.f32 %v1887_v25, %v1819_v42  ;;  %v1948_v2 = vmul.f32 %v7780_v10, %v8028_v57  ;;  %6951 = vmatpush3.bf16.msra.mxu1 %v11021_v34 }
 0x166   : > { %6932 = vmatprep.mubr.msk.bf16.mxu1 %vm547_vm1, %v2166_v61  ;;  %v1334_v29 = vadd.f32 %v11022_v45, %v1173_v1  ;;  %v1949_v37 = vmul.f32 %v7780_v10, %v8030_v39  ;;  %v1977_v4 = vrot.slane %v8028_v57, 6  ;;  %v1985_v24 = vrot.slane %v8030_v39, 6 }
 0x167   : > { %v1176_v17 = vadd.f32 %v6764_v59, %v7583_v19  ;;  %v1904_v55 = vadd.f32 %v1888_v60, %v1820_v23  ;;  %v1964_v46 = vadd.f32 %v1948_v2, %v1903_v58  ;;  %v2061_v36 = vrot.slane %v8028_v57, 2 }
 0x168   : > { %v8051_v54 = vsel %vm1531_vm3, %v1977_v4, %v1985_v24  ;;  %v2001_v20 = vsel %vm1531_vm3, %v1985_v24, %v1977_v4  ;;  %v2069_v15 = vrot.slane %v8030_v39, 2  ;;  %v6765_v56 = vpop.f32.mrb[40].mxu0  ;;  %v1491_v25 = vmul.f32 %v7618_v44, %v7795_v41  ;;  %v11024_v4 = vld [vmem:[#allocation29_spill] sm:$0xff] }
 0x169   : > { %v1337_v26 = vadd.f32 %v11023_v5, %v1176_v17  ;;  %v1965_v30 = vadd.f32 %v1949_v37, %v1904_v55  ;;  %v8060_v3 = vmul.f32 %v7603_v35, %v2001_v20  ;;  %v2033_v6 = vmul.f32 %v7811_v12, %v8051_v54  ;;  %v6766_v34 = vpop.f32.mrb[41].mxu0  ;;  %v11025_v17 = vld [vmem:[#allocation27_spill] sm:$0xff]  ;;  %v11026_v20 = vld [vmem:[#allocation22_spill] sm:$0xff] }
 0x16a   : > { %v8066_v32 = vsel %vm1616_vm5, %v2061_v36, %v2069_v15  ;;  %v2085_v38 = vsel %vm1616_vm5, %v2069_v15, %v2061_v36  ;;  %v6767_v42 = vadd.f32 %v6766_v34, %v6765_v56  ;;  %v6768_v60 = vpop.f32.mrb[42].mxu0  ;;  %v1492_v41 = vmul.f32 %v7618_v44, %v7797_v49 }
 0x16b   : > { %v1397_v61 = vpack.c.bf16 %v1337_v26, %v1334_v29  ;;  %v2032_v1 = vmul.f32 %v7811_v12, %v8060_v3  ;;  %v2049_v59 = vadd.f32 %v2033_v6, %v1965_v30  ;;  %v8075_v23 = vmul.f32 %v7633_v53, %v2085_v38  ;;  %v6769_v58 = vpop.f32.mrb[43].mxu0  ;;  %v1918_v38 = vld [vmem:[#allocation2 + $0x40] sm:$0xff] }
 0x16c   : > { %v2116_v2 = vmul.f32 %v7827_v40, %v8066_v32  ;;  %v6770_v45 = vadd.f32 %v6769_v58, %v6768_v60  ;;  %v1181_v37 = vadd.f32 %v6767_v42, %v7583_v19  ;;  %v1576_v24 = vmul.f32 %v7630_v52, %v11024_v4 }
 0x16d   : > { %1414 = vst.msk [vmem:[#allocation2 + $0x58] sm:$0xff] %vm547_vm1, %v1397_v61  ;;  %v2048_v49 = vadd.f32 %v2032_v1, %v1964_v46  ;;  %v2117_v29 = vmul.f32 %v7827_v40, %v8075_v23  ;;  %v1577_v55 = vmul.f32 %v7630_v52, %v11025_v17  ;;  %v1661_v36 = vmul.f32 %v7660_v22, %v7839_v0 }
 0x16e   : > { %v8090_v15 = vadd.f32 %v11026_v20, %v1181_v37  ;;  %v1592_v56 = vadd.f32 %v1576_v24, %v1491_v25  ;;  %v1662_v5 = vmul.f32 %v7660_v22, %v7853_v9  ;;  %v1721_v26 = vmul.f32 %v7691_v11, %v7946_v13 }
 0x16f   : > { %v2132_v46 = vadd.f32 %v2116_v2, %v2048_v49  ;;  %v2133_v30 = vadd.f32 %v2117_v29, %v2049_v59  ;;  %v1593_v6 = vadd.f32 %v1577_v55, %v1492_v41  ;;  %v1722_v34 = vmul.f32 %v7691_v11, %v7951_v31 }
 0x170   : > { %v1677_v42 = vadd.f32 %v1661_v36, %v1592_v56  ;;  %v1805_v0 = vmul.f32 %v7700_v14, %v7983_v63  ;;  %v1806_v25 = vmul.f32 %v7700_v14, %v7971_v62  ;;  %v1889_v9 = vmul.f32 %v7710_v33, %v7977_v7  ;;  %v6771_v60 = vpop.f32.mrb[44].mxu0 }
 0x171   : > { %v2154_v61 = vadd.f32 %v7874_v18, %v2132_v46  ;;  %v2155_v1 = vadd.f32 %v7874_v18, %v2133_v30  ;;  %v1678_v41 = vadd.f32 %v1662_v5, %v1593_v6  ;;  %v1890_v59 = vmul.f32 %v7710_v33, %v7989_v47  ;;  %v6772_v58 = vpop.f32.mrb[45].mxu0 }
 0x172   : > { %v1737_v2 = vadd.f32 %v1721_v26, %v1677_v42  ;;  %v8108_v37 = vunpack.c.l.bf16 %v1918_v38  ;;  %v8110_v4 = vunpack.c.h.bf16 %v1918_v38  ;;  %v1184_v24 = vadd.f32 %v6770_v45, %v7583_v19  ;;  %v6774_v49 = vpop.f32.mrb[46].mxu0 }
 0x173   : > { %v2167_v29 = vpack.c.bf16 %v2155_v1, %v2154_v61  ;;  %v1738_v17 = vadd.f32 %v1722_v34, %v1678_v41  ;;  %v6773_v55 = vadd.f32 %v6772_v58, %v6771_v60  ;;  %v6775_v36 = vpop.f32.mrb[47].mxu0  ;;  %v1493_v20 = vmul.f32 %v7618_v44, %v7865_v50  ;;  %v11027_v50 = vld [vmem:[#allocation24_spill] sm:$0xff] }
 0x174   : > { %v1821_v56 = vadd.f32 %v1805_v0, %v1737_v2  ;;  %v1950_v5 = vmul.f32 %v7780_v10, %v8108_v37  ;;  %v1951_v26 = vmul.f32 %v7780_v10, %v8110_v4  ;;  %v1978_v46 = vrot.slane %v8108_v37, 6 }
 0x175   : > { %6933 = vmatmul.mubr.msk.bf16.gmra.mrb[36].mxu1 %vm547_vm1, %v2167_v29  ;;  %v1822_v45 = vadd.f32 %v1806_v25, %v1738_v17  ;;  %v1986_v30 = vrot.slane %v8110_v4, 6  ;;  %v2062_v6 = vrot.slane %v8108_v37, 2  ;;  %v2070_v34 = vrot.slane %v8110_v4, 2 }
 0x176   : > { %v1905_v38 = vadd.f32 %v1889_v9, %v1821_v56  ;;  %v1345_v42 = vadd.f32 %v11027_v50, %v1184_v24  ;;  %v1189_v0 = vadd.f32 %v6773_v55, %v7583_v19  ;;  %v6776_v60 = vadd.f32 %v6775_v36, %v6774_v49 }
 0x177   : > { %v1906_v61 = vadd.f32 %v1890_v59, %v1822_v45  ;;  %v8128_v1 = vsel %vm1531_vm3, %v1978_v46, %v1986_v30  ;;  %v2002_v25 = vsel %vm1531_vm3, %v1986_v30, %v1978_v46  ;;  %v8134_v41 = vsel %vm1616_vm5, %v2062_v6, %v2070_v34 }
 0x178   : > { %v1966_v58 = vadd.f32 %v1950_v5, %v1905_v38  ;;  %v8137_v9 = vmul.f32 %v7603_v35, %v2002_v25  ;;  %v2035_v2 = vmul.f32 %v7811_v12, %v8128_v1  ;;  %v2086_v59 = vsel %vm1616_vm5, %v2070_v34, %v2062_v6  ;;  %v6777_v24 = vpop.f32.mrb[48].mxu0  ;;  %v11028_v5 = vld [vmem:[#allocation21_spill] sm:$0xff] }
 0x179   : > { %v1967_v49 = vadd.f32 %v1951_v26, %v1906_v61  ;;  %v8144_v29 = vmul.f32 %v7633_v53, %v2086_v59  ;;  %v2118_v17 = vmul.f32 %v7827_v40, %v8134_v41  ;;  %v1398_v55 = vpack.c.bf16 %v1345_v42, %v8090_v15  ;;  %v6778_v36 = vpop.f32.mrb[49].mxu0 }
 0x17a   : > { %v2034_v56 = vmul.f32 %v7811_v12, %v8137_v9  ;;  %v1350_v46 = vadd.f32 %v11028_v5, %v1189_v0  ;;  %v1192_v45 = vadd.f32 %v6776_v60, %v7583_v19  ;;  %v1494_v30 = vmul.f32 %v7618_v44, %v7867_v48  ;;  %v6780_v26 = vpop.f32.mrb[50].mxu0  ;;  %v11029_v0 = vld [vmem:[#allocation23_spill] sm:$0xff] }
 0x17b   : > { %v2051_v6 = vadd.f32 %v2035_v2, %v1967_v49  ;;  %v2119_v34 = vmul.f32 %v7827_v40, %v8144_v29  ;;  %1415 = vst.msk [vmem:[#allocation2 + $0x60] sm:$0xff] %vm547_vm1, %v1398_v55  ;;  %v1578_v15 = vmul.f32 %v7630_v52, %v7914_v51  ;;  %v1579_v38 = vmul.f32 %v7630_v52, %v7897_v21  ;;  %v6781_v50 = vpop.f32.mrb[51].mxu0 }
 0x17c   : > { %v2050_v42 = vadd.f32 %v2034_v56, %v1966_v58  ;;  %v1353_v19 = vadd.f32 %v11029_v0, %v1192_v45  ;;  %v1663_v44 = vmul.f32 %v7660_v22, %v7907_v27  ;;  %v1664_v48 = vmul.f32 %v7660_v22, %v7917_v8 }
 0x17d   : > { %v2135_v60 = vadd.f32 %v2119_v34, %v2051_v6  ;;  %v1594_v61 = vadd.f32 %v1578_v15, %v1493_v20  ;;  %v1595_v25 = vadd.f32 %v1579_v38, %v1494_v30  ;;  %v1723_v2 = vmul.f32 %v7691_v11, %v8028_v57 }
 0x17e   : > { %v2134_v51 = vadd.f32 %v2118_v17, %v2050_v42  ;;  %v1399_v59 = vpack.c.bf16 %v1353_v19, %v1350_v46  ;;  %v1724_v52 = vmul.f32 %v7691_v11, %v8030_v39  ;;  %v1807_v21 = vmul.f32 %v7700_v14, %v8060_v3 }
 0x17f   : > { %v2157_v58 = vadd.f32 %v7874_v18, %v2135_v60  ;;  %v1679_v27 = vadd.f32 %v1663_v44, %v1594_v61  ;;  %v1680_v49 = vadd.f32 %v1664_v48, %v1595_v25  ;;  %v1808_v8 = vmul.f32 %v7700_v14, %v8051_v54 }
 0x180   : > { %v2156_v20 = vadd.f32 %v7874_v18, %v2134_v51  ;;  %1416 = vst.msk [vmem:[#allocation2 + $0x68] sm:$0xff] %vm547_vm1, %v1399_v59  ;;  %v1891_v17 = vmul.f32 %v7710_v33, %v8066_v32  ;;  %v1892_v55 = vmul.f32 %v7710_v33, %v8075_v23  ;;  %v1952_v56 = vmul.f32 %v7780_v10, %v8032_v28  ;;  %v8184_v5 = vpop.f32.mrb[52].mxu0 }
 0x181   : > { %v1739_v46 = vadd.f32 %v1723_v2, %v1679_v27  ;;  %v1740_v45 = vadd.f32 %v1724_v52, %v1680_v49  ;;  %v1953_v30 = vmul.f32 %v7780_v10, %v8034_v43  ;;  %v1979_v6 = vrot.slane %v8032_v28, 6  ;;  %v8189_v34 = vpop.f32.mrb[53].mxu0  ;;  %v8224_v27 = vld [vmem:[%s10919_s2] ss:$0 sm:$0xff] }
 0x182   : > { %v2168_v15 = vpack.c.bf16 %v2157_v58, %v2156_v20  ;;  %v1987_v38 = vrot.slane %v8034_v43, 6  ;;  %v2063_v42 = vrot.slane %v8032_v28, 2  ;;  %v2071_v0 = vrot.slane %v8034_v43, 2  ;;  %v8194_v19 = vpop.f32.mrb[54].mxu0 }
 0x183   : > { %v1823_v44 = vadd.f32 %v1807_v21, %v1739_v46  ;;  %v1824_v48 = vadd.f32 %v1808_v8, %v1740_v45  ;;  %v6779_v60 = vadd.f32 %v6778_v36, %v6777_v24  ;;  %v6782_v61 = vadd.f32 %v6781_v50, %v6780_v26  ;;  %v8196_v25 = vpop.f32.mrb[55].mxu0  ;;  %v8230_v8 = vld [vmem:[%s10920_s3 + $0x1] ss:$0 sm:$0xff] }
 0x184   : > { %6936 = vmatprep.mubr.msk.bf16.mxu1 %vm547_vm1, %v2168_v15  ;;  %v8201_v2 = vsel %vm1531_vm3, %v1979_v6, %v1987_v38  ;;  %v2003_v51 = vsel %vm1531_vm3, %v1987_v38, %v1979_v6  ;;  %v8207_v59 = vsel %vm1616_vm5, %v2063_v42, %v2071_v0  ;;  %v2087_v52 = vsel %vm1616_vm5, %v2071_v0, %v2063_v42  ;;  %v11030_v15 = vld [vmem:[#allocation26_spill] sm:$0xff]  ;;  %v8246_v42 = vld [vmem:[%s10920_s3] ss:$0 sm:$0xff] }
 0x185   : > { %v1907_v24 = vadd.f32 %v1891_v17, %v1823_v44  ;;  %v1908_v36 = vadd.f32 %v1892_v55, %v1824_v48  ;;  %v8212_v26 = vmul.f32 %v7603_v35, %v2003_v51  ;;  %v2037_v50 = vmul.f32 %v7811_v12, %v8201_v2 }
 0x186   : > { %v8217_v21 = vmul.f32 %v7633_v53, %v2087_v52  ;;  %v2120_v58 = vmul.f32 %v7827_v40, %v8207_v59  ;;  %v1197_v49 = vadd.f32 %v8224_v27, %v6779_v60  ;;  %v1495_v20 = vmul.f32 %v8230_v8, %v7946_v13 }
 0x187   : > { %v1968_v17 = vadd.f32 %v1952_v56, %v1907_v24  ;;  %v1969_v55 = vadd.f32 %v1953_v30, %v1908_v36  ;;  %v2036_v46 = vmul.f32 %v7811_v12, %v8212_v26  ;;  %v1496_v45 = vmul.f32 %v8230_v8, %v7951_v31  ;;  %v1920_v24 = vld [vmem:[#allocation2 + $0x50] sm:$0xff] }
 0x188   : > { %v2121_v6 = vmul.f32 %v7827_v40, %v8217_v21  ;;  %v8241_v38 = vadd.f32 %v11030_v15, %v1197_v49  ;;  %v1580_v13 = vmul.f32 %v8246_v42, %v7983_v63  ;;  %v1581_v56 = vmul.f32 %v8246_v42, %v7971_v62  ;;  %v8252_v30 = vpop.f32.mrb[56].mxu0 }
 0x189   : > { %v2052_v31 = vadd.f32 %v2036_v46, %v1968_v17  ;;  %v2053_v0 = vadd.f32 %v2037_v50, %v1969_v55  ;;  %v1665_v44 = vmul.f32 %v7660_v22, %v7977_v7  ;;  %v1666_v48 = vmul.f32 %v7660_v22, %v7989_v47  ;;  %v8258_v60 = vpop.f32.mrb[57].mxu0 }
 0x18a   : > { %v1596_v51 = vadd.f32 %v1580_v13, %v1495_v20  ;;  %v1597_v52 = vadd.f32 %v1581_v56, %v1496_v45  ;;  %v1725_v63 = vmul.f32 %v7691_v11, %v8108_v37  ;;  %v1726_v62 = vmul.f32 %v7691_v11, %v8110_v4  ;;  %v8264_v36 = vpop.f32.mrb[58].mxu0 }
 0x18b   : > { %v2136_v50 = vadd.f32 %v2120_v58, %v2052_v31  ;;  %v2137_v49 = vadd.f32 %v2121_v6, %v2053_v0  ;;  %v1809_v7 = vmul.f32 %v7700_v14, %v8137_v9  ;;  %v1810_v22 = vmul.f32 %v7700_v14, %v8128_v1  ;;  %v8270_v47 = vpop.f32.mrb[59].mxu0 }
 0x18c   : > { %v1681_v20 = vadd.f32 %v1665_v44, %v1596_v51  ;;  %v1682_v17 = vadd.f32 %v1666_v48, %v1597_v52  ;;  %v1893_v55 = vmul.f32 %v7710_v33, %v8134_v41  ;;  %v1894_v11 = vmul.f32 %v7710_v33, %v8144_v29 }
 0x18d   : > { %v2158_v46 = vadd.f32 %v7874_v18, %v2136_v50  ;;  %v2159_v58 = vadd.f32 %v7874_v18, %v2137_v49  ;;  %v8278_v45 = vunpack.c.l.bf16 %v1920_v24  ;;  %v8280_v6 = vunpack.c.h.bf16 %v1920_v24 }
 0x18e   : > { %v1741_v15 = vadd.f32 %v1725_v63, %v1681_v20  ;;  %v1742_v14 = vadd.f32 %v1726_v62, %v1682_v17  ;;  %v1200_v13 = vadd.f32 %v8224_v27, %v6782_v61  ;;  %v6785_v56 = vadd.f32 %v8189_v34, %v8184_v5  ;;  %v11031_v34 = vld [vmem:[#allocation30_spill] sm:$0xff] }
 0x18f   : > { %v2169_v31 = vpack.c.bf16 %v2159_v58, %v2158_v46  ;;  %v1954_v0 = vmul.f32 %v7780_v10, %v8278_v45  ;;  %v1955_v33 = vmul.f32 %v7780_v10, %v8280_v6  ;;  %v1980_v44 = vrot.slane %v8278_v45, 6 }
 0x190   : > { %v1825_v48 = vadd.f32 %v1809_v7, %v1741_v15  ;;  %v1826_v51 = vadd.f32 %v1810_v22, %v1742_v14  ;;  %v1988_v52 = vrot.slane %v8280_v6, 6  ;;  %v2064_v63 = vrot.slane %v8278_v45, 2  ;;  %v8292_v62 = vpop.f32.mrb[60].mxu0 }
 0x191   : > { %6937 = vmatmul.mubr.msk.bf16.gmra.mrb[40].mxu1 %vm547_vm1, %v2169_v31  ;;  %v2072_v5 = vrot.slane %v8280_v6, 2  ;;  %v1361_v61 = vadd.f32 %v11031_v34, %v1200_v13  ;;  %v1205_v24 = vadd.f32 %v8224_v27, %v6785_v56  ;;  %v6788_v50 = vadd.f32 %v8196_v25, %v8194_v19  ;;  %v8300_v49 = vpop.f32.mrb[61].mxu0 }
 0x192   : > { %v1909_v7 = vadd.f32 %v1893_v55, %v1825_v48  ;;  %v1910_v22 = vadd.f32 %v1894_v11, %v1826_v51  ;;  %v8304_v20 = vsel %vm1531_vm3, %v1980_v44, %v1988_v52  ;;  %v2004_v17 = vsel %vm1531_vm3, %v1988_v52, %v1980_v44  ;;  %v8308_v46 = vpop.f32.mrb[62].mxu0  ;;  %v11032_v48 = vld [vmem:[#allocation25_spill] sm:$0xff] }
 0x193   : > { %v8311_v58 = vmul.f32 %v7603_v35, %v2004_v17  ;;  %v2039_v15 = vmul.f32 %v7811_v12, %v8304_v20  ;;  %v8317_v19 = vsel %vm1616_vm5, %v2064_v63, %v2072_v5  ;;  %v2088_v25 = vsel %vm1616_vm5, %v2072_v5, %v2064_v63  ;;  %v8321_v55 = vpop.f32.mrb[63].mxu0  ;;  %v1692_v63 = vld [vmem:[#allocation2 + $0x48] sm:$0xff]  ;;  %v8348_v17 = vld [vmem:[%s10920_s3 + $0x2] ss:$0 sm:$0xff] }
 0x194   : > { %v1970_v11 = vadd.f32 %v1954_v0, %v1909_v7  ;;  %v1971_v14 = vadd.f32 %v1955_v33, %v1910_v22  ;;  %v8324_v13 = vmul.f32 %v7633_v53, %v2088_v25  ;;  %v2122_v56 = vmul.f32 %v7827_v40, %v8317_v19  ;;  %v11033_v22 = vld [vmem:[#allocation28_spill] sm:$0xff] }
 0x195   : > { %v2038_v31 = vmul.f32 %v7811_v12, %v8311_v58  ;;  %v1400_v44 = vpack.c.bf16 %v1361_v61, %v8241_v38  ;;  %v1366_v51 = vadd.f32 %v11032_v48, %v1205_v24  ;;  %v1208_v52 = vadd.f32 %v8224_v27, %v6788_v50 }
 0x196   : > { %v2055_v5 = vadd.f32 %v2039_v15, %v1971_v14  ;;  %v2123_v0 = vmul.f32 %v7827_v40, %v8324_v13  ;;  %v1497_v33 = vmul.f32 %v8230_v8, %v8028_v57  ;;  %v1498_v34 = vmul.f32 %v8230_v8, %v8030_v39 }
 0x197   : > { %v2054_v7 = vadd.f32 %v2038_v31, %v1970_v11  ;;  %1417 = vst.msk [vmem:[#allocation2 + $0x70] sm:$0xff] %vm547_vm1, %v1400_v44  ;;  %v1369_v38 = vadd.f32 %v11033_v22, %v1208_v52  ;;  %v1582_v61 = vmul.f32 %v8246_v42, %v8060_v3  ;;  %v1583_v24 = vmul.f32 %v8246_v42, %v8051_v54  ;;  %v7151_v3 = vld [vmem:[%s10926_s9 + $0x4] ss:$8 sps:$4 sm:$0xff]   ;;  %v1921_v31 = vld [vmem:[#allocation2 + $0x58] sm:$0xff]  ;;  %v8360_v44 = vld [vmem:[%s10926_s9] ss:$8 sps:$4 sm:$0xff]  }
 0x198   : > { %v2139_v50 = vadd.f32 %v2123_v0, %v2055_v5  ;;  %v1667_v57 = vmul.f32 %v8348_v17, %v8066_v32  ;;  %v1668_v39 = vmul.f32 %v8348_v17, %v8075_v23  ;;  %v1707_v15 = vunpack.c.l.bf16 %v1692_v63  ;;  %v8366_v23 = vld [vmem:[%s10920_s3 + $0x4] ss:$0 sm:$0xff]  ;;  %4625 = vmatprep.subr.bf16.mxu0 %v7151_v3  ;;  %3903 = vmatprep.subr.bf16.mxu1 %v7151_v3 }
 0x199   : > { %v2138_v25 = vadd.f32 %v2122_v56, %v2054_v7  ;;  %v1401_v11 = vpack.c.bf16 %v1369_v38, %v1366_v51  ;;  %v1598_v54 = vadd.f32 %v1582_v61, %v1497_v33  ;;  %v1599_v14 = vadd.f32 %v1583_v24, %v1498_v34  ;;  %4626 = vmatpush1.bf16.msra.mxu0 %v8360_v44 }
 0x19a   : > { %v2161_v32 = vadd.f32 %v7874_v18, %v2139_v50  ;;  %v1708_v48 = vunpack.c.h.bf16 %v1692_v63  ;;  %v1727_v52 = vmul.f32 %v8366_v23, %v1707_v15  ;;  %v1752_v56 = vrot.slane %v1707_v15, 6 }
 0x19b   : > { %v2160_v51 = vadd.f32 %v7874_v18, %v2138_v25  ;;  %1418 = vst.msk [vmem:[#allocation2 + $0x78] sm:$0xff] %vm547_vm1, %v1401_v11  ;;  %v1683_v5 = vadd.f32 %v1667_v57, %v1598_v54  ;;  %v1684_v0 = vadd.f32 %v1668_v39, %v1599_v14  ;;  %v1836_v33 = vrot.slane %v1707_v15, 2  ;;  %v8390_v11 = vld [vmem:[%s10920_s3 + $0x3] ss:$0 sm:$0xff]  ;;  %v8398_v54 = vld [vmem:[%s10920_s3 + $0x5] ss:$0 sm:$0xff] }
 0x19c   : > { %v1728_v63 = vmul.f32 %v8366_v23, %v1708_v48  ;;  %v1760_v34 = vrot.slane %v1708_v48, 6  ;;  %v1844_v7 = vrot.slane %v1708_v48, 2  ;;  %v8373_v22 = vunpack.c.l.bf16 %v1921_v31 }
 0x19d   : > { %v2170_v38 = vpack.c.bf16 %v2161_v32, %v2160_v51  ;;  %v1743_v61 = vadd.f32 %v1727_v52, %v1683_v5  ;;  %v8375_v24 = vunpack.c.h.bf16 %v1921_v31  ;;  %v6791_v50 = vadd.f32 %v8258_v60, %v8252_v30 }
 0x19e   : > { %v1744_v3 = vadd.f32 %v1728_v63, %v1684_v0  ;;  %v1768_v57 = vsel %vm1531_vm3, %v1752_v56, %v1760_v34  ;;  %v1776_v39 = vsel %vm1531_vm3, %v1760_v34, %v1752_v56  ;;  %v1852_v15 = vsel %vm1616_vm5, %v1836_v33, %v1844_v7 }
 0x19f   : > { %6940 = vmatprep.mubr.msk.bf16.mxu1 %vm547_vm1, %v2170_v38  ;;  %v1791_v25 = vmul.f32 %v7603_v35, %v1776_v39  ;;  %v1812_v30 = vmul.f32 %v8390_v11, %v1768_v57  ;;  %v1860_v60 = vsel %vm1616_vm5, %v1844_v7, %v1836_v33  ;;  %v1895_v14 = vmul.f32 %v8398_v54, %v1852_v15 }
 0x1a0   : > { %v1876_v31 = vmul.f32 %v7633_v53, %v1860_v60  ;;  %v1956_v32 = vmul.f32 %v7780_v10, %v8373_v22  ;;  %v1957_v48 = vmul.f32 %v7780_v10, %v8375_v24  ;;  %v1981_v52 = vrot.slane %v8373_v22, 6 }
 0x1a1   : > { %v1811_v56 = vmul.f32 %v8390_v11, %v1791_v25  ;;  %v1828_v51 = vadd.f32 %v1812_v30, %v1744_v3  ;;  %v1989_v5 = vrot.slane %v8375_v24, 6  ;;  %v2065_v0 = vrot.slane %v8373_v22, 2  ;;  %v11034_v30 = vld [vmem:[#allocation32_spill] sm:$0xff] }
 0x1a2   : > { %v1896_v33 = vmul.f32 %v8398_v54, %v1876_v31  ;;  %v2073_v63 = vrot.slane %v8375_v24, 2  ;;  %v6794_v34 = vadd.f32 %v8270_v47, %v8264_v36  ;;  %v1213_v7 = vadd.f32 %v8224_v27, %v6791_v50 }
 0x1a3   : > { %v1827_v38 = vadd.f32 %v1811_v56, %v1743_v61  ;;  %v8417_v10 = vsel %vm1531_vm3, %v1981_v52, %v1989_v5  ;;  %v2005_v3 = vsel %vm1531_vm3, %v1989_v5, %v1981_v52  ;;  %v2365_v57 = vmul.f32 %v8230_v8, %v8108_v37 }
 0x1a4   : > { %v1912_v39 = vadd.f32 %v1896_v33, %v1828_v51  ;;  %v8424_v15 = vmul.f32 %v7603_v35, %v2005_v3  ;;  %v2041_v36 = vmul.f32 %v7811_v12, %v8417_v10  ;;  %v8430_v47 = vsel %vm1616_vm5, %v2065_v0, %v2073_v63 }
 0x1a5   : > { %v1911_v61 = vadd.f32 %v1895_v14, %v1827_v38  ;;  %v2089_v50 = vsel %vm1616_vm5, %v2073_v63, %v2065_v0  ;;  %v2124_v25 = vmul.f32 %v7827_v40, %v8430_v47  ;;  %v8437_v37 = vadd.f32 %v11034_v30, %v1213_v7 }
 0x1a6   : > { %v1973_v60 = vadd.f32 %v1957_v48, %v1912_v39  ;;  %v2040_v31 = vmul.f32 %v7811_v12, %v8424_v15  ;;  %v8442_v52 = vmul.f32 %v7633_v53, %v2089_v50  ;;  %v2366_v56 = vmul.f32 %v8230_v8, %v8110_v4 }
 0x1a7   : > { %v1972_v14 = vadd.f32 %v1956_v32, %v1911_v61  ;;  %v2445_v51 = vmul.f32 %v8246_v42, %v8137_v9  ;;  %v2446_v5 = vmul.f32 %v8246_v42, %v8128_v1  ;;  %v2525_v0 = vmul.f32 %v8348_v17, %v8134_v41  ;;  %v2775_v1 = vld [vmem:[#allocation2 + $0x60] sm:$0xff] }
 0x1a8   : > { %v2057_v48 = vadd.f32 %v2041_v36, %v1973_v60  ;;  %v2125_v12 = vmul.f32 %v7827_v40, %v8442_v52  ;;  %v2526_v33 = vmul.f32 %v8348_v17, %v8144_v29  ;;  %v2582_v4 = vmul.f32 %v8366_v23, %v8278_v45 }
 0x1a9   : > { %v2056_v32 = vadd.f32 %v2040_v31, %v1972_v14  ;;  %v2461_v63 = vadd.f32 %v2445_v51, %v2365_v57  ;;  %v2462_v7 = vadd.f32 %v2446_v5, %v2366_v56  ;;  %v2583_v9 = vmul.f32 %v8366_v23, %v8280_v6  ;;  %v8480_v51 = vld [vmem:[%s10920_s3 + $0x7] ss:$0 sm:$0xff] }
 0x1aa   : > { %v2141_v38 = vadd.f32 %v2125_v12, %v2057_v48  ;;  %v2662_v41 = vmul.f32 %v8390_v11, %v8311_v58  ;;  %v2663_v40 = vmul.f32 %v8390_v11, %v8304_v20  ;;  %v2742_v29 = vmul.f32 %v8398_v54, %v8317_v19 }
 0x1ab   : > { %v2140_v3 = vadd.f32 %v2124_v25, %v2056_v32  ;;  %v2541_v39 = vadd.f32 %v2525_v0, %v2461_v63  ;;  %v2542_v36 = vadd.f32 %v2526_v33, %v2462_v7  ;;  %v2743_v57 = vmul.f32 %v8398_v54, %v8324_v13  ;;  %v11035_v63 = vld [vmem:[#allocation34_spill] sm:$0xff] }
 0x1ac   : > { %v2163_v61 = vadd.f32 %v7874_v18, %v2141_v38  ;;  %v8469_v50 = vunpack.c.l.bf16 %v2775_v1  ;;  %v8471_v30 = vunpack.c.h.bf16 %v2775_v1  ;;  %v1216_v60 = vadd.f32 %v8224_v27, %v6794_v34 }
 0x1ad   : > { %v2162_v31 = vadd.f32 %v7874_v18, %v2140_v3  ;;  %v2598_v56 = vadd.f32 %v2582_v4, %v2541_v39  ;;  %v2599_v14 = vadd.f32 %v2583_v9, %v2542_v36  ;;  %v6797_v25 = vadd.f32 %v8300_v49, %v8292_v62 }
 0x1ae   : > { %v2799_v5 = vmul.f32 %v8480_v51, %v8469_v50  ;;  %v2800_v0 = vmul.f32 %v8480_v51, %v8471_v30  ;;  %v2831_v34 = vrot.slane %v8469_v50, 6  ;;  %v2839_v18 = vrot.slane %v8471_v30, 6 }
 0x1af   : > { %v2171_v48 = vpack.c.bf16 %v2163_v61, %v2162_v31  ;;  %v2678_v12 = vadd.f32 %v2662_v41, %v2598_v56  ;;  %v2679_v33 = vadd.f32 %v2663_v40, %v2599_v14  ;;  %v2911_v62 = vrot.slane %v8469_v50, 2  ;;  %v8504_v41 = vld [vmem:[%s10920_s3 + $0x6] ss:$0 sm:$0xff]  ;;  %v8524_v56 = vld [vmem:[%s10920_s3 + $0x8] ss:$0 sm:$0xff] }
 0x1b0   : > { %v8491_v49 = vsel %vm1531_vm3, %v2831_v34, %v2839_v18  ;;  %v2855_v4 = vsel %vm1531_vm3, %v2839_v18, %v2831_v34  ;;  %v2919_v32 = vrot.slane %v8471_v30, 2  ;;  %v1377_v7 = vadd.f32 %v11035_v63, %v1216_v60  ;;  %v11037_v63 = vld [vmem:[#allocation33_spill] sm:$0xff] }
 0x1b1   : > { %6941 = vmatmul.mubr.msk.bf16.gmra.mrb[44].mxu1 %vm547_vm1, %v2171_v48  ;;  %v2758_v9 = vadd.f32 %v2742_v29, %v2678_v12  ;;  %v2759_v1 = vadd.f32 %v2743_v57, %v2679_v33  ;;  %v8499_v38 = vmul.f32 %v7603_v35, %v2855_v4  ;;  %v2880_v40 = vmul.f32 %v8504_v41, %v8491_v49 }
 0x1b2   : > { %v8510_v3 = vsel %vm1616_vm5, %v2911_v62, %v2919_v32  ;;  %v2935_v39 = vsel %vm1616_vm5, %v2919_v32, %v2911_v62  ;;  %v1402_v29 = vpack.c.bf16 %v1377_v7, %v8437_v37  ;;  %v1221_v36 = vadd.f32 %v8224_v27, %v6797_v25  ;;  %v11036_v37 = vld [vmem:[#allocation31_spill] sm:$0xff] }
 0x1b3   : > { %v2815_v57 = vadd.f32 %v2799_v5, %v2758_v9  ;;  %v2816_v61 = vadd.f32 %v2800_v0, %v2759_v1  ;;  %v2879_v60 = vmul.f32 %v8504_v41, %v8499_v38  ;;  %v8519_v31 = vmul.f32 %v7633_v53, %v2935_v39 }
 0x1b4   : > { %v2959_v14 = vmul.f32 %v8524_v56, %v8510_v3  ;;  %1419 = vst.msk [vmem:[#allocation2 + $0x80] sm:$0xff] %vm547_vm1, %v1402_v29  ;;  %v1382_v25 = vadd.f32 %v11036_v37, %v1221_v36  ;;  %v6800_v5 = vadd.f32 %v8321_v55, %v8308_v46  ;;  %v2367_v0 = vmul.f32 %v8230_v8, %v8032_v28  ;;  %v8547_v55 = vld [vmem:[%s10921_s4] ss:$0 sm:$0xff] }
 0x1b5   : > { %v2895_v34 = vadd.f32 %v2879_v60, %v2815_v57  ;;  %v2896_v18 = vadd.f32 %v2880_v40, %v2816_v61  ;;  %v2960_v48 = vmul.f32 %v8524_v56, %v8519_v31  ;;  %v2368_v12 = vmul.f32 %v8230_v8, %v8034_v43  ;;  %v2776_v40 = vld [vmem:[#allocation2 + $0x68] sm:$0xff] }
 0x1b6   : > { %v1224_v33 = vadd.f32 %v8224_v27, %v6800_v5  ;;  %v2584_v32 = vmul.f32 %v8366_v23, %v8373_v22  ;;  %v2585_v28 = vmul.f32 %v8366_v23, %v8375_v24  ;;  %v2448_v27 = vmul.f32 %v8246_v42, %v8201_v2 }
 0x1b7   : > { %v2975_v62 = vadd.f32 %v2959_v14, %v2895_v34  ;;  %v2976_v4 = vadd.f32 %v2960_v48, %v2896_v18  ;;  %v2664_v1 = vmul.f32 %v8390_v11, %v8424_v15  ;;  %v2447_v29 = vmul.f32 %v8246_v42, %v8212_v26 }
 0x1b8   : > { %v1385_v46 = vadd.f32 %v11037_v63, %v1224_v33  ;;  %v2464_v36 = vadd.f32 %v2448_v27, %v2368_v12  ;;  %v2527_v57 = vmul.f32 %v8348_v17, %v8207_v59  ;;  %v2665_v61 = vmul.f32 %v8390_v11, %v8417_v10 }
 0x1b9   : > { %v2991_v7 = vadd.f32 %v8547_v55, %v2975_v62  ;;  %v2992_v43 = vadd.f32 %v8547_v55, %v2976_v4  ;;  %v2744_v2 = vmul.f32 %v8398_v54, %v8430_v47  ;;  %v2745_v60 = vmul.f32 %v8398_v54, %v8442_v52 }
 0x1ba   : > { %v1403_v9 = vpack.c.bf16 %v1385_v46, %v1382_v25  ;;  %v2463_v14 = vadd.f32 %v2447_v29, %v2367_v0  ;;  %v2528_v26 = vmul.f32 %v8348_v17, %v8217_v21  ;;  %v8569_v37 = vunpack.c.l.bf16 %v2776_v40  ;;  %v8614_v29 = vld [vmem:[%s10926_s9 + $0x10] ss:$8 sps:$4 sm:$0xff]  }
 0x1bb   : > { %v3007_v39 = vpack.c.bf16 %v2992_v43, %v2991_v7  ;;  %v8571_v25 = vunpack.c.h.bf16 %v2776_v40  ;;  %v2369_v59 = vmul.f32 %v8230_v8, %v8278_v45  ;;  %v2370_v5 = vmul.f32 %v8230_v8, %v8280_v6 }
 0x1bc   : > { %1420 = vst.msk [vmem:[#allocation2 + $0x88] sm:$0xff] %vm547_vm1, %v1403_v9  ;;  %v2449_v34 = vmul.f32 %v8246_v42, %v8311_v58  ;;  %v2450_v18 = vmul.f32 %v8246_v42, %v8304_v20  ;;  %v2543_v0 = vadd.f32 %v2527_v57, %v2463_v14  ;;  %v2544_v48 = vadd.f32 %v2528_v26, %v2464_v36 }
 0x1bd   : > { %6952 = vmatprep.mubr.msk.bf16.mxu1 %vm547_vm1, %v3007_v39  ;;  %v2801_v21 = vmul.f32 %v8480_v51, %v8569_v37  ;;  %v2802_v12 = vmul.f32 %v8480_v51, %v8571_v25  ;;  %v2832_v33 = vrot.slane %v8569_v37, 6  ;;  %v2840_v45 = vrot.slane %v8571_v25, 6 }
 0x1be   : > { %v2912_v6 = vrot.slane %v8569_v37, 2  ;;  %v2920_v62 = vrot.slane %v8571_v25, 2  ;;  %v2600_v58 = vadd.f32 %v2584_v32, %v2543_v0  ;;  %v2601_v4 = vadd.f32 %v2585_v28, %v2544_v48  ;;  %v8604_v32 = vld [vmem:[%s10926_s9 + $0x14] ss:$8 sps:$4 sm:$0xff]  }
 0x1bf   : > { %v2465_v63 = vadd.f32 %v2449_v34, %v2369_v59  ;;  %v2466_v20 = vadd.f32 %v2450_v18, %v2370_v5  ;;  %v8591_v46 = vsel %vm1531_vm3, %v2832_v33, %v2840_v45  ;;  %v2856_v7 = vsel %vm1531_vm3, %v2840_v45, %v2832_v33  ;;  %4627 = vmatprep.subr.bf16.mxu0 %v8604_v32  ;;  %v2777_v0 = vld [vmem:[#allocation2 + $0x70] sm:$0xff] }
 0x1c0   : > { %v8597_v43 = vsel %vm1616_vm5, %v2912_v6, %v2920_v62  ;;  %v2936_v27 = vsel %vm1616_vm5, %v2920_v62, %v2912_v6  ;;  %v2680_v28 = vadd.f32 %v2664_v1, %v2600_v58  ;;  %v2681_v9 = vadd.f32 %v2665_v61, %v2601_v4  ;;  %4628 = vmatpush1.bf16.msra.mxu0 %v8614_v29 }
 0x1c1   : > { %v8607_v40 = vmul.f32 %v7603_v35, %v2856_v7  ;;  %v2882_v39 = vmul.f32 %v8504_v41, %v8591_v46  ;;  %v8617_v36 = vmul.f32 %v7633_v53, %v2936_v27  ;;  %v2961_v57 = vmul.f32 %v8524_v56, %v8597_v43 }
 0x1c2   : > { %v2529_v1 = vmul.f32 %v8348_v17, %v8317_v19  ;;  %v2530_v61 = vmul.f32 %v8348_v17, %v8324_v13  ;;  %v2760_v14 = vadd.f32 %v2744_v2, %v2680_v28  ;;  %v2761_v26 = vadd.f32 %v2745_v60, %v2681_v9 }
 0x1c3   : > { %v2881_v59 = vmul.f32 %v8504_v41, %v8607_v40  ;;  %v2586_v5 = vmul.f32 %v8366_v23, %v8469_v50  ;;  %v2962_v34 = vmul.f32 %v8524_v56, %v8617_v36  ;;  %v2587_v13 = vmul.f32 %v8366_v23, %v8471_v30 }
 0x1c4   : > { %v2545_v18 = vadd.f32 %v2529_v1, %v2465_v63  ;;  %v2546_v19 = vadd.f32 %v2530_v61, %v2466_v20  ;;  %v2817_v48 = vadd.f32 %v2801_v21, %v2760_v14  ;;  %v2818_v2 = vadd.f32 %v2802_v12, %v2761_v26 }
 0x1c5   : > { %v2666_v60 = vmul.f32 %v8390_v11, %v8499_v38  ;;  %v2667_v33 = vmul.f32 %v8390_v11, %v8491_v49  ;;  %v2746_v62 = vmul.f32 %v8398_v54, %v8510_v3  ;;  %v2747_v58 = vmul.f32 %v8398_v54, %v8519_v31 }
 0x1c6   : > { %v2602_v45 = vadd.f32 %v2586_v5, %v2545_v18  ;;  %v2603_v6 = vadd.f32 %v2587_v13, %v2546_v19  ;;  %v2897_v4 = vadd.f32 %v2881_v59, %v2817_v48  ;;  %v2898_v63 = vadd.f32 %v2882_v39, %v2818_v2 }
 0x1c7   : > { %v8643_v20 = vunpack.c.l.bf16 %v2777_v0  ;;  %v8645_v21 = vunpack.c.h.bf16 %v2777_v0  ;;  %v2371_v27 = vmul.f32 %v8230_v8, %v8373_v22  ;;  %v2372_v28 = vmul.f32 %v8230_v8, %v8375_v24 }
 0x1c8   : > { %v2682_v12 = vadd.f32 %v2666_v60, %v2602_v45  ;;  %v2683_v7 = vadd.f32 %v2667_v33, %v2603_v6  ;;  %v2977_v9 = vadd.f32 %v2961_v57, %v2897_v4  ;;  %v2978_v1 = vadd.f32 %v2962_v34, %v2898_v63 }
 0x1c9   : > { %v2803_v61 = vmul.f32 %v8480_v51, %v8643_v20  ;;  %v2804_v39 = vmul.f32 %v8480_v51, %v8645_v21  ;;  %v2833_v59 = vrot.slane %v8643_v20, 6  ;;  %v2841_v5 = vrot.slane %v8645_v21, 6 }
 0x1ca   : > { %v2762_v14 = vadd.f32 %v2746_v62, %v2682_v12  ;;  %v2763_v26 = vadd.f32 %v2747_v58, %v2683_v7  ;;  %v2993_v18 = vadd.f32 %v8547_v55, %v2977_v9  ;;  %v2994_v22 = vadd.f32 %v8547_v55, %v2978_v1 }
 0x1cb   : > { %v2913_v24 = vrot.slane %v8643_v20, 2  ;;  %v2921_v57 = vrot.slane %v8645_v21, 2  ;;  %v8663_v13 = vsel %vm1531_vm3, %v2833_v59, %v2841_v5  ;;  %v2857_v0 = vsel %vm1531_vm3, %v2841_v5, %v2833_v59 }
 0x1cc   : > { %v2819_v34 = vadd.f32 %v2803_v61, %v2762_v14  ;;  %v2820_v19 = vadd.f32 %v2804_v39, %v2763_v26  ;;  %v3008_v48 = vpack.c.bf16 %v2994_v22, %v2993_v18  ;;  %v8668_v2 = vmul.f32 %v7603_v35, %v2857_v0  ;;  %v2778_v61 = vld [vmem:[#allocation2 + $0x78] sm:$0xff] }
 0x1cd   : > { %v2884_v60 = vmul.f32 %v8504_v41, %v8663_v13  ;;  %v8674_v33 = vsel %vm1616_vm5, %v2913_v24, %v2921_v57  ;;  %v2937_v45 = vsel %vm1616_vm5, %v2921_v57, %v2913_v24  ;;  %v2451_v62 = vmul.f32 %v8246_v42, %v8424_v15 }
 0x1ce   : > { %v2963_v6 = vmul.f32 %v8524_v56, %v8674_v33  ;;  %v2452_v58 = vmul.f32 %v8246_v42, %v8417_v10  ;;  %6953 = vmatmul.mubr.msk.bf16.vlgmr.msra.gmra.mrb[48].mxu1 %vm547_vm1, %v3008_v48  ;;  %v2883_v4 = vmul.f32 %v8504_v41, %v8668_v2  ;;  %v8688_v12 = vmul.f32 %v7633_v53, %v2937_v45 }
 0x1cf   : > { %v2900_v63 = vadd.f32 %v2884_v60, %v2820_v19  ;;  %v2531_v7 = vmul.f32 %v8348_v17, %v8430_v47  ;;  %v2467_v9 = vadd.f32 %v2451_v62, %v2371_v27  ;;  %v2532_v15 = vmul.f32 %v8348_v17, %v8442_v52  ;;  %3904 = vmatpush1.bf16.msra.mxu1 %v8360_v44 }
 0x1d0   : > { %v2468_v1 = vadd.f32 %v2452_v58, %v2372_v28  ;;  %v2588_v10 = vmul.f32 %v8366_v23, %v8569_v37  ;;  %v2899_v39 = vadd.f32 %v2883_v4, %v2819_v34  ;;  %v2964_v14 = vmul.f32 %v8524_v56, %v8688_v12  ;;  %3905 = vmatprep.subr.bf16.mxu1 %v8604_v32 }
 0x1d1   : > { %v2589_v26 = vmul.f32 %v8366_v23, %v8571_v25  ;;  %v2668_v47 = vmul.f32 %v8390_v11, %v8607_v40  ;;  %v2547_v27 = vadd.f32 %v2531_v7, %v2467_v9  ;;  %v2669_v28 = vmul.f32 %v8390_v11, %v8591_v46 }
 0x1d2   : > { %v2548_v52 = vadd.f32 %v2532_v15, %v2468_v1  ;;  %v2748_v44 = vmul.f32 %v8398_v54, %v8597_v43  ;;  %v2979_v59 = vadd.f32 %v2963_v6, %v2899_v39  ;;  %v2980_v5 = vadd.f32 %v2964_v14, %v2900_v63 }
 0x1d3   : > { %v2749_v18 = vmul.f32 %v8398_v54, %v8617_v36  ;;  %v8710_v22 = vunpack.c.l.bf16 %v2778_v61  ;;  %v2604_v24 = vadd.f32 %v2588_v10, %v2547_v27  ;;  %v8712_v34 = vunpack.c.h.bf16 %v2778_v61  ;;  %3906 = vmatpush1.bf16.msra.mxu1 %v8614_v29 }
 0x1d4   : > { %v2605_v57 = vadd.f32 %v2589_v26, %v2548_v52  ;;  %v2373_v32 = vmul.f32 %v8230_v8, %v8469_v50  ;;  %v2995_v19 = vadd.f32 %v8547_v55, %v2979_v59  ;;  %v2996_v0 = vadd.f32 %v8547_v55, %v2980_v5 }
 0x1d5   : > { %v2805_v48 = vmul.f32 %v8480_v51, %v8710_v22  ;;  %v2834_v60 = vrot.slane %v8710_v22, 6  ;;  %v2684_v45 = vadd.f32 %v2668_v47, %v2604_v24  ;;  %v2806_v62 = vmul.f32 %v8480_v51, %v8712_v34 }
 0x1d6   : > { %v2685_v6 = vadd.f32 %v2669_v28, %v2605_v57  ;;  %v2842_v58 = vrot.slane %v8712_v34, 6  ;;  %v3009_v4 = vpack.c.bf16 %v2996_v0, %v2995_v19  ;;  %v2914_v50 = vrot.slane %v8710_v22, 2 }
 0x1d7   : > { %v2922_v29 = vrot.slane %v8712_v34, 2  ;;  %v2374_v63 = vmul.f32 %v8230_v8, %v8471_v30  ;;  %v2764_v7 = vadd.f32 %v2748_v44, %v2684_v45  ;;  %v2453_v28 = vmul.f32 %v8246_v42, %v8499_v38  ;;  %v7157_v38 = vld [vmem:[%s10926_s9 + $0x24] ss:$8 sps:$4 sm:$0xff]  }
 0x1d8   : > { %v2765_v9 = vadd.f32 %v2749_v18, %v2685_v6  ;;  %v8731_v1 = vsel %vm1531_vm3, %v2834_v60, %v2842_v58  ;;  %v2858_v15 = vsel %vm1531_vm3, %v2842_v58, %v2834_v60  ;;  %6956 = vmatprep.mubr.msk.bf16.mxu1 %vm547_vm1, %v3009_v4  ;;  %v2454_v44 = vmul.f32 %v8246_v42, %v8491_v49  ;;  %v7155_v60 = vld [vmem:[%s10926_s9 + $0x20] ss:$8 sps:$4 sm:$0xff]  }
 0x1d9   : > { %v8737_v10 = vmul.f32 %v7603_v35, %v2858_v15  ;;  %v2886_v61 = vmul.f32 %v8504_v41, %v8731_v1  ;;  %v8743_v30 = vsel %vm1616_vm5, %v2914_v50, %v2922_v29  ;;  %v2938_v39 = vsel %vm1616_vm5, %v2922_v29, %v2914_v50  ;;  %4629 = vmatprep.subr.bf16.mxu0 %v7157_v38 }
 0x1da   : > { %v2821_v14 = vadd.f32 %v2805_v48, %v2764_v7  ;;  %v2822_v26 = vadd.f32 %v2806_v62, %v2765_v9  ;;  %v8748_v47 = vmul.f32 %v7633_v53, %v2938_v39  ;;  %v2965_v27 = vmul.f32 %v8524_v56, %v8743_v30  ;;  %v2779_v48 = vld [vmem:[#allocation2 + $0x80] sm:$0xff]  ;;  %4630 = vmatpush1.bf16.msra.mxu0 %v7155_v60 }
 0x1db   : > { %v2885_v52 = vmul.f32 %v8504_v41, %v8737_v10  ;;  %v2533_v59 = vmul.f32 %v8348_v17, %v8510_v3  ;;  %v2534_v24 = vmul.f32 %v8348_v17, %v8519_v31  ;;  %v2590_v57 = vmul.f32 %v8366_v23, %v8643_v20  ;;  %3907 = vmatprep.subr.bf16.mxu1 %v7157_v38 }
 0x1dc   : > { %v2902_v5 = vadd.f32 %v2886_v61, %v2822_v26  ;;  %v2966_v18 = vmul.f32 %v8524_v56, %v8748_v47  ;;  %v2469_v0 = vadd.f32 %v2453_v28, %v2373_v32  ;;  %v2470_v49 = vadd.f32 %v2454_v44, %v2374_v63  ;;  %3908 = vmatpush1.bf16.msra.mxu1 %v7155_v60 }
 0x1dd   : > { %v2901_v19 = vadd.f32 %v2885_v52, %v2821_v14  ;;  %v2591_v3 = vmul.f32 %v8366_v23, %v8645_v21  ;;  %v2670_v31 = vmul.f32 %v8390_v11, %v8668_v2  ;;  %v2671_v6 = vmul.f32 %v8390_v11, %v8663_v13 }
 0x1de   : > { %v2982_v45 = vadd.f32 %v2966_v18, %v2902_v5  ;;  %v2750_v62 = vmul.f32 %v8398_v54, %v8674_v33  ;;  %v2549_v58 = vadd.f32 %v2533_v59, %v2469_v0  ;;  %v2550_v4 = vadd.f32 %v2534_v24, %v2470_v49 }
 0x1df   : > { %v2981_v32 = vadd.f32 %v2965_v27, %v2901_v19  ;;  %v2751_v50 = vmul.f32 %v8398_v54, %v8688_v12  ;;  %v8783_v63 = vunpack.c.l.bf16 %v2779_v48  ;;  %v8785_v7 = vunpack.c.h.bf16 %v2779_v48 }
 0x1e0   : > { %v2998_v29 = vadd.f32 %v8547_v55, %v2982_v45  ;;  %v2375_v9 = vmul.f32 %v8230_v8, %v8569_v37  ;;  %v2606_v61 = vadd.f32 %v2590_v57, %v2549_v58  ;;  %v2607_v39 = vadd.f32 %v2591_v3, %v2550_v4 }
 0x1e1   : > { %v2997_v15 = vadd.f32 %v8547_v55, %v2981_v32  ;;  %v2376_v14 = vmul.f32 %v8230_v8, %v8571_v25  ;;  %v2807_v26 = vmul.f32 %v8480_v51, %v8783_v63  ;;  %v2808_v27 = vmul.f32 %v8480_v51, %v8785_v7 }
 0x1e2   : > { %v2835_v52 = vrot.slane %v8783_v63, 6  ;;  %v2843_v28 = vrot.slane %v8785_v7, 6  ;;  %v2686_v44 = vadd.f32 %v2670_v31, %v2606_v61  ;;  %v2687_v59 = vadd.f32 %v2671_v6, %v2607_v39  ;;  %v2780_v61 = vld [vmem:[#allocation2 + $0x88] sm:$0xff] }
 0x1e3   : > { %v3010_v37 = vpack.c.bf16 %v2998_v29, %v2997_v15  ;;  %v2915_v5 = vrot.slane %v8783_v63, 2  ;;  %v2923_v24 = vrot.slane %v8785_v7, 2  ;;  %v2455_v57 = vmul.f32 %v8246_v42, %v8607_v40 }
 0x1e4   : > { %v8801_v18 = vsel %vm1531_vm3, %v2835_v52, %v2843_v28  ;;  %v2859_v25 = vsel %vm1531_vm3, %v2843_v28, %v2835_v52  ;;  %v2766_v38 = vadd.f32 %v2750_v62, %v2686_v44  ;;  %v2767_v19 = vadd.f32 %v2751_v50, %v2687_v59 }
 0x1e5   : > { %6957 = vmatmul.mubr.msk.bf16.gmra.mrb[52].mxu1 %vm547_vm1, %v3010_v37  ;;  %v8810_v0 = vmul.f32 %v7603_v35, %v2859_v25  ;;  %v2888_v49 = vmul.f32 %v8504_v41, %v8801_v18  ;;  %v8816_v3 = vsel %vm1616_vm5, %v2915_v5, %v2923_v24  ;;  %v2939_v48 = vsel %vm1616_vm5, %v2923_v24, %v2915_v5 }
 0x1e6   : > { %v2456_v40 = vmul.f32 %v8246_v42, %v8591_v46  ;;  %v2471_v60 = vadd.f32 %v2455_v57, %v2375_v9  ;;  %v2823_v45 = vadd.f32 %v2807_v26, %v2766_v38  ;;  %v2824_v31 = vadd.f32 %v2808_v27, %v2767_v19 }
 0x1e7   : > { %v2887_v6 = vmul.f32 %v8504_v41, %v8810_v0  ;;  %v8825_v62 = vmul.f32 %v7633_v53, %v2939_v48  ;;  %v2967_v32 = vmul.f32 %v8524_v56, %v8816_v3  ;;  %v2535_v4 = vmul.f32 %v8348_v17, %v8597_v43 }
 0x1e8   : > { %v2472_v58 = vadd.f32 %v2456_v40, %v2376_v14  ;;  %v2536_v50 = vmul.f32 %v8348_v17, %v8617_v36  ;;  %v2904_v29 = vadd.f32 %v2888_v49, %v2824_v31  ;;  %v2592_v15 = vmul.f32 %v8366_v23, %v8710_v22 }
 0x1e9   : > { %v2903_v46 = vadd.f32 %v2887_v6, %v2823_v45  ;;  %v2968_v9 = vmul.f32 %v8524_v56, %v8825_v62  ;;  %v2551_v39 = vadd.f32 %v2535_v4, %v2471_v60  ;;  %v2593_v14 = vmul.f32 %v8366_v23, %v8712_v34 }
 0x1ea   : > { %v2552_v26 = vadd.f32 %v2536_v50, %v2472_v58  ;;  %v2672_v43 = vmul.f32 %v8390_v11, %v8737_v10  ;;  %v2673_v36 = vmul.f32 %v8390_v11, %v8731_v1  ;;  %v2752_v28 = vmul.f32 %v8398_v54, %v8743_v30 }
 0x1eb   : > { %v2983_v27 = vadd.f32 %v2967_v32, %v2903_v46  ;;  %v2984_v52 = vadd.f32 %v2968_v9, %v2904_v29  ;;  %v2608_v37 = vadd.f32 %v2592_v15, %v2551_v39  ;;  %v2753_v59 = vmul.f32 %v8398_v54, %v8748_v47 }
 0x1ec   : > { %v2609_v44 = vadd.f32 %v2593_v14, %v2552_v26  ;;  %v8847_v5 = vunpack.c.l.bf16 %v2780_v61  ;;  %v8851_v57 = vunpack.c.h.bf16 %v2780_v61  ;;  %v2377_v38 = vmul.f32 %v8230_v8, %v8643_v20 }
 0x1ed   : > { %v2999_v25 = vadd.f32 %v8547_v55, %v2983_v27  ;;  %v3000_v24 = vadd.f32 %v8547_v55, %v2984_v52  ;;  %v2688_v19 = vadd.f32 %v2672_v43, %v2608_v37  ;;  %v2378_v20 = vmul.f32 %v8230_v8, %v8645_v21 }
 0x1ee   : > { %v2689_v49 = vadd.f32 %v2673_v36, %v2609_v44  ;;  %v2809_v48 = vmul.f32 %v8480_v51, %v8847_v5  ;;  %v2836_v40 = vrot.slane %v8847_v5, 6  ;;  %v2810_v45 = vmul.f32 %v8480_v51, %v8851_v57  ;;  %v2781_v44 = vld [vmem:[#allocation2 + $0x90] sm:$0xff] }
 0x1ef   : > { %v3011_v60 = vpack.c.bf16 %v3000_v24, %v2999_v25  ;;  %v2844_v31 = vrot.slane %v8851_v57, 6  ;;  %v2916_v6 = vrot.slane %v8847_v5, 2  ;;  %v2768_v32 = vadd.f32 %v2752_v28, %v2688_v19 }
 0x1f0   : > { %v2769_v58 = vadd.f32 %v2753_v59, %v2689_v49  ;;  %v2924_v4 = vrot.slane %v8851_v57, 2  ;;  %v2457_v29 = vmul.f32 %v8246_v42, %v8668_v2  ;;  %v2458_v9 = vmul.f32 %v8246_v42, %v8663_v13 }
 0x1f1   : > { %6960 = vmatprep.mubr.msk.bf16.mxu1 %vm547_vm1, %v3011_v60  ;;  %v8868_v50 = vsel %vm1531_vm3, %v2836_v40, %v2844_v31  ;;  %v2860_v46 = vsel %vm1531_vm3, %v2844_v31, %v2836_v40  ;;  %v2825_v15 = vadd.f32 %v2809_v48, %v2768_v32  ;;  %v2537_v52 = vmul.f32 %v8348_v17, %v8674_v33  ;;  %v7161_v32 = vld [vmem:[%s10926_s9 + $0x40] ss:$8 sps:$4 sm:$0xff]  }
 0x1f2   : > { %v2826_v61 = vadd.f32 %v2810_v45, %v2769_v58  ;;  %v8877_v39 = vmul.f32 %v7603_v35, %v2860_v46  ;;  %v2890_v8 = vmul.f32 %v8504_v41, %v8868_v50  ;;  %v8883_v21 = vsel %vm1616_vm5, %v2916_v6, %v2924_v4 }
 0x1f3   : > { %v2940_v26 = vsel %vm1616_vm5, %v2924_v4, %v2916_v6  ;;  %v2473_v14 = vadd.f32 %v2457_v29, %v2377_v38  ;;  %v2474_v2 = vadd.f32 %v2458_v9, %v2378_v20  ;;  %v2969_v27 = vmul.f32 %v8524_v56, %v8883_v21  ;;  %v7184_v6 = vld [vmem:[%s10920_s3 + $0x1] ss:$0 sm:$0xff] }
 0x1f4   : > { %v2889_v42 = vmul.f32 %v8504_v41, %v8877_v39  ;;  %v2906_v13 = vadd.f32 %v2890_v8, %v2826_v61  ;;  %v8890_v43 = vmul.f32 %v7633_v53, %v2940_v26  ;;  %v2538_v36 = vmul.f32 %v8348_v17, %v8688_v12  ;;  %v7158_v12 = vld [vmem:[%s10926_s9 + $0x30] ss:$8 sps:$4 sm:$0xff]  }
 0x1f5   : > { %v2594_v28 = vmul.f32 %v8366_v23, %v8783_v63  ;;  %v2595_v37 = vmul.f32 %v8366_v23, %v8785_v7  ;;  %v2674_v24 = vmul.f32 %v8390_v11, %v8810_v0  ;;  %v2675_v33 = vmul.f32 %v8390_v11, %v8801_v18  ;;  %v7160_v63 = vld [vmem:[%s10926_s9 + $0x34] ss:$8 sps:$4 sm:$0xff]   ;;  %v7163_v18 = vld [vmem:[%s10926_s9 + $0x44] ss:$8 sps:$4 sm:$0xff]  }
 0x1f6   : > { %v2905_v59 = vadd.f32 %v2889_v42, %v2825_v15  ;;  %v2970_v25 = vmul.f32 %v8524_v56, %v8890_v43  ;;  %v2553_v7 = vadd.f32 %v2537_v52, %v2473_v14  ;;  %v2554_v38 = vadd.f32 %v2538_v36, %v2474_v2  ;;  %3909 = vmatprep.subr.bf16.mxu1 %v7160_v63  ;;  %v7185_v14 = vld [vmem:[%s10920_s3] ss:$0 sm:$0xff]  ;;  %v7164_v36 = vld [vmem:[%s10926_s9 + $0x50] ss:$8 sps:$4 sm:$0xff]  }
 0x1f7   : > { %v2754_v19 = vmul.f32 %v8398_v54, %v8816_v3  ;;  %v2755_v49 = vmul.f32 %v8398_v54, %v8825_v62  ;;  %v2795_v40 = vunpack.c.l.bf16 %v2781_v44  ;;  %v2796_v60 = vunpack.c.h.bf16 %v2781_v44  ;;  %4631 = vmatprep.subr.bf16.mxu0 %v7160_v63  ;;  %3910 = vmatpush1.bf16.msra.mxu1 %v7158_v12 }
 0x1f8   : > { %v2985_v0 = vadd.f32 %v2969_v27, %v2905_v59  ;;  %v2986_v48 = vadd.f32 %v2970_v25, %v2906_v13  ;;  %v2610_v45 = vadd.f32 %v2594_v28, %v2553_v7  ;;  %v2611_v31 = vadd.f32 %v2595_v37, %v2554_v38  ;;  %3911 = vmatprep.subr.bf16.mxu1 %v7163_v18 }
 0x1f9   : > { %v2379_v3 = vmul.f32 %v7184_v6, %v8710_v22  ;;  %v2380_v62 = vmul.f32 %v7184_v6, %v8712_v34  ;;  %v2811_v20 = vmul.f32 %v8480_v51, %v2795_v40  ;;  %v2812_v46 = vmul.f32 %v8480_v51, %v2796_v60  ;;  %4632 = vmatpush1.bf16.msra.mxu0 %v7158_v12  ;;  %v7166_v34 = vld [vmem:[%s10926_s9 + $0x54] ss:$8 sps:$4 sm:$0xff]  }
 0x1fa   : > { %v3001_v58 = vadd.f32 %v8547_v55, %v2985_v0  ;;  %v3002_v4 = vadd.f32 %v8547_v55, %v2986_v48  ;;  %v2690_v29 = vadd.f32 %v2674_v24, %v2610_v45  ;;  %v2691_v9 = vadd.f32 %v2675_v33, %v2611_v31  ;;  %4633 = vmatprep.subr.bf16.mxu0 %v7163_v18  ;;  %v2782_v45 = vld [vmem:[#allocation2 + $0x98] sm:$0xff] }
 0x1fb   : > { %v2837_v15 = vrot.slane %v2795_v40, 6  ;;  %v2845_v22 = vrot.slane %v2796_v60, 6  ;;  %v2917_v8 = vrot.slane %v2795_v40, 2  ;;  %v2925_v26 = vrot.slane %v2796_v60, 2  ;;  %3912 = vmatpush1.bf16.msra.mxu1 %v7161_v32 }
 0x1fc   : > { %v3012_v61 = vpack.c.bf16 %v3002_v4, %v3001_v58  ;;  %v2459_v2 = vmul.f32 %v7185_v14, %v8737_v10  ;;  %v2770_v42 = vadd.f32 %v2754_v19, %v2690_v29  ;;  %v2771_v13 = vadd.f32 %v2755_v49, %v2691_v9  ;;  %3913 = vmatprep.subr.bf16.mxu1 %v7166_v34 }
 0x1fd   : > { %v2853_v27 = vsel %vm1531_vm3, %v2837_v15, %v2845_v22  ;;  %v2861_v52 = vsel %vm1531_vm3, %v2845_v22, %v2837_v15  ;;  %v2933_v37 = vsel %vm1616_vm5, %v2917_v8, %v2925_v26  ;;  %v2941_v44 = vsel %vm1616_vm5, %v2925_v26, %v2917_v8  ;;  %4634 = vmatpush1.bf16.msra.mxu0 %v7161_v32 }
 0x1fe   : > { %6961 = vmatmul.mubr.msk.bf16.gmra.mrb[56].mxu1 %vm547_vm1, %v3012_v61  ;;  %v2875_v28 = vmul.f32 %v7603_v35, %v2861_v52  ;;  %v2892_v10 = vmul.f32 %v8504_v41, %v2853_v27  ;;  %v2827_v59 = vadd.f32 %v2811_v20, %v2770_v42  ;;  %v2828_v25 = vadd.f32 %v2812_v46, %v2771_v13 }
 0x1ff   : > { %v2956_v24 = vmul.f32 %v7633_v53, %v2941_v44  ;;  %v2971_v33 = vmul.f32 %v8524_v56, %v2933_v37  ;;  %v2460_v63 = vmul.f32 %v7185_v14, %v8731_v1  ;;  %v2475_v7 = vadd.f32 %v2459_v2, %v2379_v3  ;;  %3914 = vmatpush1.bf16.msra.mxu1 %v7164_v36 }
 0x200   : > { %v2891_v12 = vmul.f32 %v8504_v41, %v2875_v28  ;;  %v2539_v38 = vmul.f32 %v8348_v17, %v8743_v30  ;;  %v2908_v19 = vadd.f32 %v2892_v10, %v2828_v25  ;;  %v2540_v18 = vmul.f32 %v8348_v17, %v8748_v47  ;;  %4635 = vmatprep.subr.bf16.mxu0 %v7166_v34 }
 0x201   : > { %v2972_v49 = vmul.f32 %v8524_v56, %v2956_v24  ;;  %v2596_v0 = vmul.f32 %v8366_v23, %v8847_v5  ;;  %v2476_v40 = vadd.f32 %v2460_v63, %v2380_v62  ;;  %v2597_v1 = vmul.f32 %v8366_v23, %v8851_v57  ;;  %v7167_v62 = vld [vmem:[%s10926_s9 + $0x60] ss:$8 sps:$4 sm:$0xff]   ;;  %v7169_v23 = vld [vmem:[%s10926_s9 + $0x64] ss:$8 sps:$4 sm:$0xff]   ;;  %4636 = vmatpush1.bf16.msra.mxu0 %v7164_v36 }
 0x202   : > { %v2907_v48 = vadd.f32 %v2891_v12, %v2827_v59  ;;  %v2555_v60 = vadd.f32 %v2539_v38, %v2475_v7  ;;  %v2676_v31 = vmul.f32 %v8390_v11, %v8877_v39  ;;  %v2677_v6 = vmul.f32 %v8390_v11, %v8868_v50  ;;  %3915 = vmatprep.subr.bf16.mxu1 %v7169_v23 }
 0x203   : > { %v2988_v30 = vadd.f32 %v2972_v49, %v2908_v19  ;;  %v2556_v47 = vadd.f32 %v2540_v18, %v2476_v40  ;;  %v2756_v5 = vmul.f32 %v8398_v54, %v8883_v21  ;;  %v2757_v11 = vmul.f32 %v8398_v54, %v8890_v43  ;;  %4637 = vmatprep.subr.bf16.mxu0 %v7169_v23  ;;  %v11039_v40 = vld [vmem:[#allocation17_spill] sm:$0xff] }
 0x204   : > { %v2987_v17 = vadd.f32 %v2971_v33, %v2907_v48  ;;  %v2612_v3 = vadd.f32 %v2596_v0, %v2555_v60  ;;  %v2797_v50 = vunpack.c.l.bf16 %v2782_v45  ;;  %v2798_v39 = vunpack.c.h.bf16 %v2782_v45  ;;  %3916 = vmatpush1.bf16.msra.mxu1 %v7167_v62 }
 0x205   : > { %v3004_v57 = vadd.f32 %v8547_v55, %v2988_v30  ;;  %v2613_v58 = vadd.f32 %v2597_v1, %v2556_v47  ;;  %4638 = vmatpush1.bf16.msra.mxu0 %v7167_v62  ;;  %v11038_v33 = vmov 0   ;;  %vm3187_vm7 = vcmp.lt.s32.totalorder %v11039_v40, 12  ;;  %v9046_v62 = vld [vmem:[%s10924_s7 + $0x1] ss:$0 sm:$0xff] }
 0x206   : > { %v3003_v32 = vadd.f32 %v8547_v55, %v2987_v17  ;;  %v2692_v21 = vadd.f32 %v2676_v31, %v2612_v3  ;;  %v2813_v4 = vmul.f32 %v8480_v51, %v2797_v50  ;;  %v2814_v20 = vmul.f32 %v8480_v51, %v2798_v39 }
 0x207   : > { %v2838_v46 = vrot.slane %v2797_v50, 6  ;;  %v2846_v29 = vrot.slane %v2798_v39, 6  ;;  %v2693_v15 = vadd.f32 %v2677_v6, %v2613_v58  ;;  %v2918_v34 = vrot.slane %v2797_v50, 2 }
 0x208   : > { %v3013_v9 = vpack.c.bf16 %v3004_v57, %v3003_v32  ;;  %v2772_v22 = vadd.f32 %v2756_v5, %v2692_v21  ;;  %v2926_v61 = vrot.slane %v2798_v39, 2  ;;  %v11040_v17 = vmov 0.0   ;;  %v9041_v5 = vld [vmem:[%s10924_s7] ss:$0 sm:$0xff] }
 0x209   : > { %v2854_v54 = vsel %vm1531_vm3, %v2838_v46, %v2846_v29  ;;  %v2862_v43 = vsel %vm1531_vm3, %v2846_v29, %v2838_v46  ;;  %v2773_v8 = vadd.f32 %v2757_v11, %v2693_v15  ;;  %v9032_v47 = vsel %vm3180_vm6, 1.0, %v11040_v17 }
 0x20a   : > { %6964 = vmatprep.mubr.msk.bf16.mxu1 %vm547_vm1, %v3013_v9  ;;  %v2829_v26 = vadd.f32 %v2813_v4, %v2772_v22  ;;  %v2877_v51 = vmul.f32 %v7603_v35, %v2862_v43  ;;  %v2894_v14 = vmul.f32 %v8504_v41, %v2854_v54  ;;  %v2934_v2 = vsel %vm1616_vm5, %v2918_v34, %v2926_v61  ;;  %v9069_v4 = vld [vmem:[%s10924_s7 + $0x2] ss:$0 sm:$0xff] }
 0x20b   : > { %v2942_v42 = vsel %vm1616_vm5, %v2926_v61, %v2918_v34  ;;  %v2830_v13 = vadd.f32 %v2814_v20, %v2773_v8  ;;  %v2973_v36 = vmul.f32 %v8524_v56, %v2934_v2  ;;  %v9035_v3 = vsel %vm3187_vm7, 1.0, %v11040_v17  ;;  %v9314_v17 = vld [vmem:[%s10924_s7 + $0x8] ss:$0 sm:$0xff] }
 0x20c   : > { %v2893_v27 = vmul.f32 %v8504_v41, %v2877_v51  ;;  %v2958_v52 = vmul.f32 %v7633_v53, %v2942_v42  ;;  %v7170_v41 = vld [vmem:[%s10926_s9 + $0x70] ss:$8 sps:$4 sm:$0xff]   ;;  %v7172_v53 = vld [vmem:[%s10926_s9 + $0x74] ss:$8 sps:$4 sm:$0xff]   ;;  %11047 = vst [vmem:[#allocation27_spill] sm:$0xff] %v9314_v17  ;;  %vm7263_vm3 = vmmov 0  }
 0x20d   : > { %v2910_v10 = vadd.f32 %v2894_v14, %v2830_v13  ;;  %3917 = vmatprep.subr.bf16.mxu1 %v7172_v53  ;;  %4639 = vmatprep.subr.bf16.mxu0 %v7172_v53 }
 0x20e   : > { %v2909_v28 = vadd.f32 %v2893_v27, %v2829_v26  ;;  %v2974_v37 = vmul.f32 %v8524_v56, %v2958_v52  ;;  %3918 = vmatpush1.bf16.msra.mxu1 %v7170_v41  ;;  %4640 = vmatpush1.bf16.msra.mxu0 %v7170_v41 }
 0x210   : > { %v2989_v35 = vadd.f32 %v2973_v36, %v2909_v28  ;;  %v2990_v44 = vadd.f32 %v2974_v37, %v2910_v10  ;;  %v9112_v37 = vunpack.c.l.bf16 %v11038_v33 }
 0x212   : > { %v3005_v59 = vadd.f32 %v8547_v55, %v2989_v35  ;;  %v3006_v25 = vadd.f32 %v8547_v55, %v2990_v44  ;;  %v9013_v55 = vld [vmem:[%s10923_s6] ss:$0 sm:$0xff]  ;;  %11041 = vst [vmem:[#allocation14_spill] sm:$0xff] %v9112_v37  ;;  %v9115_v35 = vunpack.c.h.bf16 %v11038_v33 }
 0x214   : > { %v3014_v24 = vpack.c.bf16 %v3006_v25, %v3005_v59  ;;  %11042 = vst [vmem:[#allocation20_spill] sm:$0xff] %v9115_v35  ;;  %v3252_v25 = vrot.slane %v9112_v37, 4 }
 0x216   : > { %6965 = vmatmul.mubr.msk.bf16.gmra.mrb[60].mxu1 %vm547_vm1, %v3014_v24  ;;  %v3260_v24 = vrot.slane %v9115_v35, 4  ;;  %vm5770_vm1 = vcmask 1047559  }
 0x217   : > { %3935 = vmatprep.mubr.bf16.mxu1 %v11038_v33 }
 0x22b   : > { %v6930_v56 = vpop.f32.mrb[32].mxu1 }
 0x22c   : > { %v2260_v12 = vpop.f32.mrb[33].mxu1  ;;  %v2269_v7 = vadd.f32 %v6930_v56, %v9013_v55 }
 0x22d   : > { %v6931_v63 = vpop.f32.mrb[34].mxu1  ;;  %v2261_v49 = vadd.f32 %v9013_v55, %v2260_v12 }
 0x22e   : > { %v2272_v38 = vadd.f32 %v6931_v63, %v9013_v55  ;;  %v2263_v19 = vpop.f32.mrb[35].mxu1 }
 0x22f   : > { %v2264_v18 = vadd.f32 %v9013_v55, %v2263_v19  ;;  %v3277_v19 = vsel %vm3268_vm8, %v3260_v24, %v3252_v25 }
 0x230   : > { %v2324_v0 = vpack.c.bf16 %v2272_v38, %v2269_v7 }
 0x231   : > { %v2323_v48 = vpack.c.bf16 %v2264_v18, %v2261_v49 }
 0x232   : > { %v9021_v60 = vunpack.c.l.bf16 %v2324_v0  ;;  %v9023_v1 = vunpack.c.h.bf16 %v2324_v0 }
 0x233   : > { %v9025_v45 = vunpack.c.l.bf16 %v2323_v48  ;;  %v9027_v30 = vunpack.c.h.bf16 %v2323_v48  ;;  %v9129_v48 = vsel %vm3268_vm8, %v3252_v25, %v3260_v24 }
 0x234   : > { %v3257_v31 = vrot.slane %v9021_v60, 4  ;;  %v3265_v6 = vrot.slane %v9023_v1, 4  ;;  %v3231_v39 = vmul.f32 %v9046_v62, %v9023_v1  ;;  %v3230_v46 = vmul.f32 %v9046_v62, %v9021_v60  ;;  %11043 = vst [vmem:[#allocation15_spill] sm:$0xff] %v9129_v48 }
 0x235   : > { %v3256_v11 = vrot.slane %v9025_v45, 4  ;;  %v3264_v50 = vrot.slane %v9027_v30, 4  ;;  %v3229_v22 = vmul.f32 %v9046_v62, %v9027_v30  ;;  %v3228_v42 = vmul.f32 %v9046_v62, %v9025_v45 }
 0x236   : > { %v9050_v23 = vsel %vm3268_vm8, %v3257_v31, %v3265_v6  ;;  %v3282_v57 = vsel %vm3268_vm8, %v3265_v6, %v3257_v31  ;;  %v9132_v31 = vmul.f32 %v9032_v47, %v3277_v19  ;;  %v3357_v24 = vmul.f32 %v9069_v4, %v9129_v48 }
 0x237   : > { %v9059_v32 = vmul.f32 %v9032_v47, %v3282_v57  ;;  %v3316_v58 = vmul.f32 %v9041_v5, %v9050_v23  ;;  %v9064_v21 = vmul.f32 %v9035_v3, %v3282_v57  ;;  %v9073_v20 = vsel %vm3268_vm8, %v3256_v11, %v3264_v50 }
 0x238   : > { %v3281_v34 = vsel %vm3268_vm8, %v3264_v50, %v3256_v11  ;;  %v3314_v54 = vmul.f32 %v9041_v5, %v9073_v20  ;;  %v3367_v61 = vmul.f32 %v9069_v4, %v9050_v23  ;;  %v3365_v36 = vmul.f32 %v9069_v4, %v9073_v20  ;;  %11044 = vst [vmem:[#allocation18_spill] sm:$0xff] %v9132_v31 }
 0x239   : > { %v3315_v29 = vmul.f32 %v9041_v5, %v9059_v32  ;;  %v3332_v9 = vadd.f32 %v3316_v58, %v3231_v39  ;;  %v3368_v15 = vmul.f32 %v9069_v4, %v9064_v21  ;;  %v9092_v26 = vmul.f32 %v9032_v47, %v3281_v34 }
 0x23a   : > { %v3330_v51 = vadd.f32 %v3314_v54, %v3229_v22  ;;  %v9095_v14 = vmul.f32 %v9035_v3, %v3281_v34  ;;  %v3221_v11 = vmul.f32 %v9046_v62, %v9115_v35  ;;  %v3306_v50 = vmul.f32 %v9041_v5, %v9129_v48 }
 0x23b   : > { %v3331_v43 = vadd.f32 %v3315_v29, %v3230_v46  ;;  %v9089_v8 = vadd.f32 %v3368_v15, %v3332_v9  ;;  %v3313_v13 = vmul.f32 %v9041_v5, %v9092_v26  ;;  %v9140_v39 = vmul.f32 %v9035_v3, %v3277_v19 }
 0x23c   : > { %v3366_v27 = vmul.f32 %v9069_v4, %v9095_v14  ;;  %v3220_v34 = vmul.f32 %v9046_v62, %v9112_v37  ;;  %v3305_v54 = vmul.f32 %v9041_v5, %v9132_v31 }
 0x23d   : > { %v9097_v2 = vadd.f32 %v3367_v61, %v3331_v43  ;;  %v3329_v52 = vadd.f32 %v3313_v13, %v3228_v42  ;;  %11045 = vst [vmem:[#allocation19_spill] sm:$0xff] %v9140_v39  ;;  %v3322_v13 = vadd.f32 %v3306_v50, %v3221_v11 }
 0x23e   : > { %v9107_v28 = vadd.f32 %v3366_v27, %v3330_v51  ;;  %v3358_v27 = vmul.f32 %v9069_v4, %v9140_v39  ;;  %v3321_v25 = vadd.f32 %v3305_v54, %v3220_v34 }
 0x23f   : > { %v9109_v10 = vadd.f32 %v3365_v36, %v3329_v52 }
 0x248   : > { %v6934_v44 = vpop.f32.mrb[36].mxu1 }
 0x249   : > { %v2276_v59 = vpop.f32.mrb[37].mxu1  ;;  %v2285_v53 = vadd.f32 %v6934_v44, %v9013_v55 }
 0x24a   : > { %v6935_v41 = vpop.f32.mrb[38].mxu1  ;;  %v2277_v63 = vadd.f32 %v9013_v55, %v2276_v59  ;;  %v9176_v59 = vld [vmem:[%s10924_s7 + $0x4] ss:$0 sm:$0xff] }
 0x24b   : > { %v2288_v56 = vadd.f32 %v6935_v41, %v9013_v55  ;;  %v2279_v12 = vpop.f32.mrb[39].mxu1  ;;  %v3417_v19 = vmul.f32 %v9176_v59, %v9025_v45 }
 0x24c   : > { %v2280_v7 = vadd.f32 %v9013_v55, %v2279_v12  ;;  %v9189_v12 = vld [vmem:[%s10924_s7 + $0x3] ss:$0 sm:$0xff] }
 0x24d   : > { %v2326_v38 = vpack.c.bf16 %v2288_v56, %v2285_v53  ;;  %v9182_v53 = vadd.f32 %v3358_v27, %v3322_v13  ;;  %v3420_v56 = vmul.f32 %v9176_v59, %v9023_v1  ;;  %v3503_v1 = vmul.f32 %v9189_v12, %v9059_v32  ;;  %v9217_v32 = vld [vmem:[%s10924_s7 + $0x5] ss:$0 sm:$0xff] }
 0x24e   : > { %v2325_v49 = vpack.c.bf16 %v2280_v7, %v2277_v63  ;;  %v9191_v63 = vadd.f32 %v3357_v24, %v3321_v25  ;;  %v3419_v7 = vmul.f32 %v9176_v59, %v9021_v60  ;;  %v3501_v11 = vmul.f32 %v9189_v12, %v9092_v26 }
 0x24f   : > { %v9125_v18 = vunpack.c.l.bf16 %v2326_v38  ;;  %v3215_v0 = vunpack.c.h.bf16 %v2326_v38  ;;  %v3418_v38 = vmul.f32 %v9176_v59, %v9027_v30  ;;  %v3502_v45 = vmul.f32 %v9189_v12, %v9073_v20 }
 0x250   : > { %v9206_v50 = vunpack.c.l.bf16 %v2325_v49  ;;  %v9208_v60 = vunpack.c.h.bf16 %v2325_v49  ;;  %v3435_v30 = vadd.f32 %v3419_v7, %v9191_v63  ;;  %v3556_v49 = vmul.f32 %v9217_v32, %v9064_v21 }
 0x251   : > { %v3259_v6 = vrot.slane %v9125_v18, 4  ;;  %v3267_v57 = vrot.slane %v3215_v0, 4  ;;  %v3235_v29 = vmul.f32 %v9046_v62, %v3215_v0  ;;  %v3234_v43 = vmul.f32 %v9046_v62, %v9125_v18 }
 0x252   : > { %v3554_v13 = vmul.f32 %v9217_v32, %v9095_v14  ;;  %v3424_v27 = vmul.f32 %v9176_v59, %v3215_v0  ;;  %v3553_v25 = vmul.f32 %v9217_v32, %v9073_v20 }
 0x253   : > { %v9144_v58 = vsel %vm3268_vm8, %v3259_v6, %v3267_v57  ;;  %v3284_v46 = vsel %vm3268_vm8, %v3267_v57, %v3259_v6  ;;  %v3436_v6 = vadd.f32 %v3420_v56, %v9182_v53  ;;  %v3504_v57 = vmul.f32 %v9189_v12, %v9050_v23 }
 0x254   : > { %v9150_v9 = vmul.f32 %v9032_v47, %v3284_v46  ;;  %v3320_v15 = vmul.f32 %v9041_v5, %v9144_v58  ;;  %v9155_v22 = vmul.f32 %v9035_v3, %v3284_v46  ;;  %v3371_v36 = vmul.f32 %v9069_v4, %v9144_v58 }
 0x255   : > { %v3434_v46 = vadd.f32 %v3418_v38, %v9182_v53  ;;  %v3520_v26 = vadd.f32 %v3504_v57, %v3436_v6  ;;  %v9249_v57 = vmul.f32 %v9176_v59, %v9125_v18 }
 0x256   : > { %v3319_v61 = vmul.f32 %v9041_v5, %v9150_v9  ;;  %v3336_v51 = vadd.f32 %v3320_v15, %v3235_v29  ;;  %v3372_v42 = vmul.f32 %v9069_v4, %v9155_v22  ;;  %v3433_v29 = vadd.f32 %v3417_v19, %v9191_v63 }
 0x257   : > { %v3519_v15 = vadd.f32 %v3503_v1, %v3435_v30  ;;  %v9237_v14 = vadd.f32 %v3556_v49, %v3520_v26 }
 0x258   : > { %v3335_v52 = vadd.f32 %v3319_v61, %v3234_v43  ;;  %v9171_v44 = vadd.f32 %v3372_v42, %v3336_v51  ;;  %v3517_v54 = vadd.f32 %v3501_v11, %v3433_v29  ;;  %v3258_v43 = vrot.slane %v9206_v50, 4  ;;  %v9265_v29 = vld [vmem:[%s10924_s7 + $0x7] ss:$0 sm:$0xff] }
 0x259   : > { %v3266_v61 = vrot.slane %v9208_v60, 4  ;;  %v3518_v42 = vadd.f32 %v3502_v45, %v3434_v46  ;;  %v9252_v11 = vadd.f32 %v3424_v27, %v9182_v53  ;;  %v9256_v46 = vmul.f32 %v9189_v12, %v9150_v9 }
 0x25a   : > { %v9180_v41 = vadd.f32 %v3371_v36, %v3335_v52  ;;  %v3555_v36 = vmul.f32 %v9217_v32, %v9050_v23  ;;  %v3569_v0 = vadd.f32 %v3553_v25, %v3517_v54  ;;  %v9260_v45 = vmul.f32 %v9189_v12, %v9144_v58 }
 0x25b   : > { %v9241_v23 = vsel %vm3268_vm8, %v3258_v43, %v3266_v61  ;;  %v9245_v20 = vsel %vm3268_vm8, %v3266_v61, %v3258_v43  ;;  %v3570_v1 = vadd.f32 %v3554_v13, %v3518_v42 }
 0x25c   : > { %v9235_v19 = vadd.f32 %v3555_v36, %v3519_v15  ;;  %v9269_v26 = vmul.f32 %v9032_v47, %v9245_v20 }
 0x264   : > { %v6938_v34 = vpop.f32.mrb[40].mxu1 }
 0x265   : > { %v2292_v51 = vpop.f32.mrb[41].mxu1  ;;  %v2301_v21 = vadd.f32 %v6938_v34, %v9013_v55  ;;  %v9273_v34 = vmul.f32 %v9041_v5, %v9241_v23 }
 0x266   : > { %v6939_v52 = vpop.f32.mrb[42].mxu1  ;;  %v2293_v7 = vadd.f32 %v9013_v55, %v2292_v51 }
 0x267   : > { %v2304_v24 = vadd.f32 %v6939_v52, %v9013_v55  ;;  %v2295_v56 = vpop.f32.mrb[43].mxu1 }
 0x268   : > { %v2296_v38 = vadd.f32 %v9013_v55, %v2295_v56 }
 0x269   : > { %v2328_v6 = vpack.c.bf16 %v2304_v24, %v2301_v21 }
 0x26a   : > { %v2327_v30 = vpack.c.bf16 %v2296_v38, %v2293_v7 }
 0x26b   : > { %v3407_v15 = vunpack.c.l.bf16 %v2328_v6  ;;  %v3408_v18 = vunpack.c.h.bf16 %v2328_v6 }
 0x26c   : > { %v3405_v9 = vunpack.c.l.bf16 %v2327_v30  ;;  %v3406_v49 = vunpack.c.h.bf16 %v2327_v30 }
 0x26d   : > { %v3427_v54 = vmul.f32 %v9176_v59, %v3407_v15  ;;  %v3428_v43 = vmul.f32 %v9176_v59, %v3408_v18  ;;  %v3454_v61 = vrot.slane %v3407_v15, 4  ;;  %v3462_v51 = vrot.slane %v3408_v18, 4 }
 0x26e   : > { %v3616_v42 = vmul.f32 %v9265_v29, %v3407_v15  ;;  %v3617_v13 = vmul.f32 %v9265_v29, %v3408_v18  ;;  %v4074_v27 = vmul.f32 %v9046_v62, %v3407_v15  ;;  %v4075_v52 = vmul.f32 %v9046_v62, %v3408_v18 }
 0x26f   : > { %v9282_v36 = vadd.f32 %v3427_v54, %v9097_v2  ;;  %v9285_v25 = vadd.f32 %v3428_v43, %v9089_v8  ;;  %v9289_v21 = vsel %vm3268_vm8, %v3454_v61, %v3462_v51  ;;  %v3478_v24 = vsel %vm3268_vm8, %v3462_v51, %v3454_v61  ;;  %v9303_v8 = vld [vmem:[%s10924_s7 + $0x6] ss:$0 sm:$0xff] }
 0x270   : > { %v9294_v56 = vmul.f32 %v9032_v47, %v3478_v24  ;;  %v4155_v7 = vmul.f32 %v9041_v5, %v9289_v21  ;;  %v3425_v38 = vmul.f32 %v9176_v59, %v3405_v9  ;;  %v3426_v2 = vmul.f32 %v9176_v59, %v3406_v49  ;;  %11046 = vst [vmem:[#allocation29_spill] sm:$0xff] %v9303_v8 }
 0x271   : > { %v3453_v6 = vrot.slane %v3405_v9, 4  ;;  %v3461_v30 = vrot.slane %v3406_v49, 4  ;;  %v3614_v15 = vmul.f32 %v9265_v29, %v3405_v9  ;;  %v3615_v18 = vmul.f32 %v9265_v29, %v3406_v49 }
 0x272   : > { %v4154_v54 = vmul.f32 %v9041_v5, %v9294_v56  ;;  %v4171_v43 = vadd.f32 %v4155_v7, %v4075_v52  ;;  %v3441_v61 = vadd.f32 %v3425_v38, %v9109_v10  ;;  %v3442_v51 = vadd.f32 %v3426_v2, %v9107_v28 }
 0x273   : > { %v3469_v40 = vsel %vm3268_vm8, %v3453_v6, %v3461_v30  ;;  %v3477_v39 = vsel %vm3268_vm8, %v3461_v30, %v3453_v6  ;;  %v3630_v31 = vadd.f32 %v3614_v15, %v3569_v0  ;;  %v3631_v48 = vadd.f32 %v3615_v18, %v3570_v1 }
 0x274   : > { %v4170_v35 = vadd.f32 %v4154_v54, %v4074_v27  ;;  %v3489_v52 = vmul.f32 %v9032_v47, %v3477_v39  ;;  %v3542_v10 = vmul.f32 %v9035_v3, %v3477_v39  ;;  %v3699_v28 = vmul.f32 %v9303_v8, %v3469_v40  ;;  %v9333_v39 = vld [vmem:[%s10925_s8] ss:$0 sm:$0xff] }
 0x275   : > { %v4072_v7 = vmul.f32 %v9046_v62, %v3405_v9  ;;  %v4073_v38 = vmul.f32 %v9046_v62, %v3406_v49  ;;  %v4153_v2 = vmul.f32 %v9041_v5, %v3469_v40  ;;  %v3750_v37 = vmul.f32 %v9314_v17, %v3469_v40 }
 0x276   : > { %v3698_v16 = vmul.f32 %v9303_v8, %v3489_v52  ;;  %v3715_v6 = vadd.f32 %v3699_v28, %v3631_v48  ;;  %v4152_v0 = vmul.f32 %v9041_v5, %v3489_v52  ;;  %v3751_v1 = vmul.f32 %v9314_v17, %v3542_v10 }
 0x277   : > { %v4169_v27 = vadd.f32 %v4153_v2, %v4073_v38  ;;  %v3544_v9 = vmul.f32 %v9035_v3, %v3478_v24  ;;  %v3632_v49 = vadd.f32 %v3616_v42, %v9235_v19  ;;  %v3633_v30 = vadd.f32 %v3617_v13, %v9237_v14 }
 0x278   : > { %v3714_v15 = vadd.f32 %v3698_v16, %v3630_v31  ;;  %v4168_v18 = vadd.f32 %v4152_v0, %v4072_v7  ;;  %v3767_v54 = vadd.f32 %v3751_v1, %v3715_v6  ;;  %v3700_v48 = vmul.f32 %v9303_v8, %v9294_v56 }
 0x279   : > { %v3701_v28 = vmul.f32 %v9303_v8, %v9289_v21  ;;  %v3752_v38 = vmul.f32 %v9314_v17, %v9289_v21  ;;  %v3753_v2 = vmul.f32 %v9314_v17, %v3544_v9  ;;  %v4202_v24 = vmul.f32 %v9069_v4, %v9289_v21 }
 0x27a   : > { %v3766_v19 = vadd.f32 %v3750_v37, %v3714_v15  ;;  %v3789_v14 = vadd.f32 %v9333_v39, %v3767_v54  ;;  %v3716_v16 = vadd.f32 %v3700_v48, %v3632_v49  ;;  %v4203_v31 = vmul.f32 %v9069_v4, %v3544_v9 }
 0x27b   : > { %v3717_v42 = vadd.f32 %v3701_v28, %v3633_v30  ;;  %v9349_v13 = vadd.f32 %v4202_v24, %v4170_v35  ;;  %v4200_v7 = vmul.f32 %v9069_v4, %v3469_v40  ;;  %v4201_v6 = vmul.f32 %v9069_v4, %v3542_v10 }
 0x27c   : > { %v3788_v0 = vadd.f32 %v9333_v39, %v3766_v19  ;;  %v3768_v1 = vadd.f32 %v3752_v38, %v3716_v16  ;;  %v9354_v17 = vadd.f32 %v4203_v31, %v4171_v43  ;;  %v3509_v8 = vmul.f32 %v9189_v12, %v3489_v52 }
 0x27d   : > { %v3769_v37 = vadd.f32 %v3753_v2, %v3717_v42  ;;  %v9357_v15 = vadd.f32 %v4200_v7, %v4168_v18  ;;  %v9359_v49 = vadd.f32 %v4201_v6, %v4169_v27  ;;  %v3510_v30 = vmul.f32 %v9189_v12, %v3469_v40 }
 0x27e   : > { %v3804_v35 = vpack.c.bf16 %v3789_v14, %v3788_v0  ;;  %v3790_v54 = vadd.f32 %v9333_v39, %v3768_v1  ;;  %v3525_v48 = vadd.f32 %v3509_v8, %v3441_v61  ;;  %v3561_v28 = vmul.f32 %v9217_v32, %v3469_v40 }
 0x27f   : > { %v3791_v24 = vadd.f32 %v9333_v39, %v3769_v37  ;;  %v3526_v38 = vadd.f32 %v3510_v30, %v3442_v51  ;;  %v3562_v43 = vmul.f32 %v9217_v32, %v3542_v10  ;;  %v3511_v52 = vmul.f32 %v9189_v12, %v9294_v56 }
 0x280   : > { %v3422_v27 = vmul.f32 %v9176_v59, %v9208_v60  ;;  %3936 = vmatmul.mubr.bf16.vlgmr.msra.gmra.mrb[64].mxu1 %v3804_v35  ;;  %v9370_v18 = vadd.f32 %v3561_v28, %v3525_v48  ;;  %v3512_v2 = vmul.f32 %v9189_v12, %v9289_v21  ;;  %v3564_v8 = vmul.f32 %v9217_v32, %v3544_v9 }
 0x281   : > { %3945 = vmatprep.mubr.bf16.mxu1 %v11038_v33  ;;  %v3805_v40 = vpack.c.bf16 %v3791_v24, %v3790_v54  ;;  %v9376_v61 = vadd.f32 %v3562_v43, %v3526_v38  ;;  %v3527_v51 = vadd.f32 %v3511_v52, %v9282_v36  ;;  %v3563_v56 = vmul.f32 %v9217_v32, %v9289_v21 }
 0x282   : > { %v3317_v10 = vmul.f32 %v9041_v5, %v9269_v26  ;;  %v3350_v19 = vmul.f32 %v9035_v3, %v9245_v20  ;;  %v3421_v14 = vmul.f32 %v9176_v59, %v9206_v50  ;;  %v3528_v9 = vadd.f32 %v3512_v2, %v9285_v25 }
 0x283   : > { %v3439_v16 = vadd.f32 %v9249_v57, %v9191_v63  ;;  %v3232_v36 = vmul.f32 %v9046_v62, %v9206_v50  ;;  %v3233_v21 = vmul.f32 %v9046_v62, %v9208_v60  ;;  %v9394_v31 = vadd.f32 %v3563_v56, %v3527_v51 }
 0x284   : > { %v3438_v42 = vadd.f32 %v3422_v27, %v9182_v53  ;;  %v3505_v20 = vmul.f32 %v9189_v12, %v9269_v26  ;;  %v3506_v7 = vmul.f32 %v9189_v12, %v9241_v23  ;;  %v6942_v25 = vpop.f32.mrb[44].mxu1  ;;  %v9401_v6 = vadd.f32 %v3564_v8, %v3528_v9 }
 0x285   : > { %v3523_v57 = vadd.f32 %v9256_v46, %v3439_v16  ;;  %v3524_v50 = vadd.f32 %v9260_v45, %v9252_v11  ;;  %v3369_v60 = vmul.f32 %v9069_v4, %v9241_v23  ;;  %v2308_v0 = vpop.f32.mrb[45].mxu1  ;;  %v3333_v1 = vadd.f32 %v3317_v10, %v3232_v36 }
 0x286   : > { %v3334_v53 = vadd.f32 %v9273_v34, %v3233_v21  ;;  %v3370_v26 = vmul.f32 %v9069_v4, %v3350_v19  ;;  %v3437_v37 = vadd.f32 %v3421_v14, %v9191_v63  ;;  %v6943_v30 = vpop.f32.mrb[46].mxu1  ;;  %v2317_v35 = vadd.f32 %v6942_v25, %v9013_v55 }
 0x287   : > { %v2320_v54 = vadd.f32 %v6943_v30, %v9013_v55  ;;  %v2311_v46 = vpop.f32.mrb[47].mxu1  ;;  %v3558_v48 = vmul.f32 %v9217_v32, %v3350_v19  ;;  %v3560_v11 = vmul.f32 %v9217_v32, %v9155_v22  ;;  %v3522_v28 = vadd.f32 %v3506_v7, %v3438_v42 }
 0x288   : > { %v3521_v45 = vadd.f32 %v3505_v20, %v3437_v37  ;;  %v2309_v24 = vadd.f32 %v9013_v55, %v2308_v0  ;;  %v2312_v34 = vadd.f32 %v9013_v55, %v2311_v46  ;;  %3946 = vmatmul.mubr.bf16.gmra.mrb[68].mxu1 %v3805_v40  ;;  %v3559_v63 = vmul.f32 %v9217_v32, %v9144_v58 }
 0x289   : > { %v2330_v38 = vpack.c.bf16 %v2320_v54, %v2317_v35  ;;  %3955 = vmatprep.mubr.bf16.mxu1 %v11038_v33  ;;  %v3385_v43 = vadd.f32 %v3369_v60, %v3333_v1  ;;  %v3386_v52 = vadd.f32 %v3370_v26, %v3334_v53  ;;  %v3557_v2 = vmul.f32 %v9217_v32, %v9241_v23 }
 0x28a   : > { %v2329_v27 = vpack.c.bf16 %v2312_v34, %v2309_v24  ;;  %v3575_v51 = vadd.f32 %v3559_v63, %v3523_v57  ;;  %v3576_v56 = vadd.f32 %v3560_v11, %v3524_v50  ;;  %v3574_v40 = vadd.f32 %v3558_v48, %v3522_v28  ;;  %v11048_v57 = vld [vmem:[#allocation16_spill] sm:$0xff] }
 0x28b   : > { %v3411_v22 = vunpack.c.l.bf16 %v2330_v38  ;;  %v3412_v8 = vunpack.c.h.bf16 %v2330_v38  ;;  %v3573_v14 = vadd.f32 %v3557_v2, %v3521_v45  ;;  %vm5947_vm0 = vcmp.ge.s32.totalorder %v11048_v57, 6 }
 0x28c   : > { %v3409_v10 = vunpack.c.l.bf16 %v2329_v27  ;;  %v3410_v19 = vunpack.c.h.bf16 %v2329_v27 }
 0x28d   : > { %v3431_v9 = vmul.f32 %v9176_v59, %v3411_v22  ;;  %v3432_v16 = vmul.f32 %v9176_v59, %v3412_v8  ;;  %v3456_v36 = vrot.slane %v3411_v22, 4  ;;  %v3464_v58 = vrot.slane %v3412_v8, 4 }
 0x28e   : > { %v3620_v21 = vmul.f32 %v9265_v29, %v3411_v22  ;;  %v3621_v42 = vmul.f32 %v9265_v29, %v3412_v8  ;;  %v4078_v23 = vmul.f32 %v9046_v62, %v3411_v22  ;;  %v4079_v20 = vmul.f32 %v9046_v62, %v3412_v8  ;;  %v11050_v8 = vld [vmem:[#allocation27_spill] sm:$0xff] }
 0x28f   : > { %v9430_v7 = vadd.f32 %v3431_v9, %v9180_v41  ;;  %v9433_v25 = vadd.f32 %v3432_v16, %v9171_v44  ;;  %v9437_v50 = vsel %vm3268_vm8, %v3456_v36, %v3464_v58  ;;  %v3480_v60 = vsel %vm3268_vm8, %v3464_v58, %v3456_v36 }
 0x290   : > { %v9442_v0 = vmul.f32 %v9032_v47, %v3480_v60  ;;  %v4159_v1 = vmul.f32 %v9041_v5, %v9437_v50  ;;  %v3429_v53 = vmul.f32 %v9176_v59, %v3409_v10  ;;  %v3430_v41 = vmul.f32 %v9176_v59, %v3410_v19 }
 0x291   : > { %v3455_v26 = vrot.slane %v3409_v10, 4  ;;  %v3463_v44 = vrot.slane %v3410_v19, 4  ;;  %v3618_v37 = vmul.f32 %v9265_v29, %v3409_v10  ;;  %v3619_v30 = vmul.f32 %v9265_v29, %v3410_v19 }
 0x292   : > { %v4158_v35 = vmul.f32 %v9041_v5, %v9442_v0  ;;  %v4175_v54 = vadd.f32 %v4159_v1, %v4079_v20  ;;  %v3445_v46 = vadd.f32 %v3429_v53, %v3385_v43  ;;  %v3446_v48 = vadd.f32 %v3430_v41, %v3386_v52  ;;  %v11049_v52 = vld [vmem:[#allocation29_spill] sm:$0xff] }
 0x293   : > { %v3471_v11 = vsel %vm3268_vm8, %v3455_v26, %v3463_v44  ;;  %v3479_v45 = vsel %vm3268_vm8, %v3463_v44, %v3455_v26  ;;  %v4076_v28 = vmul.f32 %v9046_v62, %v3409_v10  ;;  %v4077_v24 = vmul.f32 %v9046_v62, %v3410_v19 }
 0x294   : > { %v4174_v34 = vadd.f32 %v4158_v35, %v4078_v23  ;;  %v3493_v38 = vmul.f32 %v9032_v47, %v3479_v45  ;;  %v4157_v63 = vmul.f32 %v9041_v5, %v3471_v11  ;;  %v3546_v27 = vmul.f32 %v9035_v3, %v3479_v45 }
 0x295   : > { %v3634_v2 = vadd.f32 %v3618_v37, %v3573_v14  ;;  %v3635_v43 = vadd.f32 %v3619_v30, %v3574_v40  ;;  %v3703_v22 = vmul.f32 %v11049_v52, %v3471_v11  ;;  %v3754_v9 = vmul.f32 %v11050_v8, %v3471_v11 }
 0x296   : > { %v4156_v16 = vmul.f32 %v9041_v5, %v3493_v38  ;;  %v4173_v36 = vadd.f32 %v4157_v63, %v4077_v24  ;;  %v3702_v10 = vmul.f32 %v11049_v52, %v3493_v38  ;;  %v3755_v19 = vmul.f32 %v11050_v8, %v3546_v27 }
 0x297   : > { %v3719_v58 = vadd.f32 %v3703_v22, %v3635_v43  ;;  %v3548_v23 = vmul.f32 %v9035_v3, %v3480_v60  ;;  %v3636_v20 = vadd.f32 %v3620_v21, %v3575_v51  ;;  %v3637_v1 = vadd.f32 %v3621_v42, %v3576_v56 }
 0x298   : > { %v4172_v53 = vadd.f32 %v4156_v16, %v4076_v28  ;;  %v3718_v41 = vadd.f32 %v3702_v10, %v3634_v2  ;;  %v3704_v14 = vmul.f32 %v11049_v52, %v9442_v0  ;;  %v3705_v40 = vmul.f32 %v11049_v52, %v9437_v50 }
 0x299   : > { %v3771_v26 = vadd.f32 %v3755_v19, %v3719_v58  ;;  %v3756_v44 = vmul.f32 %v11050_v8, %v9437_v50  ;;  %v3757_v37 = vmul.f32 %v11050_v8, %v3548_v23  ;;  %v4206_v30 = vmul.f32 %v9069_v4, %v9437_v50 }
 0x29a   : > { %v3770_v60 = vadd.f32 %v3754_v9, %v3718_v41  ;;  %v3720_v51 = vadd.f32 %v3704_v14, %v3636_v20  ;;  %v3721_v56 = vadd.f32 %v3705_v40, %v3637_v1  ;;  %v4207_v21 = vmul.f32 %v9069_v4, %v3548_v23 }
 0x29b   : > { %v3793_v42 = vadd.f32 %v9333_v39, %v3771_v26  ;;  %v9478_v35 = vadd.f32 %v4206_v30, %v4174_v34  ;;  %v4204_v45 = vmul.f32 %v9069_v4, %v3471_v11  ;;  %v4205_v28 = vmul.f32 %v9069_v4, %v3546_v27 }
 0x29c   : > { %v3792_v24 = vadd.f32 %v9333_v39, %v3770_v60  ;;  %v3772_v63 = vadd.f32 %v3756_v44, %v3720_v51  ;;  %v3773_v2 = vadd.f32 %v3757_v37, %v3721_v56  ;;  %v9483_v43 = vadd.f32 %v4207_v21, %v4175_v54 }
 0x29d   : > { %v9485_v22 = vadd.f32 %v4204_v45, %v4172_v53  ;;  %v9487_v9 = vadd.f32 %v4205_v28, %v4173_v36  ;;  %v3513_v16 = vmul.f32 %v9189_v12, %v3493_v38  ;;  %v3514_v10 = vmul.f32 %v9189_v12, %v3471_v11 }
 0x29e   : > { %v3806_v34 = vpack.c.bf16 %v3793_v42, %v3792_v24  ;;  %v3794_v19 = vadd.f32 %v9333_v39, %v3772_v63  ;;  %v3795_v58 = vadd.f32 %v9333_v39, %v3773_v2  ;;  %v3565_v20 = vmul.f32 %v9217_v32, %v3471_v11  ;;  %v11051_v24 = vld [vmem:[#allocation14_spill] sm:$0xff]  ;;  %v11052_v2 = vld [vmem:[#allocation20_spill] sm:$0xff] }
 0x29f   : > { %v3529_v1 = vadd.f32 %v3513_v16, %v3445_v46  ;;  %v3530_v41 = vadd.f32 %v3514_v10, %v3446_v48  ;;  %v3566_v54 = vmul.f32 %v9217_v32, %v3546_v27  ;;  %v3515_v53 = vmul.f32 %v9189_v12, %v9442_v0 }
 0x2a0   : > { %3956 = vmatmul.mubr.bf16.gmra.mrb[72].mxu1 %v3806_v34  ;;  %v3807_v36 = vpack.c.bf16 %v3795_v58, %v3794_v19  ;;  %v3516_v38 = vmul.f32 %v9189_v12, %v9437_v50  ;;  %v3568_v14 = vmul.f32 %v9217_v32, %v3548_v23  ;;  %v3567_v48 = vmul.f32 %v9217_v32, %v9437_v50 }
 0x2a1   : > { %3965 = vmatprep.mubr.bf16.mxu1 %v11038_v33  ;;  %v9501_v40 = vadd.f32 %v3565_v20, %v3529_v1  ;;  %v9503_v26 = vadd.f32 %v3566_v54, %v3530_v41  ;;  %v3531_v46 = vadd.f32 %v3515_v53, %v9430_v7  ;;  %v6954_v27 = vpop.f32.mrb[48].mxu1  ;;  %v9520_v63 = vmul.f32 %v9265_v29, %v11051_v24 }
 0x2a2   : > { %v3532_v0 = vadd.f32 %v3516_v38, %v9433_v25  ;;  %v3073_v37 = vpop.f32.mrb[49].mxu1  ;;  %v3082_v30 = vadd.f32 %v6954_v27, %v9013_v55  ;;  %v9524_v16 = vmul.f32 %v9265_v29, %v11052_v2 }
 0x2a3   : > { %v9509_v11 = vadd.f32 %v3567_v48, %v3531_v46  ;;  %v6955_v23 = vpop.f32.mrb[50].mxu1  ;;  %v3074_v56 = vadd.f32 %v9013_v55, %v3073_v37 }
 0x2a4   : > { %v9511_v44 = vadd.f32 %v3568_v14, %v3532_v0  ;;  %v3085_v60 = vadd.f32 %v6955_v23, %v9013_v55  ;;  %v3076_v51 = vpop.f32.mrb[51].mxu1 }
 0x2a5   : > { %v3077_v7 = vadd.f32 %v9013_v55, %v3076_v51 }
 0x2a6   : > { %v3137_v50 = vpack.c.bf16 %v3085_v60, %v3082_v30 }
 0x2a7   : > { %v3136_v25 = vpack.c.bf16 %v3077_v7, %v3074_v56 }
 0x2a8   : > { %3966 = vmatmul.mubr.bf16.gmra.mrb[76].mxu1 %v3807_v36  ;;  %v3604_v21 = vunpack.c.l.bf16 %v3137_v50  ;;  %v3605_v42 = vunpack.c.h.bf16 %v3137_v50 }
 0x2a9   : > { %3975 = vmatprep.mubr.bf16.mxu1 %v11038_v33  ;;  %v3602_v45 = vunpack.c.l.bf16 %v3136_v25  ;;  %v3603_v28 = vunpack.c.h.bf16 %v3136_v25 }
 0x2aa   : > { %v3624_v10 = vmul.f32 %v9265_v29, %v3604_v21  ;;  %v3625_v34 = vmul.f32 %v9265_v29, %v3605_v42  ;;  %v3651_v19 = vrot.slane %v3604_v21, 4  ;;  %v3659_v58 = vrot.slane %v3605_v42, 4 }
 0x2ab   : > { %v4082_v20 = vmul.f32 %v9046_v62, %v3604_v21  ;;  %v4083_v1 = vmul.f32 %v9046_v62, %v3605_v42  ;;  %v4258_v41 = vmul.f32 %v9176_v59, %v3604_v21  ;;  %v4259_v54 = vmul.f32 %v9176_v59, %v3605_v42 }
 0x2ac   : > { %v9534_v53 = vsel %vm3268_vm8, %v3651_v19, %v3659_v58  ;;  %v3675_v36 = vsel %vm3268_vm8, %v3659_v58, %v3651_v19  ;;  %v3622_v38 = vmul.f32 %v9265_v29, %v3602_v45  ;;  %v3623_v14 = vmul.f32 %v9265_v29, %v3603_v28 }
 0x2ad   : > { %v3688_v46 = vmul.f32 %v9032_v47, %v3675_v36  ;;  %v4163_v48 = vmul.f32 %v9041_v5, %v9534_v53  ;;  %v9544_v0 = vadd.f32 %v4258_v41, %v9349_v13  ;;  %v9547_v27 = vadd.f32 %v4259_v54, %v9354_v17 }
 0x2ae   : > { %v3650_v37 = vrot.slane %v3602_v45, 4  ;;  %v3658_v23 = vrot.slane %v3603_v28, 4  ;;  %v4080_v30 = vmul.f32 %v9046_v62, %v3602_v45  ;;  %v4081_v60 = vmul.f32 %v9046_v62, %v3603_v28 }
 0x2af   : > { %v4162_v51 = vmul.f32 %v9041_v5, %v3688_v46  ;;  %v4179_v56 = vadd.f32 %v4163_v48, %v4083_v1  ;;  %v4256_v7 = vmul.f32 %v9176_v59, %v3602_v45  ;;  %v4257_v50 = vmul.f32 %v9176_v59, %v3603_v28 }
 0x2b0   : > { %v9556_v13 = vsel %vm3268_vm8, %v3650_v37, %v3658_v23  ;;  %v3674_v17 = vsel %vm3268_vm8, %v3658_v23, %v3650_v37  ;;  %v3638_v25 = vadd.f32 %v3622_v38, %v9370_v18  ;;  %v3639_v21 = vadd.f32 %v3623_v14, %v9376_v61 }
 0x2b1   : > { %v4178_v42 = vadd.f32 %v4162_v51, %v4082_v20  ;;  %v9563_v24 = vmul.f32 %v9032_v47, %v3674_v17  ;;  %v4161_v45 = vmul.f32 %v9041_v5, %v9556_v13  ;;  %v9568_v28 = vadd.f32 %v4256_v7, %v9357_v15 }
 0x2b2   : > { %v9571_v2 = vadd.f32 %v4257_v50, %v9359_v49  ;;  %v3707_v19 = vmul.f32 %v11049_v52, %v9556_v13  ;;  %v9576_v18 = vmul.f32 %v9035_v3, %v3674_v17  ;;  %v3758_v61 = vmul.f32 %v11050_v8, %v9556_v13 }
 0x2b3   : > { %v4160_v58 = vmul.f32 %v9041_v5, %v9563_v24  ;;  %v4177_v20 = vadd.f32 %v4161_v45, %v4081_v60  ;;  %v3706_v15 = vmul.f32 %v11049_v52, %v9563_v24  ;;  %v3640_v1 = vadd.f32 %v3624_v10, %v9394_v31 }
 0x2b4   : > { %v3723_v49 = vadd.f32 %v3707_v19, %v3639_v21  ;;  %v3759_v41 = vmul.f32 %v11050_v8, %v9576_v18  ;;  %v3641_v54 = vadd.f32 %v3625_v34, %v9401_v6  ;;  %v3708_v38 = vmul.f32 %v11049_v52, %v3688_v46 }
 0x2b5   : > { %v4176_v14 = vadd.f32 %v4160_v58, %v4080_v30  ;;  %v3722_v48 = vadd.f32 %v3706_v15, %v3638_v25  ;;  %v3709_v37 = vmul.f32 %v11049_v52, %v9534_v53  ;;  %v3741_v23 = vmul.f32 %v9035_v3, %v3675_v36 }
 0x2b6   : > { %v3775_v60 = vadd.f32 %v3759_v41, %v3723_v49  ;;  %v3724_v51 = vadd.f32 %v3708_v38, %v3640_v1  ;;  %v3760_v31 = vmul.f32 %v11050_v8, %v9534_v53  ;;  %v4210_v10 = vmul.f32 %v9069_v4, %v9534_v53 }
 0x2b7   : > { %v3774_v50 = vadd.f32 %v3758_v61, %v3722_v48  ;;  %v3725_v6 = vadd.f32 %v3709_v37, %v3641_v54  ;;  %v3761_v34 = vmul.f32 %v11050_v8, %v3741_v23  ;;  %v4211_v30 = vmul.f32 %v9069_v4, %v3741_v23 }
 0x2b8   : > { %v6958_v7 = vpop.f32.mrb[52].mxu1  ;;  %v3797_v36 = vadd.f32 %v9333_v39, %v3775_v60  ;;  %v3776_v21 = vadd.f32 %v3760_v31, %v3724_v51  ;;  %v9600_v45 = vadd.f32 %v4210_v10, %v4178_v42  ;;  %v4338_v38 = vmul.f32 %v9189_v12, %v3688_v46 }
 0x2b9   : > { %v3098_v17 = vadd.f32 %v6958_v7, %v9013_v55  ;;  %v3089_v25 = vpop.f32.mrb[53].mxu1  ;;  %v3796_v15 = vadd.f32 %v9333_v39, %v3774_v50  ;;  %v3777_v1 = vadd.f32 %v3761_v34, %v3725_v6  ;;  %v9604_v61 = vadd.f32 %v4211_v30, %v4179_v56 }
 0x2ba   : > { %v3090_v19 = vadd.f32 %v9013_v55, %v3089_v25  ;;  %v6959_v58 = vpop.f32.mrb[54].mxu1  ;;  %v3798_v54 = vadd.f32 %v9333_v39, %v3776_v21  ;;  %v4339_v48 = vmul.f32 %v9189_v12, %v9534_v53  ;;  %v4386_v51 = vmul.f32 %v9217_v32, %v9534_v53  ;;  %v11053_v25 = vld [vmem:[#allocation15_spill] sm:$0xff] }
 0x2bb   : > { %v3101_v49 = vadd.f32 %v6959_v58, %v9013_v55  ;;  %v3092_v41 = vpop.f32.mrb[55].mxu1  ;;  %v3808_v37 = vpack.c.bf16 %v3797_v36, %v3796_v15  ;;  %v3799_v60 = vadd.f32 %v9333_v39, %v3777_v1  ;;  %v4354_v31 = vadd.f32 %v4338_v38, %v9544_v0  ;;  %v11054_v58 = vld [vmem:[#allocation18_spill] sm:$0xff] }
 0x2bc   : > { %v3093_v42 = vadd.f32 %v9013_v55, %v3092_v41  ;;  %v4355_v10 = vadd.f32 %v4339_v48, %v9547_v27  ;;  %v4387_v7 = vmul.f32 %v9217_v32, %v3741_v23  ;;  %v4208_v6 = vmul.f32 %v9069_v4, %v9556_v13 }
 0x2bd   : > { %v3139_v56 = vpack.c.bf16 %v3101_v49, %v3098_v17  ;;  %3976 = vmatmul.mubr.bf16.gmra.mrb[80].mxu1 %v3808_v37  ;;  %v3809_v46 = vpack.c.bf16 %v3799_v60, %v3798_v54  ;;  %v4209_v55 = vmul.f32 %v9069_v4, %v9576_v18  ;;  %v9623_v53 = vadd.f32 %v4386_v51, %v4354_v31 }
 0x2be   : > { %v3138_v50 = vpack.c.bf16 %v3093_v42, %v3090_v19  ;;  %3985 = vmatprep.mubr.bf16.mxu1 %v11038_v33  ;;  %v9625_v0 = vadd.f32 %v4387_v7, %v4355_v10  ;;  %v9627_v17 = vadd.f32 %v4208_v6, %v4176_v14  ;;  %v9633_v36 = vmul.f32 %v11049_v52, %v11053_v25 }
 0x2bf   : > { %v3608_v34 = vunpack.c.l.bf16 %v3139_v56  ;;  %v3609_v30 = vunpack.c.h.bf16 %v3139_v56  ;;  %v9629_v23 = vadd.f32 %v4209_v55, %v4177_v20  ;;  %v9637_v15 = vmul.f32 %v11049_v52, %v11054_v58  ;;  %v11055_v20 = vld [vmem:[#allocation19_spill] sm:$0xff] }
 0x2c0   : > { %v3606_v27 = vunpack.c.l.bf16 %v3138_v50  ;;  %v3607_v4 = vunpack.c.h.bf16 %v3138_v50  ;;  %v9643_v14 = vmul.f32 %v11050_v8, %v11053_v25  ;;  %v9647_v41 = vmul.f32 %v11050_v8, %v11055_v20 }
 0x2c1   : > { %v3653_v21 = vrot.slane %v3608_v34, 4  ;;  %v3661_v19 = vrot.slane %v3609_v30, 4  ;;  %v4262_v1 = vmul.f32 %v9176_v59, %v3608_v34  ;;  %v4263_v49 = vmul.f32 %v9176_v59, %v3609_v30 }
 0x2c2   : > { %11056 = vst [vmem:[#allocation22_spill] sm:$0xff] %v9647_v41  ;;  %v9650_v54 = vmul.f32 %v9265_v29, %v3608_v34  ;;  %v9653_v38 = vmul.f32 %v9265_v29, %v3609_v30  ;;  %v4086_v60 = vmul.f32 %v9046_v62, %v3608_v34  ;;  %v3626_v56 = vmul.f32 %v9265_v29, %v3606_v27 }
 0x2c3   : > { %v9657_v48 = vsel %vm3268_vm8, %v3653_v21, %v3661_v19  ;;  %v3677_v42 = vsel %vm3268_vm8, %v3661_v19, %v3653_v21  ;;  %v4278_v51 = vadd.f32 %v4262_v1, %v9478_v35  ;;  %v4279_v31 = vadd.f32 %v4263_v49, %v9483_v43 }
 0x2c4   : > { %v9662_v37 = vmul.f32 %v9032_v47, %v3677_v42  ;;  %v3627_v10 = vmul.f32 %v9265_v29, %v3607_v4  ;;  %v3652_v7 = vrot.slane %v3606_v27, 4  ;;  %v3660_v50 = vrot.slane %v3607_v4, 4 }
 0x2c5   : > { %v4167_v55 = vmul.f32 %v9041_v5, %v9657_v48  ;;  %v4084_v25 = vmul.f32 %v9046_v62, %v3606_v27  ;;  %v4260_v34 = vmul.f32 %v9176_v59, %v3606_v27  ;;  %3986 = vmatmul.mubr.bf16.gmra.mrb[84].mxu1 %v3809_v46  ;;  %v4261_v21 = vmul.f32 %v9176_v59, %v3607_v4 }
 0x2c6   : > { %v4166_v6 = vmul.f32 %v9041_v5, %v9662_v37  ;;  %v9677_v35 = vsel %vm3268_vm8, %v3652_v7, %v3660_v50  ;;  %v3676_v43 = vsel %vm3268_vm8, %v3660_v50, %v3652_v7  ;;  %v4336_v19 = vmul.f32 %v9189_v12, %v9563_v24  ;;  %3995 = vmatprep.mubr.bf16.mxu1 %v11038_v33 }
 0x2c7   : > { %v3690_v58 = vmul.f32 %v9032_v47, %v3676_v43  ;;  %v4085_v1 = vmul.f32 %v9046_v62, %v3607_v4  ;;  %v4165_v46 = vmul.f32 %v9041_v5, %v9677_v35  ;;  %v4276_v27 = vadd.f32 %v4260_v34, %v9485_v22 }
 0x2c8   : > { %v4277_v49 = vadd.f32 %v4261_v21, %v9487_v9  ;;  %v4337_v20 = vmul.f32 %v9189_v12, %v9556_v13  ;;  %v4352_v7 = vadd.f32 %v4336_v19, %v9568_v28  ;;  %v4384_v24 = vmul.f32 %v9217_v32, %v9556_v13 }
 0x2c9   : > { %v4164_v50 = vmul.f32 %v9041_v5, %v3690_v58  ;;  %v4181_v41 = vadd.f32 %v4165_v46, %v4085_v1  ;;  %v4385_v62 = vmul.f32 %v9217_v32, %v9576_v18  ;;  %v3642_v4 = vadd.f32 %v3626_v56, %v9501_v40  ;;  %v7186_v40 = vld [vmem:[%s10924_s7 + $0x1] ss:$0 sm:$0xff] }
 0x2ca   : > { %v4353_v22 = vadd.f32 %v4337_v20, %v9571_v2  ;;  %v9701_v34 = vadd.f32 %v4384_v24, %v4352_v7  ;;  %v3643_v9 = vadd.f32 %v3627_v10, %v9503_v26  ;;  %v3710_v21 = vmul.f32 %v11049_v52, %v3690_v58 }
 0x2cb   : > { %v9706_v28 = vmul.f32 %v9035_v3, %v3677_v42  ;;  %v4180_v13 = vadd.f32 %v4164_v50, %v4084_v25  ;;  %v3711_v5 = vmul.f32 %v11049_v52, %v9677_v35  ;;  %v3743_v19 = vmul.f32 %v9035_v3, %v3676_v43 }
 0x2cc   : > { %v4087_v2 = vmul.f32 %v7186_v40, %v3609_v30  ;;  %v9714_v18 = vadd.f32 %v4385_v62, %v4353_v22  ;;  %v3726_v56 = vadd.f32 %v3710_v21, %v3642_v4  ;;  %v3762_v26 = vmul.f32 %v11050_v8, %v9677_v35 }
 0x2cd   : > { %v3727_v10 = vadd.f32 %v3711_v5, %v3643_v9  ;;  %v3763_v42 = vmul.f32 %v11050_v8, %v3743_v19  ;;  %v4342_v25 = vmul.f32 %v9189_v12, %v9662_v37  ;;  %v4343_v43 = vmul.f32 %v9189_v12, %v9657_v48 }
 0x2ce   : > { %v9723_v1 = vadd.f32 %v4166_v6, %v4086_v60  ;;  %v9725_v46 = vadd.f32 %v4167_v55, %v4087_v2  ;;  %v3778_v30 = vadd.f32 %v3762_v26, %v3726_v56  ;;  %v4390_v20 = vmul.f32 %v9217_v32, %v9657_v48  ;;  %v9735_v60 = vld [vmem:[%s10924_s7 + $0x2] ss:$0 sm:$0xff] }
 0x2cf   : > { %v3779_v7 = vadd.f32 %v3763_v42, %v3727_v10  ;;  %v4358_v24 = vadd.f32 %v4342_v25, %v4278_v51  ;;  %v4359_v50 = vadd.f32 %v4343_v43, %v4279_v31  ;;  %v4391_v62 = vmul.f32 %v9217_v32, %v9706_v28  ;;  %v9744_v51 = vld [vmem:[%s10923_s6] ss:$0 sm:$0xff] }
 0x2d0   : > { %v3800_v22 = vadd.f32 %v9333_v39, %v3778_v30  ;;  %v4212_v6 = vmul.f32 %v9735_v60, %v9677_v35  ;;  %v4213_v55 = vmul.f32 %v9735_v60, %v3743_v19  ;;  %v4340_v9 = vmul.f32 %v9189_v12, %v3690_v58 }
 0x2d1   : > { %v6962_v4 = vpop.f32.mrb[56].mxu1  ;;  %v3801_v5 = vadd.f32 %v9333_v39, %v3779_v7  ;;  %v9748_v40 = vadd.f32 %v4390_v20, %v4358_v24  ;;  %v9750_v2 = vadd.f32 %v4391_v62, %v4359_v50  ;;  %v4341_v42 = vmul.f32 %v9189_v12, %v9677_v35 }
 0x2d2   : > { %v3114_v31 = vadd.f32 %v9744_v51, %v6962_v4  ;;  %v3105_v21 = vpop.f32.mrb[57].mxu1  ;;  %v9753_v10 = vadd.f32 %v4212_v6, %v4180_v13  ;;  %v9755_v58 = vadd.f32 %v4213_v55, %v4181_v41  ;;  %v4356_v4 = vadd.f32 %v4340_v9, %v4276_v27 }
 0x2d3   : > { %v3106_v56 = vadd.f32 %v9744_v51, %v3105_v21  ;;  %v6963_v26 = vpop.f32.mrb[58].mxu1  ;;  %v3810_v30 = vpack.c.bf16 %v3801_v5, %v3800_v22  ;;  %v4388_v20 = vmul.f32 %v9217_v32, %v9677_v35  ;;  %v4357_v24 = vadd.f32 %v4341_v42, %v4277_v49 }
 0x2d4   : > { %v3117_v25 = vadd.f32 %v9744_v51, %v6963_v26  ;;  %v3108_v43 = vpop.f32.mrb[59].mxu1  ;;  %v4389_v50 = vmul.f32 %v9217_v32, %v3743_v19  ;;  %v3644_v41 = vadd.f32 %v9650_v54, %v9509_v11  ;;  %v3645_v6 = vadd.f32 %v9653_v38, %v9511_v44 }
 0x2d5   : > { %v3109_v7 = vadd.f32 %v9744_v51, %v3108_v43  ;;  %3996 = vmatmul.mubr.bf16.gmra.mrb[88].mxu1 %v3810_v30  ;;  %v9766_v62 = vadd.f32 %v4388_v20, %v4356_v4  ;;  %v3712_v27 = vmul.f32 %v11049_v52, %v9662_v37  ;;  %v9774_v35 = vmul.f32 %v9735_v60, %v9657_v48 }
 0x2d6   : > { %v3141_v13 = vpack.c.bf16 %v3117_v25, %v3114_v31  ;;  %v9776_v49 = vadd.f32 %v4389_v50, %v4357_v24  ;;  %4005 = vmatprep.mubr.bf16.mxu1 %v11038_v33  ;;  %v3713_v32 = vmul.f32 %v11049_v52, %v9657_v48  ;;  %v3764_v44 = vmul.f32 %v11050_v8, %v9657_v48 }
 0x2d7   : > { %v3140_v22 = vpack.c.bf16 %v3109_v7, %v3106_v56  ;;  %v3728_v19 = vadd.f32 %v3712_v27, %v3644_v41  ;;  %v3765_v9 = vmul.f32 %v11050_v8, %v9706_v28 }
 0x2d8   : > { %v4250_v11 = vunpack.c.l.bf16 %v3141_v13  ;;  %v4251_v54 = vunpack.c.h.bf16 %v3141_v13  ;;  %v3729_v55 = vadd.f32 %v3713_v32, %v3645_v6  ;;  %v9806_v6 = vld [vmem:[%s10924_s7 + $0x3] ss:$0 sm:$0xff] }
 0x2d9   : > { %v4248_v38 = vunpack.c.l.bf16 %v3140_v22  ;;  %v4249_v37 = vunpack.c.h.bf16 %v3140_v22 }
 0x2da   : > { %v4266_v31 = vmul.f32 %v9176_v59, %v4250_v11  ;;  %v4267_v21 = vmul.f32 %v9176_v59, %v4251_v54  ;;  %v4293_v5 = vrot.slane %v4250_v11, 4  ;;  %v4301_v56 = vrot.slane %v4251_v54, 4 }
 0x2db   : > { %v4443_v26 = vmul.f32 %v9265_v29, %v4250_v11  ;;  %v4444_v42 = vmul.f32 %v9265_v29, %v4251_v54  ;;  %v4264_v25 = vmul.f32 %v9176_v59, %v4248_v38  ;;  %v4265_v48 = vmul.f32 %v9176_v59, %v4249_v37 }
 0x2dc   : > { %v4282_v43 = vadd.f32 %v4266_v31, %v9600_v45  ;;  %v4283_v30 = vadd.f32 %v4267_v21, %v9604_v61  ;;  %v4309_v4 = vsel %vm3268_vm8, %v4293_v5, %v4301_v56  ;;  %v4317_v20 = vsel %vm3268_vm8, %v4301_v56, %v4293_v5 }
 0x2dd   : > { %v4330_v7 = vmul.f32 %v9032_v47, %v4317_v20  ;;  %v4347_v24 = vmul.f32 %v9189_v12, %v4309_v4  ;;  %v4459_v50 = vadd.f32 %v4443_v26, %v9623_v53  ;;  %v4460_v41 = vadd.f32 %v4444_v42, %v9625_v0 }
 0x2de   : > { %v4280_v59 = vadd.f32 %v4264_v25, %v9627_v17  ;;  %v4281_v45 = vadd.f32 %v4265_v48, %v9629_v23  ;;  %v4292_v13 = vrot.slane %v4248_v38, 4  ;;  %v4300_v61 = vrot.slane %v4249_v37, 4 }
 0x2df   : > { %v4346_v27 = vmul.f32 %v9806_v6, %v4330_v7  ;;  %v4363_v22 = vadd.f32 %v4347_v24, %v4283_v30  ;;  %v4441_v12 = vmul.f32 %v9265_v29, %v4248_v38  ;;  %v4442_v53 = vmul.f32 %v9265_v29, %v4249_v37 }
 0x2e0   : > { %v4308_v0 = vsel %vm3268_vm8, %v4292_v13, %v4300_v61  ;;  %v4316_v17 = vsel %vm3268_vm8, %v4300_v61, %v4292_v13  ;;  %v3780_v23 = vadd.f32 %v3764_v44, %v3728_v19  ;;  %v3781_v32 = vadd.f32 %v3765_v9, %v3729_v55 }
 0x2e1   : > { %v4362_v11 = vadd.f32 %v4346_v27, %v4282_v43  ;;  %v4328_v54 = vmul.f32 %v9032_v47, %v4316_v17  ;;  %v4345_v31 = vmul.f32 %v9806_v6, %v4308_v0  ;;  %v4377_v21 = vmul.f32 %v9035_v3, %v4316_v17 }
 0x2e2   : > { %v4457_v5 = vadd.f32 %v4441_v12, %v9701_v34  ;;  %v4458_v38 = vadd.f32 %v4442_v53, %v9714_v18  ;;  %v4522_v29 = vmul.f32 %v11049_v52, %v4308_v0  ;;  %v4569_v37 = vmul.f32 %v11050_v8, %v4308_v0 }
 0x2e3   : > { %v4344_v56 = vmul.f32 %v9806_v6, %v4328_v54  ;;  %v4361_v26 = vadd.f32 %v4345_v31, %v4281_v45  ;;  %v4521_v19 = vmul.f32 %v11049_v52, %v4328_v54  ;;  %v4570_v44 = vmul.f32 %v11050_v8, %v4377_v21  ;;  %v9833_v45 = vld [vmem:[%s10924_s7 + $0x5] ss:$0 sm:$0xff] }
 0x2e4   : > { %v4538_v55 = vadd.f32 %v4522_v29, %v4458_v38  ;;  %v3802_v9 = vadd.f32 %v9333_v39, %v3780_v23  ;;  %v3803_v42 = vadd.f32 %v9333_v39, %v3781_v32  ;;  %v4379_v34 = vmul.f32 %v9035_v3, %v4317_v20 }
 0x2e5   : > { %v4360_v25 = vadd.f32 %v4344_v56, %v4280_v59  ;;  %v4537_v18 = vadd.f32 %v4521_v19, %v4457_v5  ;;  %v4523_v48 = vmul.f32 %v11049_v52, %v4330_v7  ;;  %v4524_v43 = vmul.f32 %v11049_v52, %v4309_v4 }
 0x2e6   : > { %v4586_v30 = vadd.f32 %v4570_v44, %v4538_v55  ;;  %v3811_v24 = vpack.c.bf16 %v3803_v42, %v3802_v9  ;;  %v4395_v13 = vmul.f32 %v9833_v45, %v4379_v34  ;;  %v4571_v61 = vmul.f32 %v11050_v8, %v4309_v4 }
 0x2e7   : > { %v4585_v27 = vadd.f32 %v4569_v37, %v4537_v18  ;;  %v4539_v12 = vadd.f32 %v4523_v48, %v4459_v50  ;;  %v4540_v20 = vadd.f32 %v4524_v43, %v4460_v41  ;;  %v4572_v59 = vmul.f32 %v11050_v8, %v4379_v34 }
 0x2e8   : > { %4006 = vmatmul.mubr.bf16.gmra.mrb[92].mxu1 %v3811_v24  ;;  %v4602_v7 = vadd.f32 %v9333_v39, %v4586_v30  ;;  %v4392_v52 = vmul.f32 %v9833_v45, %v4308_v0  ;;  %v4393_v53 = vmul.f32 %v9833_v45, %v4377_v21  ;;  %v4394_v17 = vmul.f32 %v9833_v45, %v4309_v4 }
 0x2e9   : > { %v6966_v23 = vpop.f32.mrb[60].mxu1  ;;  %v4601_v32 = vadd.f32 %v9333_v39, %v4585_v27  ;;  %v4587_v54 = vadd.f32 %v4571_v61, %v4539_v12  ;;  %v4588_v31 = vadd.f32 %v4572_v59, %v4540_v20  ;;  %v4411_v5 = vadd.f32 %v4395_v13, %v4363_v22  ;;  %v11057_v61 = vld [vmem:[#allocation22_spill] sm:$0xff] }
 0x2ea   : > { %v3121_v38 = vpop.f32.mrb[61].mxu1  ;;  %v4215_v50 = vmul.f32 %v9735_v60, %v9706_v28  ;;  %v4408_v8 = vadd.f32 %v4392_v52, %v4360_v25  ;;  %v4409_v41 = vadd.f32 %v4393_v53, %v4361_v26  ;;  %v4410_v29 = vadd.f32 %v4394_v17, %v4362_v11  ;;  %v7192_v17 = vld [vmem:[%s10924_s7 + $0x7] ss:$0 sm:$0xff] }
 0x2eb   : > { %v3130_v37 = vadd.f32 %v9744_v51, %v6966_v23  ;;  %v6967_v0 = vpop.f32.mrb[62].mxu1  ;;  %v4617_v56 = vpack.c.bf16 %v4602_v7, %v4601_v32  ;;  %v4603_v21 = vadd.f32 %v9333_v39, %v4587_v54  ;;  %v4604_v4 = vadd.f32 %v9333_v39, %v4588_v31 }
 0x2ec   : > { %v3133_v19 = vadd.f32 %v9744_v51, %v6967_v0  ;;  %v3124_v44 = vpop.f32.mrb[63].mxu1  ;;  %v4465_v22 = vadd.f32 %v9520_v63, %v4408_v8  ;;  %v4466_v55 = vadd.f32 %v9524_v16, %v4409_v41  ;;  %v4467_v28 = vadd.f32 %v9520_v63, %v4410_v29 }
 0x2ed   : > { %v3122_v60 = vadd.f32 %v9744_v51, %v3121_v38  ;;  %v3125_v11 = vadd.f32 %v9744_v51, %v3124_v44  ;;  %4658 = vmatmul.mubr.bf16.vlgmr.msra.gmra.mrb[64].mxu0 %v4617_v56  ;;  %v4618_v26 = vpack.c.bf16 %v4604_v4, %v4603_v21  ;;  %v4468_v9 = vadd.f32 %v9524_v16, %v4411_v5 }
 0x2ee   : > { %v3143_v42 = vpack.c.bf16 %v3133_v19, %v3130_v37  ;;  %4667 = vmatprep.mubr.bf16.mxu0 %v11038_v33  ;;  %v4545_v39 = vadd.f32 %v9637_v15, %v4465_v22  ;;  %v4546_v34 = vadd.f32 %v9633_v36, %v4466_v55  ;;  %v4547_v25 = vadd.f32 %v9637_v15, %v4467_v28 }
 0x2ef   : > { %v4230_v18 = vadd.f32 %v9774_v35, %v9723_v1  ;;  %v4231_v48 = vadd.f32 %v4215_v50, %v9725_v46  ;;  %v3142_v43 = vpack.c.bf16 %v3125_v11, %v3122_v60  ;;  %v4548_v51 = vadd.f32 %v9633_v36, %v4468_v9  ;;  %v7191_v46 = vld [vmem:[%s10924_s7 + $0x4] ss:$0 sm:$0xff] }
 0x2f0   : > { %v4254_v30 = vunpack.c.l.bf16 %v3143_v42  ;;  %v4255_v24 = vunpack.c.h.bf16 %v3143_v42  ;;  %v9864_v13 = vadd.f32 %v9643_v14, %v4545_v39  ;;  %v9867_v27 = vadd.f32 %v11057_v61, %v4546_v34 }
 0x2f1   : > { %v4252_v12 = vunpack.c.l.bf16 %v3142_v43  ;;  %v4253_v20 = vunpack.c.h.bf16 %v3142_v43  ;;  %v9870_v59 = vadd.f32 %v9643_v14, %v4547_v25  ;;  %v9873_v1 = vadd.f32 %v11057_v61, %v4548_v51 }
 0x2f2   : > { %v4270_v35 = vmul.f32 %v7191_v46, %v4254_v30  ;;  %v4271_v7 = vmul.f32 %v7191_v46, %v4255_v24  ;;  %v4295_v52 = vrot.slane %v4254_v30, 4  ;;  %v4303_v53 = vrot.slane %v4255_v24, 4 }
 0x2f3   : > { %v4447_v23 = vmul.f32 %v7192_v17, %v4254_v30  ;;  %v4448_v32 = vmul.f32 %v7192_v17, %v4255_v24  ;;  %v4268_v54 = vmul.f32 %v7191_v46, %v4252_v12  ;;  %v4269_v31 = vmul.f32 %v7191_v46, %v4253_v20 }
 0x2f4   : > { %v4286_v5 = vadd.f32 %v4270_v35, %v4230_v18  ;;  %v4287_v38 = vadd.f32 %v4271_v7, %v4231_v48  ;;  %v4311_v50 = vsel %vm3268_vm8, %v4295_v52, %v4303_v53  ;;  %v4319_v8 = vsel %vm3268_vm8, %v4303_v53, %v4295_v52  ;;  %v7194_v18 = vld [vmem:[%s10924_s7 + $0x8] ss:$0 sm:$0xff] }
 0x2f5   : > { %v4334_v41 = vmul.f32 %v9032_v47, %v4319_v8  ;;  %v4351_v29 = vmul.f32 %v9806_v6, %v4311_v50  ;;  %v4463_v37 = vadd.f32 %v4447_v23, %v9748_v40  ;;  %v4464_v0 = vadd.f32 %v4448_v32, %v9750_v2  ;;  %4668 = vmatmul.mubr.bf16.gmra.mrb[68].mxu0 %v4618_v26 }
 0x2f6   : > { %v4284_v56 = vadd.f32 %v4268_v54, %v9753_v10  ;;  %v4285_v21 = vadd.f32 %v4269_v31, %v9755_v58  ;;  %v4294_v4 = vrot.slane %v4252_v12, 4  ;;  %v4302_v19 = vrot.slane %v4253_v20, 4  ;;  %4677 = vmatprep.mubr.bf16.mxu0 %v11038_v33  ;;  %v7193_v10 = vld [vmem:[%s10924_s7 + $0x6] ss:$0 sm:$0xff] }
 0x2f7   : > { %v4350_v44 = vmul.f32 %v9806_v6, %v4334_v41  ;;  %v4367_v22 = vadd.f32 %v4351_v29, %v4287_v38  ;;  %v4445_v55 = vmul.f32 %v7192_v17, %v4252_v12  ;;  %v4446_v28 = vmul.f32 %v7192_v17, %v4253_v20 }
 0x2f8   : > { %v4310_v60 = vsel %vm3268_vm8, %v4294_v4, %v4302_v19  ;;  %v4318_v40 = vsel %vm3268_vm8, %v4302_v19, %v4294_v4  ;;  %v4383_v2 = vmul.f32 %v9035_v3, %v4319_v8  ;;  %v4527_v58 = vmul.f32 %v7193_v10, %v4334_v41 }
 0x2f9   : > { %v4366_v11 = vadd.f32 %v4350_v44, %v4286_v5  ;;  %v4332_v26 = vmul.f32 %v9032_v47, %v4318_v40  ;;  %v4349_v9 = vmul.f32 %v9806_v6, %v4310_v60  ;;  %v4461_v42 = vadd.f32 %v4445_v55, %v9766_v62 }
 0x2fa   : > { %v4462_v39 = vadd.f32 %v4446_v28, %v9776_v49  ;;  %v4381_v34 = vmul.f32 %v9035_v3, %v4318_v40  ;;  %v4526_v25 = vmul.f32 %v7193_v10, %v4310_v60  ;;  %v4573_v48 = vmul.f32 %v7194_v18, %v4310_v60 }
 0x2fb   : > { %v4348_v43 = vmul.f32 %v9806_v6, %v4332_v26  ;;  %v4365_v51 = vadd.f32 %v4349_v9, %v4285_v21  ;;  %v4525_v30 = vmul.f32 %v7193_v10, %v4332_v26  ;;  %v4399_v47 = vmul.f32 %v9833_v45, %v4383_v2  ;;  %v7195_v6 = vld [vmem:[%s10925_s8] ss:$0 sm:$0xff] }
 0x2fc   : > { %v4397_v24 = vmul.f32 %v9833_v45, %v4381_v34  ;;  %v4542_v12 = vadd.f32 %v4526_v25, %v4462_v39  ;;  %v4574_v62 = vmul.f32 %v7194_v18, %v4381_v34  ;;  %v4528_v20 = vmul.f32 %v7193_v10, %v4311_v50 }
 0x2fd   : > { %v4364_v49 = vadd.f32 %v4348_v43, %v4284_v56  ;;  %v4541_v46 = vadd.f32 %v4525_v30, %v4461_v42  ;;  %v4543_v3 = vadd.f32 %v4527_v58, %v4463_v37  ;;  %v4575_v35 = vmul.f32 %v7194_v18, %v4311_v50 }
 0x2fe   : > { %v4590_v7 = vadd.f32 %v4574_v62, %v4542_v12  ;;  %v4544_v52 = vadd.f32 %v4528_v20, %v4464_v0  ;;  %v4576_v53 = vmul.f32 %v7194_v18, %v4383_v2  ;;  %v4609_v17 = vadd.f32 %v7195_v6, %v9864_v13 }
 0x2ff   : > { %v4589_v23 = vadd.f32 %v4573_v48, %v4541_v46  ;;  %v4591_v32 = vadd.f32 %v4575_v35, %v4543_v3  ;;  %v4610_v54 = vadd.f32 %v7195_v6, %v9867_v27  ;;  %v4611_v31 = vadd.f32 %v7195_v6, %v9870_v59 }
 0x300   : > { %v4606_v5 = vadd.f32 %v7195_v6, %v4590_v7  ;;  %v4592_v38 = vadd.f32 %v4576_v53, %v4544_v52  ;;  %v4612_v8 = vadd.f32 %v7195_v6, %v9873_v1  ;;  %v4396_v41 = vmul.f32 %v9833_v45, %v4310_v60 }
 0x301   : > { %v4605_v29 = vadd.f32 %v7195_v6, %v4589_v23  ;;  %v4607_v37 = vadd.f32 %v7195_v6, %v4591_v32  ;;  %v4621_v0 = vpack.c.bf16 %v4610_v54, %v4609_v17  ;;  %v4413_v56 = vadd.f32 %v4397_v24, %v4365_v51  ;;  %v11060_v24 = vld [vmem:[#allocation17_spill] sm:$0xff] }
 0x302   : > { %v4608_v21 = vadd.f32 %v7195_v6, %v4592_v38  ;;  %v4622_v4 = vpack.c.bf16 %v4612_v8, %v4611_v31  ;;  %v4412_v19 = vadd.f32 %v4396_v41, %v4364_v49  ;;  %v4398_v13 = vmul.f32 %v9833_v45, %v4311_v50 }
 0x303   : > { %v4619_v44 = vpack.c.bf16 %v4606_v5, %v4605_v29  ;;  %v4470_v27 = vadd.f32 %v9524_v16, %v4413_v56  ;;  %v4415_v55 = vadd.f32 %v4399_v47, %v4367_v22  ;;  %vm4777_vm9 = vcmp.ge.s32.totalorder %v11060_v24, 10 }
 0x304   : > { %v4620_v59 = vpack.c.bf16 %v4608_v21, %v4607_v37  ;;  %v4469_v28 = vadd.f32 %v9520_v63, %v4412_v19  ;;  %v4414_v40 = vadd.f32 %v4398_v13, %v4366_v11  ;;  %v11061_v20 = vmov 0.0  }
 0x305   : > { %4678 = vmatmul.mubr.bf16.gmra.mrb[72].mxu0 %v4619_v44  ;;  %v4550_v1 = vadd.f32 %v9633_v36, %v4470_v27  ;;  %v4472_v60 = vadd.f32 %v9524_v16, %v4415_v55  ;;  %v9961_v49 = vsel %vm1616_vm5, 1.0, %v11061_v20  ;;  %v9964_v3 = vsel %vm4777_vm9, 1.0, %v11061_v20 }
 0x306   : > { %4687 = vmatprep.mubr.bf16.mxu0 %v11038_v33  ;;  %v4549_v2 = vadd.f32 %v9637_v15, %v4469_v28  ;;  %v4471_v10 = vadd.f32 %v9520_v63, %v4414_v40  ;;  %vm5942_vm2 = vcmp.lt.s32.totalorder %v11060_v24, 10  ;;  %vm6454_vm5 = vcmask 73728  }
 0x307   : > { %v4598_v45 = vadd.f32 %v11057_v61, %v4550_v1  ;;  %v4552_v50 = vadd.f32 %v9633_v36, %v4472_v60  ;;  %v9939_v36 = vsub.s32 0, %v11048_v57 }
 0x308   : > { %v4597_v22 = vadd.f32 %v9643_v14, %v4549_v2  ;;  %v4551_v58 = vadd.f32 %v9637_v15, %v4471_v10  ;;  %v3179_v15 = vld [vmem:[%s10927_s10] sm:$0x3] }
 0x309   : > { %v4600_v11 = vadd.f32 %v11057_v61, %v4552_v50  ;;  %v4614_v9 = vadd.f32 %v7195_v6, %v4598_v45  ;;  %11058 = vst [vmem:[#allocation24_spill] sm:$0xff] %v9939_v36  ;;  %v9948_v61 = vrot.slane %v3179_v15, %v9939_v36 }
 0x30a   : > { %v4613_v26 = vadd.f32 %v7195_v6, %v4597_v22  ;;  %v4599_v16 = vadd.f32 %v9643_v14, %v4551_v58  ;;  %v9945_v14 = vsub.s32 1, %v11048_v57 }
 0x30b   : > { %v4616_v34 = vadd.f32 %v7195_v6, %v4600_v11 }
 0x30c   : > { %v4623_v42 = vpack.c.bf16 %v4614_v9, %v4613_v26  ;;  %v4615_v39 = vadd.f32 %v7195_v6, %v4599_v16  ;;  %11059 = vst [vmem:[#allocation21_spill] sm:$0xff] %v9945_v14  ;;  %v9951_v18 = vrot.slane %v3179_v15, %v9945_v14 }
 0x30d   : > { %4688 = vmatmul.mubr.bf16.gmra.mrb[76].mxu0 %v4620_v59 }
 0x30e   : > { %4697 = vmatprep.mubr.bf16.mxu0 %v11038_v33  ;;  %v4624_v63 = vpack.c.bf16 %v4616_v34, %v4615_v39 }
 0x315   : > { %4698 = vmatmul.mubr.bf16.gmra.mrb[80].mxu0 %v4621_v0 }
 0x316   : > { %4707 = vmatprep.mubr.bf16.mxu0 %v11038_v33 }
 0x31d   : > { %4708 = vmatmul.mubr.bf16.gmra.mrb[84].mxu0 %v4622_v4 }
 0x31e   : > { %4717 = vmatprep.mubr.bf16.mxu0 %v11038_v33 }
 0x325   : > { %4718 = vmatmul.mubr.bf16.gmra.mrb[88].mxu0 %v4623_v42 }
 0x326   : > { %4727 = vmatprep.mubr.bf16.mxu0 %v11038_v33 }
 0x32d   : > { %4728 = vmatmul.mubr.bf16.gmra.mrb[92].mxu0 %v4624_v63 }
 0x353   : > { %v3937_v25 = vpop.f32.mrb[64].mxu1 }
 0x354   : > { %v3939_v48 = vpop.f32.mrb[65].mxu1  ;;  %v3938_v43 = vadd.f32 %v3937_v25, %v9948_v61 }
 0x355   : > { %v3941_v33 = vpop.f32.mrb[66].mxu1  ;;  %v3940_v47 = vadd.f32 %v3939_v48, %v9951_v18 }
 0x356   : > { %v3942_v51 = vadd.f32 %v3941_v33, %v9948_v61  ;;  %v3943_v30 = vpop.f32.mrb[67].mxu1 }
 0x357   : > { %v3944_v12 = vadd.f32 %v3943_v30, %v9951_v18 }
 0x358   : > { %v4016_v62 = vpack.c.bf16 %v3942_v51, %v3938_v43 }
 0x359   : > { %v4017_v46 = vpack.c.bf16 %v3944_v12, %v3940_v47 }
 0x35a   : > { %v4798_v35 = vunpack.c.l.bf16 %v4016_v62  ;;  %v4800_v7 = vunpack.c.h.bf16 %v4016_v62 }
 0x35b   : > { %v4799_v52 = vunpack.c.l.bf16 %v4017_v46  ;;  %v4801_v53 = vunpack.c.h.bf16 %v4017_v46  ;;  %v3947_v6 = vpop.f32.mrb[68].mxu1 }
 0x35c   : > { %v4830_v17 = vadd.f32 %v4800_v7, %v4798_v35  ;;  %v4942_v23 = vmul.f32 %v9961_v49, %v4798_v35  ;;  %v4944_v32 = vmul.f32 0.0, %v4800_v7  ;;  %v5086_v54 = vmul.f32 0.0, %v4798_v35  ;;  %v3949_v31 = vpop.f32.mrb[69].mxu1 }
 0x35d   : > { %v5088_v5 = vmul.f32 %v9964_v3, %v4800_v7  ;;  %v4837_v38 = vadd.f32 %v4801_v53, %v4799_v52  ;;  %v4943_v8 = vmul.f32 %v9961_v49, %v4799_v52  ;;  %v4945_v41 = vmul.f32 0.0, %v4801_v53  ;;  %v3951_v29 = vpop.f32.mrb[70].mxu1 }
 0x35e   : > { %v4831_v37 = vrot.slane %v4830_v17, 4  ;;  %v4974_v0 = vadd.f32 %v4944_v32, %v4942_v23  ;;  %v5087_v56 = vmul.f32 0.0, %v4799_v52  ;;  %v5089_v21 = vmul.f32 %v9964_v3, %v4801_v53  ;;  %v3953_v4 = vpop.f32.mrb[71].mxu1 }
 0x35f   : > { %v5118_v19 = vadd.f32 %v5088_v5, %v5086_v54  ;;  %v4838_v13 = vrot.slane %v4837_v38, 4  ;;  %v4981_v44 = vadd.f32 %v4945_v41, %v4943_v8  ;;  %v3948_v27 = vadd.f32 %v3947_v6, %v9948_v61 }
 0x360   : > { %v4832_v55 = vadd.f32 %v4831_v37, %v4830_v17  ;;  %v4975_v59 = vrot.slane %v4974_v0, 4  ;;  %v5125_v28 = vadd.f32 %v5089_v21, %v5087_v56  ;;  %v3950_v40 = vadd.f32 %v3949_v31, %v9951_v18 }
 0x361   : > { %v5119_v1 = vrot.slane %v5118_v19, 4  ;;  %v4839_v60 = vadd.f32 %v4838_v13, %v4837_v38  ;;  %v4982_v2 = vrot.slane %v4981_v44, 4  ;;  %v3952_v10 = vadd.f32 %v3951_v29, %v9948_v61 }
 0x362   : > { %v4833_v45 = vrot.slane %v4832_v55, 2  ;;  %v4976_v50 = vadd.f32 %v4975_v59, %v4974_v0  ;;  %v5126_v22 = vrot.slane %v5125_v28, 4  ;;  %v3954_v58 = vadd.f32 %v3953_v4, %v9951_v18 }
 0x363   : > { %v5120_v11 = vadd.f32 %v5119_v1, %v5118_v19  ;;  %v4840_v26 = vrot.slane %v4839_v60, 2  ;;  %v4983_v9 = vadd.f32 %v4982_v2, %v4981_v44  ;;  %v4018_v16 = vpack.c.bf16 %v3952_v10, %v3948_v27 }
 0x364   : > { %v4834_v42 = vadd.f32 %v4833_v45, %v4832_v55  ;;  %v4977_v39 = vrot.slane %v4976_v50, 2  ;;  %v5127_v34 = vadd.f32 %v5126_v22, %v5125_v28  ;;  %v4019_v63 = vpack.c.bf16 %v3954_v58, %v3950_v40 }
 0x365   : > { %v5121_v15 = vrot.slane %v5120_v11, 2  ;;  %v4841_v25 = vadd.f32 %v4840_v26, %v4839_v60  ;;  %v4984_v48 = vrot.slane %v4983_v9, 2  ;;  %v4802_v33 = vunpack.c.l.bf16 %v4018_v16 }
 0x366   : > { %v4978_v43 = vadd.f32 %v4977_v39, %v4976_v50  ;;  %v5128_v51 = vrot.slane %v5127_v34, 2  ;;  %v4804_v30 = vunpack.c.h.bf16 %v4018_v16  ;;  %v4835_v62 = vrot.slane %v4834_v42, 1 }
 0x367   : > { %v5122_v47 = vadd.f32 %v5121_v15, %v5120_v11  ;;  %v4946_v12 = vmul.f32 %v9961_v49, %v4802_v33  ;;  %v4842_v46 = vrot.slane %v4841_v25, 1  ;;  %v4985_v52 = vadd.f32 %v4984_v48, %v4983_v9 }
 0x368   : > { %v4844_v35 = vadd.f32 %v4804_v30, %v4802_v33  ;;  %v4979_v7 = vrot.slane %v4978_v43, 1  ;;  %v4948_v53 = vmul.f32 0.0, %v4804_v30  ;;  %v5129_v6 = vadd.f32 %v5128_v51, %v5127_v34 }
 0x369   : > { %v5090_v23 = vmul.f32 0.0, %v4802_v33  ;;  %v5123_v32 = vrot.slane %v5122_v47, 1  ;;  %v5092_v31 = vmul.f32 %v9964_v3, %v4804_v30  ;;  %v9976_v5 = vadd.f32 %v4835_v62, %v4834_v42 }
 0x36a   : > { %v4845_v17 = vrot.slane %v4844_v35, 4  ;;  %v4988_v54 = vadd.f32 %v4948_v53, %v4946_v12  ;;  %v9978_v38 = vadd.f32 %v4842_v46, %v4841_v25  ;;  %v4803_v41 = vunpack.c.l.bf16 %v4019_v63 }
 0x36b   : > { %v9980_v29 = vadd.f32 %v4979_v7, %v4978_v43  ;;  %v4986_v37 = vrot.slane %v4985_v52, 1  ;;  %v5132_v56 = vadd.f32 %v5092_v31, %v5090_v23  ;;  %v5130_v21 = vrot.slane %v5129_v6, 1 }
 0x36c   : > { %v4846_v8 = vadd.f32 %v4845_v17, %v4844_v35  ;;  %v4989_v0 = vrot.slane %v4988_v54, 4  ;;  %v4805_v19 = vunpack.c.h.bf16 %v4019_v63  ;;  %v4947_v13 = vmul.f32 %v9961_v49, %v4803_v41 }
 0x36d   : > { %v9983_v44 = vadd.f32 %v5123_v32, %v5122_v47  ;;  %v5133_v55 = vrot.slane %v5132_v56, 4  ;;  %v5091_v59 = vmul.f32 0.0, %v4803_v41  ;;  %v5246_v2 = vsub.f32 %v9976_v5, %v9980_v29 }
 0x36e   : > { %v4847_v4 = vrot.slane %v4846_v8, 2  ;;  %v4990_v27 = vadd.f32 %v4989_v0, %v4988_v54  ;;  %v4851_v40 = vadd.f32 %v4805_v19, %v4803_v41  ;;  %v4949_v1 = vmul.f32 0.0, %v4805_v19 }
 0x36f   : > { %v5093_v60 = vmul.f32 %v9964_v3, %v4805_v19  ;;  %v9988_v10 = vadd.f32 %v4986_v37, %v4985_v52  ;;  %v5134_v50 = vadd.f32 %v5133_v55, %v5132_v56  ;;  %v5230_v9 = vsub.f32 %v9976_v5, %v9983_v44 }
 0x370   : > { %v4848_v28 = vadd.f32 %v4847_v4, %v4846_v8  ;;  %v4991_v45 = vrot.slane %v4990_v27, 2  ;;  %v4852_v58 = vrot.slane %v4851_v40, 4  ;;  %v4995_v11 = vadd.f32 %v4949_v1, %v4947_v13 }
 0x371   : > { %v5139_v26 = vadd.f32 %v5093_v60, %v5091_v59  ;;  %v9992_v16 = vadd.f32 %v5130_v21, %v5129_v6  ;;  %v5135_v39 = vrot.slane %v5134_v50, 2  ;;  %v5247_v32 = vsub.f32 %v9978_v38, %v9988_v10 }
 0x372   : > { %v4849_v22 = vrot.slane %v4848_v28, 1  ;;  %v4992_v42 = vadd.f32 %v4991_v45, %v4990_v27  ;;  %v4853_v15 = vadd.f32 %v4852_v58, %v4851_v40  ;;  %v4996_v25 = vrot.slane %v4995_v11, 4 }
 0x373   : > { %v3957_v34 = vpop.f32.mrb[72].mxu1  ;;  %v5140_v48 = vrot.slane %v5139_v26, 4  ;;  %v5136_v51 = vadd.f32 %v5135_v39, %v5134_v50  ;;  %v5231_v0 = vsub.f32 %v9978_v38, %v9992_v16 }
 0x374   : > { %v4850_v63 = vadd.f32 %v4849_v22, %v4848_v28  ;;  %v3959_v33 = vpop.f32.mrb[73].mxu1  ;;  %v4993_v43 = vrot.slane %v4992_v42, 1  ;;  %v3958_v30 = vadd.f32 %v3957_v34, %v9948_v61  ;;  %v4854_v46 = vrot.slane %v4853_v15, 2 }
 0x375   : > { %v3960_v47 = vadd.f32 %v3959_v33, %v9951_v18  ;;  %v3961_v12 = vpop.f32.mrb[74].mxu1  ;;  %v4997_v35 = vadd.f32 %v4996_v25, %v4995_v11  ;;  %v5141_v7 = vadd.f32 %v5140_v48, %v5139_v26  ;;  %v5137_v6 = vrot.slane %v5136_v51, 1 }
 0x376   : > { %v9998_v62 = vsel %vm5758_vm10, %v4850_v63, %v9976_v5  ;;  %v3963_v52 = vpop.f32.mrb[75].mxu1  ;;  %v4994_v53 = vadd.f32 %v4993_v43, %v4992_v42  ;;  %v3962_v17 = vadd.f32 %v3961_v12, %v9948_v61  ;;  %v4855_v54 = vadd.f32 %v4854_v46, %v4853_v15 }
 0x377   : > { %v3964_v23 = vadd.f32 %v3963_v52, %v9951_v18  ;;  %v4998_v31 = vrot.slane %v4997_v35, 2  ;;  %v5142_v8 = vrot.slane %v5141_v7, 2  ;;  %v5138_v41 = vadd.f32 %v5137_v6, %v5136_v51 }
 0x378   : > { %v5248_v29 = vsub.f32 %v4850_v63, %v4994_v53  ;;  %v4020_v5 = vpack.c.bf16 %v3962_v17, %v3958_v30  ;;  %v4856_v56 = vrot.slane %v4855_v54, 1 }
 0x379   : > { %v4021_v37 = vpack.c.bf16 %v3964_v23, %v3960_v47  ;;  %v4999_v21 = vadd.f32 %v4998_v31, %v4997_v35  ;;  %v5143_v4 = vadd.f32 %v5142_v8, %v5141_v7  ;;  %v5232_v19 = vsub.f32 %v4850_v63, %v5138_v41 }
 0x37a   : > { %v10007_v13 = vsel %vm5758_vm10, %v5248_v29, %v5246_v2  ;;  %v4806_v44 = vunpack.c.l.bf16 %v4020_v5  ;;  %v4808_v27 = vunpack.c.h.bf16 %v4020_v5  ;;  %v4857_v59 = vadd.f32 %v4856_v56, %v4855_v54 }
 0x37b   : > { %v3967_v55 = vpop.f32.mrb[76].mxu1  ;;  %v5000_v28 = vrot.slane %v4999_v21, 1  ;;  %v5144_v40 = vrot.slane %v5143_v4, 1  ;;  %v4807_v1 = vunpack.c.l.bf16 %v4021_v37  ;;  %v10010_v10 = vsel %vm5758_vm10, %v5232_v19, %v5230_v9 }
 0x37c   : > { %v3969_v60 = vpop.f32.mrb[77].mxu1  ;;  %v4858_v45 = vadd.f32 %v4808_v27, %v4806_v44  ;;  %v4950_v50 = vmul.f32 %v9961_v49, %v4806_v44  ;;  %v4952_v22 = vmul.f32 0.0, %v4808_v27  ;;  %v10015_v2 = vsel %vm5758_vm10, %v4857_v59, %v9978_v38 }
 0x37d   : > { %v3971_v58 = vpop.f32.mrb[78].mxu1  ;;  %v5001_v11 = vadd.f32 %v5000_v28, %v4999_v21  ;;  %v5145_v26 = vadd.f32 %v5144_v40, %v5143_v4  ;;  %v5094_v16 = vmul.f32 0.0, %v4806_v44  ;;  %v5096_v63 = vmul.f32 %v9964_v3, %v4808_v27 }
 0x37e   : > { %v3973_v42 = vpop.f32.mrb[79].mxu1  ;;  %v4859_v39 = vrot.slane %v4858_v45, 4  ;;  %v5002_v34 = vadd.f32 %v4952_v22, %v4950_v50  ;;  %v4809_v15 = vunpack.c.h.bf16 %v4021_v37  ;;  %v4951_v48 = vmul.f32 %v9961_v49, %v4807_v1 }
 0x37f   : > { %v5233_v9 = vsub.f32 %v4857_v59, %v5145_v26  ;;  %v5249_v25 = vsub.f32 %v4857_v59, %v5001_v11  ;;  %v5095_v33 = vmul.f32 0.0, %v4807_v1  ;;  %v5146_v30 = vadd.f32 %v5096_v63, %v5094_v16 }
 0x380   : > { %v4860_v43 = vadd.f32 %v4859_v39, %v4858_v45  ;;  %v5003_v51 = vrot.slane %v5002_v34, 4  ;;  %v4865_v47 = vadd.f32 %v4809_v15, %v4807_v1  ;;  %v4953_v46 = vmul.f32 0.0, %v4809_v15 }
 0x381   : > { %v10020_v38 = vsel %vm5758_vm10, %v5233_v9, %v5231_v0  ;;  %v10023_v12 = vsel %vm5758_vm10, %v5249_v25, %v5247_v32  ;;  %v5097_v35 = vmul.f32 %v9964_v3, %v4809_v15  ;;  %v5147_v53 = vrot.slane %v5146_v30, 4 }
 0x382   : > { %v4861_v7 = vrot.slane %v4860_v43, 2  ;;  %v5004_v52 = vadd.f32 %v5003_v51, %v5002_v34  ;;  %v4866_v6 = vrot.slane %v4865_v47, 4  ;;  %v5009_v17 = vadd.f32 %v4953_v46, %v4951_v48 }
 0x383   : > { %v5153_v23 = vadd.f32 %v5097_v35, %v5095_v33  ;;  %v3968_v54 = vadd.f32 %v3967_v55, %v9948_v61  ;;  %v3970_v31 = vadd.f32 %v3969_v60, %v9951_v18  ;;  %v5148_v29 = vadd.f32 %v5147_v53, %v5146_v30 }
 0x384   : > { %v4862_v8 = vadd.f32 %v4861_v7, %v4860_v43  ;;  %v5005_v41 = vrot.slane %v5004_v52, 2  ;;  %v4867_v5 = vadd.f32 %v4866_v6, %v4865_v47  ;;  %v5010_v37 = vrot.slane %v5009_v17, 4 }
 0x385   : > { %v5154_v32 = vrot.slane %v5153_v23, 4  ;;  %v3972_v0 = vadd.f32 %v3971_v58, %v9948_v61  ;;  %v3974_v56 = vadd.f32 %v3973_v42, %v9951_v18  ;;  %v5149_v19 = vrot.slane %v5148_v29, 2 }
 0x386   : > { %v4863_v21 = vrot.slane %v4862_v8, 1  ;;  %v5006_v4 = vadd.f32 %v5005_v41, %v5004_v52  ;;  %v4868_v44 = vrot.slane %v4867_v5, 2  ;;  %v5011_v27 = vadd.f32 %v5010_v37, %v5009_v17 }
 0x387   : > { %v5155_v59 = vadd.f32 %v5154_v32, %v5153_v23  ;;  %v4022_v28 = vpack.c.bf16 %v3972_v0, %v3968_v54  ;;  %v4023_v55 = vpack.c.bf16 %v3974_v56, %v3970_v31  ;;  %v5150_v60 = vadd.f32 %v5149_v19, %v5148_v29 }
 0x388   : > { %v4864_v40 = vadd.f32 %v4863_v21, %v4862_v8  ;;  %v5007_v1 = vrot.slane %v5006_v4, 1  ;;  %v4869_v45 = vadd.f32 %v4868_v44, %v4867_v5  ;;  %v5012_v50 = vrot.slane %v5011_v27, 2 }
 0x389   : > { %v5156_v22 = vrot.slane %v5155_v59, 2  ;;  %v4810_v11 = vunpack.c.l.bf16 %v4022_v28  ;;  %v4812_v26 = vunpack.c.h.bf16 %v4022_v28  ;;  %v5151_v58 = vrot.slane %v5150_v60, 1 }
 0x38a   : > { %v5008_v16 = vadd.f32 %v5007_v1, %v5006_v4  ;;  %v10032_v42 = vsel %vm5760_vm11, %v4864_v40, %v9998_v62  ;;  %v4870_v39 = vrot.slane %v4869_v45, 1  ;;  %v5013_v34 = vadd.f32 %v5012_v50, %v5011_v27 }
 0x38b   : > { %v5157_v63 = vadd.f32 %v5156_v22, %v5155_v59  ;;  %v4872_v15 = vadd.f32 %v4812_v26, %v4810_v11  ;;  %v4954_v9 = vmul.f32 %v9961_v49, %v4810_v11  ;;  %v5152_v25 = vadd.f32 %v5151_v58, %v5150_v60 }
 0x38c   : > { %v5250_v48 = vsub.f32 %v4864_v40, %v5008_v16  ;;  %v4871_v33 = vadd.f32 %v4870_v39, %v4869_v45  ;;  %v4956_v43 = vmul.f32 0.0, %v4812_v26  ;;  %v5014_v51 = vrot.slane %v5013_v34, 1 }
 0x38d   : > { %v5158_v30 = vrot.slane %v5157_v63, 1  ;;  %v4873_v47 = vrot.slane %v4872_v15, 4  ;;  %v5098_v46 = vmul.f32 0.0, %v4810_v11  ;;  %v5234_v35 = vsub.f32 %v4864_v40, %v5152_v25 }
 0x38e   : > { %v10037_v7 = vsel %vm5760_vm11, %v5250_v48, %v10007_v13  ;;  %v10041_v62 = vsel %vm5760_vm11, %v4871_v33, %v10015_v2  ;;  %v5016_v52 = vadd.f32 %v4956_v43, %v4954_v9  ;;  %v5015_v53 = vadd.f32 %v5014_v51, %v5013_v34 }
 0x38f   : > { %v5159_v6 = vadd.f32 %v5158_v30, %v5157_v63  ;;  %v4874_v17 = vadd.f32 %v4873_v47, %v4872_v15  ;;  %v5100_v23 = vmul.f32 %v9964_v3, %v4812_v26  ;;  %v10046_v54 = vsel %vm5760_vm11, %v5234_v35, %v10010_v10 }
 0x390   : > { %v5017_v31 = vrot.slane %v5016_v52, 4  ;;  %v4811_v8 = vunpack.c.l.bf16 %v4023_v55  ;;  %v4813_v41 = vunpack.c.h.bf16 %v4023_v55  ;;  %v5251_v29 = vsub.f32 %v4871_v33, %v5015_v53  ;;  %v3977_v21 = vpop.f32.mrb[80].mxu1 }
 0x391   : > { %v5235_v13 = vsub.f32 %v4871_v33, %v5159_v6  ;;  %v4875_v5 = vrot.slane %v4874_v17, 2  ;;  %v5160_v37 = vadd.f32 %v5100_v23, %v5098_v46  ;;  %v3979_v27 = vpop.f32.mrb[81].mxu1  ;;  %v3978_v22 = vadd.f32 %v3977_v21, %v9948_v61 }
 0x392   : > { %v5018_v2 = vadd.f32 %v5017_v31, %v5016_v52  ;;  %v4879_v32 = vadd.f32 %v4813_v41, %v4811_v8  ;;  %v4955_v0 = vmul.f32 %v9961_v49, %v4811_v8  ;;  %v4957_v56 = vmul.f32 0.0, %v4813_v41  ;;  %v3981_v1 = vpop.f32.mrb[82].mxu1 }
 0x393   : > { %v10051_v4 = vsel %vm5760_vm11, %v5235_v13, %v10020_v38  ;;  %v10055_v10 = vsel %vm5760_vm11, %v5251_v29, %v10023_v12  ;;  %v4876_v19 = vadd.f32 %v4875_v5, %v4874_v17  ;;  %v5161_v44 = vrot.slane %v5160_v37, 4  ;;  %v3983_v38 = vpop.f32.mrb[83].mxu1 }
 0x394   : > { %v5019_v59 = vrot.slane %v5018_v2, 2  ;;  %v4880_v28 = vrot.slane %v4879_v32, 4  ;;  %v5023_v55 = vadd.f32 %v4957_v56, %v4955_v0  ;;  %v5099_v40 = vmul.f32 0.0, %v4811_v8 }
 0x395   : > { %v4877_v60 = vrot.slane %v4876_v19, 1  ;;  %v5162_v45 = vadd.f32 %v5161_v44, %v5160_v37  ;;  %v5101_v50 = vmul.f32 %v9964_v3, %v4813_v41  ;;  %v3980_v12 = vadd.f32 %v3979_v27, %v9951_v18 }
 0x396   : > { %v5020_v11 = vadd.f32 %v5019_v59, %v5018_v2  ;;  %v4881_v26 = vadd.f32 %v4880_v28, %v4879_v32  ;;  %v5024_v16 = vrot.slane %v5023_v55, 4  ;;  %v3982_v63 = vadd.f32 %v3981_v1, %v9948_v61 }
 0x397   : > { %v4878_v58 = vadd.f32 %v4877_v60, %v4876_v19  ;;  %v5163_v39 = vrot.slane %v5162_v45, 2  ;;  %v5167_v34 = vadd.f32 %v5101_v50, %v5099_v40  ;;  %v3984_v48 = vadd.f32 %v3983_v38, %v9951_v18 }
 0x398   : > { %v5021_v15 = vrot.slane %v5020_v11, 1  ;;  %v4882_v9 = vrot.slane %v4881_v26, 2  ;;  %v5025_v25 = vadd.f32 %v5024_v16, %v5023_v55  ;;  %v4024_v30 = vpack.c.bf16 %v3982_v63, %v3978_v22  ;;  %v3987_v53 = vpop.f32.mrb[84].mxu1 }
 0x399   : > { %v5164_v33 = vadd.f32 %v5163_v39, %v5162_v45  ;;  %v10064_v43 = vsel %vm5762_vm12, %v4878_v58, %v10032_v42  ;;  %v5168_v51 = vrot.slane %v5167_v34, 4  ;;  %v4025_v52 = vpack.c.bf16 %v3984_v48, %v3980_v12  ;;  %v3989_v8 = vpop.f32.mrb[85].mxu1 }
 0x39a   : > { %v5022_v47 = vadd.f32 %v5021_v15, %v5020_v11  ;;  %v4883_v46 = vadd.f32 %v4882_v9, %v4881_v26  ;;  %v5026_v35 = vrot.slane %v5025_v25, 2  ;;  %v4814_v23 = vunpack.c.l.bf16 %v4024_v30  ;;  %v3991_v37 = vpop.f32.mrb[86].mxu1 }
 0x39b   : > { %v5165_v6 = vrot.slane %v5164_v33, 1  ;;  %v5169_v17 = vadd.f32 %v5168_v51, %v5167_v34  ;;  %v4816_v31 = vunpack.c.h.bf16 %v4024_v30  ;;  %v4815_v5 = vunpack.c.l.bf16 %v4025_v52  ;;  %v3993_v56 = vpop.f32.mrb[87].mxu1 }
 0x39c   : > { %v5252_v41 = vsub.f32 %v4878_v58, %v5022_v47  ;;  %v4884_v13 = vrot.slane %v4883_v46, 1  ;;  %v5027_v29 = vadd.f32 %v5026_v35, %v5025_v25  ;;  %v4958_v0 = vmul.f32 %v9961_v49, %v4814_v23 }
 0x39d   : > { %v5166_v2 = vadd.f32 %v5165_v6, %v5164_v33  ;;  %v5170_v42 = vrot.slane %v5169_v17, 2  ;;  %v4886_v32 = vadd.f32 %v4816_v31, %v4814_v23  ;;  %v4960_v27 = vmul.f32 0.0, %v4816_v31 }
 0x39e   : > { %v10069_v21 = vsel %vm5762_vm12, %v5252_v41, %v10037_v7  ;;  %v4885_v19 = vadd.f32 %v4884_v13, %v4883_v46  ;;  %v5028_v44 = vrot.slane %v5027_v29, 1  ;;  %v5102_v40 = vmul.f32 0.0, %v4814_v23 }
 0x39f   : > { %v5236_v59 = vsub.f32 %v4878_v58, %v5166_v2  ;;  %v5171_v28 = vadd.f32 %v5170_v42, %v5169_v17  ;;  %v4887_v55 = vrot.slane %v4886_v32, 4  ;;  %v5030_v45 = vadd.f32 %v4960_v27, %v4958_v0 }
 0x3a0   : > { %v5029_v1 = vadd.f32 %v5028_v44, %v5027_v29  ;;  %v10073_v60 = vsel %vm5762_vm12, %v4885_v19, %v10041_v62  ;;  %v5104_v50 = vmul.f32 %v9964_v3, %v4816_v31  ;;  %v4817_v11 = vunpack.c.h.bf16 %v4025_v52 }
 0x3a1   : > { %v10078_v7 = vsel %vm5762_vm12, %v5236_v59, %v10046_v54  ;;  %v5172_v22 = vrot.slane %v5171_v28, 1  ;;  %v4888_v38 = vadd.f32 %v4887_v55, %v4886_v32  ;;  %v5031_v16 = vrot.slane %v5030_v45, 4 }
 0x3a2   : > { %v5253_v26 = vsub.f32 %v4885_v19, %v5029_v1  ;;  %v5174_v12 = vadd.f32 %v5104_v50, %v5102_v40  ;;  %v4959_v58 = vmul.f32 %v9961_v49, %v4815_v5  ;;  %v4893_v62 = vadd.f32 %v4817_v11, %v4815_v5 }
 0x3a3   : > { %v5173_v39 = vadd.f32 %v5172_v22, %v5171_v28  ;;  %v4889_v34 = vrot.slane %v4888_v38, 2  ;;  %v4961_v63 = vmul.f32 0.0, %v4817_v11  ;;  %v5032_v9 = vadd.f32 %v5031_v16, %v5030_v45 }
 0x3a4   : > { %v10083_v15 = vsel %vm5762_vm12, %v5253_v26, %v10055_v10  ;;  %v5175_v25 = vrot.slane %v5174_v12, 4  ;;  %v5103_v54 = vmul.f32 0.0, %v4815_v5  ;;  %v4894_v51 = vrot.slane %v4893_v62, 4 }
 0x3a5   : > { %v5237_v48 = vsub.f32 %v4885_v19, %v5173_v39  ;;  %v4890_v33 = vadd.f32 %v4889_v34, %v4888_v38  ;;  %v5037_v30 = vadd.f32 %v4961_v63, %v4959_v58  ;;  %v5033_v47 = vrot.slane %v5032_v9, 2 }
 0x3a6   : > { %v5176_v46 = vadd.f32 %v5175_v25, %v5174_v12  ;;  %v5105_v35 = vmul.f32 %v9964_v3, %v4817_v11  ;;  %v3988_v52 = vadd.f32 %v3987_v53, %v9948_v61  ;;  %v4895_v10 = vadd.f32 %v4894_v51, %v4893_v62 }
 0x3a7   : > { %v10089_v6 = vsel %vm5762_vm12, %v5237_v48, %v10051_v4  ;;  %v4891_v17 = vrot.slane %v4890_v33, 1  ;;  %v5038_v23 = vrot.slane %v5037_v30, 4  ;;  %v5034_v31 = vadd.f32 %v5033_v47, %v5032_v9 }
 0x3a8   : > { %v5177_v41 = vrot.slane %v5176_v46, 2  ;;  %v5181_v13 = vadd.f32 %v5105_v35, %v5103_v54  ;;  %v3990_v29 = vadd.f32 %v3989_v8, %v9951_v18  ;;  %v4896_v2 = vrot.slane %v4895_v10, 2  ;;  %v3997_v4 = vpop.f32.mrb[88].mxu1 }
 0x3a9   : > { %v4892_v5 = vadd.f32 %v4891_v17, %v4890_v33  ;;  %v5039_v42 = vadd.f32 %v5038_v23, %v5037_v30  ;;  %v3992_v32 = vadd.f32 %v3991_v37, %v9948_v61  ;;  %v5035_v0 = vrot.slane %v5034_v31, 1  ;;  %v3999_v40 = vpop.f32.mrb[89].mxu1 }
 0x3aa   : > { %v5178_v19 = vadd.f32 %v5177_v41, %v5176_v46  ;;  %v5182_v53 = vrot.slane %v5181_v13, 4  ;;  %v3994_v44 = vadd.f32 %v3993_v56, %v9951_v18  ;;  %v4897_v59 = vadd.f32 %v4896_v2, %v4895_v10  ;;  %v4001_v22 = vpop.f32.mrb[90].mxu1 }
 0x3ab   : > { %v10096_v27 = vsel %vm5764_vm13, %v4892_v5, %v10064_v43  ;;  %v5040_v28 = vrot.slane %v5039_v42, 2  ;;  %v4026_v55 = vpack.c.bf16 %v3992_v32, %v3988_v52  ;;  %v5036_v8 = vadd.f32 %v5035_v0, %v5034_v31  ;;  %v4003_v16 = vpop.f32.mrb[91].mxu1 }
 0x3ac   : > { %v5179_v1 = vrot.slane %v5178_v19, 1  ;;  %v5183_v45 = vadd.f32 %v5182_v53, %v5181_v13  ;;  %v4027_v50 = vpack.c.bf16 %v3994_v44, %v3990_v29  ;;  %v4898_v37 = vrot.slane %v4897_v59, 1 }
 0x3ad   : > { %v5041_v38 = vadd.f32 %v5040_v28, %v5039_v42  ;;  %v4818_v11 = vunpack.c.l.bf16 %v4026_v55  ;;  %v4820_v26 = vunpack.c.h.bf16 %v4026_v55  ;;  %v5254_v12 = vsub.f32 %v4892_v5, %v5036_v8 }
 0x3ae   : > { %v5180_v56 = vadd.f32 %v5179_v1, %v5178_v19  ;;  %v5184_v58 = vrot.slane %v5183_v45, 2  ;;  %v4819_v39 = vunpack.c.l.bf16 %v4027_v50  ;;  %v4899_v43 = vadd.f32 %v4898_v37, %v4897_v59 }
 0x3af   : > { %v5042_v34 = vrot.slane %v5041_v38, 1  ;;  %v4900_v62 = vadd.f32 %v4820_v26, %v4818_v11  ;;  %v4962_v63 = vmul.f32 %v9961_v49, %v4818_v11  ;;  %v10101_v25 = vsel %vm5764_vm13, %v5254_v12, %v10069_v21 }
 0x3b0   : > { %v5238_v9 = vsub.f32 %v4892_v5, %v5180_v56  ;;  %v5185_v54 = vadd.f32 %v5184_v58, %v5183_v45  ;;  %v4964_v48 = vmul.f32 0.0, %v4820_v26  ;;  %v10105_v51 = vsel %vm5764_vm13, %v4899_v43, %v10073_v60 }
 0x3b1   : > { %v5043_v33 = vadd.f32 %v5042_v34, %v5041_v38  ;;  %v4901_v30 = vrot.slane %v4900_v62, 4  ;;  %v5106_v47 = vmul.f32 0.0, %v4818_v11  ;;  %v5108_v17 = vmul.f32 %v9964_v3, %v4820_v26 }
 0x3b2   : > { %v10109_v46 = vsel %vm5764_vm13, %v5238_v9, %v10078_v7  ;;  %v5186_v35 = vrot.slane %v5185_v54, 1  ;;  %v5044_v52 = vadd.f32 %v4964_v48, %v4962_v63  ;;  %v4821_v23 = vunpack.c.h.bf16 %v4027_v50 }
 0x3b3   : > { %v5255_v21 = vsub.f32 %v4899_v43, %v5043_v33  ;;  %v4902_v10 = vadd.f32 %v4901_v30, %v4900_v62  ;;  %v4963_v31 = vmul.f32 %v9961_v49, %v4819_v39  ;;  %v5188_v60 = vadd.f32 %v5108_v17, %v5106_v47 }
 0x3b4   : > { %v5187_v41 = vadd.f32 %v5186_v35, %v5185_v54  ;;  %v5045_v13 = vrot.slane %v5044_v52, 4  ;;  %v5107_v29 = vmul.f32 0.0, %v4819_v39  ;;  %v4907_v2 = vadd.f32 %v4821_v23, %v4819_v39 }
 0x3b5   : > { %v10115_v5 = vsel %vm5764_vm13, %v5255_v21, %v10083_v15  ;;  %v4903_v7 = vrot.slane %v4902_v10, 2  ;;  %v4965_v42 = vmul.f32 0.0, %v4821_v23  ;;  %v5189_v19 = vrot.slane %v5188_v60, 4 }
 0x3b6   : > { %v5239_v32 = vsub.f32 %v4899_v43, %v5187_v41  ;;  %v5046_v0 = vadd.f32 %v5045_v13, %v5044_v52  ;;  %v5109_v53 = vmul.f32 %v9964_v3, %v4821_v23  ;;  %v4908_v59 = vrot.slane %v4907_v2, 4 }
 0x3b7   : > { %v4904_v44 = vadd.f32 %v4903_v7, %v4902_v10  ;;  %v5051_v28 = vadd.f32 %v4965_v42, %v4963_v31  ;;  %v3998_v55 = vadd.f32 %v3997_v4, %v9948_v61  ;;  %v5190_v15 = vadd.f32 %v5189_v19, %v5188_v60 }
 0x3b8   : > { %v10121_v8 = vsel %vm5764_vm13, %v5239_v32, %v10089_v6  ;;  %v5047_v1 = vrot.slane %v5046_v0, 2  ;;  %v5195_v45 = vadd.f32 %v5109_v53, %v5107_v29  ;;  %v4909_v37 = vadd.f32 %v4908_v59, %v4907_v2 }
 0x3b9   : > { %v4905_v50 = vrot.slane %v4904_v44, 1  ;;  %v5052_v38 = vrot.slane %v5051_v28, 4  ;;  %v4000_v11 = vadd.f32 %v3999_v40, %v9951_v18  ;;  %v5191_v56 = vrot.slane %v5190_v15, 2 }
 0x3ba   : > { %v5048_v26 = vadd.f32 %v5047_v1, %v5046_v0  ;;  %v5196_v12 = vrot.slane %v5195_v45, 4  ;;  %v4002_v58 = vadd.f32 %v4001_v22, %v9948_v61  ;;  %v4910_v43 = vrot.slane %v4909_v37, 2 }
 0x3bb   : > { %v4906_v39 = vadd.f32 %v4905_v50, %v4904_v44  ;;  %v5053_v4 = vadd.f32 %v5052_v38, %v5051_v28  ;;  %v4004_v34 = vadd.f32 %v4003_v16, %v9951_v18  ;;  %v5192_v62 = vadd.f32 %v5191_v56, %v5190_v15  ;;  %v4007_v54 = vpop.f32.mrb[92].mxu1 }
 0x3bc   : > { %v5049_v6 = vrot.slane %v5048_v26, 1  ;;  %v5197_v63 = vadd.f32 %v5196_v12, %v5195_v45  ;;  %v4028_v9 = vpack.c.bf16 %v4002_v58, %v3998_v55  ;;  %v4911_v40 = vadd.f32 %v4910_v43, %v4909_v37  ;;  %v4009_v47 = vpop.f32.mrb[93].mxu1 }
 0x3bd   : > { %v10128_v48 = vsel %vm5766_vm14, %v4906_v39, %v10096_v27  ;;  %v5054_v33 = vrot.slane %v5053_v4, 2  ;;  %v4029_v30 = vpack.c.bf16 %v4004_v34, %v4000_v11  ;;  %v5193_v22 = vrot.slane %v5192_v62, 1  ;;  %v4011_v21 = vpop.f32.mrb[94].mxu1 }
 0x3be   : > { %v5050_v35 = vadd.f32 %v5049_v6, %v5048_v26  ;;  %v5198_v52 = vrot.slane %v5197_v63, 2  ;;  %v4822_v17 = vunpack.c.l.bf16 %v4028_v9  ;;  %v4912_v10 = vrot.slane %v4911_v40, 1  ;;  %v4013_v41 = vpop.f32.mrb[95].mxu1 }
 0x3bf   : > { %v5055_v16 = vadd.f32 %v5054_v33, %v5053_v4  ;;  %v4824_v23 = vunpack.c.h.bf16 %v4028_v9  ;;  %v4823_v31 = vunpack.c.l.bf16 %v4029_v30  ;;  %v5194_v13 = vadd.f32 %v5193_v22, %v5192_v62 }
 0x3c0   : > { %v5256_v60 = vsub.f32 %v4906_v39, %v5050_v35  ;;  %v5199_v29 = vadd.f32 %v5198_v52, %v5197_v63  ;;  %v4966_v27 = vmul.f32 %v9961_v49, %v4822_v17  ;;  %v4913_v7 = vadd.f32 %v4912_v10, %v4911_v40  ;;  %v10131_v0 = vpop.f32.mrb[64].mxu0 }
 0x3c1   : > { %v5056_v2 = vrot.slane %v5055_v16, 1  ;;  %v4914_v42 = vadd.f32 %v4824_v23, %v4822_v17  ;;  %v4968_v32 = vmul.f32 0.0, %v4824_v23  ;;  %v5240_v19 = vsub.f32 %v4906_v39, %v5194_v13  ;;  %v10137_v28 = vpop.f32.mrb[65].mxu0 }
 0x3c2   : > { %v10135_v53 = vsel %vm5766_vm14, %v5256_v60, %v10101_v25  ;;  %v5200_v44 = vrot.slane %v5199_v29, 1  ;;  %v5110_v59 = vmul.f32 0.0, %v4822_v17  ;;  %v10141_v1 = vsel %vm5766_vm14, %v4913_v7, %v10105_v51  ;;  %v10143_v50 = vpop.f32.mrb[66].mxu0 }
 0x3c3   : > { %v5057_v55 = vadd.f32 %v5056_v2, %v5055_v16  ;;  %v4915_v15 = vrot.slane %v4914_v42, 4  ;;  %v5058_v45 = vadd.f32 %v4968_v32, %v4966_v27  ;;  %v10147_v37 = vsel %vm5766_vm14, %v5240_v19, %v10109_v46  ;;  %v10150_v26 = vpop.f32.mrb[67].mxu0 }
 0x3c4   : > { %v5201_v38 = vadd.f32 %v5200_v44, %v5199_v29  ;;  %v5112_v25 = vmul.f32 %v9964_v3, %v4824_v23  ;;  %v4825_v11 = vunpack.c.h.bf16 %v4029_v30  ;;  %v4967_v51 = vmul.f32 %v9961_v49, %v4823_v31 }
 0x3c5   : > { %v5257_v56 = vsub.f32 %v4913_v7, %v5057_v55  ;;  %v4916_v12 = vadd.f32 %v4915_v15, %v4914_v42  ;;  %v5059_v58 = vrot.slane %v5058_v45, 4  ;;  %v5111_v63 = vmul.f32 0.0, %v4823_v31 }
 0x3c6   : > { %v5241_v39 = vsub.f32 %v4913_v7, %v5201_v38  ;;  %v5202_v43 = vadd.f32 %v5112_v25, %v5110_v59  ;;  %v4921_v4 = vadd.f32 %v4825_v11, %v4823_v31  ;;  %v4969_v34 = vmul.f32 0.0, %v4825_v11 }
 0x3c7   : > { %v10155_v46 = vsel %vm5766_vm14, %v5257_v56, %v10115_v5  ;;  %v4917_v6 = vrot.slane %v4916_v12, 2  ;;  %v5060_v62 = vadd.f32 %v5059_v58, %v5058_v45  ;;  %v5113_v52 = vmul.f32 %v9964_v3, %v4825_v11 }
 0x3c8   : > { %11062 = vst [vmem:[#allocation23_spill] sm:$0xff] %v10155_v46  ;;  %v10159_v9 = vsel %vm5766_vm14, %v5241_v39, %v10121_v8  ;;  %v5203_v40 = vrot.slane %v5202_v43, 4  ;;  %v4922_v33 = vrot.slane %v4921_v4, 4  ;;  %v5065_v30 = vadd.f32 %v4969_v34, %v4967_v51  ;;  %v10164_v5 = vpop.f32.mrb[68].mxu0 }
 0x3c9   : > { %v4918_v35 = vadd.f32 %v4917_v6, %v4916_v12  ;;  %v5061_v22 = vrot.slane %v5060_v62, 2  ;;  %v4008_v17 = vadd.f32 %v4007_v54, %v9948_v61  ;;  %v4010_v31 = vadd.f32 %v4009_v47, %v9951_v18  ;;  %v10167_v8 = vpop.f32.mrb[69].mxu0 }
 0x3ca   : > { %v5204_v10 = vadd.f32 %v5203_v40, %v5202_v43  ;;  %v4923_v16 = vadd.f32 %v4922_v33, %v4921_v4  ;;  %v5066_v23 = vrot.slane %v5065_v30, 4  ;;  %v5209_v29 = vadd.f32 %v5113_v52, %v5111_v63  ;;  %v10170_v7 = vpop.f32.mrb[70].mxu0 }
 0x3cb   : > { %v4919_v13 = vrot.slane %v4918_v35, 1  ;;  %v5062_v60 = vadd.f32 %v5061_v22, %v5060_v62  ;;  %v4012_v27 = vadd.f32 %v4011_v21, %v9948_v61  ;;  %v4014_v32 = vadd.f32 %v4013_v41, %v9951_v18  ;;  %v10173_v19 = vpop.f32.mrb[71].mxu0 }
 0x3cc   : > { %v5205_v2 = vrot.slane %v5204_v10, 2  ;;  %v4924_v54 = vrot.slane %v4923_v16, 2  ;;  %v5067_v42 = vadd.f32 %v5066_v23, %v5065_v30  ;;  %v5210_v55 = vrot.slane %v5209_v29, 4 }
 0x3cd   : > { %v4920_v44 = vadd.f32 %v4919_v13, %v4918_v35  ;;  %v5063_v59 = vrot.slane %v5062_v60, 1  ;;  %v4030_v47 = vpack.c.bf16 %v4012_v27, %v4008_v17  ;;  %v4031_v25 = vpack.c.bf16 %v4014_v32, %v4010_v31 }
 0x3ce   : > { %v5206_v15 = vadd.f32 %v5205_v2, %v5204_v10  ;;  %v4925_v45 = vadd.f32 %v4924_v54, %v4923_v16  ;;  %v5068_v38 = vrot.slane %v5067_v42, 2  ;;  %v5211_v56 = vadd.f32 %v5210_v55, %v5209_v29 }
 0x3cf   : > { %v5064_v11 = vadd.f32 %v5063_v59, %v5062_v60  ;;  %v10177_v21 = vsel %vm5768_vm15, %v4920_v44, %v10128_v48  ;;  %v4826_v12 = vunpack.c.l.bf16 %v4030_v47  ;;  %v4828_v39 = vunpack.c.h.bf16 %v4030_v47 }
 0x3d0   : > { %v5207_v58 = vrot.slane %v5206_v15, 1  ;;  %v4926_v51 = vrot.slane %v4925_v45, 1  ;;  %v5069_v41 = vadd.f32 %v5068_v38, %v5067_v42  ;;  %v5212_v4 = vrot.slane %v5211_v56, 2 }
 0x3d1   : > { %v5258_v43 = vsub.f32 %v4920_v44, %v5064_v11  ;;  %v4970_v34 = vmul.f32 %v9961_v49, %v4826_v12  ;;  %v5114_v6 = vmul.f32 0.0, %v4826_v12  ;;  %v4928_v33 = vadd.f32 %v4828_v39, %v4826_v12 }
 0x3d2   : > { %v5208_v62 = vadd.f32 %v5207_v58, %v5206_v15  ;;  %v10180_v63 = vadd.f32 %v4926_v51, %v4925_v45  ;;  %v5070_v40 = vrot.slane %v5069_v41, 1  ;;  %v5213_v30 = vadd.f32 %v5212_v4, %v5211_v56 }
 0x3d3   : > { %v10184_v48 = vsel %vm5768_vm15, %v5258_v43, %v10135_v53  ;;  %v4972_v35 = vmul.f32 0.0, %v4828_v39  ;;  %v5116_v22 = vmul.f32 %v9964_v3, %v4828_v39  ;;  %v4929_v10 = vrot.slane %v4928_v33, 4 }
 0x3d4   : > { %11063 = vst [vmem:[#allocation26_spill] sm:$0xff] %v10180_v63  ;;  %v5242_v52 = vsub.f32 %v4920_v44, %v5208_v62  ;;  %v10190_v17 = vsel %vm5768_vm15, %v10180_v63, %v10141_v1  ;;  %v10195_v16 = vsel %vm5947_vm0, 1.0, %v11061_v20  ;;  %v5214_v23 = vrot.slane %v5213_v30, 1 }
 0x3d5   : > { %11064 = vst [vmem:[#allocation30_spill] sm:$0xff] %v10195_v16  ;;  %v5072_v31 = vadd.f32 %v4972_v35, %v4970_v34  ;;  %v5216_v53 = vadd.f32 %v5116_v22, %v5114_v6  ;;  %v4827_v13 = vunpack.c.l.bf16 %v4031_v25  ;;  %v10201_v29 = vadd.f32 %v5070_v40, %v5069_v41 }
 0x3d6   : > { %v10199_v60 = vsel %vm5768_vm15, %v5242_v52, %v10147_v37  ;;  %v4930_v27 = vadd.f32 %v4929_v10, %v4928_v33  ;;  %v4829_v1 = vunpack.c.h.bf16 %v4031_v25  ;;  %v5215_v2 = vadd.f32 %v5214_v23, %v5213_v30 }
 0x3d7   : > { %11065 = vst [vmem:[#allocation25_spill] sm:$0xff] %v10201_v29  ;;  %v5073_v54 = vrot.slane %v5072_v31, 4  ;;  %v5217_v42 = vrot.slane %v5216_v53, 4  ;;  %v4971_v57 = vmul.f32 %v9961_v49, %v4827_v13  ;;  %v5115_v55 = vmul.f32 0.0, %v4827_v13 }
 0x3d8   : > { %v4931_v32 = vrot.slane %v4930_v27, 2  ;;  %v4935_v44 = vadd.f32 %v4829_v1, %v4827_v13  ;;  %v4973_v59 = vmul.f32 0.0, %v4829_v1  ;;  %v5243_v47 = vsub.f32 %v10180_v63, %v5215_v2  ;;  %v10206_v38 = vpop.f32.mrb[72].mxu0 }
 0x3d9   : > { %v5074_v15 = vadd.f32 %v5073_v54, %v5072_v31  ;;  %v5218_v45 = vadd.f32 %v5217_v42, %v5216_v53  ;;  %v5117_v37 = vmul.f32 %v9964_v3, %v4829_v1  ;;  %v4660_v12 = vadd.f32 %v10131_v0, %v9948_v61  ;;  %v10210_v58 = vpop.f32.mrb[73].mxu0 }
 0x3da   : > { %v4932_v11 = vadd.f32 %v4931_v32, %v4930_v27  ;;  %v4936_v56 = vrot.slane %v4935_v44, 4  ;;  %v5079_v25 = vadd.f32 %v4973_v59, %v4971_v57  ;;  %v10214_v51 = vsel %vm5768_vm15, %v5243_v47, %v10159_v9  ;;  %v10216_v4 = vpop.f32.mrb[74].mxu0 }
 0x3db   : > { %v5075_v41 = vrot.slane %v5074_v15, 2  ;;  %v5219_v39 = vrot.slane %v5218_v45, 2  ;;  %v5223_v43 = vadd.f32 %v5117_v37, %v5115_v55  ;;  %v4662_v40 = vadd.f32 %v10137_v28, %v9951_v18  ;;  %v10220_v33 = vpop.f32.mrb[75].mxu0 }
 0x3dc   : > { %v4933_v34 = vrot.slane %v4932_v11, 1  ;;  %v4937_v6 = vadd.f32 %v4936_v56, %v4935_v44  ;;  %v5080_v62 = vrot.slane %v5079_v25, 4  ;;  %v4664_v9 = vadd.f32 %v10143_v50, %v9948_v61 }
 0x3dd   : > { %v5076_v0 = vadd.f32 %v5075_v41, %v5074_v15  ;;  %v5220_v30 = vadd.f32 %v5219_v39, %v5218_v45  ;;  %v5224_v35 = vrot.slane %v5223_v43, 4  ;;  %v4666_v23 = vadd.f32 %v10150_v26, %v9951_v18 }
 0x3de   : > { %v4934_v22 = vadd.f32 %v4933_v34, %v4932_v11  ;;  %v4938_v52 = vrot.slane %v4937_v6, 2  ;;  %v5081_v10 = vadd.f32 %v5080_v62, %v5079_v25  ;;  %v4738_v27 = vpack.c.bf16 %v4664_v9, %v4660_v12 }
 0x3df   : > { %v5077_v31 = vrot.slane %v5076_v0, 1  ;;  %v5221_v53 = vrot.slane %v5220_v30, 1  ;;  %v5225_v13 = vadd.f32 %v5224_v35, %v5223_v43  ;;  %v4739_v54 = vpack.c.bf16 %v4666_v23, %v4662_v40 }
 0x3e0   : > { %v10228_v28 = vsel %vm5770_vm1, %v4934_v22, %v10177_v21  ;;  %v4939_v1 = vadd.f32 %v4938_v52, %v4937_v6  ;;  %v5082_v2 = vrot.slane %v5081_v10, 2  ;;  %v10232_v44 = vpop.f32.mrb[76].mxu0  ;;  %v5278_v55 = vunpack.c.l.bf16 %v4738_v27 }
 0x3e1   : > { %11066 = vst [vmem:[#allocation28_spill] sm:$0xff] %v10228_v28  ;;  %v5078_v42 = vadd.f32 %v5077_v31, %v5076_v0  ;;  %v5222_v57 = vadd.f32 %v5221_v53, %v5220_v30  ;;  %v5226_v32 = vrot.slane %v5225_v13, 2  ;;  %v5280_v47 = vunpack.c.h.bf16 %v4738_v27  ;;  %v10234_v15 = vpop.f32.mrb[77].mxu0 }
 0x3e2   : > { %v4940_v26 = vrot.slane %v4939_v1, 1  ;;  %v5083_v59 = vadd.f32 %v5082_v2, %v5081_v10  ;;  %v5279_v11 = vunpack.c.l.bf16 %v4739_v54  ;;  %v10236_v56 = vpop.f32.mrb[78].mxu0  ;;  %v5422_v39 = vmul.f32 %v9961_v49, %v5278_v55 }
 0x3e3   : > { %v5244_v45 = vsub.f32 %v4934_v22, %v5222_v57  ;;  %v5260_v21 = vsub.f32 %v4934_v22, %v5078_v42  ;;  %v5227_v37 = vadd.f32 %v5226_v32, %v5225_v13  ;;  %v5310_v41 = vadd.f32 %v5280_v47, %v5278_v55  ;;  %v10241_v43 = vpop.f32.mrb[79].mxu0 }
 0x3e4   : > { %v10238_v25 = vadd.f32 %v4940_v26, %v4939_v1  ;;  %v5084_v12 = vrot.slane %v5083_v59, 1  ;;  %v5424_v40 = vmul.f32 0.0, %v5280_v47  ;;  %v10257_v30 = vmul.f32 %v10195_v16, %v10228_v28 }
 0x3e5   : > { %v10245_v34 = vsel %vm5770_vm1, %v5244_v45, %v10199_v60  ;;  %v10249_v6 = vsel %vm5770_vm1, %v5260_v21, %v10184_v48  ;;  %v5228_v62 = vrot.slane %v5227_v37, 1  ;;  %v5311_v60 = vrot.slane %v5310_v41, 4 }
 0x3e6   : > { %11067 = vst [vmem:[#allocation32_spill] sm:$0xff] %v10245_v34  ;;  %11068 = vst [vmem:[#allocation34_spill] sm:$0xff] %v10249_v6  ;;  %v10253_v0 = vmul.f32 %v10195_v16, %v10245_v34  ;;  %v10262_v35 = vsel %vm5770_vm1, %v10238_v25, %v10190_v17  ;;  %v5454_v22 = vadd.f32 %v5424_v40, %v5422_v39  ;;  %v5566_v48 = vmul.f32 0.0, %v5278_v55 }
 0x3e7   : > { %11070 = vst [vmem:[#allocation33_spill] sm:$0xff] %v10257_v30  ;;  %11071 = vst [vmem:[#allocation16_spill] sm:$0xff] %v10262_v35  ;;  %v5229_v9 = vadd.f32 %v5228_v62, %v5227_v37  ;;  %v5568_v52 = vmul.f32 %v9964_v3, %v5280_v47  ;;  %v10265_v10 = vadd.f32 %v5084_v12, %v5083_v59  ;;  %v5281_v31 = vunpack.c.h.bf16 %v4739_v54 }
 0x3e8   : > { %11069 = vst [vmem:[#allocation31_spill] sm:$0xff] %v10253_v0  ;;  %v5312_v23 = vadd.f32 %v5311_v60, %v5310_v41  ;;  %v5423_v53 = vmul.f32 %v9961_v49, %v5279_v11  ;;  %v5455_v27 = vrot.slane %v5454_v22, 4  ;;  %v5567_v2 = vmul.f32 0.0, %v5279_v11  ;;  %v10269_v42 = vpop.f32.mrb[80].mxu0 }
 0x3e9   : > { %v5245_v13 = vsub.f32 %v10238_v25, %v5229_v9  ;;  %v5598_v1 = vadd.f32 %v5568_v52, %v5566_v48  ;;  %v5317_v57 = vadd.f32 %v5281_v31, %v5279_v11  ;;  %v5425_v32 = vmul.f32 0.0, %v5281_v31  ;;  %v10272_v55 = vpop.f32.mrb[81].mxu0 }
 0x3ea   : > { %v5313_v17 = vrot.slane %v5312_v23, 2  ;;  %v5569_v26 = vmul.f32 %v9964_v3, %v5281_v31  ;;  %v5456_v54 = vadd.f32 %v5455_v27, %v5454_v22  ;;  %v4670_v45 = vadd.f32 %v10164_v5, %v9948_v61  ;;  %v10280_v21 = vpop.f32.mrb[82].mxu0 }
 0x3eb   : > { %v10276_v59 = vsel %vm5770_vm1, %v5245_v13, %v10214_v51  ;;  %v5599_v47 = vrot.slane %v5598_v1, 4  ;;  %v5318_v12 = vrot.slane %v5317_v57, 4  ;;  %v5461_v41 = vadd.f32 %v5425_v32, %v5423_v53  ;;  %v10282_v39 = vpop.f32.mrb[83].mxu0 }
 0x3ec   : > { %11072 = vst [vmem:[#allocation29_spill] sm:$0xff] %v10276_v59  ;;  %v5314_v37 = vadd.f32 %v5313_v17, %v5312_v23  ;;  %v5605_v11 = vadd.f32 %v5569_v26, %v5567_v2  ;;  %v5457_v62 = vrot.slane %v5456_v54, 2  ;;  %v4672_v60 = vadd.f32 %v10167_v8, %v9951_v18 }
 0x3ed   : > { %v5600_v40 = vadd.f32 %v5599_v47, %v5598_v1  ;;  %v4674_v51 = vadd.f32 %v10170_v7, %v9948_v61  ;;  %v5319_v22 = vadd.f32 %v5318_v12, %v5317_v57  ;;  %v5462_v48 = vrot.slane %v5461_v41, 4 }
 0x3ee   : > { %v5315_v9 = vrot.slane %v5314_v37, 1  ;;  %v5606_v5 = vrot.slane %v5605_v11, 4  ;;  %v5458_v52 = vadd.f32 %v5457_v62, %v5456_v54  ;;  %v4676_v53 = vadd.f32 %v10173_v19, %v9951_v18 }
 0x3ef   : > { %v5601_v31 = vrot.slane %v5600_v40, 2  ;;  %v4740_v23 = vpack.c.bf16 %v4674_v51, %v4670_v45  ;;  %v5320_v27 = vrot.slane %v5319_v22, 2  ;;  %v5463_v1 = vadd.f32 %v5462_v48, %v5461_v41 }
 0x3f0   : > { %v10290_v13 = vadd.f32 %v5315_v9, %v5314_v37  ;;  %v5607_v2 = vadd.f32 %v5606_v5, %v5605_v11  ;;  %v5459_v17 = vrot.slane %v5458_v52, 1  ;;  %v10292_v7 = vpop.f32.mrb[84].mxu0  ;;  %v4741_v54 = vpack.c.bf16 %v4676_v53, %v4672_v60 }
 0x3f1   : > { %v5602_v8 = vadd.f32 %v5601_v31, %v5600_v40  ;;  %v5282_v32 = vunpack.c.l.bf16 %v4740_v23  ;;  %v5284_v26 = vunpack.c.h.bf16 %v4740_v23  ;;  %v5321_v57 = vadd.f32 %v5320_v27, %v5319_v22  ;;  %v10294_v62 = vpop.f32.mrb[85].mxu0 }
 0x3f2   : > { %v5464_v47 = vrot.slane %v5463_v1, 2  ;;  %v5608_v12 = vrot.slane %v5607_v2, 2  ;;  %v10296_v45 = vadd.f32 %v5459_v17, %v5458_v52  ;;  %v10299_v41 = vpop.f32.mrb[86].mxu0  ;;  %v5285_v60 = vunpack.c.h.bf16 %v4741_v54 }
 0x3f3   : > { %v5603_v19 = vrot.slane %v5602_v8, 1  ;;  %v5324_v37 = vadd.f32 %v5284_v26, %v5282_v32  ;;  %v5426_v51 = vmul.f32 %v9961_v49, %v5282_v32  ;;  %v5322_v11 = vrot.slane %v5321_v57, 1  ;;  %v10301_v5 = vpop.f32.mrb[87].mxu0 }
 0x3f4   : > { %v5465_v40 = vadd.f32 %v5464_v47, %v5463_v1  ;;  %v5609_v9 = vadd.f32 %v5608_v12, %v5607_v2  ;;  %v5428_v48 = vmul.f32 0.0, %v5284_v26  ;;  %v5570_v52 = vmul.f32 0.0, %v5282_v32 }
 0x3f5   : > { %v10303_v22 = vadd.f32 %v5603_v19, %v5602_v8  ;;  %v5325_v31 = vrot.slane %v5324_v37, 4  ;;  %v10307_v23 = vadd.f32 %v5322_v11, %v5321_v57  ;;  %v5572_v2 = vmul.f32 %v9964_v3, %v5284_v26 }
 0x3f6   : > { %v5466_v53 = vrot.slane %v5465_v40, 1  ;;  %v5610_v27 = vrot.slane %v5609_v9, 1  ;;  %v5468_v17 = vadd.f32 %v5428_v48, %v5426_v51  ;;  %v5283_v47 = vunpack.c.l.bf16 %v4741_v54 }
 0x3f7   : > { %v5326_v1 = vadd.f32 %v5325_v31, %v5324_v37  ;;  %v5612_v32 = vadd.f32 %v5572_v2, %v5570_v52  ;;  %v5429_v54 = vmul.f32 0.0, %v5285_v60  ;;  %v5573_v52 = vmul.f32 %v9964_v3, %v5285_v60 }
 0x3f8   : > { %v10312_v12 = vadd.f32 %v5466_v53, %v5465_v40  ;;  %v10314_v8 = vadd.f32 %v5610_v27, %v5609_v9  ;;  %v5469_v19 = vrot.slane %v5468_v17, 4  ;;  %v5427_v57 = vmul.f32 %v9961_v49, %v5283_v47  ;;  %v10317_v14 = vpop.f32.mrb[88].mxu0 }
 0x3f9   : > { %v5327_v16 = vrot.slane %v5326_v1, 2  ;;  %v5571_v11 = vmul.f32 0.0, %v5283_v47  ;;  %v5331_v40 = vadd.f32 %v5285_v60, %v5283_v47  ;;  %v10323_v48 = vpop.f32.mrb[89].mxu0  ;;  %v5613_v31 = vrot.slane %v5612_v32, 4 }
 0x3fa   : > { %v5470_v37 = vadd.f32 %v5469_v19, %v5468_v17  ;;  %v10326_v53 = vpop.f32.mrb[90].mxu0  ;;  %v4680_v50 = vadd.f32 %v10206_v38, %v9948_v61  ;;  %v4682_v51 = vadd.f32 %v10210_v58, %v9951_v18  ;;  %v5475_v19 = vadd.f32 %v5429_v54, %v5427_v57 }
 0x3fb   : > { %v5328_v9 = vadd.f32 %v5327_v16, %v5326_v1  ;;  %v5332_v2 = vrot.slane %v5331_v40, 4  ;;  %v10332_v26 = vpop.f32.mrb[91].mxu0  ;;  %v5614_v47 = vadd.f32 %v5613_v31, %v5612_v32  ;;  %v5619_v16 = vadd.f32 %v5573_v52, %v5571_v11 }
 0x3fc   : > { %v5471_v27 = vrot.slane %v5470_v37, 2  ;;  %v4684_v60 = vadd.f32 %v10216_v4, %v9948_v61  ;;  %v4686_v36 = vadd.f32 %v10220_v33, %v9951_v18  ;;  %v5476_v38 = vrot.slane %v5475_v19, 4 }
 0x3fd   : > { %v5329_v17 = vrot.slane %v5328_v9, 1  ;;  %v5333_v59 = vadd.f32 %v5332_v2, %v5331_v40  ;;  %v5615_v63 = vrot.slane %v5614_v47, 2  ;;  %v5620_v46 = vrot.slane %v5619_v16, 4 }
 0x3fe   : > { %v5472_v1 = vadd.f32 %v5471_v27, %v5470_v37  ;;  %v4742_v0 = vpack.c.bf16 %v4684_v60, %v4680_v50  ;;  %v4743_v34 = vpack.c.bf16 %v4686_v36, %v4682_v51  ;;  %v5477_v57 = vadd.f32 %v5476_v38, %v5475_v19 }
 0x3ff   : > { %v5330_v29 = vadd.f32 %v5329_v17, %v5328_v9  ;;  %v5334_v58 = vrot.slane %v5333_v59, 2  ;;  %v5616_v6 = vadd.f32 %v5615_v63, %v5614_v47  ;;  %v5621_v11 = vadd.f32 %v5620_v46, %v5619_v16 }
 0x400   : > { %v5473_v35 = vrot.slane %v5472_v1, 1  ;;  %v10342_v37 = vpop.f32.mrb[92].mxu0  ;;  %v5286_v33 = vunpack.c.l.bf16 %v4742_v0  ;;  %v5288_v9 = vunpack.c.h.bf16 %v4742_v0  ;;  %v5478_v52 = vrot.slane %v5477_v57, 2 }
 0x401   : > { %v10340_v32 = vsel %vm5758_vm10, %v5330_v29, %v10290_v13  ;;  %v5335_v40 = vadd.f32 %v5334_v58, %v5333_v59  ;;  %v10344_v31 = vpop.f32.mrb[93].mxu0  ;;  %v5617_v54 = vrot.slane %v5616_v6, 1  ;;  %v5622_v27 = vrot.slane %v5621_v11, 2 }
 0x402   : > { %v5474_v4 = vadd.f32 %v5473_v35, %v5472_v1  ;;  %v5287_v50 = vunpack.c.l.bf16 %v4743_v34  ;;  %v10346_v36 = vpop.f32.mrb[94].mxu0  ;;  %v5338_v2 = vadd.f32 %v5288_v9, %v5286_v33  ;;  %v5430_v17 = vmul.f32 %v9961_v49, %v5286_v33 }
 0x403   : > { %v5336_v51 = vrot.slane %v5335_v40, 1  ;;  %v10349_v46 = vpop.f32.mrb[95].mxu0  ;;  %v5618_v47 = vadd.f32 %v5617_v54, %v5616_v6  ;;  %v5479_v35 = vadd.f32 %v5478_v52, %v5477_v57  ;;  %v5623_v59 = vadd.f32 %v5622_v27, %v5621_v11 }
 0x404   : > { %v5728_v63 = vsub.f32 %v5330_v29, %v5474_v4  ;;  %11073 = vst [vmem:[#allocation27_spill] sm:$0xff] %v10349_v46  ;;  %v5432_v19 = vmul.f32 0.0, %v5288_v9  ;;  %v11074_v0 = vsub.f32 %v10290_v13, %v10296_v45  ;;  %v5339_v60 = vrot.slane %v5338_v2, 4 }
 0x405   : > { %v5337_v1 = vadd.f32 %v5336_v51, %v5335_v40  ;;  %v5574_v38 = vmul.f32 0.0, %v5286_v33  ;;  %v5712_v58 = vsub.f32 %v5330_v29, %v5618_v47  ;;  %v5480_v4 = vrot.slane %v5479_v35, 1 }
 0x406   : > { %v10355_v16 = vsel %vm5758_vm10, %v5728_v63, %v11074_v0  ;;  %v5624_v30 = vrot.slane %v5623_v59, 1  ;;  %v5482_v28 = vadd.f32 %v5432_v19, %v5430_v17  ;;  %v5340_v6 = vadd.f32 %v5339_v60, %v5338_v2 }
 0x407   : > { %v10359_v46 = vsel %vm5758_vm10, %v5337_v1, %v10307_v23  ;;  %v5576_v57 = vmul.f32 %v9964_v3, %v5288_v9  ;;  %v5289_v11 = vunpack.c.h.bf16 %v4743_v34  ;;  %v11075_v45 = vsub.f32 %v10290_v13, %v10303_v22 }
 0x408   : > { %v5481_v40 = vadd.f32 %v5480_v4, %v5479_v35  ;;  %v5625_v33 = vadd.f32 %v5624_v30, %v5623_v59  ;;  %v5483_v29 = vrot.slane %v5482_v28, 4  ;;  %v5341_v52 = vrot.slane %v5340_v6, 2 }
 0x409   : > { %v10366_v54 = vsel %vm5758_vm10, %v5712_v58, %v11075_v45  ;;  %v5626_v27 = vadd.f32 %v5576_v57, %v5574_v38  ;;  %v5345_v63 = vadd.f32 %v5289_v11, %v5287_v50  ;;  %v5431_v51 = vmul.f32 %v9961_v49, %v5287_v50 }
 0x40a   : > { %v5713_v17 = vsub.f32 %v5337_v1, %v5625_v33  ;;  %v5729_v47 = vsub.f32 %v5337_v1, %v5481_v40  ;;  %v5484_v2 = vadd.f32 %v5483_v29, %v5482_v28  ;;  %v5433_v19 = vmul.f32 0.0, %v5289_v11 }
 0x40b   : > { %v5342_v9 = vadd.f32 %v5341_v52, %v5340_v6  ;;  %v5627_v34 = vrot.slane %v5626_v27, 4  ;;  %v5346_v0 = vrot.slane %v5345_v63, 4  ;;  %v5575_v60 = vmul.f32 0.0, %v5287_v50 }
 0x40c   : > { %v11076_v13 = vsub.f32 %v10307_v23, %v10314_v8  ;;  %v11077_v30 = vsub.f32 %v10307_v23, %v10312_v12  ;;  %v5485_v59 = vrot.slane %v5484_v2, 2  ;;  %v5489_v1 = vadd.f32 %v5433_v19, %v5431_v51 }
 0x40d   : > { %v5343_v28 = vrot.slane %v5342_v9, 1  ;;  %v5628_v38 = vadd.f32 %v5627_v34, %v5626_v27  ;;  %v5347_v58 = vadd.f32 %v5346_v0, %v5345_v63  ;;  %v5577_v4 = vmul.f32 %v9964_v3, %v5289_v11 }
 0x40e   : > { %v10373_v22 = vsel %vm5758_vm10, %v5713_v17, %v11076_v13  ;;  %v10379_v35 = vsel %vm5758_vm10, %v5729_v47, %v11077_v30  ;;  %v5486_v50 = vadd.f32 %v5485_v59, %v5484_v2  ;;  %v5490_v6 = vrot.slane %v5489_v1, 4 }
 0x40f   : > { %v4690_v8 = vadd.f32 %v10232_v44, %v9948_v61  ;;  %v4692_v57 = vadd.f32 %v10234_v15, %v9951_v18  ;;  %v5344_v45 = vadd.f32 %v5343_v28, %v5342_v9  ;;  %v5629_v23 = vrot.slane %v5628_v38, 2 }
 0x410   : > { %v5348_v12 = vrot.slane %v5347_v58, 2  ;;  %v5633_v40 = vadd.f32 %v5577_v4, %v5575_v60  ;;  %v5487_v33 = vrot.slane %v5486_v50, 1  ;;  %v5491_v29 = vadd.f32 %v5490_v6, %v5489_v1 }
 0x411   : > { %v4694_v52 = vadd.f32 %v10236_v56, %v9948_v61  ;;  %v4696_v11 = vadd.f32 %v10241_v43, %v9951_v18  ;;  %v5630_v27 = vadd.f32 %v5629_v23, %v5628_v38  ;;  %v10392_v63 = vsel %vm5760_vm11, %v5344_v45, %v10340_v32 }
 0x412   : > { %v5349_v44 = vadd.f32 %v5348_v12, %v5347_v58  ;;  %v5634_v51 = vrot.slane %v5633_v40, 4  ;;  %v5488_v15 = vadd.f32 %v5487_v33, %v5486_v50  ;;  %v5492_v17 = vrot.slane %v5491_v29, 2 }
 0x413   : > { %v4744_v47 = vpack.c.bf16 %v4694_v52, %v4690_v8  ;;  %v4745_v2 = vpack.c.bf16 %v4696_v11, %v4692_v57  ;;  %v5631_v19 = vrot.slane %v5630_v27, 1  ;;  %v4700_v56 = vadd.f32 %v10269_v42, %v9948_v61 }
 0x414   : > { %v5350_v9 = vrot.slane %v5349_v44, 1  ;;  %v5635_v34 = vadd.f32 %v5634_v51, %v5633_v40  ;;  %v5730_v0 = vsub.f32 %v5344_v45, %v5488_v15  ;;  %v5493_v60 = vadd.f32 %v5492_v17, %v5491_v29 }
 0x415   : > { %v5290_v43 = vunpack.c.l.bf16 %v4744_v47  ;;  %v5292_v13 = vunpack.c.h.bf16 %v4744_v47  ;;  %v5632_v30 = vadd.f32 %v5631_v19, %v5630_v27  ;;  %v5291_v1 = vunpack.c.l.bf16 %v4745_v2 }
 0x416   : > { %v5351_v59 = vadd.f32 %v5350_v9, %v5349_v44  ;;  %v5636_v32 = vrot.slane %v5635_v34, 2  ;;  %v10398_v28 = vsel %vm5760_vm11, %v5730_v0, %v10355_v16  ;;  %v5494_v38 = vrot.slane %v5493_v60, 1 }
 0x417   : > { %v5352_v58 = vadd.f32 %v5292_v13, %v5290_v43  ;;  %v5434_v4 = vmul.f32 %v9961_v49, %v5290_v43  ;;  %v5714_v50 = vsub.f32 %v5344_v45, %v5632_v30  ;;  %v5436_v8 = vmul.f32 0.0, %v5292_v13 }
 0x418   : > { %v5637_v6 = vadd.f32 %v5636_v32, %v5635_v34  ;;  %v10403_v42 = vsel %vm5760_vm11, %v5351_v59, %v10359_v46  ;;  %v5495_v57 = vadd.f32 %v5494_v38, %v5493_v60  ;;  %v5578_v12 = vmul.f32 0.0, %v5290_v43 }
 0x419   : > { %v5353_v23 = vrot.slane %v5352_v58, 4  ;;  %v5580_v40 = vmul.f32 %v9964_v3, %v5292_v13  ;;  %v10408_v16 = vsel %vm5760_vm11, %v5714_v50, %v10366_v54  ;;  %v5496_v29 = vadd.f32 %v5436_v8, %v5434_v4 }
 0x41a   : > { %v5638_v33 = vrot.slane %v5637_v6, 1  ;;  %v5293_v52 = vunpack.c.h.bf16 %v4745_v2  ;;  %v5731_v11 = vsub.f32 %v5351_v59, %v5495_v57  ;;  %v5435_v44 = vmul.f32 %v9961_v49, %v5291_v1 }
 0x41b   : > { %v5354_v45 = vadd.f32 %v5353_v23, %v5352_v58  ;;  %v5640_v27 = vadd.f32 %v5580_v40, %v5578_v12  ;;  %v5497_v51 = vrot.slane %v5496_v29, 4  ;;  %v5579_v54 = vmul.f32 0.0, %v5291_v1 }
 0x41c   : > { %v5639_v46 = vadd.f32 %v5638_v33, %v5637_v6  ;;  %v5359_v15 = vadd.f32 %v5293_v52, %v5291_v1  ;;  %v5437_v17 = vmul.f32 0.0, %v5293_v52  ;;  %v10413_v47 = vsel %vm5760_vm11, %v5731_v11, %v10379_v35 }
 0x41d   : > { %v5355_v19 = vrot.slane %v5354_v45, 2  ;;  %v5641_v9 = vrot.slane %v5640_v27, 4  ;;  %v5498_v0 = vadd.f32 %v5497_v51, %v5496_v29  ;;  %v5581_v30 = vmul.f32 %v9964_v3, %v5293_v52 }
 0x41e   : > { %v5715_v34 = vsub.f32 %v5351_v59, %v5639_v46  ;;  %v5360_v60 = vrot.slane %v5359_v15, 4  ;;  %v5503_v2 = vadd.f32 %v5437_v17, %v5435_v44  ;;  %v4702_v32 = vadd.f32 %v10272_v55, %v9951_v18 }
 0x41f   : > { %v5356_v43 = vadd.f32 %v5355_v19, %v5354_v45  ;;  %v5642_v13 = vadd.f32 %v5641_v9, %v5640_v27  ;;  %v5499_v35 = vrot.slane %v5498_v0, 2  ;;  %v5647_v59 = vadd.f32 %v5581_v30, %v5579_v54 }
 0x420   : > { %v10420_v38 = vsel %vm5760_vm11, %v5715_v34, %v10373_v22  ;;  %v5361_v58 = vadd.f32 %v5360_v60, %v5359_v15  ;;  %v5504_v4 = vrot.slane %v5503_v2, 4  ;;  %v4704_v6 = vadd.f32 %v10280_v21, %v9948_v61 }
 0x421   : > { %v5357_v50 = vrot.slane %v5356_v43, 1  ;;  %v5643_v1 = vrot.slane %v5642_v13, 2  ;;  %v5500_v8 = vadd.f32 %v5499_v35, %v5498_v0  ;;  %v4706_v12 = vadd.f32 %v10282_v39, %v9951_v18 }
 0x422   : > { %v5362_v57 = vrot.slane %v5361_v58, 2  ;;  %v5505_v23 = vadd.f32 %v5504_v4, %v5503_v2  ;;  %v5648_v33 = vrot.slane %v5647_v59, 4  ;;  %v4746_v22 = vpack.c.bf16 %v4704_v6, %v4700_v56 }
 0x423   : > { %v5358_v55 = vadd.f32 %v5357_v50, %v5356_v43  ;;  %v5644_v40 = vadd.f32 %v5643_v1, %v5642_v13  ;;  %v5501_v29 = vrot.slane %v5500_v8, 1  ;;  %v4747_v45 = vpack.c.bf16 %v4706_v12, %v4702_v32 }
 0x424   : > { %v5363_v52 = vadd.f32 %v5362_v57, %v5361_v58  ;;  %v5506_v11 = vrot.slane %v5505_v23, 2  ;;  %v5649_v21 = vadd.f32 %v5648_v33, %v5647_v59  ;;  %v5294_v46 = vunpack.c.l.bf16 %v4746_v22 }
 0x425   : > { %v5645_v27 = vrot.slane %v5644_v40, 1  ;;  %v10428_v44 = vsel %vm5762_vm12, %v5358_v55, %v10392_v63  ;;  %v5502_v51 = vadd.f32 %v5501_v29, %v5500_v8  ;;  %v5296_v19 = vunpack.c.h.bf16 %v4746_v22 }
 0x426   : > { %v5364_v15 = vrot.slane %v5363_v52, 1  ;;  %v5507_v17 = vadd.f32 %v5506_v11, %v5505_v23  ;;  %v5650_v9 = vrot.slane %v5649_v21, 2  ;;  %v5438_v54 = vmul.f32 %v9961_v49, %v5294_v46 }
 0x427   : > { %v5646_v39 = vadd.f32 %v5645_v27, %v5644_v40  ;;  %v5582_v56 = vmul.f32 0.0, %v5294_v46  ;;  %v5732_v34 = vsub.f32 %v5358_v55, %v5502_v51  ;;  %v5366_v2 = vadd.f32 %v5296_v19, %v5294_v46 }
 0x428   : > { %v5365_v0 = vadd.f32 %v5364_v15, %v5363_v52  ;;  %v5508_v60 = vrot.slane %v5507_v17, 1  ;;  %v5651_v13 = vadd.f32 %v5650_v9, %v5649_v21  ;;  %v5440_v30 = vmul.f32 0.0, %v5296_v19 }
 0x429   : > { %v5716_v43 = vsub.f32 %v5358_v55, %v5646_v39  ;;  %v5584_v63 = vmul.f32 %v9964_v3, %v5296_v19  ;;  %v10434_v32 = vsel %vm5762_vm12, %v5732_v34, %v10398_v28  ;;  %v5367_v4 = vrot.slane %v5366_v2, 4 }
 0x42a   : > { %v5509_v35 = vadd.f32 %v5508_v60, %v5507_v17  ;;  %v10438_v58 = vsel %vm5762_vm12, %v5365_v0, %v10403_v42  ;;  %v5652_v1 = vrot.slane %v5651_v13, 1  ;;  %v5510_v59 = vadd.f32 %v5440_v30, %v5438_v54 }
 0x42b   : > { %v10442_v50 = vsel %vm5762_vm12, %v5716_v43, %v10408_v16  ;;  %v5654_v6 = vadd.f32 %v5584_v63, %v5582_v56  ;;  %v5368_v57 = vadd.f32 %v5367_v4, %v5366_v2  ;;  %v5295_v23 = vunpack.c.l.bf16 %v4747_v45 }
 0x42c   : > { %v5733_v8 = vsub.f32 %v5365_v0, %v5509_v35  ;;  %v5297_v12 = vunpack.c.h.bf16 %v4747_v45  ;;  %v5653_v55 = vadd.f32 %v5652_v1, %v5651_v13  ;;  %v5511_v28 = vrot.slane %v5510_v59, 4 }
 0x42d   : > { %v5655_v40 = vrot.slane %v5654_v6, 4  ;;  %v4710_v33 = vadd.f32 %v10292_v7, %v9948_v61  ;;  %v5369_v22 = vrot.slane %v5368_v57, 2  ;;  %v5439_v29 = vmul.f32 %v9961_v49, %v5295_v23 }
 0x42e   : > { %v10448_v42 = vsel %vm5762_vm12, %v5733_v8, %v10413_v47  ;;  %v5373_v16 = vadd.f32 %v5297_v12, %v5295_v23  ;;  %v5717_v52 = vsub.f32 %v5365_v0, %v5653_v55  ;;  %v5512_v11 = vadd.f32 %v5511_v28, %v5510_v59 }
 0x42f   : > { %v5656_v27 = vadd.f32 %v5655_v40, %v5654_v6  ;;  %v5441_v21 = vmul.f32 0.0, %v5297_v12  ;;  %v5370_v46 = vadd.f32 %v5369_v22, %v5368_v57  ;;  %v5583_v51 = vmul.f32 0.0, %v5295_v23 }
 0x430   : > { %v5374_v45 = vrot.slane %v5373_v16, 4  ;;  %v5585_v15 = vmul.f32 %v9964_v3, %v5297_v12  ;;  %v10454_v7 = vsel %vm5762_vm12, %v5717_v52, %v10420_v38  ;;  %v5513_v17 = vrot.slane %v5512_v11, 2 }
 0x431   : > { %v5657_v47 = vrot.slane %v5656_v27, 2  ;;  %v5517_v19 = vadd.f32 %v5441_v21, %v5439_v29  ;;  %v5371_v39 = vrot.slane %v5370_v46, 1  ;;  %v4712_v56 = vadd.f32 %v10294_v62, %v9951_v18 }
 0x432   : > { %v5375_v9 = vadd.f32 %v5374_v45, %v5373_v16  ;;  %v5661_v54 = vadd.f32 %v5585_v15, %v5583_v51  ;;  %v5514_v34 = vadd.f32 %v5513_v17, %v5512_v11  ;;  %v4714_v2 = vadd.f32 %v10299_v41, %v9948_v61 }
 0x433   : > { %v5658_v0 = vadd.f32 %v5657_v47, %v5656_v27  ;;  %v5518_v60 = vrot.slane %v5517_v19, 4  ;;  %v5372_v43 = vadd.f32 %v5371_v39, %v5370_v46  ;;  %v4716_v38 = vadd.f32 %v10301_v5, %v9951_v18 }
 0x434   : > { %v5376_v13 = vrot.slane %v5375_v9, 2  ;;  %v5662_v30 = vrot.slane %v5661_v54, 4  ;;  %v5515_v63 = vrot.slane %v5514_v34, 1  ;;  %v4748_v1 = vpack.c.bf16 %v4714_v2, %v4710_v33 }
 0x435   : > { %v5659_v35 = vrot.slane %v5658_v0, 1  ;;  %v5519_v4 = vadd.f32 %v5518_v60, %v5517_v19  ;;  %v10464_v59 = vsel %vm5764_vm13, %v5372_v43, %v10428_v44  ;;  %v4749_v8 = vpack.c.bf16 %v4716_v38, %v4712_v56 }
 0x436   : > { %v5377_v62 = vadd.f32 %v5376_v13, %v5375_v9  ;;  %v5663_v6 = vadd.f32 %v5662_v30, %v5661_v54  ;;  %v5516_v57 = vadd.f32 %v5515_v63, %v5514_v34  ;;  %v5298_v12 = vunpack.c.l.bf16 %v4748_v1 }
 0x437   : > { %v5660_v23 = vadd.f32 %v5659_v35, %v5658_v0  ;;  %v5520_v41 = vrot.slane %v5519_v4, 2  ;;  %v5300_v40 = vunpack.c.h.bf16 %v4748_v1  ;;  %v5299_v22 = vunpack.c.l.bf16 %v4749_v8 }
 0x438   : > { %v5378_v55 = vrot.slane %v5377_v62, 1  ;;  %v5664_v28 = vrot.slane %v5663_v6, 2  ;;  %v5734_v16 = vsub.f32 %v5372_v43, %v5516_v57  ;;  %v5442_v33 = vmul.f32 %v9961_v49, %v5298_v12 }
 0x439   : > { %v5718_v5 = vsub.f32 %v5372_v43, %v5660_v23  ;;  %v5521_v29 = vadd.f32 %v5520_v41, %v5519_v4  ;;  %v5380_v44 = vadd.f32 %v5300_v40, %v5298_v12  ;;  %v5444_v27 = vmul.f32 0.0, %v5300_v40 }
 0x43a   : > { %v5379_v52 = vadd.f32 %v5378_v55, %v5377_v62  ;;  %v5665_v11 = vadd.f32 %v5664_v28, %v5663_v6  ;;  %v10473_v46 = vsel %vm5764_vm13, %v5734_v16, %v10434_v32  ;;  %v5586_v51 = vmul.f32 0.0, %v5298_v12 }
 0x43b   : > { %v10469_v21 = vsel %vm5764_vm13, %v5718_v5, %v10442_v50  ;;  %v5522_v45 = vrot.slane %v5521_v29, 1  ;;  %v5381_v47 = vrot.slane %v5380_v44, 4  ;;  %v5524_v19 = vadd.f32 %v5444_v27, %v5442_v33 }
 0x43c   : > { %v5666_v15 = vrot.slane %v5665_v11, 1  ;;  %v10477_v17 = vsel %vm5764_vm13, %v5379_v52, %v10438_v58  ;;  %v5588_v9 = vmul.f32 %v9964_v3, %v5300_v40  ;;  %v5301_v54 = vunpack.c.h.bf16 %v4749_v8 }
 0x43d   : > { %v5523_v39 = vadd.f32 %v5522_v45, %v5521_v29  ;;  %v5443_v50 = vmul.f32 %v9961_v49, %v5299_v22  ;;  %v5382_v34 = vadd.f32 %v5381_v47, %v5380_v44  ;;  %v5525_v0 = vrot.slane %v5524_v19, 4 }
 0x43e   : > { %v5667_v56 = vadd.f32 %v5666_v15, %v5665_v11  ;;  %v5587_v32 = vmul.f32 0.0, %v5299_v22  ;;  %v5668_v2 = vadd.f32 %v5588_v9, %v5586_v51  ;;  %v5387_v43 = vadd.f32 %v5301_v54, %v5299_v22 }
 0x43f   : > { %v5735_v60 = vsub.f32 %v5379_v52, %v5523_v39  ;;  %v5445_v13 = vmul.f32 0.0, %v5301_v54  ;;  %v5383_v38 = vrot.slane %v5382_v34, 2  ;;  %v5526_v58 = vadd.f32 %v5525_v0, %v5524_v19 }
 0x440   : > { %v5719_v30 = vsub.f32 %v5379_v52, %v5667_v56  ;;  %v5589_v63 = vmul.f32 %v9964_v3, %v5301_v54  ;;  %v5669_v4 = vrot.slane %v5668_v2, 4  ;;  %v5388_v1 = vrot.slane %v5387_v43, 4 }
 0x441   : > { %v10484_v35 = vsel %vm5764_vm13, %v5735_v60, %v10448_v42  ;;  %v5531_v62 = vadd.f32 %v5445_v13, %v5443_v50  ;;  %v5384_v8 = vadd.f32 %v5383_v38, %v5382_v34  ;;  %v5527_v57 = vrot.slane %v5526_v58, 2 }
 0x442   : > { %v10488_v6 = vsel %vm5764_vm13, %v5719_v30, %v10454_v7  ;;  %v5675_v23 = vadd.f32 %v5589_v63, %v5587_v32  ;;  %v5670_v41 = vadd.f32 %v5669_v4, %v5668_v2  ;;  %v5389_v12 = vadd.f32 %v5388_v1, %v5387_v43 }
 0x443   : > { %v5532_v55 = vrot.slane %v5531_v62, 4  ;;  %v4720_v28 = vadd.f32 %v10317_v14, %v9948_v61  ;;  %v5385_v40 = vrot.slane %v5384_v8, 1  ;;  %v5528_v22 = vadd.f32 %v5527_v57, %v5526_v58 }
 0x444   : > { %v5676_v42 = vrot.slane %v5675_v23, 4  ;;  %v4722_v5 = vadd.f32 %v10323_v48, %v9951_v18  ;;  %v5671_v16 = vrot.slane %v5670_v41, 2  ;;  %v5390_v29 = vrot.slane %v5389_v12, 2 }
 0x445   : > { %v5533_v33 = vadd.f32 %v5532_v55, %v5531_v62  ;;  %v4724_v7 = vadd.f32 %v10326_v53, %v9948_v61  ;;  %v5386_v52 = vadd.f32 %v5385_v40, %v5384_v8  ;;  %v5529_v11 = vrot.slane %v5528_v22, 1 }
 0x446   : > { %v5677_v44 = vadd.f32 %v5676_v42, %v5675_v23  ;;  %v4726_v27 = vadd.f32 %v10332_v26, %v9951_v18  ;;  %v5672_v45 = vadd.f32 %v5671_v16, %v5670_v41  ;;  %v5391_v14 = vadd.f32 %v5390_v29, %v5389_v12 }
 0x447   : > { %v5534_v51 = vrot.slane %v5533_v33, 2  ;;  %v4750_v15 = vpack.c.bf16 %v4724_v7, %v4720_v28  ;;  %v5530_v47 = vadd.f32 %v5529_v11, %v5528_v22  ;;  %v10500_v48 = vsel %vm5766_vm14, %v5386_v52, %v10464_v59 }
 0x448   : > { %v5678_v19 = vrot.slane %v5677_v44, 2  ;;  %v4751_v39 = vpack.c.bf16 %v4726_v27, %v4722_v5  ;;  %v5673_v9 = vrot.slane %v5672_v45, 1  ;;  %v5392_v54 = vrot.slane %v5391_v14, 1 }
 0x449   : > { %v5535_v53 = vadd.f32 %v5534_v51, %v5533_v33  ;;  %v5302_v50 = vunpack.c.l.bf16 %v4750_v15  ;;  %v5736_v56 = vsub.f32 %v5386_v52, %v5530_v47  ;;  %v5304_v0 = vunpack.c.h.bf16 %v4750_v15 }
 0x44a   : > { %v5679_v34 = vadd.f32 %v5678_v19, %v5677_v44  ;;  %v5303_v32 = vunpack.c.l.bf16 %v4751_v39  ;;  %v5674_v26 = vadd.f32 %v5673_v9, %v5672_v45  ;;  %v10502_v60 = vadd.f32 %v5392_v54, %v5391_v14 }
 0x44b   : > { %v5536_v2 = vrot.slane %v5535_v53, 1  ;;  %v5446_v43 = vmul.f32 %v9961_v49, %v5302_v50  ;;  %v10507_v59 = vsel %vm5766_vm14, %v5736_v56, %v10473_v46  ;;  %v5394_v30 = vadd.f32 %v5304_v0, %v5302_v50 }
 0x44c   : > { %v5680_v13 = vrot.slane %v5679_v34, 1  ;;  %v5448_v38 = vmul.f32 0.0, %v5304_v0  ;;  %v5261_v58 = vsub.f32 %v10238_v25, %v10265_v10  ;;  %v5720_v63 = vsub.f32 %v5386_v52, %v5674_v26  ;;  %v11089_v10 = vld [vmem:[#allocation24_spill] sm:$0xff] }
 0x44d   : > { %v10514_v4 = vsel %vm5766_vm14, %v10502_v60, %v10477_v17  ;;  %v5590_v1 = vmul.f32 0.0, %v5302_v50  ;;  %v5395_v8 = vrot.slane %v5394_v30, 4  ;;  %v5592_v23 = vmul.f32 %v9964_v3, %v5304_v0 }
 0x44e   : > { %v5681_v62 = vadd.f32 %v5680_v13, %v5679_v34  ;;  %v5538_v57 = vadd.f32 %v5448_v38, %v5446_v43  ;;  %v10519_v46 = vsel %vm5766_vm14, %v5720_v63, %v10469_v21  ;;  %v10521_v41 = vadd.f32 %v5536_v2, %v5535_v53 }
 0x44f   : > { %v5305_v12 = vunpack.c.h.bf16 %v4751_v39  ;;  %v5447_v55 = vmul.f32 %v9961_v49, %v5303_v32  ;;  %v5396_v40 = vadd.f32 %v5395_v8, %v5394_v30  ;;  %v5682_v22 = vadd.f32 %v5592_v23, %v5590_v1 }
 0x450   : > { %v5721_v28 = vsub.f32 %v10502_v60, %v5681_v62  ;;  %v5539_v17 = vrot.slane %v5538_v57, 4  ;;  %v5591_v16 = vmul.f32 0.0, %v5303_v32  ;;  %v5737_v11 = vsub.f32 %v10502_v60, %v10521_v41 }
 0x451   : > { %v5401_v42 = vadd.f32 %v5305_v12, %v5303_v32  ;;  %v5449_v5 = vmul.f32 0.0, %v5305_v12  ;;  %v5593_v29 = vmul.f32 %v9964_v3, %v5305_v12  ;;  %v5397_v21 = vrot.slane %v5396_v40, 2 }
 0x452   : > { %v10528_v33 = vsel %vm5766_vm14, %v5721_v28, %v10488_v6  ;;  %v5540_v7 = vadd.f32 %v5539_v17, %v5538_v57  ;;  %v5683_v52 = vrot.slane %v5682_v22, 4  ;;  %v4730_v47 = vadd.f32 %v10342_v37, %v9948_v61 }
 0x453   : > { %v5402_v44 = vrot.slane %v5401_v42, 4  ;;  %v5545_v27 = vadd.f32 %v5449_v5, %v5447_v55  ;;  %v5689_v45 = vadd.f32 %v5593_v29, %v5591_v16  ;;  %v5398_v14 = vadd.f32 %v5397_v21, %v5396_v40 }
 0x454   : > { %v5541_v51 = vrot.slane %v5540_v7, 2  ;;  %v5684_v15 = vadd.f32 %v5683_v52, %v5682_v22  ;;  %v4734_v6 = vadd.f32 %v10346_v36, %v9948_v61  ;;  %v4732_v56 = vadd.f32 %v10344_v31, %v9951_v18  ;;  %v6288_v52 = vld [vmem:[%s10930_s13 + $0x88] sm:$0xff] }
 0x455   : > { %v5403_v19 = vadd.f32 %v5402_v44, %v5401_v42  ;;  %v5546_v39 = vrot.slane %v5545_v27, 4  ;;  %v5690_v9 = vrot.slane %v5689_v45, 4  ;;  %v5399_v54 = vrot.slane %v5398_v14, 1 }
 0x456   : > { %v5542_v53 = vadd.f32 %v5541_v51, %v5540_v7  ;;  %v5685_v50 = vrot.slane %v5684_v15, 2  ;;  %v4752_v26 = vpack.c.bf16 %v4734_v6, %v4730_v47  ;;  %v6287_v7 = vld [vmem:[%s10930_s13 + $0x80] sm:$0xff]  ;;  %v6272_v51 = vld [vmem:[%s10930_s13 + $0x8] sm:$0xff]  ;;  %v6273_v6 = vld [vmem:[%s10930_s13 + $0x10] sm:$0xff] }
 0x457   : > { %v5404_v34 = vrot.slane %v5403_v19, 2  ;;  %v5547_v0 = vadd.f32 %v5546_v39, %v5545_v27  ;;  %v5691_v32 = vadd.f32 %v5690_v9, %v5689_v45  ;;  %v5400_v2 = vadd.f32 %v5399_v54, %v5398_v14  ;;  %v6271_v14 = vld [vmem:[%s10930_s13] sm:$0xff]  ;;  %v6290_v9 = vld [vmem:[%s10930_s13 + $0x98] sm:$0xff] }
 0x458   : > { %v5543_v43 = vrot.slane %v5542_v53, 1  ;;  %v5686_v13 = vadd.f32 %v5685_v50, %v5684_v15  ;;  %v5306_v63 = vunpack.c.l.bf16 %v4752_v26  ;;  %v5308_v31 = vunpack.c.h.bf16 %v4752_v26  ;;  %v6274_v54 = vld [vmem:[%s10930_s13 + $0x18] sm:$0xff] }
 0x459   : > { %v5405_v37 = vadd.f32 %v5404_v34, %v5403_v19  ;;  %v5548_v30 = vrot.slane %v5547_v0, 2  ;;  %v5692_v38 = vrot.slane %v5691_v32, 2  ;;  %v10541_v1 = vsel %vm5768_vm15, %v5400_v2, %v10500_v48  ;;  %v11078_v19 = vld [vmem:[#allocation27_spill] sm:$0xff] }
 0x45a   : > { %v5544_v61 = vadd.f32 %v5543_v43, %v5542_v53  ;;  %v5687_v36 = vrot.slane %v5686_v13, 1  ;;  %v5450_v23 = vmul.f32 %v9961_v49, %v5306_v63  ;;  %v5408_v28 = vadd.f32 %v5308_v31, %v5306_v63  ;;  %v6292_v43 = vld [vmem:[%s10930_s13 + $0xa8] sm:$0xff] }
 0x45b   : > { %v5406_v62 = vrot.slane %v5405_v37, 1  ;;  %v5549_v8 = vadd.f32 %v5548_v30, %v5547_v0  ;;  %v5693_v57 = vadd.f32 %v5692_v38, %v5691_v32  ;;  %v5452_v40 = vmul.f32 0.0, %v5308_v31 }
 0x45c   : > { %v5688_v12 = vadd.f32 %v5687_v36, %v5686_v13  ;;  %v5738_v55 = vsub.f32 %v5400_v2, %v5544_v61  ;;  %v5594_v5 = vmul.f32 0.0, %v5306_v63  ;;  %v5409_v29 = vrot.slane %v5408_v28, 4  ;;  %v6275_v13 = vld [vmem:[%s10930_s13 + $0x20] sm:$0xff] }
 0x45d   : > { %v10544_v17 = vadd.f32 %v5406_v62, %v5405_v37  ;;  %v5550_v22 = vrot.slane %v5549_v8, 1  ;;  %v5694_v42 = vrot.slane %v5693_v57, 1  ;;  %v5552_v21 = vadd.f32 %v5452_v40, %v5450_v23  ;;  %v6276_v37 = vld [vmem:[%s10930_s13 + $0x28] sm:$0xff] }
 0x45e   : > { %v5722_v16 = vsub.f32 %v5400_v2, %v5688_v12  ;;  %v10548_v48 = vsel %vm5768_vm15, %v5738_v55, %v10507_v59  ;;  %v5596_v45 = vmul.f32 %v9964_v3, %v5308_v31  ;;  %v10565_v59 = vsel %vm5942_vm2, 1.0, %v11061_v20  ;;  %v6294_v55 = vld [vmem:[%s10930_s13 + $0xb8] sm:$0xff] }
 0x45f   : > { %v5695_v44 = vadd.f32 %v5694_v42, %v5693_v57  ;;  %v10559_v27 = vsel %vm5768_vm15, %v10544_v17, %v10514_v4  ;;  %v6289_v4 = vld [vmem:[%s10930_s13 + $0x90] sm:$0xff]  ;;  %v5410_v47 = vadd.f32 %v5409_v29, %v5408_v28  ;;  %v5553_v24 = vrot.slane %v5552_v21, 4 }
 0x460   : > { %v10578_v15 = vsel %vm5768_vm15, %v5722_v16, %v10519_v46  ;;  %v4736_v39 = vadd.f32 %v11078_v19, %v9951_v18  ;;  %v10591_v53 = vadd.f32 %v5550_v22, %v5549_v8  ;;  %v5696_v50 = vadd.f32 %v5596_v45, %v5594_v5  ;;  %v6291_v18 = vld [vmem:[%s10930_s13 + $0xa0] sm:$0xff]  ;;  %v6277_v5 = vld [vmem:[%s10930_s13 + $0x30] sm:$0xff]  ;;  %v6278_v16 = vld [vmem:[%s10930_s13 + $0x38] sm:$0xff] }
 0x461   : > { %v5723_v46 = vsub.f32 %v10544_v17, %v5695_v44  ;;  %v6981_v34 = vpack.c.bf16 %v6288_v52, %v6287_v7  ;;  %v5411_v0 = vrot.slane %v5410_v47, 2  ;;  %v5554_v32 = vadd.f32 %v5553_v24, %v5552_v21  ;;  %v6295_v44 = vld [vmem:[%s10930_s13 + $0xc0] sm:$0xff] }
 0x462   : > { %v4753_v26 = vpack.c.bf16 %v4736_v39, %v4732_v56  ;;  %v6983_v2 = vpack.c.bf16 %v6272_v51, %v6271_v14  ;;  %v5697_v38 = vrot.slane %v5696_v50, 4  ;;  %v6985_v56 = vpack.c.bf16 %v6290_v9, %v6289_v4 }
 0x463   : > { %v10608_v30 = vsel %vm5768_vm15, %v5723_v46, %v10528_v33  ;;  %6982 = vmatprep.subr.bf16.mxu1 %v6981_v34  ;;  %v6987_v63 = vpack.c.bf16 %v6274_v54, %v6273_v6  ;;  %v5412_v61 = vadd.f32 %v5411_v0, %v5410_v47  ;;  %v5555_v36 = vrot.slane %v5554_v32, 2  ;;  %v6293_v33 = vld [vmem:[%s10930_s13 + $0xb0] sm:$0xff]  ;;  %v6279_v46 = vld [vmem:[%s10930_s13 + $0x40] sm:$0xff] }
 0x464   : > { %v5307_v31 = vunpack.c.l.bf16 %v4753_v26  ;;  %v5309_v62 = vunpack.c.h.bf16 %v4753_v26  ;;  %6984 = vmatpush3.bf16.msra.mxu1 %v6983_v2  ;;  %v5739_v8 = vsub.f32 %v10544_v17, %v10591_v53  ;;  %v5698_v57 = vadd.f32 %v5697_v38, %v5696_v50  ;;  %v6280_v50 = vld [vmem:[%s10930_s13 + $0x48] sm:$0xff]  ;;  %v11079_v0 = vld [vmem:[#allocation28_spill] sm:$0xff]  ;;  %v11080_v26 = vld [vmem:[#allocation33_spill] sm:$0xff] }
 0x465   : > { %6986 = vmatprep.subr.bf16.mxu1 %v6985_v56  ;;  %v6989_v23 = vpack.c.bf16 %v6292_v43, %v6291_v18  ;;  %v6991_v12 = vpack.c.bf16 %v6276_v37, %v6275_v13  ;;  %v5413_v28 = vrot.slane %v5412_v61, 1  ;;  %v5556_v40 = vadd.f32 %v5555_v36, %v5554_v32  ;;  %v11090_v17 = vld [vmem:[#allocation29_spill] sm:$0xff] }
 0x466   : > { %v5415_v22 = vadd.f32 %v5309_v62, %v5307_v31  ;;  %v5451_v42 = vmul.f32 %v9961_v49, %v5307_v31  ;;  %v5699_v29 = vrot.slane %v5698_v57, 2  ;;  %v5453_v21 = vmul.f32 0.0, %v5309_v62  ;;  %v6296_v49 = vld [vmem:[%s10930_s13 + $0xc8] sm:$0xff] }
 0x467   : > { %v5595_v7 = vmul.f32 0.0, %v5307_v31  ;;  %v5597_v52 = vmul.f32 %v9964_v3, %v5309_v62  ;;  %v5414_v45 = vadd.f32 %v5413_v28, %v5412_v61  ;;  %v5557_v14 = vrot.slane %v5556_v40, 1 }
 0x468   : > { %v5416_v51 = vrot.slane %v5415_v22, 4  ;;  %6988 = vmatpush3.bf16.msra.mxu1 %v6987_v63  ;;  %v6993_v4 = vpack.c.bf16 %v6294_v55, %v6293_v33  ;;  %v5700_v47 = vadd.f32 %v5699_v29, %v5698_v57  ;;  %v5559_v24 = vadd.f32 %v5453_v21, %v5451_v42 }
 0x469   : > { %v5703_v19 = vadd.f32 %v5597_v52, %v5595_v7  ;;  %6990 = vmatprep.subr.bf16.mxu1 %v6989_v23  ;;  %v6995_v39 = vpack.c.bf16 %v6278_v16, %v6277_v5  ;;  %v5558_v9 = vadd.f32 %v5557_v14, %v5556_v40  ;;  %v5867_v3 = vsel %vm5770_vm1, %v5414_v45, %v10541_v1  ;;  %v11082_v52 = vld [vmem:[#allocation32_spill] sm:$0xff] }
 0x46a   : > { %v5417_v6 = vadd.f32 %v5416_v51, %v5415_v22  ;;  %v6997_v54 = vpack.c.bf16 %v6296_v49, %v6295_v44  ;;  %v5701_v34 = vrot.slane %v5700_v47, 1  ;;  %v6005_v18 = vmul.f32 %v10565_v59, %v5867_v3  ;;  %v6297_v51 = vld [vmem:[%s10930_s13 + $0xd0] sm:$0xff] }
 0x46b   : > { %v6098_v32 = vadd.f32 %v5867_v3, %v11079_v0  ;;  %v10643_v2 = vadd.f32 %v11080_v26, %v5867_v3  ;;  %v5740_v43 = vsub.f32 %v5414_v45, %v5558_v9  ;;  %v5560_v13 = vrot.slane %v5559_v24, 4 }
 0x46c   : > { %v5418_v1 = vrot.slane %v5417_v6, 2  ;;  %v5704_v37 = vrot.slane %v5703_v19, 4  ;;  %6992 = vmatpush3.bf16.msra.mxu1 %v6991_v12  ;;  %v5702_v38 = vadd.f32 %v5701_v34, %v5700_v47  ;;  %v6007_v56 = vadd.f32 %v6005_v18, %v11079_v0  ;;  %v11081_v12 = vld [vmem:[#allocation34_spill] sm:$0xff] }
 0x46d   : > { %v6099_v63 = vrot.slane %v6098_v32, 4  ;;  %6994 = vmatprep.subr.bf16.mxu1 %v6993_v4  ;;  %v6999_v61 = vpack.c.bf16 %v6280_v50, %v6279_v46  ;;  %v10648_v36 = vsel %vm5770_vm1, %v5740_v43, %v10548_v48  ;;  %v5561_v62 = vadd.f32 %v5560_v13, %v5559_v24  ;;  %v6281_v43 = vld [vmem:[%s10930_s13 + $0x50] sm:$0xff] }
 0x46e   : > { %v5419_v31 = vadd.f32 %v5418_v1, %v5417_v6  ;;  %v5705_v57 = vadd.f32 %v5704_v37, %v5703_v19  ;;  %v5724_v23 = vsub.f32 %v5414_v45, %v5702_v38  ;;  %v6008_v33 = vrot.slane %v6007_v56, 4  ;;  %v11083_v45 = vld [vmem:[#allocation31_spill] sm:$0xff]  ;;  %v6282_v1 = vld [vmem:[%s10930_s13 + $0x58] sm:$0xff] }
 0x46f   : > { %v6038_v55 = vmul.f32 %v10565_v59, %v10648_v36  ;;  %v6100_v28 = vadd.f32 %v6099_v63, %v6098_v32  ;;  %v10654_v40 = vadd.f32 %v10648_v36, %v11081_v12  ;;  %v5562_v42 = vrot.slane %v5561_v62, 2  ;;  %v11084_v38 = vld [vmem:[#allocation16_spill] sm:$0xff]  ;;  %v6299_v63 = vld [vmem:[%s10930_s13 + $0xe0] sm:$0xff] }
 0x470   : > { %v5420_v22 = vrot.slane %v5419_v31, 1  ;;  %v5706_v5 = vrot.slane %v5705_v57, 2  ;;  %6996 = vmatpush3.bf16.msra.mxu1 %v6995_v39  ;;  %v5803_v48 = vsel %vm5770_vm1, %v5724_v23, %v10578_v15  ;;  %v6009_v16 = vadd.f32 %v6008_v33, %v6007_v56  ;;  %v6298_v15 = vld [vmem:[%s10930_s13 + $0xd8] sm:$0xff] }
 0x471   : > { %v6040_v29 = vadd.f32 %v6038_v55, %v11081_v12  ;;  %v6194_v21 = vrot.slane %v10643_v2, 4  ;;  %6998 = vmatprep.subr.bf16.mxu1 %v6997_v54  ;;  %v5972_v7 = vmul.f32 %v10565_v59, %v5803_v48  ;;  %v6069_v44 = vadd.f32 %v5803_v48, %v11082_v52  ;;  %v6284_v55 = vld [vmem:[%s10930_s13 + $0x68] sm:$0xff] }
 0x472   : > { %v6101_v49 = vrot.slane %v6100_v28, 2  ;;  %v10663_v14 = vadd.f32 %v11083_v45, %v5803_v48  ;;  %v6010_v4 = vrot.slane %v6009_v16, 2  ;;  %v6128_v24 = vrot.slane %v10654_v40, 4 }
 0x473   : > { %v6041_v47 = vrot.slane %v6040_v29, 4  ;;  %v5421_v19 = vadd.f32 %v5420_v22, %v5419_v31  ;;  %v5974_v39 = vadd.f32 %v5972_v7, %v11082_v52  ;;  %v6070_v9 = vrot.slane %v6069_v44, 4  ;;  %v6283_v31 = vld [vmem:[%s10930_s13 + $0x60] sm:$0xff]  ;;  %v6302_v22 = vld [vmem:[%s10930_s13 + $0xf8] sm:$0xff] }
 0x474   : > { %v5563_v3 = vadd.f32 %v5562_v42, %v5561_v62  ;;  %v5707_v6 = vadd.f32 %v5706_v5, %v5705_v57  ;;  %7000 = vmatpush3.bf16.msra.mxu1 %v6999_v61  ;;  %v6011_v54 = vadd.f32 %v6010_v4, %v6009_v16  ;;  %v7001_v34 = vpack.c.bf16 %v6298_v15, %v6297_v51  ;;  %v6300_v61 = vld [vmem:[%s10930_s13 + $0xe8] sm:$0xff] }
 0x475   : > { %v10673_v46 = vadd.f32 %v6041_v47, %v6040_v29  ;;  %v10677_v50 = vsel %vm5770_vm1, %v5421_v19, %v10559_v27  ;;  %v5975_v18 = vrot.slane %v5974_v39, 4  ;;  %v10679_v0 = vadd.f32 %v6070_v9, %v6069_v44  ;;  %v6286_v47 = vld [vmem:[%s10930_s13 + $0x78] sm:$0xff] }
 0x476   : > { %v5564_v32 = vrot.slane %v5563_v3, 1  ;;  %v5708_v26 = vrot.slane %v5707_v6, 1  ;;  %v6012_v13 = vrot.slane %v6011_v54, 1  ;;  %v10687_v37 = vadd.f32 %v6101_v49, %v6100_v28  ;;  %7002 = vmatprep.subr.bf16.mxu1 %v7001_v34  ;;  %v6301_v28 = vld [vmem:[%s10930_s13 + $0xf0] sm:$0xff] }
 0x477   : > { %v6006_v27 = vmul.f32 %v10565_v59, %v10677_v50  ;;  %v10693_v56 = vadd.f32 %v10677_v50, %v11084_v38  ;;  %v5976_v62 = vadd.f32 %v5975_v18, %v5974_v39  ;;  %v6043_v57 = vrot.slane %v10673_v46, 2  ;;  %v6285_v49 = vld [vmem:[%s10930_s13 + $0x70] sm:$0xff]  ;;  %v10726_v39 = vld [vmem:[%s10928_s11] ss:$8 sm:$0x3] }
 0x478   : > { %v5565_v23 = vadd.f32 %v5564_v32, %v5563_v3  ;;  %v5709_v33 = vadd.f32 %v5708_v26, %v5707_v6  ;;  %v6013_v42 = vadd.f32 %v6012_v13, %v6011_v54  ;;  %v6072_v5 = vrot.slane %v10679_v0, 2  ;;  %v11085_v3 = vld [vmem:[#allocation23_spill] sm:$0xff]  ;;  %v11086_v6 = vld [vmem:[#allocation26_spill] sm:$0xff]  ;;  %v11087_v54 = vld [vmem:[#allocation25_spill] sm:$0xff] }
 0x479   : > { %v6014_v48 = vadd.f32 %v6006_v27, %v11084_v38  ;;  %v7003_v16 = vpack.c.bf16 %v6282_v1, %v6281_v43  ;;  %v5977_v29 = vrot.slane %v5976_v62, 2  ;;  %v7005_v44 = vpack.c.bf16 %v6300_v61, %v6299_v63  ;;  %v6677_v26 = vld [vmem:[%s10928_s11 + $0x1] ss:$8 sm:$0x3] }
 0x47a   : > { %v5725_v7 = vsub.f32 %v5421_v19, %v5709_v33  ;;  %v5741_v52 = vsub.f32 %v5421_v19, %v5565_v23  ;;  %v6106_v51 = vrot.slane %v10693_v56, 4  ;;  %v7007_v15 = vpack.c.bf16 %v6284_v55, %v6283_v31  ;;  %v10774_v61 = vld [vmem:[%s10928_s11 + $0x3] ss:$8 sm:$0x3] }
 0x47b   : > { %v6015_v45 = vrot.slane %v6014_v48, 4  ;;  %7004 = vmatpush3.bf16.msra.mxu1 %v7003_v16  ;;  %v7009_v4 = vpack.c.bf16 %v6302_v22, %v6301_v28  ;;  %v5978_v19 = vadd.f32 %v5977_v29, %v5976_v62  ;;  %v11088_v34 = vsub.f32 %v11086_v6, %v11087_v54 }
 0x47c   : > { %7006 = vmatprep.subr.bf16.mxu1 %v7005_v44  ;;  %v10730_v9 = vsel %vm5770_vm1, %v5725_v7, %v10608_v30  ;;  %v5936_v32 = vsel %vm5766_vm14, %v5737_v11, %v10484_v35  ;;  %v7011_v35 = vpack.c.bf16 %v6286_v47, %v6285_v49  ;;  %v10763_v11 = vld [vmem:[%s10928_s11 + $0x2] ss:$8 sm:$0x3]  ;;  %v6025_v63 = vrot.slane %v6677_v26, %v11089_v10 }
 0x47d   : > { %v5905_v18 = vsel %vm5768_vm15, %v11088_v34, %v11085_v3  ;;  %v6016_v43 = vadd.f32 %v6015_v45, %v6014_v48  ;;  %v5937_v1 = vsel %vm5768_vm15, %v5739_v8, %v5936_v32  ;;  %v5973_v60 = vmul.f32 %v10565_v59, %v10730_v9  ;;  %v11091_v8 = vld [vmem:[#allocation21_spill] sm:$0xff] }
 0x47e   : > { %v10749_v30 = vsel %vm5770_vm1, %v5261_v58, %v5905_v18  ;;  %v10758_v41 = vsel %vm5770_vm1, %v5741_v52, %v5937_v1  ;;  %v5979_v25 = vrot.slane %v5978_v19, 1  ;;  %v5992_v58 = vrot.slane %v10726_v39, %v11089_v10 }
 0x47f   : > { %v6017_v13 = vrot.slane %v6016_v43, 2  ;;  %7008 = vmatpush3.bf16.msra.mxu1 %v7007_v15  ;;  %v5981_v53 = vadd.f32 %v5973_v60, %v11090_v17  ;;  %v5996_v27 = vrot.slane %v10726_v39, %v11091_v8  ;;  %v6029_v62 = vrot.slane %v6677_v26, %v11091_v8 }
 0x480   : > { %7010 = vmatprep.subr.bf16.mxu1 %v7009_v4  ;;  %v5980_v31 = vadd.f32 %v5979_v25, %v5978_v19  ;;  %v6039_v23 = vmul.f32 %v10565_v59, %v10758_v41  ;;  %v6044_v33 = vadd.f32 %v6043_v57, %v10673_v46  ;;  %v6032_v22 = vmul.f32 %v6025_v63, %v6013_v42 }
 0x481   : > { %v5982_v55 = vrot.slane %v5981_v53, 4  ;;  %v6018_v28 = vadd.f32 %v6017_v13, %v6016_v43  ;;  %v6058_v48 = vrot.slane %v10763_v11, %v11089_v10  ;;  %v6073_v52 = vadd.f32 %v6072_v5, %v10679_v0  ;;  %v6680_v0 = vld [vmem:[%s10928_s11 + $0x4] ss:$8 sm:$0x3] }
 0x482   : > { %v5999_v16 = vmul.f32 %v5992_v58, %v5980_v31  ;;  %v6045_v29 = vrot.slane %v6044_v33, 1  ;;  %v6047_v7 = vadd.f32 %v6039_v23, %v10749_v30  ;;  %v6076_v59 = vadd.f32 %v10730_v9, %v11090_v17 }
 0x483   : > { %7012 = vmatpush3.bf16.msra.mxu1 %v7011_v35  ;;  %v5983_v44 = vadd.f32 %v5982_v55, %v5981_v53  ;;  %v6019_v49 = vrot.slane %v6018_v28, 1  ;;  %v6087_v46 = vrot.slane %v10774_v61, %v11089_v10  ;;  %v6074_v15 = vrot.slane %v6073_v52, 1 }
 0x484   : > { %v6034_v57 = vadd.f32 %v6032_v22, %v5999_v16  ;;  %v6046_v42 = vadd.f32 %v6045_v29, %v6044_v33  ;;  %v6048_v45 = vrot.slane %v6047_v7, 4  ;;  %v6062_v39 = vrot.slane %v10763_v11, %v11091_v8 }
 0x485   : > { %v5984_v4 = vrot.slane %v5983_v44, 2  ;;  %v6020_v47 = vadd.f32 %v6019_v49, %v6018_v28  ;;  %v6077_v19 = vrot.slane %v6076_v59, 4  ;;  %v6075_v6 = vadd.f32 %v6074_v15, %v6073_v52 }
 0x486   : > { %v6049_v5 = vadd.f32 %v6048_v45, %v6047_v7  ;;  %v6065_v3 = vmul.f32 %v6058_v48, %v6046_v42  ;;  %v6103_v54 = vrot.slane %v10687_v37, 1  ;;  %v6091_v32 = vrot.slane %v10774_v61, %v11091_v8 }
 0x487   : > { %v5985_v34 = vadd.f32 %v5984_v4, %v5983_v44  ;;  %v6078_v18 = vadd.f32 %v6077_v19, %v6076_v59  ;;  %v6107_v26 = vadd.f32 %v6106_v51, %v10693_v56  ;;  %v6094_v60 = vmul.f32 %v6087_v46, %v6075_v6  ;;  %v6681_v56 = vld [vmem:[%s10928_s11 + $0x5] ss:$8 sm:$0x3] }
 0x488   : > { %v6050_v43 = vrot.slane %v6049_v5, 2  ;;  %v6067_v1 = vadd.f32 %v6065_v3, %v6034_v57  ;;  %v6104_v35 = vadd.f32 %v6103_v54, %v10687_v37  ;;  %v6116_v13 = vrot.slane %v6680_v0, %v11089_v10  ;;  %v11092_v57 = vld [vmem:[#allocation30_spill] sm:$0xff] }
 0x489   : > { %v5986_v11 = vrot.slane %v5985_v34, 1  ;;  %v6079_v25 = vrot.slane %v6078_v18, 2  ;;  %v6108_v58 = vrot.slane %v6107_v26, 2  ;;  %v6033_v53 = vmul.f32 %v6029_v62, %v6020_v47 }
 0x48a   : > { %v6051_v63 = vadd.f32 %v6050_v43, %v6049_v5  ;;  %v6096_v31 = vadd.f32 %v6094_v60, %v6067_v1  ;;  %v6129_v23 = vadd.f32 %v6128_v24, %v10654_v40  ;;  %v6123_v37 = vmul.f32 %v6116_v13, %v6104_v35 }
 0x48b   : > { %v5987_v51 = vadd.f32 %v5986_v11, %v5985_v34  ;;  %v6080_v61 = vadd.f32 %v6079_v25, %v6078_v18  ;;  %v6109_v33 = vadd.f32 %v6108_v58, %v6107_v26  ;;  %v6120_v28 = vrot.slane %v6680_v0, %v11091_v8 }
 0x48c   : > { %v6052_v55 = vrot.slane %v6051_v63, 1  ;;  %v6130_v22 = vrot.slane %v6129_v23, 2  ;;  %v6134_v62 = vadd.f32 %v10758_v41, %v10749_v30  ;;  %v6125_v7 = vadd.f32 %v6123_v37, %v6096_v31 }
 0x48d   : > { %v6000_v48 = vmul.f32 %v5996_v27, %v5987_v51  ;;  %v6081_v16 = vrot.slane %v6080_v61, 1  ;;  %v6110_v29 = vrot.slane %v6109_v33, 1  ;;  %v6145_v44 = vrot.slane %v6681_v56, %v11089_v10 }
 0x48e   : > { %v6053_v40 = vadd.f32 %v6052_v55, %v6051_v63  ;;  %v6131_v24 = vadd.f32 %v6130_v22, %v6129_v23  ;;  %v6135_v52 = vrot.slane %v6134_v62, 4  ;;  %v6157_v42 = vmul.f32 %v11092_v57, %v11090_v17 }
 0x48f   : > { %v6035_v49 = vadd.f32 %v6033_v53, %v6000_v48  ;;  %v6082_v59 = vadd.f32 %v6081_v16, %v6080_v61  ;;  %v6111_v46 = vadd.f32 %v6110_v29, %v6109_v33  ;;  %v6161_v47 = vrot.slane %v10663_v14, 4 }
 0x490   : > { %v6066_v45 = vmul.f32 %v6062_v39, %v6053_v40  ;;  %v6132_v15 = vrot.slane %v6131_v24, 1  ;;  %v6136_v4 = vadd.f32 %v6135_v52, %v6134_v62  ;;  %v6167_v19 = vadd.f32 %v6157_v42, %v10730_v9  ;;  %v6682_v39 = vld [vmem:[%s10928_s11 + $0x6] ss:$8 sm:$0x3] }
 0x491   : > { %v6095_v27 = vmul.f32 %v6091_v32, %v6082_v59  ;;  %v6162_v6 = vadd.f32 %v6161_v47, %v10663_v14  ;;  %v6124_v54 = vmul.f32 %v6120_v28, %v6111_v46  ;;  %v6190_v18 = vmul.f32 %v11092_v57, %v11084_v38  ;;  %v6683_v38 = vld [vmem:[%s10928_s11 + $0x7] ss:$8 sm:$0x3] }
 0x492   : > { %v6068_v0 = vadd.f32 %v6066_v45, %v6035_v49  ;;  %v6133_v5 = vadd.f32 %v6132_v15, %v6131_v24  ;;  %v6137_v3 = vrot.slane %v6136_v4, 2  ;;  %v6168_v34 = vrot.slane %v6167_v19, 4 }
 0x493   : > { %v6195_v17 = vadd.f32 %v6194_v21, %v10643_v2  ;;  %v6163_v43 = vrot.slane %v6162_v6, 2  ;;  %v6149_v1 = vrot.slane %v6681_v56, %v11091_v8  ;;  %v6200_v35 = vadd.f32 %v6190_v18, %v10677_v50 }
 0x494   : > { %v6097_v32 = vadd.f32 %v6095_v27, %v6068_v0  ;;  %v6138_v9 = vadd.f32 %v6137_v3, %v6136_v4  ;;  %v6152_v26 = vmul.f32 %v6145_v44, %v6133_v5  ;;  %v6169_v14 = vadd.f32 %v6168_v34, %v6167_v19  ;;  %v6684_v27 = vld [vmem:[%s10928_s11 + $0x10] ss:$8 sm:$0x3] }
 0x495   : > { %v6196_v60 = vrot.slane %v6195_v17, 2  ;;  %v6164_v25 = vadd.f32 %v6163_v43, %v6162_v6  ;;  %v6178_v13 = vrot.slane %v6682_v39, %v11089_v10  ;;  %v6201_v63 = vrot.slane %v6200_v35, 4 }
 0x496   : > { %v6126_v11 = vadd.f32 %v6124_v54, %v6097_v32  ;;  %v6139_v2 = vrot.slane %v6138_v9, 1  ;;  %v6154_v21 = vadd.f32 %v6152_v26, %v6125_v7  ;;  %v6170_v58 = vrot.slane %v6169_v14, 2  ;;  %v6257_v26 = vld [vmem:[%s10929_s12] sm:$0x3] }
 0x497   : > { %v6197_v53 = vadd.f32 %v6196_v60, %v6195_v17  ;;  %v6165_v23 = vrot.slane %v6164_v25, 1  ;;  %v6222_v56 = vmul.f32 %v11092_v57, %v11081_v12  ;;  %v6223_v50 = vmul.f32 %v11092_v57, %v10749_v30 }
 0x498   : > { %v6140_v31 = vadd.f32 %v6139_v2, %v6138_v9  ;;  %v6171_v51 = vadd.f32 %v6170_v58, %v6169_v14  ;;  %v6202_v33 = vadd.f32 %v6201_v63, %v6200_v35  ;;  %v6211_v37 = vrot.slane %v6683_v38, %v11089_v10  ;;  %v6375_v2 = vld [vmem:[%s10932_s15 + $0x8] sm:$0xff] }
 0x499   : > { %v6198_v61 = vrot.slane %v6197_v53, 1  ;;  %v6166_v28 = vadd.f32 %v6165_v23, %v6164_v25  ;;  %v6226_v22 = vadd.f32 %v6222_v56, %v10648_v36  ;;  %v6233_v62 = vadd.f32 %v6223_v50, %v10758_v41  ;;  %v6303_v56 = vld [vmem:[%s10931_s14] sm:$0x1] }
 0x49a   : > { %v6153_v55 = vmul.f32 %v6149_v1, %v6140_v31  ;;  %v6172_v48 = vrot.slane %v6171_v51, 1  ;;  %v6182_v16 = vrot.slane %v6682_v39, %v11091_v8  ;;  %v6203_v7 = vrot.slane %v6202_v33, 2  ;;  %v6378_v31 = vld [vmem:[%s10932_s15 + $0x20] sm:$0xff] }
 0x49b   : > { %v6199_v29 = vadd.f32 %v6198_v61, %v6197_v53  ;;  %v6185_v40 = vmul.f32 %v6178_v13, %v6166_v28  ;;  %v6227_v24 = vrot.slane %v6226_v22, 4  ;;  %v6234_v30 = vrot.slane %v6233_v62, 4 }
 0x49c   : > { %v6155_v12 = vadd.f32 %v6153_v55, %v6126_v11  ;;  %v6173_v52 = vadd.f32 %v6172_v48, %v6171_v51  ;;  %v6204_v44 = vadd.f32 %v6203_v7, %v6202_v33  ;;  %v6215_v36 = vrot.slane %v6683_v38, %v11091_v8  ;;  %v6374_v11 = vld [vmem:[%s10932_s15] sm:$0xff] }
 0x49d   : > { %v6187_v49 = vadd.f32 %v6185_v40, %v6154_v21  ;;  %v6218_v59 = vmul.f32 %v6211_v37, %v6199_v29  ;;  %v6228_v46 = vadd.f32 %v6227_v24, %v6226_v22  ;;  %v6235_v57 = vadd.f32 %v6234_v30, %v6233_v62 }
 0x49e   : > { %v6186_v42 = vmul.f32 %v6182_v16, %v6173_v52  ;;  %v6205_v45 = vrot.slane %v6204_v44, 1  ;;  %v7262_v47 = vmov 0.0|0.0   ;;  %v6244_v18 = vrot.slane %v6684_v27, %v11089_v10 }
 0x49f   : > { %v6220_v41 = vadd.f32 %v6218_v59, %v6187_v49  ;;  %v6229_v15 = vrot.slane %v6228_v46, 2  ;;  %v6236_v4 = vrot.slane %v6235_v57, 2  ;;  %7013 = vmatprep.subr.bf16.mxu1 %v7262_v47  ;;  %v6248_v17 = vrot.slane %v6684_v27, %v11091_v8 }
 0x4a0   : > { %v6188_v19 = vadd.f32 %v6186_v42, %v6155_v12  ;;  %v6206_v0 = vadd.f32 %v6205_v45, %v6204_v44  ;;  %v6266_v35 = vrot.slane %v6257_v26, %v11091_v8  ;;  %v6262_v38 = vrot.slane %v6257_v26, %v11089_v10  ;;  %v6376_v10 = vld [vmem:[%s10932_s15 + $0x10] sm:$0xff]  ;;  %v6377_v8 = vld [vmem:[%s10932_s15 + $0x18] sm:$0xff] }
 0x4a1   : > { %v6230_v5 = vadd.f32 %v6229_v15, %v6228_v46  ;;  %v6237_v3 = vadd.f32 %v6236_v4, %v6235_v57  ;;  %v7014_v13 = vpack.c.bf16 %v6375_v2, %v6374_v11  ;;  %v7017_v63 = vpack.c.bf16 %v6377_v8, %v6376_v10 }
 0x4a2   : > { %v6219_v6 = vmul.f32 %v6215_v36, %v6206_v0 }
 0x4a3   : > { %v6231_v54 = vrot.slane %v6230_v5, 1  ;;  %v6238_v34 = vrot.slane %v6237_v3, 1 }
 0x4a4   : > { %v6221_v39 = vadd.f32 %v6219_v6, %v6188_v19 }
 0x4a5   : > { %v6232_v32 = vadd.f32 %v6231_v54, %v6230_v5  ;;  %v6239_v9 = vadd.f32 %v6238_v34, %v6237_v3 }
 0x4a7   : > { %v6251_v43 = vmul.f32 %v6244_v18, %v6232_v32  ;;  %v6252_v1 = vmul.f32 %v6248_v17, %v6239_v9 }
 0x4a9   : > { %v6253_v14 = vadd.f32 %v6251_v43, %v6220_v41  ;;  %v6254_v60 = vadd.f32 %v6252_v1, %v6221_v39 }
 0x4ab   : > { %v6255_v21 = vmul.f32 0.00390625, %v6253_v14  ;;  %v6256_v25 = vmul.f32 0.00390625, %v6254_v60 }
 0x4ad   : > { %v6270_v58 = vadd.f32 %v6266_v35, %v6256_v25  ;;  %v6269_v53 = vadd.f32 %v6262_v38, %v6255_v21 }
 0x4af   : > { %6368 = vmatprep.mubr.f32.mxu1 %v6270_v58 }
 0x4b0   : > { %6369 = vmatmul.mubr.f32.vlgmr.msra.gmra.mrb[96].mxu1 %v6269_v53 }
 0x4b1   : > { %7015 = vmatpush3.bf16.msra.mxu1 %v7014_v13  ;;  %6978 = vmatprep.mubr.msk.f32.mxu1 %vm7263_vm3, %v11061_v20 }
 0x4b2   : > { %7016 = vmatprep.subr.bf16.mxu1 %v7262_v47 }
 0x4b5   : > { %7018 = vmatpush3.bf16.msra.mxu1 %v7017_v63 }
 0x4b6   : > { %6976 = vmatprep.subr.mxu1 %v11061_v20  ;;  %v6379_v20 = vld [vmem:[%s11093_s18] sm:$0x1] }
 0x4b9   : > { %6977 = vmatpush3.msra.mxu1 %v6378_v31 }
 0x583   : > { %v6875_v23 = vpop.f32.mrb[96].mxu1 }
 0x584   : > { %v6876_v50 = vpop.f32.mrb[97].mxu1 }
 0x585   : > { %v6877_v51 = vadd.f32 %v6876_v50, %v6875_v23 }
 0x587   : > { %v6371_v61 = vadd.f32 %v6877_v51, %v6303_v56 }
 0x589   : > { %6979 = vmatmul.mubr.msk.f32.vlgmr.msra.gmra.mrb[98].mxu1 %vm6380_vm4, %v6371_v61 }
 0x65c   : > { %v6450_v33 = vpop.f32.mrb[98].mxu1 }
 0x65d   : > { %v6451_v37 = vadd.f32 %v6450_v33, %v6379_v20  ;;  %v6980_v55 = vpop.f32.mrb[99].mxu1 }
 0x65f   : > { %6455 = vst.msk [vmem:[%s540_s0] sm:$0x1] %vm6454_vm5, %v6451_v37 }
 0x660   : > { %7209 = shalt.err (!%p7206_p3)
}
 0x661   : > { %s7210_s20 = scalar_lea.hbm %s10875_s26, 16  ;;  %s7214_s0 = scalar_lea.hbm %s11094_s22, 32 }
 0x662   : > { %p7211_p4 = scmp.ne.s32.totalorder %s10875_s26, %s7210_s20  ;;  %p7215_p9 = scmp.lt.u32.totalorder %s10875_s26, %s11094_s22 }
 0x663   : > { %p7216_p10 = scmp.lt.u32.totalorder %s7214_s0, %s7210_s20  ;;  %p7218_p12 = scmp.lt.u32.totalorder %s7210_s20, %s10875_s26 }
 0x664   : > { %p7212_p7 = pnand %p7211_p4, %p7393_p5 }
 0x665   : > { %p7217_p11 = por %p7216_p10, %p7215_p9 }
 0x666   : > { %p7213_p8 = pneg %p7212_p7 }
 0x667   : > { %p7219_p13 = por %p7218_p12, %p7217_p11 }
 0x669   : > { %p7220_p0 = pnand %p7219_p13, %p7213_p8 }
 0x66b   : > { %7223 = shalt.err (!%p7220_p0)
}
 0x66c   : > { %7020 = dma.vmem_to_hbm [thread:$0]  (%p7393_p5), %s10877_s27, 16, %s10875_s26, %s6457_s16  }
 0x66d PF: > { %s11095_s24 = sld [smem:[#allocation10_spill]]  ;;  %s11096_s28 = sld [smem:[#allocation8_spill]] }
 0x673   : > { %p7026_p1 = scmp.ge.s32.totalorder %s11095_s24, 2  ;;  %s6481_s19 = sand.u32 1, %s11096_s28  }
 0x674   : > { %s6482_s18 = scalar_lea.sflag [#allocation6], %s6481_s19 }
 0x675   : > { %p7023_p2 = pnand %p7026_p1, %p7397_p6 }
 0x677   : > { %7241 = dma.done.wait (!%p7023_p2), %s6482_s18, 16  }
 0x678   : > { %7243 = vsyncadd (!%p7023_p2), %s6482_s18, 4294967280  ;;  %s11098_s27 = sld [smem:[#allocation11_spill]]  ;;  %s11099_s20 = sld [smem:[#allocation9_spill]] }
 0x679   : > { %s11100_s26 = sld [smem:[#allocation12_spill]]  ;;  %s11101_s24 = smov %s7250_s25 }
 0x67e   : > { %p27_p3 = scmp.ge.s32.totalorder %s11098_s27, 4   ;;  %s11102_s25 = smov %s11099_s20 }
 0x680   :  { %29 = sbr.rel (!%p27_p3) target bundleno = 8 (0x8), region = 143 }
 0x687   :  { %6486 = vsyncpa [#allocation6], 1 }
 0x688   :  { %6488 = vsyncpa [#allocation6 + $0x1], 1 }

</bundles_post_ra>
